<compile_context>
chip_gen: v7x
topology: tpu7x:2x2x1
jax: 0.10.0
libtpu: 0.0.40
codegen_flags: <defaults>
</compile_context>

<pallas_src>
import functools

import numpy as np
import jax
import jax.numpy as jnp
from jax import lax
from jax.experimental import pallas as pl
from jax.experimental.pallas import tpu as pltpu

EPS = 1e-5
NEG_SLOPE = 0.2
MXU_DTYPE = jnp.bfloat16      # matmul operand dtype (accumulation stays f32)
INTER_DTYPE = jnp.bfloat16    # dtype of the c1 / skip intermediates in HBM
VMEM_LIMIT = 32 * 1024 * 1024


def _leaky(x):
    return jnp.where(x >= 0, x, NEG_SLOPE * x)


# ---------------------------------------------------------------------------
# Kernel 0: per-(sample, tile) per-channel sum / sum-of-squares of x (BN1).
# ---------------------------------------------------------------------------
def _stats_kernel(x_ref, st_ref):
    x = x_ref[0].astype(jnp.float32)                    # (TM, C)
    st_ref[0, 0, 0:1, :] = jnp.sum(x, axis=0, keepdims=True)
    st_ref[0, 0, 1:2, :] = jnp.sum(x * x, axis=0, keepdims=True)


def _pick_stats_tile(m, c, budget_bytes=4 << 20):
    """Largest row tile that divides m, is a multiple of 8 and fits VMEM."""
    max_rows = max(8, budget_bytes // max(1, 4 * c))
    if m <= max_rows:
        return m
    for t in range(min(max_rows, m), 7, -1):
        if m % t == 0 and t % 8 == 0:
            return t
    return m


def _channel_stats(x_flat):
    """x_flat: (N, M, C) -> (N, n_tiles, 2, C) partial [sum, sumsq]."""
    n, m, c = x_flat.shape
    tm = _pick_stats_tile(m, c)
    nt = m // tm
    return pl.pallas_call(
        _stats_kernel,
        out_shape=jax.ShapeDtypeStruct((n, nt, 2, c), jnp.float32),
        grid=(n, nt),
        in_specs=[pl.BlockSpec((1, tm, c), lambda i, t: (i, t, 0))],
        out_specs=pl.BlockSpec((1, 1, 2, c), lambda i, t: (i, t, 0, 0)),
        compiler_params=pltpu.CompilerParams(
            dimension_semantics=("parallel", "parallel")),
    )(x_flat)


def _scale_shift(stats, count, gamma, beta):
    """Finalize BN scale/shift from partial [sum, sumsq] stats (tiny)."""
    # TODO(synk): single-pass E[x^2]-E[x]^2 can cancel for very large means;
    # kept in f32 with a clamp (matches the torch reference at these scales).
    s = stats[..., 0, :]
    sq = stats[..., 1, :]
    axes = tuple(range(s.ndim - 1))
    s = s.sum(axes)
    sq = sq.sum(axes)
    mean = s / count
    var = jnp.maximum(sq / count - mean * mean, 0.0)
    scale = gamma / jnp.sqrt(var + EPS)
    shift = beta - mean * scale
    return scale.reshape(1, -1), shift.reshape(1, -1)


# ---------------------------------------------------------------------------
# Kernel 1: fused [BN1 + LeakyReLU + conv1] and [skip conv] for one output
# d-plane.  The three kd taps live in the body; the 27 (kd,kh,kw) tap slices
# are concatenated along lanes and fed to one K=27*Cin MXU matmul per path.
# Emits conv1 in the padded-(H,W) layout conv2 consumes, the skip output in
# conv2's accumulator row layout, and per-(n, d_out) channel sum/sumsq.
# ---------------------------------------------------------------------------
def _dual_conv_kernel(x0_ref, x1_ref, x2_ref, m2d_ref, vrow_ref,
                      s1_ref, t1_ref, w1_ref, b1_ref, ws_ref, bs_ref,
                      c1p_ref, cs_ref, st1_ref, sts_ref,
                      *, stride, pad, Dp, Wp, Wp2, Ho, Wo, R):
    d = pl.program_id(1)
    s1 = s1_ref[...]
    t1 = t1_ref[...]
    m2d = m2d_ref[...]
    x_refs = (x0_ref, x1_ref, x2_ref)

    a_cols = []
    x_cols = []
    for k in range(3):                                   # kd taps, in-body
        plane = x_refs[k][0, 0]                          # (Hp*Wp, Cin), f32
        dd = d * stride + k                              # padded depth index
        dmask = jnp.where(jnp.logical_and(dd >= pad, dd < Dp - pad), 1.0, 0.0)
        act = _leaky(plane * s1 + t1) * (m2d * dmask)    # BN1 + LeakyReLU
        for t in range(9):                               # (kh, kw) taps
            kh, kw = divmod(t, 3)
            off = kh * Wp + kw
            sl = slice(off, off + stride * (R - 1) + 1, stride)
            a_cols.append(act[sl, :])
            x_cols.append(plane[sl, :])
    a_slab = jnp.concatenate(a_cols, axis=1).astype(MXU_DTYPE)  # (R, 27*Cin)
    x_slab = jnp.concatenate(x_cols, axis=1).astype(MXU_DTYPE)
    r1 = jnp.dot(a_slab, w1_ref[...], preferred_element_type=jnp.float32)
    r1 = r1 + b1_ref[...]
    rs = jnp.dot(x_slab, ws_ref[...], preferred_element_type=jnp.float32)
    rs = rs + bs_ref[...]

    vrow = vrow_ref[...]                                 # (R, 1) valid rows
    m1 = r1 * vrow
    ms = rs * vrow
    st1_ref[0, 0, 0:1, :] = jnp.sum(m1, axis=0, keepdims=True)
    st1_ref[0, 0, 1:2, :] = jnp.sum(m1 * m1, axis=0, keepdims=True)
    sts_ref[0, 0, 0:1, :] = jnp.sum(ms, axis=0, keepdims=True)
    sts_ref[0, 0, 1:2, :] = jnp.sum(ms * ms, axis=0, keepdims=True)

    # conv1 output written directly in the zero-padded (H, W) plane layout.
    c1p_ref[0, 0, :, :] = jnp.zeros(c1p_ref.shape[2:], c1p_ref.dtype)
    if Wp == Wp2:                      # stride == 1: one contiguous store
        off0 = pad * (Wp2 + 1)
        c1p_ref[0, 0, off0:off0 + R, :] = m1.astype(c1p_ref.dtype)
        cs_ref[0, 0, :, :] = rs.astype(cs_ref.dtype)     # same row layout
    else:                              # general stride: per-row placement
        for h in range(Ho):
            row = (h + pad) * Wp2 + pad
            c1p_ref[0, 0, row:row + Wo, :] = (
                r1[h * Wp:h * Wp + Wo, :].astype(c1p_ref.dtype))
            cs_ref[0, 0, h * Wp2:h * Wp2 + Wo, :] = (
                rs[h * Wp:h * Wp + Wo, :].astype(cs_ref.dtype))


# ---------------------------------------------------------------------------
# Kernel 2: fused [BN2 + LeakyReLU + conv2] with [skip-BN + residual add].
# Depth padding of the intermediate is never materialized: the three kd
# planes are clamped reads of the depth-compact c1 tensor, zeroed by dmask.
# ---------------------------------------------------------------------------
def _conv_res_kernel(c0_ref, c1_ref, c2_ref, m2d_ref, s2_ref, t2_ref,
                     w2_ref, b2_ref, skip_ref, ss_ref, ts_ref, out_ref,
                     *, pad, Dp2, Wp2, Ho, Wo, R2):
    d = pl.program_id(1)
    s2 = s2_ref[...]
    t2 = t2_ref[...]
    m2d = m2d_ref[...]
    c_refs = (c0_ref, c1_ref, c2_ref)

    cols = []
    for k in range(3):
        plane = c_refs[k][0, 0].astype(jnp.float32)      # (Hp2*Wp2, Cout)
        dd = d + k                                       # padded depth index
        dmask = jnp.where(jnp.logical_and(dd >= pad, dd < Dp2 - pad), 1.0, 0.0)
        act = _leaky(plane * s2 + t2) * (m2d * dmask)    # BN2 + LeakyReLU
        for t in range(9):
            kh, kw = divmod(t, 3)
            off = kh * Wp2 + kw
            cols.append(act[off:off + R2, :])
    slab = jnp.concatenate(cols, axis=1).astype(MXU_DTYPE)   # (R2, 27*Cout)
    res = jnp.dot(slab, w2_ref[...], preferred_element_type=jnp.float32)
    res = res + b2_ref[...]
    skip = skip_ref[0, 0].astype(jnp.float32) * ss_ref[...] + ts_ref[...]
    total = res + skip
    for h in range(Ho):                                  # compact valid rows
        out_ref[0, 0, h * Wo:(h + 1) * Wo, :] = total[h * Wp2:h * Wp2 + Wo, :]


# ------------------------------ host-side helpers ---------------------------
def _interior_mask(hp, wp, p):
    m = np.zeros((hp, wp), np.float32)
    m[p:hp - p, p:wp - p] = 1.0
    return jnp.asarray(m.reshape(hp * wp, 1))


def _valid_row_mask(ho, wo, wp):
    r = (ho - 1) * wp + wo
    v = np.zeros((r, 1), np.float32)
    for h in range(ho):
        v[h * wp:h * wp + wo, 0] = 1.0
    return jnp.asarray(v)


def _to_mat(w_pt):
    """PyTorch Conv3d weight (Cout, Cin, 3, 3, 3) -> (27*Cin, Cout)."""
    co, ci = w_pt.shape[0], w_pt.shape[1]
    return jnp.transpose(w_pt, (2, 3, 4, 1, 0)).reshape(27 * ci, co)


# ------------------------------- forward pass -------------------------------
def residual_block_forward(x_ncdhw, params, stride, padding):
    assert padding == 1, "residual add only shape-checks for padding == 1"
    # TODO(synk): the NCDHW<->NDHWC transposes, the H/W/D zero-padding of x,
    # the tiny BN finalization, lane-dense (C>=128) layouts and multi-d-plane
    # (TD) blocking remain as follow-ups; they need overlapping-window specs.
    x = jnp.transpose(x_ncdhw, (0, 2, 3, 4, 1)).astype(jnp.float32)  # NDHWC
    n, dim_d, dim_h, dim_w, cin = x.shape
    cout = params["b1"].shape[0]
    p = padding
    dp, hp, wp = dim_d + 2 * p, dim_h + 2 * p, dim_w + 2 * p
    do = (dp - 3) // stride + 1
    ho = (hp - 3) // stride + 1
    wo = (wp - 3) // stride + 1
    dp2, hp2, wp2 = do + 2 * p, ho + 2 * p, wo + 2 * p
    r1_rows = (ho - 1) * wp + wo          # kernel-1 result rows (Wp spacing)
    r2_rows = (ho - 1) * wp2 + wo         # kernel-2 result rows (Wp2 spacing)

    # ---- BN1 batch statistics (tiled reduction over the volume) -----------
    st_x = _channel_stats(x.reshape(n, dim_d * dim_h * dim_w, cin))
    s1, t1 = _scale_shift(st_x, n * dim_d * dim_h * dim_w,
                          params["bn1_gamma"], params["bn1_beta"])

    # ---- fused [BN1 + LeakyReLU + conv1] and [skip conv] -------------------
    xp = jnp.pad(x, ((0, 0), (p, p), (p, p), (p, p), (0, 0)))
    xp = xp.reshape(n, dp, hp * wp, cin)
    m2d = _interior_mask(hp, wp, p)
    vrow = _valid_row_mask(ho, wo, wp)
    w1 = _to_mat(params["w1"]).astype(MXU_DTYPE)
    ws = _to_mat(params["ws"]).astype(MXU_DTYPE)
    b1 = params["b1"].reshape(1, cout).astype(jnp.float32)
    bs = params["bs"].reshape(1, cout).astype(jnp.float32)

    def _const(shape):
        return pl.BlockSpec(shape, lambda i, j: (0,) * len(shape))

    x_specs = [
        pl.BlockSpec((1, 1, hp * wp, cin),
                     lambda i, j, k=k: (i, j * stride + k, 0, 0))
        for k in range(3)
    ]
    kernel1 = functools.partial(
        _dual_conv_kernel, stride=stride, pad=p, Dp=dp, Wp=wp, Wp2=wp2,
        Ho=ho, Wo=wo, R=r1_rows)
    c1p, cs, st1, sts = pl.pallas_call(
        kernel1,
        out_shape=(
            jax.ShapeDtypeStruct((n, do, hp2 * wp2, cout), INTER_DTYPE),
            jax.ShapeDtypeStruct((n, do, r2_rows, cout), INTER_DTYPE),
            jax.ShapeDtypeStruct((n, do, 2, cout), jnp.float32),
            jax.ShapeDtypeStruct((n, do, 2, cout), jnp.float32),
        ),
        grid=(n, do),
        in_specs=x_specs + [
            _const((hp * wp, 1)),            # interior (H, W) mask
            _const((r1_rows, 1)),            # valid-row mask
            _const((1, cin)),                # BN1 scale
            _const((1, cin)),                # BN1 shift
            _const((27 * cin, cout)),        # conv1 weight (grid-resident)
            _const((1, cout)),               # conv1 bias
            _const((27 * cin, cout)),        # skip-conv weight (resident)
            _const((1, cout)),               # skip-conv bias
        ],
        out_specs=(
            pl.BlockSpec((1, 1, hp2 * wp2, cout), lambda i, j: (i, j, 0, 0)),
            pl.BlockSpec((1, 1, r2_rows, cout), lambda i, j: (i, j, 0, 0)),
            pl.BlockSpec((1, 1, 2, cout), lambda i, j: (i, j, 0, 0)),
            pl.BlockSpec((1, 1, 2, cout), lambda i, j: (i, j, 0, 0)),
        ),
        compiler_params=pltpu.CompilerParams(
            dimension_semantics=("parallel", "parallel"),
            vmem_limit_bytes=VMEM_LIMIT),
    )(xp, xp, xp, m2d, vrow, s1, t1, w1, b1, ws, bs)

    count1 = n * do * ho * wo
    s2, t2 = _scale_shift(st1, count1, params["bn2_gamma"], params["bn2_beta"])
    ss, ts = _scale_shift(sts, count1, params["bns_gamma"], params["bns_beta"])

    # ---- fused [BN2 + LeakyReLU + conv2] + [skip BN + residual add] --------
    m2d2 = _interior_mask(hp2, wp2, p)
    w2 = _to_mat(params["w2"]).astype(MXU_DTYPE)
    b2 = params["b2"].reshape(1, cout).astype(jnp.float32)

    c_specs = [
        pl.BlockSpec(
            (1, 1, hp2 * wp2, cout),
            lambda i, j, k=k: (
                i, jnp.maximum(0, jnp.minimum(j + k - p, do - 1)), 0, 0))
        for k in range(3)
    ]
    kernel2 = functools.partial(
        _conv_res_kernel, pad=p, Dp2=dp2, Wp2=wp2, Ho=ho, Wo=wo, R2=r2_rows)
    out = pl.pallas_call(
        kernel2,
        out_shape=jax.ShapeDtypeStruct((n, do, ho * wo, cout), jnp.float32),
        grid=(n, do),
        in_specs=c_specs + [
            _const((hp2 * wp2, 1)),          # interior (H, W) mask
            _const((1, cout)),               # BN2 scale
            _const((1, cout)),               # BN2 shift
            _const((27 * cout, cout)),       # conv2 weight (grid-resident)
            _const((1, cout)),               # conv2 bias
            pl.BlockSpec((1, 1, r2_rows, cout), lambda i, j: (i, j, 0, 0)),
            _const((1, cout)),               # skip BN scale
            _const((1, cout)),               # skip BN shift
        ],
        out_specs=pl.BlockSpec((1, 1, ho * wo, cout),
                               lambda i, j: (i, j, 0, 0)),
        compiler_params=pltpu.CompilerParams(
            dimension_semantics=("parallel", "parallel"),
            vmem_limit_bytes=VMEM_LIMIT),
    )(c1p, c1p, c1p, m2d2, s2, t2, w2, b2, cs, ss, ts)

    out = out.reshape(n, do, ho, wo, cout)
    return jnp.transpose(out, (0, 4, 1, 2, 3))           # back to NCDHW


# ------------------------------ reference & init ----------------------------
def _reference_forward(x, params, stride, padding):
    """Pure-JAX reference with PyTorch-layout weights (training-mode BN)."""
    def bn(v, gamma, beta):
        mean = v.mean(axis=(0, 2, 3, 4), keepdims=True)
        var = v.var(axis=(0, 2, 3, 4), keepdims=True)     # biased
        g = gamma.reshape(1, -1, 1, 1, 1)
        b = beta.reshape(1, -1, 1, 1, 1)
        return (v - mean) / jnp.sqrt(var + EPS) * g + b

    def conv(v, w, b, s):
        out = lax.conv_general_dilated(
            v, w, window_strides=(s, s, s),
            padding=[(padding, padding)] * 3,
            dimension_numbers=("NCDHW", "OIDHW", "NCDHW"))
        return out + b.reshape(1, -1, 1, 1, 1)

    h = _leaky(bn(x, params["bn1_gamma"], params["bn1_beta"]))
    h = conv(h, params["w1"], params["b1"], stride)
    h = _leaky(bn(h, params["bn2_gamma"], params["bn2_beta"]))
    h = conv(h, params["w2"], params["b2"], 1)
    s = conv(x, params["ws"], params["bs"], stride)
    s = bn(s, params["bns_gamma"], params["bns_beta"])
    return h + s


def init_params(key, in_dim, out_dim):
    ks = jax.random.split(key, 6)
    return dict(
        w1=0.1 * jax.random.normal(ks[0], (out_dim, in_dim, 3, 3, 3), jnp.float32),
        b1=0.1 * jax.random.normal(ks[1], (out_dim,), jnp.float32),
        w2=0.1 * jax.random.normal(ks[2], (out_dim, out_dim, 3, 3, 3), jnp.float32),
        b2=0.1 * jax.random.normal(ks[3], (out_dim,), jnp.float32),
        ws=0.1 * jax.random.normal(ks[4], (out_dim, in_dim, 3, 3, 3), jnp.float32),
        bs=0.1 * jax.random.normal(ks[5], (out_dim,), jnp.float32),
        # BatchNorm3d defaults: weight=1, bias=0 (training-mode batch stats).
        bn1_gamma=jnp.ones((in_dim,), jnp.float32),
        bn1_beta=jnp.zeros((in_dim,), jnp.float32),
        bn2_gamma=jnp.ones((out_dim,), jnp.float32),
        bn2_beta=jnp.zeros((out_dim,), jnp.float32),
        bns_gamma=jnp.ones((out_dim,), jnp.float32),
        bns_beta=jnp.zeros((out_dim,), jnp.float32),
    )


if __name__ == "__main__":
    key = jax.random.PRNGKey(0)
    kx, kp = jax.random.split(key)

    N, CIN, COUT = 2, 4, 8
    D = H = W = 8
    STRIDE, PADDING = 1, 1

    x = jax.random.normal(kx, (N, CIN, D, H, W), jnp.float32)
    params = init_params(kp, CIN, COUT)

    fwd = jax.jit(functools.partial(residual_block_forward,
                                    stride=STRIDE, padding=PADDING))
    out = fwd(x, params)
    jax.block_until_ready(out)
    assert out.shape == (N, COUT, D, H, W), out.shape

    ref = _reference_forward(x, params, STRIDE, PADDING)
    np.testing.assert_allclose(np.asarray(out), np.asarray(ref),
                               rtol=5e-2, atol=5e-2)
    print("KERNEL_OK")
</pallas_src>

<mosaic_0001>
module attributes {stable_mosaic.version = 11 : i64} {
  func.func @_stats_kernel(%arg0: i32, %arg1: i32, %arg2: memref<1x512x4xf32, #tpu.memory_space<vmem>>, %arg3: memref<1x1x2x4xf32, #tpu.memory_space<vmem>>) attributes {dimension_semantics = [#tpu.dimension_semantics<parallel>, #tpu.dimension_semantics<parallel>], iteration_bounds = array<i64: 2, 1>, scalar_prefetch = 0 : i64, scratch_operands = 0 : i64, tpu.core_type = #tpu.core_type<tc>, window_params = [{transform_indices = @transform_0, window_bounds = array<i64: 1, 512, 4>}, {transform_indices = @transform_1, window_bounds = array<i64: 1, 1, 2, 4>}]} {
    %c0 = arith.constant 0 : index
    %c0_0 = arith.constant 0 : index
    %c0_1 = arith.constant 0 : index
    %0 = vector.load %arg2[%c0, %c0_0, %c0_1] : memref<1x512x4xf32, #tpu.memory_space<vmem>>, vector<1x512x4xf32>
    %1 = vector.shape_cast %0 : vector<1x512x4xf32> to vector<512x4xf32>
    %cst = arith.constant dense<0.000000e+00> : vector<4xf32>
    %2 = vector.multi_reduction <add>, %1, %cst [0] : vector<512x4xf32> to vector<4xf32>
    %3 = vector.shape_cast %2 : vector<4xf32> to vector<1x4xf32>
    %c0_2 = arith.constant 0 : index
    %c0_3 = arith.constant 0 : index
    %c0_4 = arith.constant 0 : index
    %c0_5 = arith.constant 0 : index
    %4 = vector.load %arg3[%c0_2, %c0_3, %c0_4, %c0_5] : memref<1x1x2x4xf32, #tpu.memory_space<vmem>>, vector<1x1x1x4xf32>
    %5 = vector.shape_cast %4 : vector<1x1x1x4xf32> to vector<1x4xf32>
    %6 = vector.shape_cast %3 : vector<1x4xf32> to vector<1x1x1x4xf32>
    tpu.vector_store %arg3[%c0_2, %c0_3, %c0_4, %c0_5], %6 {strides = array<i32>} : memref<1x1x2x4xf32, #tpu.memory_space<vmem>>, vector<1x1x1x4xf32>,
    %7 = arith.mulf %1, %1 : vector<512x4xf32>
    %cst_6 = arith.constant dense<0.000000e+00> : vector<4xf32>
    %8 = vector.multi_reduction <add>, %7, %cst_6 [0] : vector<512x4xf32> to vector<4xf32>
    %9 = vector.shape_cast %8 : vector<4xf32> to vector<1x4xf32>
    %c0_7 = arith.constant 0 : index
    %c0_8 = arith.constant 0 : index
    %c1 = arith.constant 1 : index
    %c0_9 = arith.constant 0 : index
    %10 = vector.load %arg3[%c0_7, %c0_8, %c1, %c0_9] : memref<1x1x2x4xf32, #tpu.memory_space<vmem>>, vector<1x1x1x4xf32>
    %11 = vector.shape_cast %10 : vector<1x1x1x4xf32> to vector<1x4xf32>
    %12 = vector.shape_cast %9 : vector<1x4xf32> to vector<1x1x1x4xf32>
    tpu.vector_store %arg3[%c0_7, %c0_8, %c1, %c0_9], %12 {strides = array<i32>} : memref<1x1x2x4xf32, #tpu.memory_space<vmem>>, vector<1x1x1x4xf32>,
    return
  }
  func.func @transform_0(%arg0: i32, %arg1: i32) -> (i32, i32, i32) {
    %c0_i32 = arith.constant 0 : i32
    %c0_i32_0 = arith.constant 0 : i32
    return %arg0, %arg1, %c0_i32 : i32, i32, i32
  }
  func.func @transform_1(%arg0: i32, %arg1: i32) -> (i32, i32, i32, i32) {
    %c0_i32 = arith.constant 0 : i32
    %c0_i32_0 = arith.constant 0 : i32
    %c0_i32_1 = arith.constant 0 : i32
    return %arg0, %arg1, %c0_i32, %c0_i32_0 : i32, i32, i32, i32
  }
}

module attributes {stable_mosaic.version = 11 : i64} {
  func.func @_dual_conv_kernel(%arg0: i32, %arg1: i32, %arg2: memref<1x1x100x4xf32, #tpu.memory_space<vmem>>, %arg3: memref<1x1x100x4xf32, #tpu.memory_space<vmem>>, %arg4: memref<1x1x100x4xf32, #tpu.memory_space<vmem>>, %arg5: memref<100x1xf32, #tpu.memory_space<vmem>>, %arg6: memref<78x1xf32, #tpu.memory_space<vmem>>, %arg7: memref<1x4xf32, #tpu.memory_space<vmem>>, %arg8: memref<1x4xf32, #tpu.memory_space<vmem>>, %arg9: memref<108x8xbf16, #tpu.memory_space<vmem>>, %arg10: memref<1x8xf32, #tpu.memory_space<vmem>>, %arg11: memref<108x8xbf16, #tpu.memory_space<vmem>>, %arg12: memref<1x8xf32, #tpu.memory_space<vmem>>, %arg13: memref<1x1x100x8xbf16, #tpu.memory_space<vmem>>, %arg14: memref<1x1x78x8xbf16, #tpu.memory_space<vmem>>, %arg15: memref<1x1x2x8xf32, #tpu.memory_space<vmem>>, %arg16: memref<1x1x2x8xf32, #tpu.memory_space<vmem>>) attributes {dimension_semantics = [#tpu.dimension_semantics<parallel>, #tpu.dimension_semantics<parallel>], iteration_bounds = array<i64: 2, 8>, scalar_prefetch = 0 : i64, scratch_operands = 0 : i64, tpu.core_type = #tpu.core_type<tc>, window_params = [{transform_indices = @transform_0, window_bounds = array<i64: 1, 1, 100, 4>}, {transform_indices = @transform_1, window_bounds = array<i64: 1, 1, 100, 4>}, {transform_indices = @transform_2, window_bounds = array<i64: 1, 1, 100, 4>}, {pipeline_mode = #tpu.pipeline_mode<synchronous>, transform_indices = @transform_3, window_bounds = array<i64: 100, 1>}, {pipeline_mode = #tpu.pipeline_mode<synchronous>, transform_indices = @transform_4, window_bounds = array<i64: 78, 1>}, {pipeline_mode = #tpu.pipeline_mode<synchronous>, transform_indices = @transform_5, window_bounds = array<i64: 1, 4>}, {pipeline_mode = #tpu.pipeline_mode<synchronous>, transform_indices = @transform_6, window_bounds = array<i64: 1, 4>}, {pipeline_mode = #tpu.pipeline_mode<synchronous>, transform_indices = @transform_7, window_bounds = array<i64: 108, 8>}, {pipeline_mode = #tpu.pipeline_mode<synchronous>, transform_indices = @transform_8, window_bounds = array<i64: 1, 8>}, {pipeline_mode = #tpu.pipeline_mode<synchronous>, transform_indices = @transform_9, window_bounds = array<i64: 108, 8>}, {pipeline_mode = #tpu.pipeline_mode<synchronous>, transform_indices = @transform_10, window_bounds = array<i64: 1, 8>}, {transform_indices = @transform_11, window_bounds = array<i64: 1, 1, 100, 8>}, {transform_indices = @transform_12, window_bounds = array<i64: 1, 1, 78, 8>}, {transform_indices = @transform_13, window_bounds = array<i64: 1, 1, 2, 8>}, {transform_indices = @transform_14, window_bounds = array<i64: 1, 1, 2, 8>}]} {
    %c0 = arith.constant 0 : index
    %c0_0 = arith.constant 0 : index
    %0 = vector.load %arg7[%c0, %c0_0] : memref<1x4xf32, #tpu.memory_space<vmem>>, vector<1x4xf32>
    %c0_1 = arith.constant 0 : index
    %c0_2 = arith.constant 0 : index
    %1 = vector.load %arg8[%c0_1, %c0_2] : memref<1x4xf32, #tpu.memory_space<vmem>>, vector<1x4xf32>
    %c0_3 = arith.constant 0 : index
    %c0_4 = arith.constant 0 : index
    %2 = vector.load %arg5[%c0_3, %c0_4] : memref<100x1xf32, #tpu.memory_space<vmem>>, vector<100x1xf32>
    %c0_5 = arith.constant 0 : index
    %c0_6 = arith.constant 0 : index
    %c0_7 = arith.constant 0 : index
    %c0_8 = arith.constant 0 : index
    %3 = vector.load %arg2[%c0_5, %c0_6, %c0_7, %c0_8] : memref<1x1x100x4xf32, #tpu.memory_space<vmem>>, vector<1x1x100x4xf32>
    %4 = vector.shape_cast %3 : vector<1x1x100x4xf32> to vector<100x4xf32>
    %c1_i32 = arith.constant 1 : i32
    %5 = arith.muli %arg1, %c1_i32 : i32
    %c0_i32 = arith.constant 0 : i32
    %6 = arith.addi %5, %c0_i32 : i32
    %c1_i32_9 = arith.constant 1 : i32
    %7 = arith.cmpi sge, %6, %c1_i32_9 : i32
    %c9_i32 = arith.constant 9 : i32
    %8 = arith.cmpi slt, %6, %c9_i32 : i32
    %9 = arith.andi %7, %8 : i1
    %cst = arith.constant 1.000000e+00 : f32
    %cst_10 = arith.constant 0.000000e+00 : f32
    %10 = arith.select %9, %cst, %cst_10 : f32
    %11 = vector.broadcast %0 : vector<1x4xf32> to vector<100x4xf32>
    %12 = arith.mulf %4, %11 : vector<100x4xf32>
    %13 = vector.broadcast %1 : vector<1x4xf32> to vector<100x4xf32>
    %14 = arith.addf %12, %13 : vector<100x4xf32>
    %cst_11 = arith.constant 0.000000e+00 : f32
    %15 = vector.broadcast %cst_11 : f32 to vector<100x4xf32>
    %16 = arith.cmpf oge, %14, %15 : vector<100x4xf32>
    %cst_12 = arith.constant 2.000000e-01 : f32
    %17 = vector.broadcast %cst_12 : f32 to vector<100x4xf32>
    %18 = arith.mulf %17, %14 : vector<100x4xf32>
    %19 = arith.select %16, %14, %18 : vector<100x4xi1>, vector<100x4xf32>
    %20 = vector.broadcast %10 : f32 to vector<100x1xf32>
    %21 = arith.mulf %2, %20 : vector<100x1xf32>
    %22 = vector.broadcast %21 : vector<100x1xf32> to vector<100x4xf32>
    %23 = arith.mulf %19, %22 : vector<100x4xf32>
    %24 = vector.extract_strided_slice %23 {offsets = [0, 0], sizes = [78, 4], strides = [1, 1]} : vector<100x4xf32> to vector<78x4xf32>
    %25 = vector.extract_strided_slice %4 {offsets = [0, 0], sizes = [78, 4], strides = [1, 1]} : vector<100x4xf32> to vector<78x4xf32>
    %26 = vector.extract_strided_slice %23 {offsets = [1, 0], sizes = [78, 4], strides = [1, 1]} : vector<100x4xf32> to vector<78x4xf32>
    %27 = vector.extract_strided_slice %4 {offsets = [1, 0], sizes = [78, 4], strides = [1, 1]} : vector<100x4xf32> to vector<78x4xf32>
    %28 = vector.extract_strided_slice %23 {offsets = [2, 0], sizes = [78, 4], strides = [1, 1]} : vector<100x4xf32> to vector<78x4xf32>
    %29 = vector.extract_strided_slice %4 {offsets = [2, 0], sizes = [78, 4], strides = [1, 1]} : vector<100x4xf32> to vector<78x4xf32>
    %30 = vector.extract_strided_slice %23 {offsets = [10, 0], sizes = [78, 4], strides = [1, 1]} : vector<100x4xf32> to vector<78x4xf32>
    %31 = vector.extract_strided_slice %4 {offsets = [10, 0], sizes = [78, 4], strides = [1, 1]} : vector<100x4xf32> to vector<78x4xf32>
    %32 = vector.extract_strided_slice %23 {offsets = [11, 0], sizes = [78, 4], strides = [1, 1]} : vector<100x4xf32> to vector<78x4xf32>
    %33 = vector.extract_strided_slice %4 {offsets = [11, 0], sizes = [78, 4], strides = [1, 1]} : vector<100x4xf32> to vector<78x4xf32>
    %34 = vector.extract_strided_slice %23 {offsets = [12, 0], sizes = [78, 4], strides = [1, 1]} : vector<100x4xf32> to vector<78x4xf32>
    %35 = vector.extract_strided_slice %4 {offsets = [12, 0], sizes = [78, 4], strides = [1, 1]} : vector<100x4xf32> to vector<78x4xf32>
    %36 = vector.extract_strided_slice %23 {offsets = [20, 0], sizes = [78, 4], strides = [1, 1]} : vector<100x4xf32> to vector<78x4xf32>
    %37 = vector.extract_strided_slice %4 {offsets = [20, 0], sizes = [78, 4], strides = [1, 1]} : vector<100x4xf32> to vector<78x4xf32>
    %38 = vector.extract_strided_slice %23 {offsets = [21, 0], sizes = [78, 4], strides = [1, 1]} : vector<100x4xf32> to vector<78x4xf32>
    %39 = vector.extract_strided_slice %4 {offsets = [21, 0], sizes = [78, 4], strides = [1, 1]} : vector<100x4xf32> to vector<78x4xf32>
    %40 = vector.extract_strided_slice %23 {offsets = [22, 0], sizes = [78, 4], strides = [1, 1]} : vector<100x4xf32> to vector<78x4xf32>
    %41 = vector.extract_strided_slice %4 {offsets = [22, 0], sizes = [78, 4], strides = [1, 1]} : vector<100x4xf32> to vector<78x4xf32>
    %c0_13 = arith.constant 0 : index
    %c0_14 = arith.constant 0 : index
    %c0_15 = arith.constant 0 : index
    %c0_16 = arith.constant 0 : index
    %42 = vector.load %arg3[%c0_13, %c0_14, %c0_15, %c0_16] : memref<1x1x100x4xf32, #tpu.memory_space<vmem>>, vector<1x1x100x4xf32>
    %43 = vector.shape_cast %42 : vector<1x1x100x4xf32> to vector<100x4xf32>
    %c1_i32_17 = arith.constant 1 : i32
    %44 = arith.muli %arg1, %c1_i32_17 : i32
    %c1_i32_18 = arith.constant 1 : i32
    %45 = arith.addi %44, %c1_i32_18 : i32
    %c1_i32_19 = arith.constant 1 : i32
    %46 = arith.cmpi sge, %45, %c1_i32_19 : i32
    %c9_i32_20 = arith.constant 9 : i32
    %47 = arith.cmpi slt, %45, %c9_i32_20 : i32
    %48 = arith.andi %46, %47 : i1
    %cst_21 = arith.constant 1.000000e+00 : f32
    %cst_22 = arith.constant 0.000000e+00 : f32
    %49 = arith.select %48, %cst_21, %cst_22 : f32
    %50 = vector.broadcast %0 : vector<1x4xf32> to vector<100x4xf32>
    %51 = arith.mulf %43, %50 : vector<100x4xf32>
    %52 = vector.broadcast %1 : vector<1x4xf32> to vector<100x4xf32>
    %53 = arith.addf %51, %52 : vector<100x4xf32>
    %cst_23 = arith.constant 0.000000e+00 : f32
    %54 = vector.broadcast %cst_23 : f32 to vector<100x4xf32>
    %55 = arith.cmpf oge, %53, %54 : vector<100x4xf32>
    %cst_24 = arith.constant 2.000000e-01 : f32
    %56 = vector.broadcast %cst_24 : f32 to vector<100x4xf32>
    %57 = arith.mulf %56, %53 : vector<100x4xf32>
    %58 = arith.select %55, %53, %57 : vector<100x4xi1>, vector<100x4xf32>
    %59 = vector.broadcast %49 : f32 to vector<100x1xf32>
    %60 = arith.mulf %2, %59 : vector<100x1xf32>
    %61 = vector.broadcast %60 : vector<100x1xf32> to vector<100x4xf32>
    %62 = arith.mulf %58, %61 : vector<100x4xf32>
    %63 = vector.extract_strided_slice %62 {offsets = [0, 0], sizes = [78, 4], strides = [1, 1]} : vector<100x4xf32> to vector<78x4xf32>
    %64 = vector.extract_strided_slice %43 {offsets = [0, 0], sizes = [78, 4], strides = [1, 1]} : vector<100x4xf32> to vector<78x4xf32>
    %65 = vector.extract_strided_slice %62 {offsets = [1, 0], sizes = [78, 4], strides = [1, 1]} : vector<100x4xf32> to vector<78x4xf32>
    %66 = vector.extract_strided_slice %43 {offsets = [1, 0], sizes = [78, 4], strides = [1, 1]} : vector<100x4xf32> to vector<78x4xf32>
    %67 = vector.extract_strided_slice %62 {offsets = [2, 0], sizes = [78, 4], strides = [1, 1]} : vector<100x4xf32> to vector<78x4xf32>
    %68 = vector.extract_strided_slice %43 {offsets = [2, 0], sizes = [78, 4], strides = [1, 1]} : vector<100x4xf32> to vector<78x4xf32>
    %69 = vector.extract_strided_slice %62 {offsets = [10, 0], sizes = [78, 4], strides = [1, 1]} : vector<100x4xf32> to vector<78x4xf32>
    %70 = vector.extract_strided_slice %43 {offsets = [10, 0], sizes = [78, 4], strides = [1, 1]} : vector<100x4xf32> to vector<78x4xf32>
    %71 = vector.extract_strided_slice %62 {offsets = [11, 0], sizes = [78, 4], strides = [1, 1]} : vector<100x4xf32> to vector<78x4xf32>
    %72 = vector.extract_strided_slice %43 {offsets = [11, 0], sizes = [78, 4], strides = [1, 1]} : vector<100x4xf32> to vector<78x4xf32>
    %73 = vector.extract_strided_slice %62 {offsets = [12, 0], sizes = [78, 4], strides = [1, 1]} : vector<100x4xf32> to vector<78x4xf32>
    %74 = vector.extract_strided_slice %43 {offsets = [12, 0], sizes = [78, 4], strides = [1, 1]} : vector<100x4xf32> to vector<78x4xf32>
    %75 = vector.extract_strided_slice %62 {offsets = [20, 0], sizes = [78, 4], strides = [1, 1]} : vector<100x4xf32> to vector<78x4xf32>
    %76 = vector.extract_strided_slice %43 {offsets = [20, 0], sizes = [78, 4], strides = [1, 1]} : vector<100x4xf32> to vector<78x4xf32>
    %77 = vector.extract_strided_slice %62 {offsets = [21, 0], sizes = [78, 4], strides = [1, 1]} : vector<100x4xf32> to vector<78x4xf32>
    %78 = vector.extract_strided_slice %43 {offsets = [21, 0], sizes = [78, 4], strides = [1, 1]} : vector<100x4xf32> to vector<78x4xf32>
    %79 = vector.extract_strided_slice %62 {offsets = [22, 0], sizes = [78, 4], strides = [1, 1]} : vector<100x4xf32> to vector<78x4xf32>
    %80 = vector.extract_strided_slice %43 {offsets = [22, 0], sizes = [78, 4], strides = [1, 1]} : vector<100x4xf32> to vector<78x4xf32>
    %c0_25 = arith.constant 0 : index
    %c0_26 = arith.constant 0 : index
    %c0_27 = arith.constant 0 : index
    %c0_28 = arith.constant 0 : index
    %81 = vector.load %arg4[%c0_25, %c0_26, %c0_27, %c0_28] : memref<1x1x100x4xf32, #tpu.memory_space<vmem>>, vector<1x1x100x4xf32>
    %82 = vector.shape_cast %81 : vector<1x1x100x4xf32> to vector<100x4xf32>
    %c1_i32_29 = arith.constant 1 : i32
    %83 = arith.muli %arg1, %c1_i32_29 : i32
    %c2_i32 = arith.constant 2 : i32
    %84 = arith.addi %83, %c2_i32 : i32
    %c1_i32_30 = arith.constant 1 : i32
    %85 = arith.cmpi sge, %84, %c1_i32_30 : i32
    %c9_i32_31 = arith.constant 9 : i32
    %86 = arith.cmpi slt, %84, %c9_i32_31 : i32
    %87 = arith.andi %85, %86 : i1
    %cst_32 = arith.constant 1.000000e+00 : f32
    %cst_33 = arith.constant 0.000000e+00 : f32
    %88 = arith.select %87, %cst_32, %cst_33 : f32
    %89 = vector.broadcast %0 : vector<1x4xf32> to vector<100x4xf32>
    %90 = arith.mulf %82, %89 : vector<100x4xf32>
    %91 = vector.broadcast %1 : vector<1x4xf32> to vector<100x4xf32>
    %92 = arith.addf %90, %91 : vector<100x4xf32>
    %cst_34 = arith.constant 0.000000e+00 : f32
    %93 = vector.broadcast %cst_34 : f32 to vector<100x4xf32>
    %94 = arith.cmpf oge, %92, %93 : vector<100x4xf32>
    %cst_35 = arith.constant 2.000000e-01 : f32
    %95 = vector.broadcast %cst_35 : f32 to vector<100x4xf32>
    %96 = arith.mulf %95, %92 : vector<100x4xf32>
    %97 = arith.select %94, %92, %96 : vector<100x4xi1>, vector<100x4xf32>
    %98 = vector.broadcast %88 : f32 to vector<100x1xf32>
    %99 = arith.mulf %2, %98 : vector<100x1xf32>
    %100 = vector.broadcast %99 : vector<100x1xf32> to vector<100x4xf32>
    %101 = arith.mulf %97, %100 : vector<100x4xf32>
    %102 = vector.extract_strided_slice %101 {offsets = [0, 0], sizes = [78, 4], strides = [1, 1]} : vector<100x4xf32> to vector<78x4xf32>
    %103 = vector.extract_strided_slice %82 {offsets = [0, 0], sizes = [78, 4], strides = [1, 1]} : vector<100x4xf32> to vector<78x4xf32>
    %104 = vector.extract_strided_slice %101 {offsets = [1, 0], sizes = [78, 4], strides = [1, 1]} : vector<100x4xf32> to vector<78x4xf32>
    %105 = vector.extract_strided_slice %82 {offsets = [1, 0], sizes = [78, 4], strides = [1, 1]} : vector<100x4xf32> to vector<78x4xf32>
    %106 = vector.extract_strided_slice %101 {offsets = [2, 0], sizes = [78, 4], strides = [1, 1]} : vector<100x4xf32> to vector<78x4xf32>
    %107 = vector.extract_strided_slice %82 {offsets = [2, 0], sizes = [78, 4], strides = [1, 1]} : vector<100x4xf32> to vector<78x4xf32>
    %108 = vector.extract_strided_slice %101 {offsets = [10, 0], sizes = [78, 4], strides = [1, 1]} : vector<100x4xf32> to vector<78x4xf32>
    %109 = vector.extract_strided_slice %82 {offsets = [10, 0], sizes = [78, 4], strides = [1, 1]} : vector<100x4xf32> to vector<78x4xf32>
    %110 = vector.extract_strided_slice %101 {offsets = [11, 0], sizes = [78, 4], strides = [1, 1]} : vector<100x4xf32> to vector<78x4xf32>
    %111 = vector.extract_strided_slice %82 {offsets = [11, 0], sizes = [78, 4], strides = [1, 1]} : vector<100x4xf32> to vector<78x4xf32>
    %112 = vector.extract_strided_slice %101 {offsets = [12, 0], sizes = [78, 4], strides = [1, 1]} : vector<100x4xf32> to vector<78x4xf32>
    %113 = vector.extract_strided_slice %82 {offsets = [12, 0], sizes = [78, 4], strides = [1, 1]} : vector<100x4xf32> to vector<78x4xf32>
    %114 = vector.extract_strided_slice %101 {offsets = [20, 0], sizes = [78, 4], strides = [1, 1]} : vector<100x4xf32> to vector<78x4xf32>
    %115 = vector.extract_strided_slice %82 {offsets = [20, 0], sizes = [78, 4], strides = [1, 1]} : vector<100x4xf32> to vector<78x4xf32>
    %116 = vector.extract_strided_slice %101 {offsets = [21, 0], sizes = [78, 4], strides = [1, 1]} : vector<100x4xf32> to vector<78x4xf32>
    %117 = vector.extract_strided_slice %82 {offsets = [21, 0], sizes = [78, 4], strides = [1, 1]} : vector<100x4xf32> to vector<78x4xf32>
    %118 = vector.extract_strided_slice %101 {offsets = [22, 0], sizes = [78, 4], strides = [1, 1]} : vector<100x4xf32> to vector<78x4xf32>
    %119 = vector.extract_strided_slice %82 {offsets = [22, 0], sizes = [78, 4], strides = [1, 1]} : vector<100x4xf32> to vector<78x4xf32>
    %120 = tpu.concatenate %24, %26, %28, %30, %32, %34, %36, %38, %40, %63, %65, %67, %69, %71, %73, %75 in 1 : vector<78x4xf32>, vector<78x4xf32>, vector<78x4xf32>, vector<78x4xf32>, vector<78x4xf32>, vector<78x4xf32>, vector<78x4xf32>, vector<78x4xf32>, vector<78x4xf32>, vector<78x4xf32>, vector<78x4xf32>, vector<78x4xf32>, vector<78x4xf32>, vector<78x4xf32>, vector<78x4xf32>, vector<78x4xf32> -> vector<78x64xf32>
    %121 = tpu.concatenate %77, %79, %102, %104, %106, %108, %110, %112, %114, %116, %118 in 1 : vector<78x4xf32>, vector<78x4xf32>, vector<78x4xf32>, vector<78x4xf32>, vector<78x4xf32>, vector<78x4xf32>, vector<78x4xf32>, vector<78x4xf32>, vector<78x4xf32>, vector<78x4xf32>, vector<78x4xf32> -> vector<78x44xf32>
    %122 = tpu.concatenate %120, %121 in 1 : vector<78x64xf32>, vector<78x44xf32> -> vector<78x108xf32>
    %123 = arith.truncf %122 : vector<78x108xf32> to vector<78x108xbf16>
    %124 = tpu.concatenate %25, %27, %29, %31, %33, %35, %37, %39, %41, %64, %66, %68, %70, %72, %74, %76 in 1 : vector<78x4xf32>, vector<78x4xf32>, vector<78x4xf32>, vector<78x4xf32>, vector<78x4xf32>, vector<78x4xf32>, vector<78x4xf32>, vector<78x4xf32>, vector<78x4xf32>, vector<78x4xf32>, vector<78x4xf32>, vector<78x4xf32>, vector<78x4xf32>, vector<78x4xf32>, vector<78x4xf32>, vector<78x4xf32> -> vector<78x64xf32>
    %125 = tpu.concatenate %78, %80, %103, %105, %107, %109, %111, %113, %115, %117, %119 in 1 : vector<78x4xf32>, vector<78x4xf32>, vector<78x4xf32>, vector<78x4xf32>, vector<78x4xf32>, vector<78x4xf32>, vector<78x4xf32>, vector<78x4xf32>, vector<78x4xf32>, vector<78x4xf32>, vector<78x4xf32> -> vector<78x44xf32>
    %126 = tpu.concatenate %124, %125 in 1 : vector<78x64xf32>, vector<78x44xf32> -> vector<78x108xf32>
    %127 = arith.truncf %126 : vector<78x108xf32> to vector<78x108xbf16>
    %c0_36 = arith.constant 0 : index
    %c0_37 = arith.constant 0 : index
    %128 = vector.load %arg9[%c0_36, %c0_37] : memref<108x8xbf16, #tpu.memory_space<vmem>>, vector<108x8xbf16>
    %cst_38 = arith.constant dense<0.000000e+00> : vector<78x8xf32>
    %129 = tpu.matmul %123, %128, %cst_38 {dimension_numbers = #tpu.dot_dimension_numbers<[1], [0], [0], [1], [0, 0, 1, 1], [], []>} : vector<78x108xbf16>, vector<108x8xbf16>, vector<78x8xf32> -> vector<78x8xf32>
    %c0_39 = arith.constant 0 : index
    %c0_40 = arith.constant 0 : index
    %130 = vector.load %arg10[%c0_39, %c0_40] : memref<1x8xf32, #tpu.memory_space<vmem>>, vector<1x8xf32>
    %131 = vector.broadcast %130 : vector<1x8xf32> to vector<78x8xf32>
    %132 = arith.addf %129, %131 : vector<78x8xf32>
    %c0_41 = arith.constant 0 : index
    %c0_42 = arith.constant 0 : index
    %133 = vector.load %arg11[%c0_41, %c0_42] : memref<108x8xbf16, #tpu.memory_space<vmem>>, vector<108x8xbf16>
    %cst_43 = arith.constant dense<0.000000e+00> : vector<78x8xf32>
    %134 = tpu.matmul %127, %133, %cst_43 {dimension_numbers = #tpu.dot_dimension_numbers<[1], [0], [0], [1], [0, 0, 1, 1], [], []>} : vector<78x108xbf16>, vector<108x8xbf16>, vector<78x8xf32> -> vector<78x8xf32>
    %c0_44 = arith.constant 0 : index
    %c0_45 = arith.constant 0 : index
    %135 = vector.load %arg12[%c0_44, %c0_45] : memref<1x8xf32, #tpu.memory_space<vmem>>, vector<1x8xf32>
    %136 = vector.broadcast %135 : vector<1x8xf32> to vector<78x8xf32>
    %137 = arith.addf %134, %136 : vector<78x8xf32>
    %c0_46 = arith.constant 0 : index
    %c0_47 = arith.constant 0 : index
    %138 = vector.load %arg6[%c0_46, %c0_47] : memref<78x1xf32, #tpu.memory_space<vmem>>, vector<78x1xf32>
    %139 = vector.broadcast %138 : vector<78x1xf32> to vector<78x8xf32>
    %140 = arith.mulf %132, %139 : vector<78x8xf32>
    %141 = vector.broadcast %138 : vector<78x1xf32> to vector<78x8xf32>
    %142 = arith.mulf %137, %141 : vector<78x8xf32>
    %cst_48 = arith.constant dense<0.000000e+00> : vector<8xf32>
    %143 = vector.multi_reduction <add>, %140, %cst_48 [0] : vector<78x8xf32> to vector<8xf32>
    %144 = vector.shape_cast %143 : vector<8xf32> to vector<1x8xf32>
    %c0_49 = arith.constant 0 : index
    %c0_50 = arith.constant 0 : index
    %c0_51 = arith.constant 0 : index
    %c0_52 = arith.constant 0 : index
    %145 = vector.load %arg15[%c0_49, %c0_50, %c0_51, %c0_52] : memref<1x1x2x8xf32, #tpu.memory_space<vmem>>, vector<1x1x1x8xf32>
    %146 = vector.shape_cast %145 : vector<1x1x1x8xf32> to vector<1x8xf32>
    %147 = vector.shape_cast %144 : vector<1x8xf32> to vector<1x1x1x8xf32>
    tpu.vector_store %arg15[%c0_49, %c0_50, %c0_51, %c0_52], %147 {strides = array<i32>} : memref<1x1x2x8xf32, #tpu.memory_space<vmem>>, vector<1x1x1x8xf32>,
    %148 = arith.mulf %140, %140 : vector<78x8xf32>
    %cst_53 = arith.constant dense<0.000000e+00> : vector<8xf32>
    %149 = vector.multi_reduction <add>, %148, %cst_53 [0] : vector<78x8xf32> to vector<8xf32>
    %150 = vector.shape_cast %149 : vector<8xf32> to vector<1x8xf32>
    %c0_54 = arith.constant 0 : index
    %c0_55 = arith.constant 0 : index
    %c1 = arith.constant 1 : index
    %c0_56 = arith.constant 0 : index
    %151 = vector.load %arg15[%c0_54, %c0_55, %c1, %c0_56] : memref<1x1x2x8xf32, #tpu.memory_space<vmem>>, vector<1x1x1x8xf32>
    %152 = vector.shape_cast %151 : vector<1x1x1x8xf32> to vector<1x8xf32>
    %153 = vector.shape_cast %150 : vector<1x8xf32> to vector<1x1x1x8xf32>
    tpu.vector_store %arg15[%c0_54, %c0_55, %c1, %c0_56], %153 {strides = array<i32>} : memref<1x1x2x8xf32, #tpu.memory_space<vmem>>, vector<1x1x1x8xf32>,
    %cst_57 = arith.constant dense<0.000000e+00> : vector<8xf32>
    %154 = vector.multi_reduction <add>, %142, %cst_57 [0] : vector<78x8xf32> to vector<8xf32>
    %155 = vector.shape_cast %154 : vector<8xf32> to vector<1x8xf32>
    %c0_58 = arith.constant 0 : index
    %c0_59 = arith.constant 0 : index
    %c0_60 = arith.constant 0 : index
    %c0_61 = arith.constant 0 : index
    %156 = vector.load %arg16[%c0_58, %c0_59, %c0_60, %c0_61] : memref<1x1x2x8xf32, #tpu.memory_space<vmem>>, vector<1x1x1x8xf32>
    %157 = vector.shape_cast %156 : vector<1x1x1x8xf32> to vector<1x8xf32>
    %158 = vector.shape_cast %155 : vector<1x8xf32> to vector<1x1x1x8xf32>
    tpu.vector_store %arg16[%c0_58, %c0_59, %c0_60, %c0_61], %158 {strides = array<i32>} : memref<1x1x2x8xf32, #tpu.memory_space<vmem>>, vector<1x1x1x8xf32>,
    %159 = arith.mulf %142, %142 : vector<78x8xf32>
    %cst_62 = arith.constant dense<0.000000e+00> : vector<8xf32>
    %160 = vector.multi_reduction <add>, %159, %cst_62 [0] : vector<78x8xf32> to vector<8xf32>
    %161 = vector.shape_cast %160 : vector<8xf32> to vector<1x8xf32>
    %c0_63 = arith.constant 0 : index
    %c0_64 = arith.constant 0 : index
    %c1_65 = arith.constant 1 : index
    %c0_66 = arith.constant 0 : index
    %162 = vector.load %arg16[%c0_63, %c0_64, %c1_65, %c0_66] : memref<1x1x2x8xf32, #tpu.memory_space<vmem>>, vector<1x1x1x8xf32>
    %163 = vector.shape_cast %162 : vector<1x1x1x8xf32> to vector<1x8xf32>
    %164 = vector.shape_cast %161 : vector<1x8xf32> to vector<1x1x1x8xf32>
    tpu.vector_store %arg16[%c0_63, %c0_64, %c1_65, %c0_66], %164 {strides = array<i32>} : memref<1x1x2x8xf32, #tpu.memory_space<vmem>>, vector<1x1x1x8xf32>,
    %cst_67 = arith.constant 0.000000e+00 : bf16
    %165 = vector.broadcast %cst_67 : bf16 to vector<100x8xbf16>
    %c0_68 = arith.constant 0 : index
    %c0_69 = arith.constant 0 : index
    %c0_70 = arith.constant 0 : index
    %c0_71 = arith.constant 0 : index
    %166 = vector.load %arg13[%c0_68, %c0_69, %c0_70, %c0_71] : memref<1x1x100x8xbf16, #tpu.memory_space<vmem>>, vector<1x1x100x8xbf16>
    %167 = vector.shape_cast %166 : vector<1x1x100x8xbf16> to vector<100x8xbf16>
    %168 = vector.shape_cast %165 : vector<100x8xbf16> to vector<1x1x100x8xbf16>
    tpu.vector_store %arg13[%c0_68, %c0_69, %c0_70, %c0_71], %168 {strides = array<i32>} : memref<1x1x100x8xbf16, #tpu.memory_space<vmem>>, vector<1x1x100x8xbf16>,
    %169 = arith.truncf %140 : vector<78x8xf32> to vector<78x8xbf16>
    %c0_72 = arith.constant 0 : index
    %c0_73 = arith.constant 0 : index
    %c11 = arith.constant 11 : index
    %c0_74 = arith.constant 0 : index
    %170 = vector.load %arg13[%c0_72, %c0_73, %c11, %c0_74] : memref<1x1x100x8xbf16, #tpu.memory_space<vmem>>, vector<1x1x78x8xbf16>
    %171 = vector.shape_cast %170 : vector<1x1x78x8xbf16> to vector<78x8xbf16>
    %172 = vector.shape_cast %169 : vector<78x8xbf16> to vector<1x1x78x8xbf16>
    tpu.vector_store %arg13[%c0_72, %c0_73, %c11, %c0_74], %172 {strides = array<i32>} : memref<1x1x100x8xbf16, #tpu.memory_space<vmem>>, vector<1x1x78x8xbf16>,
    %173 = arith.truncf %137 : vector<78x8xf32> to vector<78x8xbf16>
    %c0_75 = arith.constant 0 : index
    %c0_76 = arith.constant 0 : index
    %c0_77 = arith.constant 0 : index
    %c0_78 = arith.constant 0 : index
    %174 = vector.load %arg14[%c0_75, %c0_76, %c0_77, %c0_78] : memref<1x1x78x8xbf16, #tpu.memory_space<vmem>>, vector<1x1x78x8xbf16>
    %175 = vector.shape_cast %174 : vector<1x1x78x8xbf16> to vector<78x8xbf16>
    %176 = vector.shape_cast %173 : vector<78x8xbf16> to vector<1x1x78x8xbf16>
    tpu.vector_store %arg14[%c0_75, %c0_76, %c0_77, %c0_78], %176 {strides = array<i32>} : memref<1x1x78x8xbf16, #tpu.memory_space<vmem>>, vector<1x1x78x8xbf16>,
    return
  }
  func.func @transform_0(%arg0: i32, %arg1: i32) -> (i32, i32, i32, i32) {
    %c1_i32 = arith.constant 1 : i32
    %0 = arith.muli %arg1, %c1_i32 : i32
    %c0_i32 = arith.constant 0 : i32
    %1 = arith.addi %0, %c0_i32 : i32
    %c0_i32_0 = arith.constant 0 : i32
    %c0_i32_1 = arith.constant 0 : i32
    %c0_i32_2 = arith.constant 0 : i32
    return %arg0, %1, %c0_i32_0, %c0_i32_1 : i32, i32, i32, i32
  }
  func.func @transform_1(%arg0: i32, %arg1: i32) -> (i32, i32, i32, i32) {
    %c1_i32 = arith.constant 1 : i32
    %0 = arith.muli %arg1, %c1_i32 : i32
    %c1_i32_0 = arith.constant 1 : i32
    %1 = arith.addi %0, %c1_i32_0 : i32
    %c0_i32 = arith.constant 0 : i32
    %c0_i32_1 = arith.constant 0 : i32
    %c0_i32_2 = arith.constant 0 : i32
    return %arg0, %1, %c0_i32, %c0_i32_1 : i32, i32, i32, i32
  }
  func.func @transform_2(%arg0: i32, %arg1: i32) -> (i32, i32, i32, i32) {
    %c1_i32 = arith.constant 1 : i32
    %0 = arith.muli %arg1, %c1_i32 : i32
    %c2_i32 = arith.constant 2 : i32
    %1 = arith.addi %0, %c2_i32 : i32
    %c0_i32 = arith.constant 0 : i32
    %c0_i32_0 = arith.constant 0 : i32
    %c0_i32_1 = arith.constant 0 : i32
    return %arg0, %1, %c0_i32, %c0_i32_0 : i32, i32, i32, i32
  }
  func.func @transform_3(%arg0: i32, %arg1: i32) -> (i32, i32) {
    %c0_i32 = arith.constant 0 : i32
    %c0_i32_0 = arith.constant 0 : i32
    %c0_i32_1 = arith.constant 0 : i32
    return %c0_i32, %c0_i32_0 : i32, i32
  }
  func.func @transform_4(%arg0: i32, %arg1: i32) -> (i32, i32) {
    %c0_i32 = arith.constant 0 : i32
    %c0_i32_0 = arith.constant 0 : i32
    %c0_i32_1 = arith.constant 0 : i32
    return %c0_i32, %c0_i32_0 : i32, i32
  }
  func.func @transform_5(%arg0: i32, %arg1: i32) -> (i32, i32) {
    %c0_i32 = arith.constant 0 : i32
    %c0_i32_0 = arith.constant 0 : i32
    %c0_i32_1 = arith.constant 0 : i32
    return %c0_i32, %c0_i32_0 : i32, i32
  }
  func.func @transform_6(%arg0: i32, %arg1: i32) -> (i32, i32) {
    %c0_i32 = arith.constant 0 : i32
    %c0_i32_0 = arith.constant 0 : i32
    %c0_i32_1 = arith.constant 0 : i32
    return %c0_i32, %c0_i32_0 : i32, i32
  }
  func.func @transform_7(%arg0: i32, %arg1: i32) -> (i32, i32) {
    %c0_i32 = arith.constant 0 : i32
    %c0_i32_0 = arith.constant 0 : i32
    %c0_i32_1 = arith.constant 0 : i32
    return %c0_i32, %c0_i32_0 : i32, i32
  }
  func.func @transform_8(%arg0: i32, %arg1: i32) -> (i32, i32) {
    %c0_i32 = arith.constant 0 : i32
    %c0_i32_0 = arith.constant 0 : i32
    %c0_i32_1 = arith.constant 0 : i32
    return %c0_i32, %c0_i32_0 : i32, i32
  }
  func.func @transform_9(%arg0: i32, %arg1: i32) -> (i32, i32) {
    %c0_i32 = arith.constant 0 : i32
    %c0_i32_0 = arith.constant 0 : i32
    %c0_i32_1 = arith.constant 0 : i32
    return %c0_i32, %c0_i32_0 : i32, i32
  }
  func.func @transform_10(%arg0: i32, %arg1: i32) -> (i32, i32) {
    %c0_i32 = arith.constant 0 : i32
    %c0_i32_0 = arith.constant 0 : i32
    %c0_i32_1 = arith.constant 0 : i32
    return %c0_i32, %c0_i32_0 : i32, i32
  }
  func.func @transform_11(%arg0: i32, %arg1: i32) -> (i32, i32, i32, i32) {
    %c0_i32 = arith.constant 0 : i32
    %c0_i32_0 = arith.constant 0 : i32
    %c0_i32_1 = arith.constant 0 : i32
    return %arg0, %arg1, %c0_i32, %c0_i32_0 : i32, i32, i32, i32
  }
  func.func @transform_12(%arg0: i32, %arg1: i32) -> (i32, i32, i32, i32) {
    %c0_i32 = arith.constant 0 : i32
    %c0_i32_0 = arith.constant 0 : i32
    %c0_i32_1 = arith.constant 0 : i32
    return %arg0, %arg1, %c0_i32, %c0_i32_0 : i32, i32, i32, i32
  }
  func.func @transform_13(%arg0: i32, %arg1: i32) -> (i32, i32, i32, i32) {
    %c0_i32 = arith.constant 0 : i32
    %c0_i32_0 = arith.constant 0 : i32
    %c0_i32_1 = arith.constant 0 : i32
    return %arg0, %arg1, %c0_i32, %c0_i32_0 : i32, i32, i32, i32
  }
  func.func @transform_14(%arg0: i32, %arg1: i32) -> (i32, i32, i32, i32) {
    %c0_i32 = arith.constant 0 : i32
    %c0_i32_0 = arith.constant 0 : i32
    %c0_i32_1 = arith.constant 0 : i32
    return %arg0, %arg1, %c0_i32, %c0_i32_0 : i32, i32, i32, i32
  }
}

module attributes {stable_mosaic.version = 11 : i64} {
  func.func @_conv_res_kernel(%arg0: i32, %arg1: i32, %arg2: memref<1x1x100x8xbf16, #tpu.memory_space<vmem>>, %arg3: memref<1x1x100x8xbf16, #tpu.memory_space<vmem>>, %arg4: memref<1x1x100x8xbf16, #tpu.memory_space<vmem>>, %arg5: memref<100x1xf32, #tpu.memory_space<vmem>>, %arg6: memref<1x8xf32, #tpu.memory_space<vmem>>, %arg7: memref<1x8xf32, #tpu.memory_space<vmem>>, %arg8: memref<216x8xbf16, #tpu.memory_space<vmem>>, %arg9: memref<1x8xf32, #tpu.memory_space<vmem>>, %arg10: memref<1x1x78x8xbf16, #tpu.memory_space<vmem>>, %arg11: memref<1x8xf32, #tpu.memory_space<vmem>>, %arg12: memref<1x8xf32, #tpu.memory_space<vmem>>, %arg13: memref<1x1x64x8xf32, #tpu.memory_space<vmem>>) attributes {dimension_semantics = [#tpu.dimension_semantics<parallel>, #tpu.dimension_semantics<parallel>], iteration_bounds = array<i64: 2, 8>, scalar_prefetch = 0 : i64, scratch_operands = 0 : i64, tpu.core_type = #tpu.core_type<tc>, window_params = [{transform_indices = @transform_0, window_bounds = array<i64: 1, 1, 100, 8>}, {transform_indices = @transform_1, window_bounds = array<i64: 1, 1, 100, 8>}, {transform_indices = @transform_2, window_bounds = array<i64: 1, 1, 100, 8>}, {pipeline_mode = #tpu.pipeline_mode<synchronous>, transform_indices = @transform_3, window_bounds = array<i64: 100, 1>}, {pipeline_mode = #tpu.pipeline_mode<synchronous>, transform_indices = @transform_4, window_bounds = array<i64: 1, 8>}, {pipeline_mode = #tpu.pipeline_mode<synchronous>, transform_indices = @transform_5, window_bounds = array<i64: 1, 8>}, {pipeline_mode = #tpu.pipeline_mode<synchronous>, transform_indices = @transform_6, window_bounds = array<i64: 216, 8>}, {pipeline_mode = #tpu.pipeline_mode<synchronous>, transform_indices = @transform_7, window_bounds = array<i64: 1, 8>}, {transform_indices = @transform_8, window_bounds = array<i64: 1, 1, 78, 8>}, {pipeline_mode = #tpu.pipeline_mode<synchronous>, transform_indices = @transform_9, window_bounds = array<i64: 1, 8>}, {pipeline_mode = #tpu.pipeline_mode<synchronous>, transform_indices = @transform_10, window_bounds = array<i64: 1, 8>}, {transform_indices = @transform_11, window_bounds = array<i64: 1, 1, 64, 8>}]} {
    %c0 = arith.constant 0 : index
    %c0_0 = arith.constant 0 : index
    %0 = vector.load %arg6[%c0, %c0_0] : memref<1x8xf32, #tpu.memory_space<vmem>>, vector<1x8xf32>
    %c0_1 = arith.constant 0 : index
    %c0_2 = arith.constant 0 : index
    %1 = vector.load %arg7[%c0_1, %c0_2] : memref<1x8xf32, #tpu.memory_space<vmem>>, vector<1x8xf32>
    %c0_3 = arith.constant 0 : index
    %c0_4 = arith.constant 0 : index
    %2 = vector.load %arg5[%c0_3, %c0_4] : memref<100x1xf32, #tpu.memory_space<vmem>>, vector<100x1xf32>
    %c0_5 = arith.constant 0 : index
    %c0_6 = arith.constant 0 : index
    %c0_7 = arith.constant 0 : index
    %c0_8 = arith.constant 0 : index
    %3 = vector.load %arg2[%c0_5, %c0_6, %c0_7, %c0_8] : memref<1x1x100x8xbf16, #tpu.memory_space<vmem>>, vector<1x1x100x8xbf16>
    %4 = vector.shape_cast %3 : vector<1x1x100x8xbf16> to vector<100x8xbf16>
    %5 = arith.extf %4 : vector<100x8xbf16> to vector<100x8xf32>
    %c0_i32 = arith.constant 0 : i32
    %6 = arith.addi %arg1, %c0_i32 : i32
    %c1_i32 = arith.constant 1 : i32
    %7 = arith.cmpi sge, %6, %c1_i32 : i32
    %c9_i32 = arith.constant 9 : i32
    %8 = arith.cmpi slt, %6, %c9_i32 : i32
    %9 = arith.andi %7, %8 : i1
    %cst = arith.constant 1.000000e+00 : f32
    %cst_9 = arith.constant 0.000000e+00 : f32
    %10 = arith.select %9, %cst, %cst_9 : f32
    %11 = vector.broadcast %0 : vector<1x8xf32> to vector<100x8xf32>
    %12 = arith.mulf %5, %11 : vector<100x8xf32>
    %13 = vector.broadcast %1 : vector<1x8xf32> to vector<100x8xf32>
    %14 = arith.addf %12, %13 : vector<100x8xf32>
    %cst_10 = arith.constant 0.000000e+00 : f32
    %15 = vector.broadcast %cst_10 : f32 to vector<100x8xf32>
    %16 = arith.cmpf oge, %14, %15 : vector<100x8xf32>
    %cst_11 = arith.constant 2.000000e-01 : f32
    %17 = vector.broadcast %cst_11 : f32 to vector<100x8xf32>
    %18 = arith.mulf %17, %14 : vector<100x8xf32>
    %19 = arith.select %16, %14, %18 : vector<100x8xi1>, vector<100x8xf32>
    %20 = vector.broadcast %10 : f32 to vector<100x1xf32>
    %21 = arith.mulf %2, %20 : vector<100x1xf32>
    %22 = vector.broadcast %21 : vector<100x1xf32> to vector<100x8xf32>
    %23 = arith.mulf %19, %22 : vector<100x8xf32>
    %24 = vector.extract_strided_slice %23 {offsets = [0, 0], sizes = [78, 8], strides = [1, 1]} : vector<100x8xf32> to vector<78x8xf32>
    %25 = vector.extract_strided_slice %23 {offsets = [1, 0], sizes = [78, 8], strides = [1, 1]} : vector<100x8xf32> to vector<78x8xf32>
    %26 = vector.extract_strided_slice %23 {offsets = [2, 0], sizes = [78, 8], strides = [1, 1]} : vector<100x8xf32> to vector<78x8xf32>
    %27 = vector.extract_strided_slice %23 {offsets = [10, 0], sizes = [78, 8], strides = [1, 1]} : vector<100x8xf32> to vector<78x8xf32>
    %28 = vector.extract_strided_slice %23 {offsets = [11, 0], sizes = [78, 8], strides = [1, 1]} : vector<100x8xf32> to vector<78x8xf32>
    %29 = vector.extract_strided_slice %23 {offsets = [12, 0], sizes = [78, 8], strides = [1, 1]} : vector<100x8xf32> to vector<78x8xf32>
    %30 = vector.extract_strided_slice %23 {offsets = [20, 0], sizes = [78, 8], strides = [1, 1]} : vector<100x8xf32> to vector<78x8xf32>
    %31 = vector.extract_strided_slice %23 {offsets = [21, 0], sizes = [78, 8], strides = [1, 1]} : vector<100x8xf32> to vector<78x8xf32>
    %32 = vector.extract_strided_slice %23 {offsets = [22, 0], sizes = [78, 8], strides = [1, 1]} : vector<100x8xf32> to vector<78x8xf32>
    %c0_12 = arith.constant 0 : index
    %c0_13 = arith.constant 0 : index
    %c0_14 = arith.constant 0 : index
    %c0_15 = arith.constant 0 : index
    %33 = vector.load %arg3[%c0_12, %c0_13, %c0_14, %c0_15] : memref<1x1x100x8xbf16, #tpu.memory_space<vmem>>, vector<1x1x100x8xbf16>
    %34 = vector.shape_cast %33 : vector<1x1x100x8xbf16> to vector<100x8xbf16>
    %35 = arith.extf %34 : vector<100x8xbf16> to vector<100x8xf32>
    %c1_i32_16 = arith.constant 1 : i32
    %36 = arith.addi %arg1, %c1_i32_16 : i32
    %c1_i32_17 = arith.constant 1 : i32
    %37 = arith.cmpi sge, %36, %c1_i32_17 : i32
    %c9_i32_18 = arith.constant 9 : i32
    %38 = arith.cmpi slt, %36, %c9_i32_18 : i32
    %39 = arith.andi %37, %38 : i1
    %cst_19 = arith.constant 1.000000e+00 : f32
    %cst_20 = arith.constant 0.000000e+00 : f32
    %40 = arith.select %39, %cst_19, %cst_20 : f32
    %41 = vector.broadcast %0 : vector<1x8xf32> to vector<100x8xf32>
    %42 = arith.mulf %35, %41 : vector<100x8xf32>
    %43 = vector.broadcast %1 : vector<1x8xf32> to vector<100x8xf32>
    %44 = arith.addf %42, %43 : vector<100x8xf32>
    %cst_21 = arith.constant 0.000000e+00 : f32
    %45 = vector.broadcast %cst_21 : f32 to vector<100x8xf32>
    %46 = arith.cmpf oge, %44, %45 : vector<100x8xf32>
    %cst_22 = arith.constant 2.000000e-01 : f32
    %47 = vector.broadcast %cst_22 : f32 to vector<100x8xf32>
    %48 = arith.mulf %47, %44 : vector<100x8xf32>
    %49 = arith.select %46, %44, %48 : vector<100x8xi1>, vector<100x8xf32>
    %50 = vector.broadcast %40 : f32 to vector<100x1xf32>
    %51 = arith.mulf %2, %50 : vector<100x1xf32>
    %52 = vector.broadcast %51 : vector<100x1xf32> to vector<100x8xf32>
    %53 = arith.mulf %49, %52 : vector<100x8xf32>
    %54 = vector.extract_strided_slice %53 {offsets = [0, 0], sizes = [78, 8], strides = [1, 1]} : vector<100x8xf32> to vector<78x8xf32>
    %55 = vector.extract_strided_slice %53 {offsets = [1, 0], sizes = [78, 8], strides = [1, 1]} : vector<100x8xf32> to vector<78x8xf32>
    %56 = vector.extract_strided_slice %53 {offsets = [2, 0], sizes = [78, 8], strides = [1, 1]} : vector<100x8xf32> to vector<78x8xf32>
    %57 = vector.extract_strided_slice %53 {offsets = [10, 0], sizes = [78, 8], strides = [1, 1]} : vector<100x8xf32> to vector<78x8xf32>
    %58 = vector.extract_strided_slice %53 {offsets = [11, 0], sizes = [78, 8], strides = [1, 1]} : vector<100x8xf32> to vector<78x8xf32>
    %59 = vector.extract_strided_slice %53 {offsets = [12, 0], sizes = [78, 8], strides = [1, 1]} : vector<100x8xf32> to vector<78x8xf32>
    %60 = vector.extract_strided_slice %53 {offsets = [20, 0], sizes = [78, 8], strides = [1, 1]} : vector<100x8xf32> to vector<78x8xf32>
    %61 = vector.extract_strided_slice %53 {offsets = [21, 0], sizes = [78, 8], strides = [1, 1]} : vector<100x8xf32> to vector<78x8xf32>
    %62 = vector.extract_strided_slice %53 {offsets = [22, 0], sizes = [78, 8], strides = [1, 1]} : vector<100x8xf32> to vector<78x8xf32>
    %c0_23 = arith.constant 0 : index
    %c0_24 = arith.constant 0 : index
    %c0_25 = arith.constant 0 : index
    %c0_26 = arith.constant 0 : index
    %63 = vector.load %arg4[%c0_23, %c0_24, %c0_25, %c0_26] : memref<1x1x100x8xbf16, #tpu.memory_space<vmem>>, vector<1x1x100x8xbf16>
    %64 = vector.shape_cast %63 : vector<1x1x100x8xbf16> to vector<100x8xbf16>
    %65 = arith.extf %64 : vector<100x8xbf16> to vector<100x8xf32>
    %c2_i32 = arith.constant 2 : i32
    %66 = arith.addi %arg1, %c2_i32 : i32
    %c1_i32_27 = arith.constant 1 : i32
    %67 = arith.cmpi sge, %66, %c1_i32_27 : i32
    %c9_i32_28 = arith.constant 9 : i32
    %68 = arith.cmpi slt, %66, %c9_i32_28 : i32
    %69 = arith.andi %67, %68 : i1
    %cst_29 = arith.constant 1.000000e+00 : f32
    %cst_30 = arith.constant 0.000000e+00 : f32
    %70 = arith.select %69, %cst_29, %cst_30 : f32
    %71 = vector.broadcast %0 : vector<1x8xf32> to vector<100x8xf32>
    %72 = arith.mulf %65, %71 : vector<100x8xf32>
    %73 = vector.broadcast %1 : vector<1x8xf32> to vector<100x8xf32>
    %74 = arith.addf %72, %73 : vector<100x8xf32>
    %cst_31 = arith.constant 0.000000e+00 : f32
    %75 = vector.broadcast %cst_31 : f32 to vector<100x8xf32>
    %76 = arith.cmpf oge, %74, %75 : vector<100x8xf32>
    %cst_32 = arith.constant 2.000000e-01 : f32
    %77 = vector.broadcast %cst_32 : f32 to vector<100x8xf32>
    %78 = arith.mulf %77, %74 : vector<100x8xf32>
    %79 = arith.select %76, %74, %78 : vector<100x8xi1>, vector<100x8xf32>
    %80 = vector.broadcast %70 : f32 to vector<100x1xf32>
    %81 = arith.mulf %2, %80 : vector<100x1xf32>
    %82 = vector.broadcast %81 : vector<100x1xf32> to vector<100x8xf32>
    %83 = arith.mulf %79, %82 : vector<100x8xf32>
    %84 = vector.extract_strided_slice %83 {offsets = [0, 0], sizes = [78, 8], strides = [1, 1]} : vector<100x8xf32> to vector<78x8xf32>
    %85 = vector.extract_strided_slice %83 {offsets = [1, 0], sizes = [78, 8], strides = [1, 1]} : vector<100x8xf32> to vector<78x8xf32>
    %86 = vector.extract_strided_slice %83 {offsets = [2, 0], sizes = [78, 8], strides = [1, 1]} : vector<100x8xf32> to vector<78x8xf32>
    %87 = vector.extract_strided_slice %83 {offsets = [10, 0], sizes = [78, 8], strides = [1, 1]} : vector<100x8xf32> to vector<78x8xf32>
    %88 = vector.extract_strided_slice %83 {offsets = [11, 0], sizes = [78, 8], strides = [1, 1]} : vector<100x8xf32> to vector<78x8xf32>
    %89 = vector.extract_strided_slice %83 {offsets = [12, 0], sizes = [78, 8], strides = [1, 1]} : vector<100x8xf32> to vector<78x8xf32>
    %90 = vector.extract_strided_slice %83 {offsets = [20, 0], sizes = [78, 8], strides = [1, 1]} : vector<100x8xf32> to vector<78x8xf32>
    %91 = vector.extract_strided_slice %83 {offsets = [21, 0], sizes = [78, 8], strides = [1, 1]} : vector<100x8xf32> to vector<78x8xf32>
    %92 = vector.extract_strided_slice %83 {offsets = [22, 0], sizes = [78, 8], strides = [1, 1]} : vector<100x8xf32> to vector<78x8xf32>
    %93 = tpu.concatenate %24, %25, %26, %27, %28, %29, %30, %31, %32, %54, %55, %56, %57, %58, %59, %60 in 1 : vector<78x8xf32>, vector<78x8xf32>, vector<78x8xf32>, vector<78x8xf32>, vector<78x8xf32>, vector<78x8xf32>, vector<78x8xf32>, vector<78x8xf32>, vector<78x8xf32>, vector<78x8xf32>, vector<78x8xf32>, vector<78x8xf32>, vector<78x8xf32>, vector<78x8xf32>, vector<78x8xf32>, vector<78x8xf32> -> vector<78x128xf32>
    %94 = tpu.concatenate %61, %62, %84, %85, %86, %87, %88, %89, %90, %91, %92 in 1 : vector<78x8xf32>, vector<78x8xf32>, vector<78x8xf32>, vector<78x8xf32>, vector<78x8xf32>, vector<78x8xf32>, vector<78x8xf32>, vector<78x8xf32>, vector<78x8xf32>, vector<78x8xf32>, vector<78x8xf32> -> vector<78x88xf32>
    %95 = tpu.concatenate %93, %94 in 1 : vector<78x128xf32>, vector<78x88xf32> -> vector<78x216xf32>
    %96 = arith.truncf %95 : vector<78x216xf32> to vector<78x216xbf16>
    %c0_33 = arith.constant 0 : index
    %c0_34 = arith.constant 0 : index
    %97 = vector.load %arg8[%c0_33, %c0_34] : memref<216x8xbf16, #tpu.memory_space<vmem>>, vector<216x8xbf16>
    %cst_35 = arith.constant dense<0.000000e+00> : vector<78x8xf32>
    %98 = tpu.matmul %96, %97, %cst_35 {dimension_numbers = #tpu.dot_dimension_numbers<[1], [0], [0], [1], [0, 0, 1, 1], [], []>} : vector<78x216xbf16>, vector<216x8xbf16>, vector<78x8xf32> -> vector<78x8xf32>
    %c0_36 = arith.constant 0 : index
    %c0_37 = arith.constant 0 : index
    %99 = vector.load %arg9[%c0_36, %c0_37] : memref<1x8xf32, #tpu.memory_space<vmem>>, vector<1x8xf32>
    %100 = vector.broadcast %99 : vector<1x8xf32> to vector<78x8xf32>
    %101 = arith.addf %98, %100 : vector<78x8xf32>
    %c0_38 = arith.constant 0 : index
    %c0_39 = arith.constant 0 : index
    %c0_40 = arith.constant 0 : index
    %c0_41 = arith.constant 0 : index
    %102 = vector.load %arg10[%c0_38, %c0_39, %c0_40, %c0_41] : memref<1x1x78x8xbf16, #tpu.memory_space<vmem>>, vector<1x1x78x8xbf16>
    %103 = vector.shape_cast %102 : vector<1x1x78x8xbf16> to vector<78x8xbf16>
    %104 = arith.extf %103 : vector<78x8xbf16> to vector<78x8xf32>
    %c0_42 = arith.constant 0 : index
    %c0_43 = arith.constant 0 : index
    %105 = vector.load %arg11[%c0_42, %c0_43] : memref<1x8xf32, #tpu.memory_space<vmem>>, vector<1x8xf32>
    %106 = vector.broadcast %105 : vector<1x8xf32> to vector<78x8xf32>
    %107 = arith.mulf %104, %106 : vector<78x8xf32>
    %c0_44 = arith.constant 0 : index
    %c0_45 = arith.constant 0 : index
    %108 = vector.load %arg12[%c0_44, %c0_45] : memref<1x8xf32, #tpu.memory_space<vmem>>, vector<1x8xf32>
    %109 = vector.broadcast %108 : vector<1x8xf32> to vector<78x8xf32>
    %110 = arith.addf %107, %109 : vector<78x8xf32>
    %111 = arith.addf %101, %110 : vector<78x8xf32>
    %112 = vector.extract_strided_slice %111 {offsets = [0, 0], sizes = [8, 8], strides = [1, 1]} : vector<78x8xf32> to vector<8x8xf32>
    %c0_46 = arith.constant 0 : index
    %c0_47 = arith.constant 0 : index
    %c0_48 = arith.constant 0 : index
    %c0_49 = arith.constant 0 : index
    %113 = vector.load %arg13[%c0_46, %c0_47, %c0_48, %c0_49] : memref<1x1x64x8xf32, #tpu.memory_space<vmem>>, vector<1x1x8x8xf32>
    %114 = vector.shape_cast %113 : vector<1x1x8x8xf32> to vector<8x8xf32>
    %115 = vector.shape_cast %112 : vector<8x8xf32> to vector<1x1x8x8xf32>
    tpu.vector_store %arg13[%c0_46, %c0_47, %c0_48, %c0_49], %115 {strides = array<i32>} : memref<1x1x64x8xf32, #tpu.memory_space<vmem>>, vector<1x1x8x8xf32>,
    %116 = vector.extract_strided_slice %111 {offsets = [10, 0], sizes = [8, 8], strides = [1, 1]} : vector<78x8xf32> to vector<8x8xf32>
    %c0_50 = arith.constant 0 : index
    %c0_51 = arith.constant 0 : index
    %c8 = arith.constant 8 : index
    %c0_52 = arith.constant 0 : index
    %117 = vector.load %arg13[%c0_50, %c0_51, %c8, %c0_52] : memref<1x1x64x8xf32, #tpu.memory_space<vmem>>, vector<1x1x8x8xf32>
    %118 = vector.shape_cast %117 : vector<1x1x8x8xf32> to vector<8x8xf32>
    %119 = vector.shape_cast %116 : vector<8x8xf32> to vector<1x1x8x8xf32>
    tpu.vector_store %arg13[%c0_50, %c0_51, %c8, %c0_52], %119 {strides = array<i32>} : memref<1x1x64x8xf32, #tpu.memory_space<vmem>>, vector<1x1x8x8xf32>,
    %120 = vector.extract_strided_slice %111 {offsets = [20, 0], sizes = [8, 8], strides = [1, 1]} : vector<78x8xf32> to vector<8x8xf32>
    %c0_53 = arith.constant 0 : index
    %c0_54 = arith.constant 0 : index
    %c16 = arith.constant 16 : index
    %c0_55 = arith.constant 0 : index
    %121 = vector.load %arg13[%c0_53, %c0_54, %c16, %c0_55] : memref<1x1x64x8xf32, #tpu.memory_space<vmem>>, vector<1x1x8x8xf32>
    %122 = vector.shape_cast %121 : vector<1x1x8x8xf32> to vector<8x8xf32>
    %123 = vector.shape_cast %120 : vector<8x8xf32> to vector<1x1x8x8xf32>
    tpu.vector_store %arg13[%c0_53, %c0_54, %c16, %c0_55], %123 {strides = array<i32>} : memref<1x1x64x8xf32, #tpu.memory_space<vmem>>, vector<1x1x8x8xf32>,
    %124 = vector.extract_strided_slice %111 {offsets = [30, 0], sizes = [8, 8], strides = [1, 1]} : vector<78x8xf32> to vector<8x8xf32>
    %c0_56 = arith.constant 0 : index
    %c0_57 = arith.constant 0 : index
    %c24 = arith.constant 24 : index
    %c0_58 = arith.constant 0 : index
    %125 = vector.load %arg13[%c0_56, %c0_57, %c24, %c0_58] : memref<1x1x64x8xf32, #tpu.memory_space<vmem>>, vector<1x1x8x8xf32>
    %126 = vector.shape_cast %125 : vector<1x1x8x8xf32> to vector<8x8xf32>
    %127 = vector.shape_cast %124 : vector<8x8xf32> to vector<1x1x8x8xf32>
    tpu.vector_store %arg13[%c0_56, %c0_57, %c24, %c0_58], %127 {strides = array<i32>} : memref<1x1x64x8xf32, #tpu.memory_space<vmem>>, vector<1x1x8x8xf32>,
    %128 = vector.extract_strided_slice %111 {offsets = [40, 0], sizes = [8, 8], strides = [1, 1]} : vector<78x8xf32> to vector<8x8xf32>
    %c0_59 = arith.constant 0 : index
    %c0_60 = arith.constant 0 : index
    %c32 = arith.constant 32 : index
    %c0_61 = arith.constant 0 : index
    %129 = vector.load %arg13[%c0_59, %c0_60, %c32, %c0_61] : memref<1x1x64x8xf32, #tpu.memory_space<vmem>>, vector<1x1x8x8xf32>
    %130 = vector.shape_cast %129 : vector<1x1x8x8xf32> to vector<8x8xf32>
    %131 = vector.shape_cast %128 : vector<8x8xf32> to vector<1x1x8x8xf32>
    tpu.vector_store %arg13[%c0_59, %c0_60, %c32, %c0_61], %131 {strides = array<i32>} : memref<1x1x64x8xf32, #tpu.memory_space<vmem>>, vector<1x1x8x8xf32>,
    %132 = vector.extract_strided_slice %111 {offsets = [50, 0], sizes = [8, 8], strides = [1, 1]} : vector<78x8xf32> to vector<8x8xf32>
    %c0_62 = arith.constant 0 : index
    %c0_63 = arith.constant 0 : index
    %c40 = arith.constant 40 : index
    %c0_64 = arith.constant 0 : index
    %133 = vector.load %arg13[%c0_62, %c0_63, %c40, %c0_64] : memref<1x1x64x8xf32, #tpu.memory_space<vmem>>, vector<1x1x8x8xf32>
    %134 = vector.shape_cast %133 : vector<1x1x8x8xf32> to vector<8x8xf32>
    %135 = vector.shape_cast %132 : vector<8x8xf32> to vector<1x1x8x8xf32>
    tpu.vector_store %arg13[%c0_62, %c0_63, %c40, %c0_64], %135 {strides = array<i32>} : memref<1x1x64x8xf32, #tpu.memory_space<vmem>>, vector<1x1x8x8xf32>,
    %136 = vector.extract_strided_slice %111 {offsets = [60, 0], sizes = [8, 8], strides = [1, 1]} : vector<78x8xf32> to vector<8x8xf32>
    %c0_65 = arith.constant 0 : index
    %c0_66 = arith.constant 0 : index
    %c48 = arith.constant 48 : index
    %c0_67 = arith.constant 0 : index
    %137 = vector.load %arg13[%c0_65, %c0_66, %c48, %c0_67] : memref<1x1x64x8xf32, #tpu.memory_space<vmem>>, vector<1x1x8x8xf32>
    %138 = vector.shape_cast %137 : vector<1x1x8x8xf32> to vector<8x8xf32>
    %139 = vector.shape_cast %136 : vector<8x8xf32> to vector<1x1x8x8xf32>
    tpu.vector_store %arg13[%c0_65, %c0_66, %c48, %c0_67], %139 {strides = array<i32>} : memref<1x1x64x8xf32, #tpu.memory_space<vmem>>, vector<1x1x8x8xf32>,
    %140 = vector.extract_strided_slice %111 {offsets = [70, 0], sizes = [8, 8], strides = [1, 1]} : vector<78x8xf32> to vector<8x8xf32>
    %c0_68 = arith.constant 0 : index
    %c0_69 = arith.constant 0 : index
    %c56 = arith.constant 56 : index
    %c0_70 = arith.constant 0 : index
    %141 = vector.load %arg13[%c0_68, %c0_69, %c56, %c0_70] : memref<1x1x64x8xf32, #tpu.memory_space<vmem>>, vector<1x1x8x8xf32>
    %142 = vector.shape_cast %141 : vector<1x1x8x8xf32> to vector<8x8xf32>
    %143 = vector.shape_cast %140 : vector<8x8xf32> to vector<1x1x8x8xf32>
    tpu.vector_store %arg13[%c0_68, %c0_69, %c56, %c0_70], %143 {strides = array<i32>} : memref<1x1x64x8xf32, #tpu.memory_space<vmem>>, vector<1x1x8x8xf32>,
    return
  }
  func.func @transform_0(%arg0: i32, %arg1: i32) -> (i32, i32, i32, i32) {
    %c0_i32 = arith.constant 0 : i32
    %0 = arith.addi %arg1, %c0_i32 : i32
    %c1_i32 = arith.constant 1 : i32
    %1 = arith.subi %0, %c1_i32 : i32
    %c7_i32 = arith.constant 7 : i32
    %2 = arith.minsi %1, %c7_i32 : i32
    %c0_i32_0 = arith.constant 0 : i32
    %3 = arith.maxsi %c0_i32_0, %2 : i32
    %c0_i32_1 = arith.constant 0 : i32
    %c0_i32_2 = arith.constant 0 : i32
    %c0_i32_3 = arith.constant 0 : i32
    return %arg0, %3, %c0_i32_1, %c0_i32_2 : i32, i32, i32, i32
  }
  func.func @transform_1(%arg0: i32, %arg1: i32) -> (i32, i32, i32, i32) {
    %c1_i32 = arith.constant 1 : i32
    %0 = arith.addi %arg1, %c1_i32 : i32
    %c1_i32_0 = arith.constant 1 : i32
    %1 = arith.subi %0, %c1_i32_0 : i32
    %c7_i32 = arith.constant 7 : i32
    %2 = arith.minsi %1, %c7_i32 : i32
    %c0_i32 = arith.constant 0 : i32
    %3 = arith.maxsi %c0_i32, %2 : i32
    %c0_i32_1 = arith.constant 0 : i32
    %c0_i32_2 = arith.constant 0 : i32
    %c0_i32_3 = arith.constant 0 : i32
    return %arg0, %3, %c0_i32_1, %c0_i32_2 : i32, i32, i32, i32
  }
  func.func @transform_2(%arg0: i32, %arg1: i32) -> (i32, i32, i32, i32) {
    %c2_i32 = arith.constant 2 : i32
    %0 = arith.addi %arg1, %c2_i32 : i32
    %c1_i32 = arith.constant 1 : i32
    %1 = arith.subi %0, %c1_i32 : i32
    %c7_i32 = arith.constant 7 : i32
    %2 = arith.minsi %1, %c7_i32 : i32
    %c0_i32 = arith.constant 0 : i32
    %3 = arith.maxsi %c0_i32, %2 : i32
    %c0_i32_0 = arith.constant 0 : i32
    %c0_i32_1 = arith.constant 0 : i32
    %c0_i32_2 = arith.constant 0 : i32
    return %arg0, %3, %c0_i32_0, %c0_i32_1 : i32, i32, i32, i32
  }
  func.func @transform_3(%arg0: i32, %arg1: i32) -> (i32, i32) {
    %c0_i32 = arith.constant 0 : i32
    %c0_i32_0 = arith.constant 0 : i32
    %c0_i32_1 = arith.constant 0 : i32
    return %c0_i32, %c0_i32_0 : i32, i32
  }
  func.func @transform_4(%arg0: i32, %arg1: i32) -> (i32, i32) {
    %c0_i32 = arith.constant 0 : i32
    %c0_i32_0 = arith.constant 0 : i32
    %c0_i32_1 = arith.constant 0 : i32
    return %c0_i32, %c0_i32_0 : i32, i32
  }
  func.func @transform_5(%arg0: i32, %arg1: i32) -> (i32, i32) {
    %c0_i32 = arith.constant 0 : i32
    %c0_i32_0 = arith.constant 0 : i32
    %c0_i32_1 = arith.constant 0 : i32
    return %c0_i32, %c0_i32_0 : i32, i32
  }
  func.func @transform_6(%arg0: i32, %arg1: i32) -> (i32, i32) {
    %c0_i32 = arith.constant 0 : i32
    %c0_i32_0 = arith.constant 0 : i32
    %c0_i32_1 = arith.constant 0 : i32
    return %c0_i32, %c0_i32_0 : i32, i32
  }
  func.func @transform_7(%arg0: i32, %arg1: i32) -> (i32, i32) {
    %c0_i32 = arith.constant 0 : i32
    %c0_i32_0 = arith.constant 0 : i32
    %c0_i32_1 = arith.constant 0 : i32
    return %c0_i32, %c0_i32_0 : i32, i32
  }
  func.func @transform_8(%arg0: i32, %arg1: i32) -> (i32, i32, i32, i32) {
    %c0_i32 = arith.constant 0 : i32
    %c0_i32_0 = arith.constant 0 : i32
    %c0_i32_1 = arith.constant 0 : i32
    return %arg0, %arg1, %c0_i32, %c0_i32_0 : i32, i32, i32, i32
  }
  func.func @transform_9(%arg0: i32, %arg1: i32) -> (i32, i32) {
    %c0_i32 = arith.constant 0 : i32
    %c0_i32_0 = arith.constant 0 : i32
    %c0_i32_1 = arith.constant 0 : i32
    return %c0_i32, %c0_i32_0 : i32, i32
  }
  func.func @transform_10(%arg0: i32, %arg1: i32) -> (i32, i32) {
    %c0_i32 = arith.constant 0 : i32
    %c0_i32_0 = arith.constant 0 : i32
    %c0_i32_1 = arith.constant 0 : i32
    return %c0_i32, %c0_i32_0 : i32, i32
  }
  func.func @transform_11(%arg0: i32, %arg1: i32) -> (i32, i32, i32, i32) {
    %c0_i32 = arith.constant 0 : i32
    %c0_i32_0 = arith.constant 0 : i32
    %c0_i32_1 = arith.constant 0 : i32
    return %arg0, %arg1, %c0_i32, %c0_i32_0 : i32, i32, i32, i32
  }
}

</mosaic_0001>

<bundles_post_ra>
// kernel: residual_block_forward.3
= control target key start
LH: loop header
LB: loop body
LE: loop exit
PB: predicated region body
PF: predicated region fallthrough
CT: control target
= control target key end

     0   :  { %s695_s6 = smov 0   ;;  %s697_s7 = smov 0   ;;  %s1460_s0 = inlined_call_operand.vmem [shape: f32[2,512,4], index: 0, kind: input, shape index: {}]   ;;  %s1461_s1 = inlined_call_operand.vmem [shape: f32[2,1,2,4], index: 1, kind: output, shape index: {}]  }
   0x1   :  { %s699_s8 = smov 0  }
   0x2 LB: > { %s23_s9 = sadd.s32 1, %s679_s7  ;;  %p630_p0 = scmp.ge.s32.totalorder %s683_s8, 1  ;;  %s683_s8 = sphi %s699_s8, %s11_s8   ;;  %s679_s7 = sphi %s697_s7, %s1589_s7   ;;  %s675_s6 = sphi %s695_s6, %s1588_s6  }
   0x3   : > { %p25_p1 = scmp.ge.s32.totalorder %s23_s9, 2  ;;  %p108_p2 = scmp.lt.s32.totalorder %s683_s8, 3 }
   0x5   : > { %s1591_s9 = smov (%p25_p1, %s23_s9), 0  ;;  %p109_p3 = pnand %p630_p0, %p108_p2 }
   0x7   : > { %112 = sbr.rel (%p109_p3) target bundleno = 197 (0xc5), region = 24 }
   0xe   : > { %p135_p4 = scmp.lt.s32.totalorder %s675_s6, 1  ;;  %vm215_vm0 = vcmask 31744   ;;  %vm349_vm1 = vcmask 24576  }
  0x10   : > { %s1593_s6 = smov (!%p135_p4, %s675_s6), 1 }
  0x11   : > { %s636_s10 = sshll.u32 %s1593_s6, 9  ;;  %s633_s14 = sshll.u32 %s1593_s6, 1 }
  0x12   : > { %s719_s13 = scalar_lea.vmem %s1460_s0, %s636_s10  ;;  %s150_s17 = scalar_lea.vmem %s1461_s1, %s633_s14 }
  0x13   : > { %v722_v0 = vld [vmem:[%s719_s13] sm:$0xff]  ;;  %v725_v1 = vld [vmem:[%s719_s13 + $0x8] sm:$0xff]  ;;  %v728_v2 = vld [vmem:[%s719_s13 + $0x10] sm:$0xff] }
  0x14   : > { %v216_v3 = vsel %vm215_vm0, %v722_v0, 0.0  ;;  %v217_v4 = vsel %vm215_vm0, %v725_v1, 0.0  ;;  %v219_v5 = vsel %vm215_vm0, %v728_v2, 0.0  ;;  %v737_v6 = vld [vmem:[%s719_s13 + $0x18] sm:$0xff]  ;;  %v742_v9 = vld [vmem:[%s719_s13 + $0x20] sm:$0xff]  ;;  %v747_v12 = vld [vmem:[%s719_s13 + $0x28] sm:$0xff] }
  0x15   : > { %v218_v7 = vadd.f32 %v217_v4, %v216_v3  ;;  %v221_v8 = vsel %vm215_vm0, %v737_v6, 0.0  ;;  %v223_v11 = vsel %vm215_vm0, %v742_v9, 0.0  ;;  %v225_v14 = vsel %vm215_vm0, %v747_v12, 0.0  ;;  %v752_v15 = vld [vmem:[%s719_s13 + $0x30] sm:$0xff]  ;;  %v755_v17 = vld [vmem:[%s719_s13 + $0x38] sm:$0xff]  ;;  %v758_v18 = vld [vmem:[%s719_s13 + $0x40] sm:$0xff] }
  0x16   : > { %v227_v19 = vsel %vm215_vm0, %v752_v15, 0.0  ;;  %v763_v20 = vld [vmem:[%s719_s13 + $0x48] sm:$0xff]  ;;  %v766_v21 = vld [vmem:[%s719_s13 + $0x50] sm:$0xff]  ;;  %v769_v22 = vld [vmem:[%s719_s13 + $0x58] sm:$0xff]  ;;  %v229_v24 = vsel %vm215_vm0, %v755_v17, 0.0  ;;  %v231_v25 = vsel %vm215_vm0, %v758_v18, 0.0 }
  0x17   : > { %v220_v10 = vadd.f32 %v219_v5, %v218_v7  ;;  %v776_v26 = vld [vmem:[%s719_s13 + $0x108] sm:$0xff]  ;;  %v779_v27 = vld [vmem:[%s719_s13 + $0x110] sm:$0xff]  ;;  %v782_v28 = vld [vmem:[%s719_s13 + $0x118] sm:$0xff]  ;;  %v233_v29 = vsel %vm215_vm0, %v763_v20, 0.0  ;;  %v235_v30 = vsel %vm215_vm0, %v766_v21, 0.0  ;;  %v790_v31 = vsel %vm215_vm0, %v769_v22, 0.0 }
  0x18   : > { %v793_v32 = vld [vmem:[%s719_s13 + $0x120] sm:$0xff]  ;;  %v796_v33 = vld [vmem:[%s719_s13 + $0x128] sm:$0xff]  ;;  %v799_v34 = vld [vmem:[%s719_s13 + $0x130] sm:$0xff]  ;;  %v803_v36 = vsel %vm215_vm0, %v776_v26, 0.0  ;;  %v807_v37 = vsel %vm215_vm0, %v779_v27, 0.0  ;;  %v811_v38 = vsel %vm215_vm0, %v782_v28, 0.0 }
  0x19   : > { %v222_v13 = vadd.f32 %v221_v8, %v220_v10  ;;  %1482 = vst [vmem:[#allocation2_spill] sm:$0xff] %v803_v36  ;;  %1483 = vst [vmem:[#allocation3_spill] sm:$0xff] %v807_v37  ;;  %v814_v39 = vld [vmem:[%s719_s13 + $0x138] sm:$0xff]  ;;  %v817_v40 = vld [vmem:[%s719_s13 + $0x140] sm:$0xff]  ;;  %v824_v42 = vsel %vm215_vm0, %v793_v32, 0.0  ;;  %v828_v43 = vsel %vm215_vm0, %v796_v33, 0.0 }
  0x1a   : > { %1484 = vst [vmem:[#allocation4_spill] sm:$0xff] %v811_v38  ;;  %v820_v41 = vld [vmem:[%s719_s13 + $0x148] sm:$0xff]  ;;  %1485 = vst [vmem:[#allocation5_spill] sm:$0xff] %v824_v42  ;;  %v832_v44 = vsel %vm215_vm0, %v799_v34, 0.0  ;;  %v835_v45 = vld [vmem:[%s719_s13 + $0x150] sm:$0xff]  ;;  %v845_v49 = vsel %vm215_vm0, %v814_v39, 0.0 }
  0x1b   : > { %v224_v16 = vadd.f32 %v223_v11, %v222_v13  ;;  %1486 = vst [vmem:[#allocation6_spill] sm:$0xff] %v828_v43  ;;  %1487 = vst [vmem:[#allocation7_spill] sm:$0xff] %v832_v44  ;;  %v838_v46 = vld [vmem:[%s719_s13 + $0x158] sm:$0xff]  ;;  %v841_v47 = vld [vmem:[%s719_s13 + $0x160] sm:$0xff]  ;;  %v849_v50 = vsel %vm215_vm0, %v817_v40, 0.0  ;;  %v853_v51 = vsel %vm215_vm0, %v820_v41, 0.0  ;;  %v352_v44 = vmul.f32 %v725_v1, %v725_v1 }
  0x1c   : > { %1488 = vst [vmem:[#allocation8_spill] sm:$0xff] %v845_v49  ;;  %1489 = vst [vmem:[#allocation9_spill] sm:$0xff] %v849_v50  ;;  %v856_v52 = vld [vmem:[%s719_s13 + $0x168] sm:$0xff]  ;;  %v859_v53 = vld [vmem:[%s719_s13 + $0x170] sm:$0xff]  ;;  %v866_v55 = vsel %vm215_vm0, %v835_v45, 0.0  ;;  %v870_v56 = vsel %vm215_vm0, %v838_v46, 0.0  ;;  %v353_v43 = vmul.f32 %v728_v2, %v728_v2 }
  0x1d   : > { %v226_v23 = vadd.f32 %v225_v14, %v224_v16  ;;  %1490 = vst [vmem:[#allocation10_spill] sm:$0xff] %v853_v51  ;;  %v862_v54 = vld [vmem:[%s719_s13 + $0x178] sm:$0xff]  ;;  %1491 = vst [vmem:[#allocation11_spill] sm:$0xff] %v866_v55  ;;  %v874_v57 = vsel %vm215_vm0, %v841_v47, 0.0  ;;  %v877_v58 = vld [vmem:[%s719_s13 + $0x180] sm:$0xff]  ;;  %v887_v62 = vsel %vm215_vm0, %v856_v52, 0.0 }
  0x1e   : > { %1492 = vst [vmem:[#allocation12_spill] sm:$0xff] %v870_v56  ;;  %1493 = vst [vmem:[#allocation13_spill] sm:$0xff] %v874_v57  ;;  %v880_v59 = vld [vmem:[%s719_s13 + $0x188] sm:$0xff]  ;;  %v883_v60 = vld [vmem:[%s719_s13 + $0x190] sm:$0xff]  ;;  %v891_v63 = vsel %vm215_vm0, %v859_v53, 0.0  ;;  %v895_v3 = vsel %vm215_vm0, %v862_v54, 0.0 }
  0x1f   : > { %v228_v35 = vadd.f32 %v227_v19, %v226_v23  ;;  %1494 = vst [vmem:[#allocation14_spill] sm:$0xff] %v887_v62  ;;  %1495 = vst [vmem:[#allocation15_spill] sm:$0xff] %v891_v63  ;;  %v898_v4 = vld [vmem:[%s719_s13 + $0x198] sm:$0xff]  ;;  %v901_v5 = vld [vmem:[%s719_s13 + $0x1a0] sm:$0xff]  ;;  %v908_v8 = vsel %vm215_vm0, %v877_v58, 0.0  ;;  %v912_v10 = vsel %vm215_vm0, %v880_v59, 0.0 }
  0x20   : > { %1496 = vst [vmem:[#allocation16_spill] sm:$0xff] %v895_v3  ;;  %v904_v7 = vld [vmem:[%s719_s13 + $0x1a8] sm:$0xff]  ;;  %1497 = vst [vmem:[#allocation17_spill] sm:$0xff] %v908_v8  ;;  %v916_v11 = vsel %vm215_vm0, %v883_v60, 0.0  ;;  %v919_v13 = vld [vmem:[%s719_s13 + $0x60] sm:$0xff] }
  0x21   : > { %v230_v48 = vadd.f32 %v229_v24, %v228_v35  ;;  %1498 = vst [vmem:[#allocation18_spill] sm:$0xff] %v912_v10  ;;  %1499 = vst [vmem:[#allocation19_spill] sm:$0xff] %v916_v11  ;;  %v922_v14 = vld [vmem:[%s719_s13 + $0x1b0] sm:$0xff]  ;;  %v925_v16 = vld [vmem:[%s719_s13 + $0x1b8] sm:$0xff]  ;;  %v932_v24 = vsel %vm215_vm0, %v898_v4, 0.0  ;;  %v940_v35 = vsel %vm215_vm0, %v904_v7, 0.0 }
  0x22   : > { %v928_v19 = vld [vmem:[%s719_s13 + $0x1c0] sm:$0xff]  ;;  %1500 = vst [vmem:[#allocation20_spill] sm:$0xff] %v932_v24  ;;  %1502 = vst [vmem:[#allocation22_spill] sm:$0xff] %v940_v35  ;;  %v946_v11 = vld [vmem:[%s719_s13 + $0x1d0] sm:$0xff] }
  0x23   : > { %v232_v61 = vadd.f32 %v231_v25, %v230_v48  ;;  %v936_v25 = vsel %vm215_vm0, %v901_v5, 0.0  ;;  %v943_v48 = vld [vmem:[%s719_s13 + $0x1c8] sm:$0xff]  ;;  %v949_v10 = vld [vmem:[%s719_s13 + $0x1d8] sm:$0xff]  ;;  %v964_v35 = vld [vmem:[%s719_s13 + $0x1e0] sm:$0xff] }
  0x24   : > { %1501 = vst [vmem:[#allocation21_spill] sm:$0xff] %v936_v25  ;;  %v961_v25 = vsel %vm215_vm0, %v928_v19, 0.0  ;;  %1506 = vst [vmem:[#allocation26_spill] sm:$0xff] %v964_v35  ;;  %v967_v24 = vld [vmem:[%s719_s13 + $0x1e8] sm:$0xff]  ;;  %v970_v8 = vld [vmem:[%s719_s13 + $0x1f0] sm:$0xff] }
  0x25   : > { %v234_v23 = vadd.f32 %v233_v29, %v232_v61  ;;  %v953_v29 = vsel %vm215_vm0, %v922_v14, 0.0  ;;  %v957_v61 = vsel %vm215_vm0, %v925_v16, 0.0  ;;  %1505 = vst [vmem:[#allocation25_spill] sm:$0xff] %v961_v25  ;;  %1507 = vst [vmem:[#allocation27_spill] sm:$0xff] %v967_v24  ;;  %v982_v25 = vsel %vm215_vm0, %v949_v10, 0.0  ;;  %v985_v63 = vld [vmem:[%s719_s13 + $0x1f8] sm:$0xff] }
  0x26   : > { %1503 = vst [vmem:[#allocation23_spill] sm:$0xff] %v953_v29  ;;  %1504 = vst [vmem:[#allocation24_spill] sm:$0xff] %v957_v61  ;;  %v974_v29 = vsel %vm215_vm0, %v943_v48, 0.0  ;;  %v978_v61 = vsel %vm215_vm0, %v946_v11, 0.0  ;;  %v1005_v57 = vsel %vm215_vm0, %v985_v63, 0.0  ;;  %v1010_v51 = vld [vmem:[%s719_s13 + $0x78] sm:$0xff] }
  0x27   : > { %1508 = vst [vmem:[#allocation28_spill] sm:$0xff] %v970_v8  ;;  %v236_v3 = vadd.f32 %v235_v30, %v234_v23  ;;  %1509 = vst [vmem:[#allocation29_spill] sm:$0xff] %v974_v29  ;;  %v239_v30 = vsel %vm215_vm0, %v919_v13, 0.0  ;;  %v991_v23 = vsel %vm215_vm0, %v964_v35, 0.0  ;;  %v995_v29 = vsel %vm215_vm0, %v967_v24, 0.0  ;;  %v1016_v50 = vld [vmem:[%s719_s13 + $0x88] sm:$0xff] }
  0x28   : > { %1510 = vst [vmem:[#allocation30_spill] sm:$0xff] %v978_v61  ;;  %1511 = vst [vmem:[#allocation31_spill] sm:$0xff] %v982_v25  ;;  %v999_v61 = vsel %vm215_vm0, %v970_v8, 0.0  ;;  %v164_v25 = vld [vmem:[%s719_s13 + $0x68] sm:$0xff]  ;;  %v1028_v49 = vld [vmem:[%s719_s13 + $0xa0] sm:$0xff] }
  0x29   : > { %1512 = vst [vmem:[#allocation32_spill] sm:$0xff] %v985_v63  ;;  %1513 = vst [vmem:[#allocation33_spill] sm:$0xff] %v991_v23  ;;  %v238_v62 = vadd.f32 %v790_v31, %v236_v3  ;;  %v241_v56 = vsel %vm215_vm0, %v164_v25, 0.0  ;;  %v165_v23 = vld [vmem:[%s719_s13 + $0x70] sm:$0xff]  ;;  %v351_v31 = vmul.f32 %v722_v0, %v722_v0  ;;  %v1037_v0 = vld [vmem:[%s719_s13 + $0xa8] sm:$0xff] }
  0x2a   : > { %1514 = vst [vmem:[#allocation34_spill] sm:$0xff] %v995_v29  ;;  %1515 = vst [vmem:[#allocation35_spill] sm:$0xff] %v999_v61  ;;  %v1013_v29 = vld [vmem:[%s719_s13 + $0x80] sm:$0xff]  ;;  %v243_v61 = vsel %vm215_vm0, %v165_v23, 0.0  ;;  %v1022_v3 = vld [vmem:[%s719_s13 + $0x90] sm:$0xff] }
  0x2b   : > { %1516 = vst [vmem:[#allocation36_spill] sm:$0xff] %v1005_v57  ;;  %v240_v55 = vadd.f32 %v239_v30, %v238_v62  ;;  %1517 = vst [vmem:[#allocation37_spill] sm:$0xff] %v1010_v51  ;;  %v1025_v57 = vld [vmem:[%s719_s13 + $0x98] sm:$0xff]  ;;  %v245_v30 = vsel %vm215_vm0, %v1010_v51, 0.0  ;;  %v1040_v42 = vld [vmem:[%s719_s13 + $0xb0] sm:$0xff]  ;;  %v247_v38 = vsel %vm215_vm0, %v1013_v29, 0.0 }
  0x2c   : > { %1518 = vst [vmem:[#allocation38_spill] sm:$0xff] %v1013_v29  ;;  %1519 = vst [vmem:[#allocation39_spill] sm:$0xff] %v1016_v50  ;;  %v253_v1 = vsel %vm215_vm0, %v1025_v57, 0.0  ;;  %v1051_v2 = vld [vmem:[%s719_s13 + $0xb8] sm:$0xff]  ;;  %v1054_v37 = vld [vmem:[%s719_s13 + $0xc0] sm:$0xff]  ;;  %v255_v29 = vsel %vm215_vm0, %v1028_v49, 0.0 }
  0x2d   : > { %1520 = vst [vmem:[#allocation40_spill] sm:$0xff] %v1022_v3  ;;  %1521 = vst [vmem:[#allocation41_spill] sm:$0xff] %v1025_v57  ;;  %v242_v62 = vadd.f32 %v241_v56, %v240_v55  ;;  %v249_v55 = vsel %vm215_vm0, %v1016_v50, 0.0  ;;  %v251_v56 = vsel %vm215_vm0, %v1022_v3, 0.0  ;;  %v1057_v36 = vld [vmem:[%s719_s13 + $0xc8] sm:$0xff]  ;;  %v257_v50 = vsel %vm215_vm0, %v1037_v0, 0.0 }
  0x2e   : > { %1522 = vst [vmem:[#allocation42_spill] sm:$0xff] %v1028_v49  ;;  %1523 = vst [vmem:[#allocation43_spill] sm:$0xff] %v1037_v0  ;;  %v354_v3 = vmul.f32 %v737_v6, %v737_v6  ;;  %v1066_v63 = vld [vmem:[%s719_s13 + $0xd0] sm:$0xff]  ;;  %v1069_v57 = vld [vmem:[%s719_s13 + $0xd8] sm:$0xff]  ;;  %v1073_v8 = vsel %vm215_vm0, %v1040_v42, 0.0  ;;  %v1085_v0 = vsel %vm215_vm0, %v1057_v36, 0.0 }
  0x2f   : > { %1524 = vst [vmem:[#allocation44_spill] sm:$0xff] %v1040_v42  ;;  %1525 = vst [vmem:[#allocation45_spill] sm:$0xff] %v1051_v2  ;;  %v244_v51 = vadd.f32 %v243_v61, %v242_v62  ;;  %v1077_v61 = vsel %vm215_vm0, %v1051_v2, 0.0  ;;  %v1081_v62 = vsel %vm215_vm0, %v1054_v37, 0.0  ;;  %v1088_v6 = vld [vmem:[%s719_s13 + $0xe0] sm:$0xff]  ;;  %v1091_v49 = vld [vmem:[%s719_s13 + $0xe8] sm:$0xff] }
  0x30   : > { %1526 = vst [vmem:[#allocation46_spill] sm:$0xff] %v1054_v37  ;;  %1527 = vst [vmem:[#allocation47_spill] sm:$0xff] %v1057_v36  ;;  %v1094_v24 = vld [vmem:[%s719_s13 + $0xf0] sm:$0xff]  ;;  %v1098_v35 = vsel %vm215_vm0, %v1066_v63, 0.0  ;;  %v1102_v2 = vsel %vm215_vm0, %v1069_v57, 0.0  ;;  %v355_v37 = vmul.f32 %v742_v9, %v742_v9  ;;  %v1108_v36 = vsel %vm215_vm0, %v1088_v6, 0.0 }
  0x31   : > { %1528 = vst [vmem:[#allocation48_spill] sm:$0xff] %v1066_v63  ;;  %1529 = vst [vmem:[#allocation49_spill] sm:$0xff] %v1069_v57  ;;  %v246_v42 = vadd.f32 %v245_v30, %v244_v51  ;;  %v1116_v51 = vsel %vm215_vm0, %v1094_v24, 0.0  ;;  %v356_v30 = vmul.f32 %v747_v12, %v747_v12  ;;  %v357_v63 = vmul.f32 %v752_v15, %v752_v15 }
  0x32   : > { %1530 = vst [vmem:[#allocation50_spill] sm:$0xff] %v1085_v0  ;;  %1531 = vst [vmem:[#allocation51_spill] sm:$0xff] %v1088_v6  ;;  %v1112_v0 = vsel %vm215_vm0, %v1091_v49, 0.0  ;;  %v358_v9 = vmul.f32 %v755_v17, %v755_v17  ;;  %v359_v6 = vmul.f32 %v758_v18, %v758_v18  ;;  %v363_v12 = vmul.f32 %v919_v13, %v919_v13 }
  0x33   : > { %1532 = vst [vmem:[#allocation52_spill] sm:$0xff] %v1091_v49  ;;  %1533 = vst [vmem:[#allocation53_spill] sm:$0xff] %v1094_v24  ;;  %v248_v57 = vadd.f32 %v247_v38, %v246_v42  ;;  %v360_v49 = vmul.f32 %v763_v20, %v763_v20  ;;  %v361_v24 = vmul.f32 %v766_v21, %v766_v21 }
  0x34   : > { %1534 = vst [vmem:[#allocation54_spill] sm:$0xff] %v1116_v51  ;;  %v362_v51 = vmul.f32 %v769_v22, %v769_v22  ;;  %v1134_v15 = vmul.f32 %v164_v25, %v164_v25  ;;  %v1136_v42 = vmul.f32 %v165_v23, %v165_v23  ;;  %v384_v17 = vmul.f32 %v776_v26, %v776_v26 }
  0x35   : > { %v250_v38 = vadd.f32 %v249_v55, %v248_v57  ;;  %v385_v18 = vmul.f32 %v779_v27, %v779_v27  ;;  %v386_v20 = vmul.f32 %v782_v28, %v782_v28  ;;  %v387_v21 = vmul.f32 %v793_v32, %v793_v32 }
  0x36   : > { %v388_v22 = vmul.f32 %v796_v33, %v796_v33  ;;  %v389_v13 = vmul.f32 %v799_v34, %v799_v34  ;;  %v390_v25 = vmul.f32 %v814_v39, %v814_v39  ;;  %v391_v26 = vmul.f32 %v817_v40, %v817_v40 }
  0x37   : > { %v252_v57 = vadd.f32 %v251_v56, %v250_v38  ;;  %v392_v27 = vmul.f32 %v820_v41, %v820_v41  ;;  %v393_v28 = vmul.f32 %v835_v45, %v835_v45  ;;  %v394_v32 = vmul.f32 %v838_v46, %v838_v46  ;;  %v1535_v38 = vld [vmem:[#allocation26_spill] sm:$0xff] }
  0x38   : > { %v415_v33 = vsel %vm215_vm0, %v351_v31, 0.0  ;;  %v395_v34 = vmul.f32 %v841_v47, %v841_v47  ;;  %v416_v39 = vsel %vm215_vm0, %v352_v44, 0.0  ;;  %v418_v55 = vsel %vm215_vm0, %v353_v43, 0.0 }
  0x39   : > { %v254_v23 = vadd.f32 %v253_v1, %v252_v57  ;;  %v396_v40 = vmul.f32 %v856_v52, %v856_v52  ;;  %v397_v41 = vmul.f32 %v859_v53, %v859_v53  ;;  %v398_v45 = vmul.f32 %v862_v54, %v862_v54  ;;  %v1536_v57 = vld [vmem:[#allocation27_spill] sm:$0xff] }
  0x3a   : > { %v417_v46 = vadd.f32 %v416_v39, %v415_v33  ;;  %v399_v31 = vmul.f32 %v877_v58, %v877_v58  ;;  %v400_v47 = vmul.f32 %v880_v59, %v880_v59  ;;  %v420_v44 = vsel %vm215_vm0, %v354_v3, 0.0  ;;  %v1537_v33 = vld [vmem:[#allocation28_spill] sm:$0xff] }
  0x3b   : > { %v256_v56 = vadd.f32 %v255_v29, %v254_v23  ;;  %v401_v43 = vmul.f32 %v883_v60, %v883_v60  ;;  %v402_v52 = vmul.f32 %v898_v4, %v898_v4  ;;  %v403_v53 = vmul.f32 %v901_v5, %v901_v5  ;;  %v1538_v39 = vld [vmem:[#allocation32_spill] sm:$0xff] }
  0x3c   : > { %v419_v54 = vadd.f32 %v418_v55, %v417_v46  ;;  %v404_v29 = vmul.f32 %v904_v7, %v904_v7  ;;  %v405_v58 = vmul.f32 %v922_v14, %v922_v14  ;;  %v422_v59 = vsel %vm215_vm0, %v355_v37, 0.0 }
  0x3d   : > { %v258_v1 = vadd.f32 %v257_v50, %v256_v56  ;;  %v406_v3 = vmul.f32 %v925_v16, %v925_v16  ;;  %v407_v60 = vmul.f32 %v928_v19, %v928_v19  ;;  %v408_v4 = vmul.f32 %v943_v48, %v943_v48 }
  0x3e   : > { %v421_v5 = vadd.f32 %v420_v44, %v419_v54  ;;  %v409_v7 = vmul.f32 %v946_v11, %v946_v11  ;;  %v410_v14 = vmul.f32 %v949_v10, %v949_v10  ;;  %v424_v37 = vsel %vm215_vm0, %v356_v30, 0.0 }
  0x3f   : > { %v260_v50 = vadd.f32 %v1073_v8, %v258_v1  ;;  %v411_v16 = vmul.f32 %v1535_v38, %v1535_v38  ;;  %v412_v19 = vmul.f32 %v1536_v57, %v1536_v57  ;;  %v413_v48 = vmul.f32 %v1537_v33, %v1537_v33 }
  0x40   : > { %v423_v23 = vadd.f32 %v422_v59, %v421_v5  ;;  %v414_v11 = vmul.f32 %v1538_v39, %v1538_v39  ;;  %v426_v55 = vsel %vm215_vm0, %v357_v63, 0.0  ;;  %v428_v10 = vsel %vm215_vm0, %v358_v9, 0.0  ;;  %v1541_v39 = vld [vmem:[#allocation37_spill] sm:$0xff] }
  0x41   : > { %v262_v8 = vadd.f32 %v1077_v61, %v260_v50  ;;  %v430_v46 = vsel %vm215_vm0, %v359_v6, 0.0  ;;  %v432_v56 = vsel %vm215_vm0, %v360_v49, 0.0  ;;  %v434_v44 = vsel %vm215_vm0, %v361_v24, 0.0  ;;  %v1539_v24 = vld [vmem:[#allocation50_spill] sm:$0xff] }
  0x42   : > { %v425_v30 = vadd.f32 %v424_v37, %v423_v23  ;;  %v436_v1 = vsel %vm215_vm0, %v362_v51, 0.0  ;;  %v438_v61 = vsel %vm215_vm0, %v363_v12, 0.0  ;;  %v1217_v59 = vsel %vm215_vm0, %v384_v17, 0.0  ;;  %v1320_v23 = vld [vmem:[%s719_s13 + $0x100] sm:$0xff] }
  0x43   : > { %v264_v54 = vadd.f32 %v1081_v62, %v262_v8  ;;  %v1220_v63 = vsel %vm215_vm0, %v385_v18, 0.0  ;;  %v1223_v9 = vsel %vm215_vm0, %v386_v20, 0.0  ;;  %v1226_v49 = vsel %vm215_vm0, %v387_v21, 0.0 }
  0x44   : > { %v427_v5 = vadd.f32 %v426_v55, %v425_v30  ;;  %v1230_v62 = vsel %vm215_vm0, %v388_v22, 0.0  ;;  %v1233_v51 = vsel %vm215_vm0, %v389_v13, 0.0  ;;  %v1236_v12 = vsel %vm215_vm0, %v390_v25, 0.0 }
  0x45   : > { %v266_v6 = vadd.f32 %v1539_v24, %v264_v54  ;;  %v1239_v18 = vsel %vm215_vm0, %v391_v26, 0.0  ;;  %v1242_v20 = vsel %vm215_vm0, %v392_v27, 0.0  ;;  %v1245_v21 = vsel %vm215_vm0, %v393_v28, 0.0  ;;  %v1543_v54 = vld [vmem:[#allocation39_spill] sm:$0xff] }
  0x46   : > { %v429_v17 = vadd.f32 %v428_v10, %v427_v5  ;;  %v1249_v22 = vsel %vm215_vm0, %v394_v32, 0.0  ;;  %v1252_v13 = vsel %vm215_vm0, %v395_v34, 0.0  ;;  %v1255_v25 = vsel %vm215_vm0, %v396_v40, 0.0  ;;  %v1542_v10 = vld [vmem:[#allocation38_spill] sm:$0xff] }
  0x47   : > { %v268_v50 = vadd.f32 %v1098_v35, %v266_v6  ;;  %v1258_v26 = vsel %vm215_vm0, %v397_v41, 0.0  ;;  %v1261_v27 = vsel %vm215_vm0, %v398_v45, 0.0  ;;  %v1264_v28 = vsel %vm215_vm0, %v399_v31, 0.0 }
  0x48   : > { %v431_v37 = vadd.f32 %v430_v46, %v429_v17  ;;  %v1268_v32 = vsel %vm215_vm0, %v400_v47, 0.0  ;;  %v1271_v34 = vsel %vm215_vm0, %v401_v43, 0.0  ;;  %v1274_v40 = vsel %vm215_vm0, %v402_v52, 0.0  ;;  %v1545_v17 = vld [vmem:[#allocation40_spill] sm:$0xff] }
  0x49   : > { %v270_v35 = vadd.f32 %v1102_v2, %v268_v50  ;;  %v1277_v38 = vsel %vm215_vm0, %v403_v53, 0.0  ;;  %v1280_v45 = vsel %vm215_vm0, %v404_v29, 0.0  ;;  %v1283_v31 = vsel %vm215_vm0, %v405_v58, 0.0 }
  0x4a   : > { %v433_v41 = vadd.f32 %v432_v56, %v431_v37  ;;  %v1287_v47 = vsel %vm215_vm0, %v406_v3, 0.0  ;;  %v1290_v43 = vsel %vm215_vm0, %v407_v60, 0.0  ;;  %v1293_v52 = vsel %vm215_vm0, %v408_v4, 0.0 }
  0x4b   : > { %v272_v2 = vadd.f32 %v1108_v36, %v270_v35  ;;  %v1296_v57 = vsel %vm215_vm0, %v409_v7, 0.0  ;;  %v1299_v29 = vsel %vm215_vm0, %v410_v14, 0.0  ;;  %v1302_v58 = vsel %vm215_vm0, %v411_v16, 0.0  ;;  %v1305_v36 = vld [vmem:[%s719_s13 + $0xf8] sm:$0xff]  ;;  %v1540_v16 = vld [vmem:[#allocation54_spill] sm:$0xff]  ;;  %v1546_v35 = vld [vmem:[#allocation3_spill] sm:$0xff] }
  0x4c   : > { %v435_v53 = vadd.f32 %v434_v44, %v433_v41  ;;  %v1309_v60 = vsel %vm215_vm0, %v412_v19, 0.0  ;;  %v1312_v4 = vsel %vm215_vm0, %v413_v48, 0.0  ;;  %v1315_v33 = vsel %vm215_vm0, %v414_v11, 0.0 }
  0x4d   : > { %v274_v3 = vadd.f32 %v1112_v0, %v272_v2  ;;  %v277_v7 = vsel %vm215_vm0, %v1305_v36, 0.0  ;;  %v366_v0 = vmul.f32 %v1541_v39, %v1541_v39  ;;  %v440_v19 = vsel %vm215_vm0, %v1134_v15, 0.0  ;;  %v1544_v15 = vld [vmem:[#allocation2_spill] sm:$0xff]  ;;  %v1547_v2 = vld [vmem:[#allocation41_spill] sm:$0xff] }
  0x4e   : > { %v437_v14 = vadd.f32 %v436_v1, %v435_v53  ;;  %v279_v48 = vsel %vm215_vm0, %v1320_v23, 0.0  ;;  %v367_v30 = vmul.f32 %v1542_v10, %v1542_v10  ;;  %v442_v46 = vsel %vm215_vm0, %v1136_v42, 0.0 }
  0x4f   : > { %v276_v8 = vadd.f32 %v1540_v16, %v274_v3  ;;  %v368_v1 = vmul.f32 %v1543_v54, %v1543_v54  ;;  %v444_v5 = vsel %vm215_vm0, %v366_v0, 0.0  ;;  %v370_v42 = vmul.f32 %v1547_v2, %v1547_v2  ;;  %v1549_v16 = vld [vmem:[#allocation42_spill] sm:$0xff] }
  0x50   : > { %v439_v55 = vadd.f32 %v438_v61, %v437_v14  ;;  %v369_v61 = vmul.f32 %v1545_v17, %v1545_v17  ;;  %v446_v50 = vsel %vm215_vm0, %v367_v30, 0.0 }
  0x51   : > { %v278_v11 = vadd.f32 %v277_v7, %v276_v8  ;;  %v448_v53 = vsel %vm215_vm0, %v368_v1, 0.0  ;;  %v1548_v7 = vld [vmem:[#allocation4_spill] sm:$0xff]  ;;  %v371_v8 = vmul.f32 %v1549_v16, %v1549_v16  ;;  %v452_v10 = vsel %vm215_vm0, %v370_v42, 0.0 }
  0x52   : > { %v441_v56 = vadd.f32 %v440_v19, %v439_v55  ;;  %v450_v39 = vsel %vm215_vm0, %v369_v61, 0.0  ;;  %v1550_v19 = vld [vmem:[#allocation5_spill] sm:$0xff]  ;;  %v1551_v55 = vld [vmem:[#allocation43_spill] sm:$0xff] }
  0x53   : > { %v280_v44 = vadd.f32 %v279_v48, %v278_v11  ;;  %v372_v11 = vmul.f32 %v1551_v55, %v1551_v55  ;;  %v454_v1 = vsel %vm215_vm0, %v371_v8, 0.0 }
  0x54   : > { %v443_v24 = vadd.f32 %v442_v46, %v441_v56  ;;  %v1552_v46 = vld [vmem:[#allocation6_spill] sm:$0xff] }
  0x55   : > { %v282_v6 = vadd.f32 %v1544_v15, %v280_v44  ;;  %v1553_v44 = vld [vmem:[#allocation44_spill] sm:$0xff]  ;;  %v456_v61 = vsel %vm215_vm0, %v372_v11, 0.0 }
  0x56   : > { %v445_v37 = vadd.f32 %v444_v5, %v443_v24  ;;  %v373_v54 = vmul.f32 %v1553_v44, %v1553_v44  ;;  %v1554_v24 = vld [vmem:[#allocation7_spill] sm:$0xff] }
  0x57   : > { %v284_v41 = vadd.f32 %v1546_v35, %v282_v6  ;;  %v1555_v6 = vld [vmem:[#allocation45_spill] sm:$0xff] }
  0x58   : > { %v447_v3 = vadd.f32 %v446_v50, %v445_v37  ;;  %v374_v17 = vmul.f32 %v1555_v6, %v1555_v6  ;;  %v1556_v37 = vld [vmem:[#allocation8_spill] sm:$0xff]  ;;  %v458_v42 = vsel %vm215_vm0, %v373_v54, 0.0 }
  0x59   : > { %v286_v14 = vadd.f32 %v1548_v7, %v284_v41  ;;  %v1557_v41 = vld [vmem:[#allocation46_spill] sm:$0xff] }
  0x5a   : > { %v449_v0 = vadd.f32 %v448_v53, %v447_v3  ;;  %v375_v2 = vmul.f32 %v1557_v41, %v1557_v41  ;;  %v1558_v3 = vld [vmem:[#allocation9_spill] sm:$0xff]  ;;  %v460_v8 = vsel %vm215_vm0, %v374_v17, 0.0 }
  0x5b   : > { %v288_v48 = vadd.f32 %v1550_v19, %v286_v14  ;;  %v1559_v14 = vld [vmem:[#allocation47_spill] sm:$0xff] }
  0x5c   : > { %v451_v30 = vadd.f32 %v450_v39, %v449_v0  ;;  %v376_v16 = vmul.f32 %v1559_v14, %v1559_v14  ;;  %v1560_v0 = vld [vmem:[#allocation10_spill] sm:$0xff]  ;;  %v462_v11 = vsel %vm215_vm0, %v375_v2, 0.0 }
  0x5d   : > { %v290_v56 = vadd.f32 %v1552_v46, %v288_v48  ;;  %v1561_v48 = vld [vmem:[#allocation48_spill] sm:$0xff] }
  0x5e   : > { %v453_v5 = vadd.f32 %v452_v10, %v451_v30  ;;  %v377_v55 = vmul.f32 %v1561_v48, %v1561_v48  ;;  %v1562_v30 = vld [vmem:[#allocation11_spill] sm:$0xff]  ;;  %v464_v54 = vsel %vm215_vm0, %v376_v16, 0.0 }
  0x5f   : > { %v292_v15 = vadd.f32 %v1554_v24, %v290_v56  ;;  %v1563_v56 = vld [vmem:[#allocation49_spill] sm:$0xff] }
  0x60   : > { %v455_v50 = vadd.f32 %v454_v1, %v453_v5  ;;  %v378_v44 = vmul.f32 %v1563_v56, %v1563_v56  ;;  %v1564_v5 = vld [vmem:[#allocation12_spill] sm:$0xff]  ;;  %v466_v17 = vsel %vm215_vm0, %v377_v55, 0.0 }
  0x61   : > { %v294_v35 = vadd.f32 %v1556_v37, %v292_v15  ;;  %v1565_v15 = vld [vmem:[#allocation51_spill] sm:$0xff] }
  0x62   : > { %v457_v53 = vadd.f32 %v456_v61, %v455_v50  ;;  %v379_v6 = vmul.f32 %v1565_v15, %v1565_v15  ;;  %v1566_v50 = vld [vmem:[#allocation13_spill] sm:$0xff]  ;;  %v468_v2 = vsel %vm215_vm0, %v378_v44, 0.0 }
  0x63   : > { %v296_v7 = vadd.f32 %v1558_v3, %v294_v35  ;;  %v1567_v35 = vld [vmem:[#allocation52_spill] sm:$0xff]  ;;  %v1572_v44 = vld [vmem:[#allocation17_spill] sm:$0xff] }
  0x64   : > { %v459_v39 = vadd.f32 %v458_v42, %v457_v53  ;;  %v380_v41 = vmul.f32 %v1567_v35, %v1567_v35  ;;  %v1568_v53 = vld [vmem:[#allocation14_spill] sm:$0xff]  ;;  %v470_v16 = vsel %vm215_vm0, %v379_v6, 0.0 }
  0x65   : > { %v298_v19 = vadd.f32 %v1560_v0, %v296_v7  ;;  %v1569_v7 = vld [vmem:[#allocation53_spill] sm:$0xff] }
  0x66   : > { %v461_v10 = vadd.f32 %v460_v8, %v459_v39  ;;  %v381_v14 = vmul.f32 %v1569_v7, %v1569_v7  ;;  %v1570_v39 = vld [vmem:[#allocation15_spill] sm:$0xff]  ;;  %v472_v48 = vsel %vm215_vm0, %v380_v41, 0.0  ;;  %v1576_v41 = vld [vmem:[#allocation21_spill] sm:$0xff] }
  0x67   : > { %v300_v46 = vadd.f32 %v1562_v30, %v298_v19  ;;  %v382_v19 = vmul.f32 %v1305_v36, %v1305_v36  ;;  %v383_v30 = vmul.f32 %v1320_v23, %v1320_v23 }
  0x68   : > { %v463_v1 = vadd.f32 %v462_v11, %v461_v10  ;;  %v1571_v11 = vld [vmem:[#allocation16_spill] sm:$0xff] }
  0x69   : > { %v302_v24 = vadd.f32 %v1564_v5, %v300_v46  ;;  %v474_v46 = vsel %vm215_vm0, %v381_v14, 0.0  ;;  %v478_v36 = vsel %vm215_vm0, %v383_v30, 0.0  ;;  %v1578_v14 = vld [vmem:[#allocation23_spill] sm:$0xff]  ;;  %v1582_v30 = vld [vmem:[#allocation30_spill] sm:$0xff] }
  0x6a   : > { %v465_v61 = vadd.f32 %v464_v54, %v463_v1  ;;  %v476_v1 = vsel %vm215_vm0, %v382_v19, 0.0 }
  0x6b   : > { %v304_v37 = vadd.f32 %v1566_v50, %v302_v24  ;;  %v1573_v24 = vld [vmem:[#allocation18_spill] sm:$0xff] }
  0x6c   : > { %v467_v42 = vadd.f32 %v466_v17, %v465_v61  ;;  %v1574_v17 = vld [vmem:[#allocation19_spill] sm:$0xff] }
  0x6d   : > { %v306_v3 = vadd.f32 %v1568_v53, %v304_v37  ;;  %v1575_v37 = vld [vmem:[#allocation20_spill] sm:$0xff]  ;;  %v1577_v53 = vld [vmem:[#allocation22_spill] sm:$0xff] }
  0x6e   : > { %v469_v8 = vadd.f32 %v468_v2, %v467_v42 }
  0x6f   : > { %v308_v0 = vadd.f32 %v1570_v39, %v306_v3  ;;  %v1579_v39 = vld [vmem:[#allocation24_spill] sm:$0xff] }
  0x70   : > { %v471_v55 = vadd.f32 %v470_v16, %v469_v8 }
  0x71   : > { %v310_v10 = vadd.f32 %v1571_v11, %v308_v0  ;;  %v1581_v11 = vld [vmem:[#allocation29_spill] sm:$0xff] }
  0x72   : > { %v473_v56 = vadd.f32 %v472_v48, %v471_v55  ;;  %v1580_v48 = vld [vmem:[#allocation25_spill] sm:$0xff] }
  0x73   : > { %v312_v54 = vadd.f32 %v1572_v44, %v310_v10 }
  0x74   : > { %v475_v5 = vadd.f32 %v474_v46, %v473_v56  ;;  %v1583_v56 = vld [vmem:[#allocation31_spill] sm:$0xff] }
  0x75   : > { %v314_v15 = vadd.f32 %v1573_v24, %v312_v54  ;;  %v1584_v54 = vld [vmem:[#allocation33_spill] sm:$0xff] }
  0x76   : > { %v477_v6 = vadd.f32 %v476_v1, %v475_v5  ;;  %v1585_v5 = vld [vmem:[#allocation34_spill] sm:$0xff] }
  0x77   : > { %v316_v61 = vadd.f32 %v1574_v17, %v314_v15  ;;  %v1586_v15 = vld [vmem:[#allocation35_spill] sm:$0xff] }
  0x78   : > { %v479_v50 = vadd.f32 %v478_v36, %v477_v6  ;;  %v1587_v6 = vld [vmem:[#allocation36_spill] sm:$0xff] }
  0x79   : > { %v318_v35 = vadd.f32 %v1575_v37, %v316_v61 }
  0x7a   : > { %v481_v23 = vadd.f32 %v1217_v59, %v479_v50 }
  0x7b   : > { %v320_v2 = vadd.f32 %v1576_v41, %v318_v35 }
  0x7c   : > { %v483_v42 = vadd.f32 %v1220_v63, %v481_v23 }
  0x7d   : > { %v322_v3 = vadd.f32 %v1577_v53, %v320_v2 }
  0x7e   : > { %v485_v7 = vadd.f32 %v1223_v9, %v483_v42 }
  0x7f   : > { %v324_v16 = vadd.f32 %v1578_v14, %v322_v3 }
  0x80   : > { %v487_v8 = vadd.f32 %v1226_v49, %v485_v7 }
  0x81   : > { %v326_v0 = vadd.f32 %v1579_v39, %v324_v16 }
  0x82   : > { %v489_v19 = vadd.f32 %v1230_v62, %v487_v8 }
  0x83   : > { %v328_v55 = vadd.f32 %v1580_v48, %v326_v0 }
  0x84   : > { %v491_v59 = vadd.f32 %v1233_v51, %v489_v19 }
  0x85   : > { %v330_v10 = vadd.f32 %v1581_v11, %v328_v55 }
  0x86   : > { %v493_v63 = vadd.f32 %v1236_v12, %v491_v59 }
  0x87   : > { %v332_v46 = vadd.f32 %v1582_v30, %v330_v10 }
  0x88   : > { %v495_v9 = vadd.f32 %v1239_v18, %v493_v63 }
  0x89   : > { %v334_v44 = vadd.f32 %v1583_v56, %v332_v46 }
  0x8a   : > { %v497_v49 = vadd.f32 %v1242_v20, %v495_v9 }
  0x8b   : > { %v336_v1 = vadd.f32 %v1584_v54, %v334_v44 }
  0x8c   : > { %v499_v62 = vadd.f32 %v1245_v21, %v497_v49 }
  0x8d   : > { %v338_v24 = vadd.f32 %v1585_v5, %v336_v1 }
  0x8e   : > { %v501_v51 = vadd.f32 %v1249_v22, %v499_v62 }
  0x8f   : > { %v340_v36 = vadd.f32 %v1586_v15, %v338_v24 }
  0x90   : > { %v503_v12 = vadd.f32 %v1252_v13, %v501_v51 }
  0x91   : > { %v342_v17 = vadd.f32 %v1587_v6, %v340_v36 }
  0x92   : > { %v505_v18 = vadd.f32 %v1255_v25, %v503_v12 }
  0x93   : > { %v343_v61 = vrot.slane %v342_v17, 4 }
  0x94   : > { %v507_v50 = vadd.f32 %v1258_v26, %v505_v18 }
  0x95   : > { %v344_v20 = vadd.f32 %v343_v61, %v342_v17 }
  0x96   : > { %v509_v37 = vadd.f32 %v1261_v27, %v507_v50 }
  0x97   : > { %v345_v35 = vrot.slane %v344_v20, 2 }
  0x98   : > { %v511_v21 = vadd.f32 %v1264_v28, %v509_v37 }
  0x99   : > { %v346_v23 = vadd.f32 %v345_v35, %v344_v20 }
  0x9a   : > { %v513_v22 = vadd.f32 %v1268_v32, %v511_v21 }
  0x9b   : > { %v347_v41 = vrot.slane %v346_v23, 1 }
  0x9c   : > { %v515_v13 = vadd.f32 %v1271_v34, %v513_v22 }
  0x9d   : > { %v348_v25 = vadd.f32 %v347_v41, %v346_v23 }
  0x9e   : > { %v517_v26 = vadd.f32 %v1274_v40, %v515_v13 }
  0x9f   : > { %350 = vst.msk [vmem:[%s150_s17] sm:$0x1] %vm349_vm1, %v348_v25 }
  0xa0   : > { %v519_v27 = vadd.f32 %v1277_v38, %v517_v26 }
  0xa2   : > { %v521_v28 = vadd.f32 %v1280_v45, %v519_v27 }
  0xa4   : > { %v523_v2 = vadd.f32 %v1283_v31, %v521_v28 }
  0xa6   : > { %v525_v32 = vadd.f32 %v1287_v47, %v523_v2 }
  0xa8   : > { %v527_v42 = vadd.f32 %v1290_v43, %v525_v32 }
  0xaa   : > { %v529_v53 = vadd.f32 %v1293_v52, %v527_v42 }
  0xac   : > { %v531_v3 = vadd.f32 %v1296_v57, %v529_v53 }
  0xae   : > { %v533_v34 = vadd.f32 %v1299_v29, %v531_v3 }
  0xb0   : > { %v535_v40 = vadd.f32 %v1302_v58, %v533_v34 }
  0xb2   : > { %v537_v7 = vadd.f32 %v1309_v60, %v535_v40 }
  0xb4   : > { %v539_v38 = vadd.f32 %v1312_v4, %v537_v7 }
  0xb6   : > { %v541_v45 = vadd.f32 %v1315_v33, %v539_v38 }
  0xb8   : > { %v542_v14 = vrot.slane %v541_v45, 4 }
  0xba   : > { %v543_v31 = vadd.f32 %v542_v14, %v541_v45 }
  0xbc   : > { %v544_v16 = vrot.slane %v543_v31, 2 }
  0xbe   : > { %v545_v47 = vadd.f32 %v544_v16, %v543_v31 }
  0xc0   : > { %v546_v8 = vrot.slane %v545_v47, 1 }
  0xc2   : > { %v547_v43 = vadd.f32 %v546_v8, %v545_v47 }
  0xc4   : > { %548 = vst.msk [vmem:[%s150_s17 + $0x1] sm:$0x1] %vm349_vm1, %v547_v43 }
  0xc5 PF: > { %s11_s8 = sadd.s32 1, %s683_s8   ;;  %s1588_s6 = smov %s679_s7 }
  0xc6   : > { %p8_p5 = scmp.ge.s32.totalorder %s11_s8, 4   ;;  %s1589_s7 = smov %s1591_s9 }
  0xc8   :  { %10 = sbr.rel (!%p8_p5) target bundleno = 2 (0x2), region = 54 }

// kernel: residual_block_forward.5
= control target key start
LH: loop header
LB: loop body
LE: loop exit
PB: predicated region body
PF: predicated region fallthrough
CT: control target
= control target key end

     0   :  { %s4215_s17 = smov 0   ;;  %s4217_s18 = smov 0   ;;  %s7128_s0 = inlined_call_operand.vmem [shape: bf16[2,8,100,8], index: 0, kind: input, shape index: {}, may-alias: {0,1,2}]   ;;  %s7129_s1 = inlined_call_operand.vmem [shape: bf16[2,8,100,8], index: 1, kind: input, shape index: {}, may-alias: {0,1,2}]   ;;  %s7130_s2 = inlined_call_operand.vmem [shape: bf16[2,8,100,8], index: 2, kind: input, shape index: {}, may-alias: {0,1,2}]   ;;  %s7131_s3 = inlined_call_operand.vmem [shape: f32[100,1], index: 3, kind: input, shape index: {}]   ;;  %s7132_s4 = inlined_call_operand.vmem [shape: f32[1,8], index: 4, kind: input, shape index: {}]   ;;  %s7133_s5 = inlined_call_operand.vmem [shape: f32[1,8], index: 5, kind: input, shape index: {}]   ;;  %s7134_s6 = inlined_call_operand.vmem [shape: bf16[216,8], index: 6, kind: input, shape index: {}]   ;;  %s7135_s7 = inlined_call_operand.vmem [shape: f32[1,8], index: 7, kind: input, shape index: {}]   ;;  %s7136_s8 = inlined_call_operand.vmem [shape: bf16[2,8,78,8], index: 8, kind: input, shape index: {}]   ;;  %s7137_s9 = inlined_call_operand.vmem [shape: f32[1,8], index: 9, kind: input, shape index: {}]   ;;  %s7138_s10 = inlined_call_operand.vmem [shape: f32[1,8], index: 10, kind: input, shape index: {}]   ;;  %s7139_s11 = inlined_call_operand.vmem [shape: f32[2,8,64,8], index: 11, kind: output, shape index: {}]  }
   0x1   :  { %s4219_s19 = smov 0   ;;  %s4221_s20 = smov 0  }
   0x2   :  { %s4223_s21 = smov 0  }
   0x3 LB: > { %s30_s22 = sadd.s32 1, %s4129_s19  ;;  %s33_s23 = sadd.s32 1, %s4133_s20  ;;  %s4137_s21 = sphi %s4223_s21, %s21_s21   ;;  %s4133_s20 = sphi %s4221_s20, %s7582_s20   ;;  %s4129_s19 = sphi %s4219_s19, %s7581_s19   ;;  %s4125_s18 = sphi %s4217_s18, %s7580_s18   ;;  %s4121_s17 = sphi %s4215_s17, %s7579_s17  }
   0x4   : > { %p31_p0 = scmp.ge.s32.totalorder %s30_s22, 8  ;;  %p3192_p1 = scmp.ge.s32.totalorder %s4137_s21, 1 }
   0x5   : > { %p461_p2 = scmp.lt.s32.totalorder %s4137_s21, 17 }
   0x6   : > { %s7584_s22 = smov (%p31_p0, %s30_s22), 0  ;;  %s7586_s23 = smov (!%p31_p0, %s33_s23), %s4133_s20 }
   0x7   : > { %p462_p3 = pnand %p3192_p1, %p461_p2  ;;  %p35_p4 = scmp.ge.s32.totalorder %s7586_s23, 2 }
   0x9   : > { %s7588_s23 = smov (%p35_p4, %s7586_s23), 0  ;;  %465 = sbr.rel (%p462_p3) target bundleno = 778 (0x30a), region = 64 }
   0xa   : > { %7264 = sst [smem:[#allocation2_spill]] %s7588_s23 }
  0x10   : > { %p665_p5 = scmp.ge.s32.totalorder %s4121_s17, 1  ;;  %p666_p6 = scmp.lt.s32.totalorder %s4121_s17, 9  ;;  %v7140_v0 = vmov 0   ;;  %v4258_v1 = vld [vmem:[%s7131_s3 + $0x10] sm:$0xff]  ;;  %v4263_v2 = vld [vmem:[%s7131_s3] sm:$0xff]  ;;  %v4268_v3 = vld [vmem:[%s7131_s3 + $0x18] sm:$0xff] }
  0x11   : > { %3459 = vset.pattern.permute.xlu1 %v7140_v0  ;;  %3458 = vset.pattern.permute.xlu0 %v7140_v0  ;;  %v4273_v5 = vld [vmem:[%s7131_s3 + $0x8] sm:$0xff]  ;;  %s550_s14 = sadd.s32 4294967295, %s4121_s17  ;;  %s4279_s15 = sadd.s32 1, %s4121_s17  ;;  %v4291_v11 = vld [vmem:[%s7131_s3 + $0x20] sm:$0xff]  ;;  %v4302_v14 = vld [vmem:[%s7131_s3 + $0x38] sm:$0xff]  ;;  %vm1227_vm13 = vcmask 1046528  }
  0x12   : > { %p667_p7 = pnand %p666_p6, %p665_p5  ;;  %2843 = vmatprep.subr.bf16.mxu0 %v7140_v0  ;;  %3368 = vmatprep.subr.bf16.mxu1 %v7140_v0  ;;  %v4284_v8 = vld [vmem:[%s7131_s3 + $0x28] sm:$0xff]  ;;  %p551_p8 = scmp.lt.s32.totalorder %s550_s14, 7  ;;  %v4307_v15 = vld [vmem:[%s7131_s3 + $0x30] sm:$0xff]  ;;  %v4332_v19 = vld [vmem:[%s7131_s3 + $0x40] sm:$0xff] }
  0x13   : > { %p3193_p9 = scmp.gt.s32.totalorder %s550_s14, 0  ;;  %p866_p10 = scmp.ge.s32.totalorder %s4279_s15, 1  ;;  %v4322_v18 = vld [vmem:[%s7131_s3 + $0x48] sm:$0xff]  ;;  %v4342_v22 = vld [vmem:[%s7131_s3 + $0x58] sm:$0xff]  ;;  %v4347_v23 = vld [vmem:[%s7131_s3 + $0x50] sm:$0xff] }
  0x14   : > { %s3215_s26 = scalar_select %p667_p7, 0.0, 1.0  ;;  %v4357_v26 = vld [vmem:[%s7131_s3 + $0x60] sm:$0xf] }
  0x15   : > { %p867_p11 = scmp.lt.s32.totalorder %s4279_s15, 9  ;;  %s7590_s14 = smov (!%p551_p8, %s550_s14), 7  ;;  %v4401_v40 = vld [vmem:[%s7132_s4] ss:$0 sm:$0xff] }
  0x16   : > { %v747_v4 = vstv %s3215_s26  ;;  %p555_p12 = scmp.lt.s32.totalorder %s4125_s18, 1  ;;  %p569_p13 = scmp.lt.s32.totalorder %s4121_s17, 7  ;;  %v4410_v46 = vld [vmem:[%s7133_s5] ss:$0 sm:$0xff] }
  0x17   : > { %v750_v6 = vmul.f32 %v747_v4, %v4258_v1  ;;  %v748_v7 = vmul.f32 %v747_v4, %v4263_v2  ;;  %v751_v9 = vmul.f32 %v747_v4, %v4268_v3  ;;  %v749_v10 = vmul.f32 %v747_v4, %v4273_v5  ;;  %s7592_s14 = smov (!%p3193_p9, %s7590_s14), 0  ;;  %p4309_p0 = pnand %p867_p11, %p866_p10 }
  0x18   : > { %v753_v12 = vmul.f32 %v747_v4, %v4284_v8  ;;  %v752_v13 = vmul.f32 %v747_v4, %v4291_v11  ;;  %p557_p1 = scmp.lt.s32.totalorder %s7592_s14, 7  ;;  %p3199_p2 = scmp.gt.s32.totalorder %s4121_s17, 0  ;;  %v755_v16 = vmul.f32 %v747_v4, %v4302_v14  ;;  %v754_v17 = vmul.f32 %v747_v4, %v4307_v15 }
  0x19   : > { %773 = vperm.xlu1 %3459, %v750_v6   ;;  %763 = vperm.xlu0 %3458, %v748_v7   ;;  %s4315_s13 = scalar_select %p569_p13, %s4121_s17, 7  ;;  %v757_v20 = vmul.f32 %v747_v4, %v4322_v18  ;;  %v756_v21 = vmul.f32 %v747_v4, %v4332_v19  ;;  %v759_v24 = vmul.f32 %v747_v4, %v4342_v22 }
  0x1a   : > { %s7594_s18 = smov (!%p555_p12, %s4125_s18), 1  ;;  %s7596_s14 = smov (!%p557_p1, %s7592_s14), 7  ;;  %v758_v25 = vmul.f32 %v747_v4, %v4347_v23  ;;  %v760_v28 = vmul.f32 %v747_v4, %v4357_v26 }
  0x1b   : > { %s3259_s27 = scalar_select %p3199_p2, %s4315_s13, 0 }
  0x1c   : > { %s3218_s28 = scalar_select %p4309_p0, 0.0, 1.0 }
  0x1d   : > { %778 = vperm.xlu1 %3459, %v751_v9   ;;  %768 = vperm.xlu0 %3458, %v749_v10   ;;  %p575_p3 = scmp.lt.s32.totalorder %s3259_s27, 7  ;;  %s4350_s25 = smul.u32 104, %s7594_s18 }
  0x1e   : > { %s3396_s26 = smul.u32 13, %s7596_s14  ;;  %v4359_v27 = vstv %s3218_s28  ;;  %p587_p7 = scmp.lt.s32.totalorder %s4279_s15, 7 }
  0x1f   : > { %s7598_s27 = smov (!%p575_p3, %s3259_s27), 7  ;;  %v937_v29 = vmul.f32 %v4359_v27, %v4263_v2  ;;  %v938_v30 = vmul.f32 %v4359_v27, %v4273_v5  ;;  %v939_v31 = vmul.f32 %v4359_v27, %v4258_v1  ;;  %v940_v34 = vmul.f32 %v4359_v27, %v4268_v3  ;;  %p3205_p8 = scmp.gt.s32.totalorder %s4279_s15, 0 }
  0x20   : > { %s3398_s30 = smul.u32 13, %s7598_s27  ;;  %s561_s16 = sadd.s32 %s4350_s25, %s3396_s26  ;;  %v941_v35 = vmul.f32 %v4359_v27, %v4291_v11  ;;  %v942_v39 = vmul.f32 %v4359_v27, %v4284_v8  ;;  %v943_v42 = vmul.f32 %v4359_v27, %v4307_v15  ;;  %v944_v52 = vmul.f32 %v4359_v27, %v4302_v14 }
  0x21   : > { %788 = vperm.xlu1 %3459, %v753_v12   ;;  %783 = vperm.xlu0 %3458, %v752_v13   ;;  %s3198_s23 = sshll.u32 %s561_s16, 2  ;;  %s1054_s16 = sadd.s32 2, %s4121_s17  ;;  %v945_v53 = vmul.f32 %v4359_v27, %v4332_v19  ;;  %v946_v61 = vmul.f32 %v4359_v27, %v4322_v18  ;;  %v947_v62 = vmul.f32 %v4359_v27, %v4347_v23 }
  0x22   : > { %s579_s24 = sadd.s32 %s3398_s30, %s4350_s25  ;;  %s4378_s30 = scalar_lea.vmem %s7128_s0, %s3198_s23 }
  0x23   : > { %s3204_s14 = sshll.u32 %s579_s24, 2  ;;  %v651_v32 = vld [vmem:[%s4378_s30 + $0x30] sm:$0x3]  ;;  %p4390_p4 = scmp.ge.s32.totalorder %s1054_s16, 1 }
  0x24   : > { %s4373_s26 = scalar_lea.vmem %s7129_s1, %s3204_s14  ;;  %v664_v36 = vunpack.c.l.bf16 %v651_v32  ;;  %p4394_p5 = scmp.lt.s32.totalorder %s1054_s16, 9 }
  0x25   : > { %798 = vperm.xlu1 %3459, %v755_v16   ;;  %793 = vperm.xlu0 %3458, %v754_v17   ;;  %v3287_v33 = vld [vmem:[%s4373_s26] sm:$0xff]   ;;  %v3355_v37 = vld [vmem:[%s4373_s26 + $0x8] sm:$0xff]   ;;  %v3356_v51 = vld [vmem:[%s4373_s26 + $0x10] sm:$0xff]   ;;  %s588_s29 = scalar_select %p587_p7, %s4279_s15, 7 }
  0x26   : > { %v3288_v38 = vunpack.c.l.bf16 %v3287_v33  ;;  %v3289_v41 = vunpack.c.h.bf16 %v3287_v33  ;;  %v688_v43 = vmul.f32 %v4401_v40, %v664_v36  ;;  %v3292_v45 = vunpack.c.l.bf16 %v3355_v37  ;;  %p1057_p6 = pnand %p4394_p5, %p4390_p4  ;;  %v3357_v59 = vld [vmem:[%s4373_s26 + $0x18] sm:$0xff]   ;;  %v3358_v60 = vld [vmem:[%s4373_s26 + $0x20] sm:$0xff]   ;;  %s4141_s14 = smov 16  }
  0x27   : > { %v3293_v56 = vunpack.c.h.bf16 %v3355_v37  ;;  %v3296_v57 = vunpack.c.l.bf16 %v3356_v51  ;;  %v3297_v58 = vunpack.c.h.bf16 %v3356_v51  ;;  %v3300_v7 = vunpack.c.l.bf16 %v3357_v59  ;;  %s7600_s29 = smov (!%p3205_p8, %s588_s29), 0  ;;  %s7249_s27 = smov 24  }
  0x28   : > { %v871_v44 = vmul.f32 %v3288_v38, %v4401_v40  ;;  %v4413_v47 = vadd.f32 %v4410_v46, %v688_v43  ;;  %v872_v49 = vmul.f32 %v3289_v41, %v4401_v40  ;;  %v873_v50 = vmul.f32 %v3292_v45, %v4401_v40  ;;  %s3219_s12 = scalar_select %p1057_p6, 0.0, 1.0 }
  0x29   : > { %808 = vperm.xlu1 %3459, %v757_v20   ;;  %803 = vperm.xlu0 %3458, %v756_v21   ;;  %v874_v63 = vmul.f32 %v3293_v56, %v4401_v40  ;;  %v875_v4 = vmul.f32 %v3296_v57, %v4401_v40  ;;  %v876_v6 = vmul.f32 %v3297_v58, %v4401_v40  ;;  %v3301_v9 = vunpack.c.h.bf16 %v3357_v59  ;;  %p593_p9 = scmp.lt.s32.totalorder %s7600_s29, 7  ;;  %s4143_s17 = smov 32  }
  0x2a   : > { %v4420_v48 = vadd.f32 %v4410_v46, %v871_v44  ;;  %v4430_v54 = vadd.f32 %v4410_v46, %v872_v49  ;;  %v4433_v55 = vadd.f32 %v4410_v46, %v873_v50  ;;  %v3304_v10 = vunpack.c.l.bf16 %v3358_v60  ;;  %s4144_s28 = smov 40   ;;  %s7223_s23 = smov 88  }
  0x2b   : > { %v4453_v12 = vadd.f32 %v4410_v46, %v874_v63  ;;  %v4456_v13 = vadd.f32 %v4410_v46, %v875_v4  ;;  %v4459_v16 = vadd.f32 %v4410_v46, %v876_v6  ;;  %v877_v17 = vmul.f32 %v3300_v7, %v4401_v40  ;;  %s7602_s29 = smov (!%p593_p9, %s7600_s29), 7 }
  0x2c   : > { %v878_v20 = vmul.f32 %v3301_v9, %v4401_v40  ;;  %v879_v21 = vmul.f32 %v3304_v10, %v4401_v40  ;;  %s3399_s15 = smul.u32 13, %s7602_s29  ;;  %vm720_vm12 = vcmp.ge.f32.partialorder %v4413_v47, 0.0  ;;  %vm897_vm14 = vcmp.ge.f32.partialorder %v4420_v48, 0.0  ;;  %s4146_s29 = smov 56  }
  0x2d   : > { %818 = vperm.xlu1 %3459, %v759_v24   ;;  %813 = vperm.xlu0 %3458, %v758_v25   ;;  %v3305_v24 = vunpack.c.h.bf16 %v3358_v60  ;;  %v948_v25 = vmul.f32 %v4359_v27, %v4342_v22  ;;  %vm898_vm15 = vcmp.ge.f32.partialorder %v4430_v54, 0.0 }
  0x2e   : > { %v4477_v32 = vadd.f32 %v4410_v46, %v879_v21 }
  0x2f   : > { %v880_v33 = vmul.f32 %v3305_v24, %v4401_v40 }
  0x31   : > { %823 = vperm.xlu0 %3458, %v760_v28   ;;  %952 = vperm.xlu1 %3459, %v937_v29   ;;  %v949_v28 = vmul.f32 %v4359_v27, %v4357_v26  ;;  %v4468_v29 = vstv %s3219_s12  ;;  %v4487_v37 = vadd.f32 %v4410_v46, %v880_v33  ;;  %s4145_s12 = smov 48  }
  0x32   : > { %v1126_v27 = vmul.f32 %v4468_v29, %v4263_v2  ;;  %v1127_v36 = vmul.f32 %v4468_v29, %v4273_v5  ;;  %v1128_v2 = vmul.f32 %v4468_v29, %v4258_v1  ;;  %v1129_v5 = vmul.f32 %v4468_v29, %v4268_v3 }
  0x33   : > { %v1130_v3 = vmul.f32 %v4468_v29, %v4291_v11  ;;  %v1131_v51 = vmul.f32 %v4468_v29, %v4284_v8  ;;  %v1133_v8 = vmul.f32 %v4468_v29, %v4302_v14  ;;  %v1134_v14 = vmul.f32 %v4468_v29, %v4332_v19 }
  0x35   : > { %957 = vperm.xlu0 %3458, %v938_v30   ;;  %962 = vperm.xlu1 %3459, %v939_v31   ;;  %v4471_v30 = vadd.f32 %v4410_v46, %v877_v17  ;;  %v4474_v31 = vadd.f32 %v4410_v46, %v878_v20  ;;  %v1135_v17 = vmul.f32 %v4468_v29, %v4322_v18 }
  0x36   : > { %v1136_v18 = vmul.f32 %v4468_v29, %v4347_v23 }
  0x39   : > { %967 = vperm.xlu0 %3458, %v940_v34   ;;  %972 = vperm.xlu1 %3459, %v941_v35   ;;  %v3359_v34 = vld [vmem:[%s4373_s26 + $0x28] sm:$0xff]   ;;  %v851_v35 = vld [vmem:[%s4373_s26 + $0x30] sm:$0x3]  ;;  %s597_s26 = sadd.s32 %s3399_s15, %s4350_s25  ;;  %s4147_s15 = smov 64  }
  0x3a   : > { %v3308_v38 = vunpack.c.l.bf16 %v3359_v34  ;;  %v864_v41 = vunpack.c.l.bf16 %v851_v35  ;;  %s3210_s16 = sshll.u32 %s597_s26, 2  ;;  %s4148_s26 = smov 72  }
  0x3b   : > { %s4509_s24 = scalar_lea.vmem %s7130_s2, %s3210_s16  ;;  %s7225_s16 = smov 80  }
  0x3c   : > { %v883_v44 = vmul.f32 %v4401_v40, %v864_v41  ;;  %v3311_v1 = vld [vmem:[%s4509_s24] sm:$0xff]   ;;  %v3360_v56 = vld [vmem:[%s4509_s24 + $0x8] sm:$0xff]   ;;  %v3361_v11 = vld [vmem:[%s4509_s24 + $0x10] sm:$0xff]   ;;  %s4154_s25 = smov 120  }
  0x3d   : > { %977 = vperm.xlu0 %3458, %v942_v39   ;;  %982 = vperm.xlu1 %3459, %v943_v42   ;;  %v3309_v39 = vunpack.c.h.bf16 %v3359_v34  ;;  %v881_v42 = vmul.f32 %v3308_v38, %v4401_v40  ;;  %v3316_v57 = vunpack.c.l.bf16 %v3360_v56  ;;  %v3317_v58 = vunpack.c.h.bf16 %v3360_v56  ;;  %v3362_v21 = vld [vmem:[%s4509_s24 + $0x18] sm:$0xff]   ;;  %v3363_v19 = vld [vmem:[%s4509_s24 + $0x20] sm:$0xff]  }
  0x3e   : > { %v4504_v50 = vadd.f32 %v4410_v46, %v883_v44  ;;  %v3320_v7 = vunpack.c.l.bf16 %v3361_v11  ;;  %v3321_v10 = vunpack.c.h.bf16 %v3361_v11  ;;  %v3325_v33 = vunpack.c.h.bf16 %v3362_v21 }
  0x3f   : > { %v882_v43 = vmul.f32 %v3309_v39, %v4401_v40  ;;  %v4498_v45 = vadd.f32 %v4410_v46, %v881_v42  ;;  %v1063_v63 = vmul.f32 %v3317_v58, %v4401_v40  ;;  %v3328_v38 = vunpack.c.l.bf16 %v3363_v19 }
  0x40   : > { %7270 = vst [vmem:[#allocation5_spill] sm:$0xff] %v4504_v50  ;;  %v1064_v20 = vmul.f32 %v3320_v7, %v4401_v40  ;;  %v1065_v24 = vmul.f32 %v3321_v10, %v4401_v40  ;;  %v3329_v41 = vunpack.c.h.bf16 %v3363_v19  ;;  %v3353_v7 = vld [vmem:[%s4378_s30 + $0x20] sm:$0xff]   ;;  %v3354_v19 = vld [vmem:[%s4378_s30 + $0x28] sm:$0xff]  }
  0x41   : > { %987 = vperm.xlu0 %3458, %v944_v52   ;;  %992 = vperm.xlu1 %3459, %v945_v53   ;;  %7268 = vst [vmem:[#allocation3_spill] sm:$0xff] %v4498_v45  ;;  %v4501_v49 = vadd.f32 %v4410_v46, %v882_v43  ;;  %v3312_v52 = vunpack.c.l.bf16 %v3311_v1  ;;  %v3313_v53 = vunpack.c.h.bf16 %v3311_v1  ;;  %v4536_v9 = vadd.f32 %v4410_v46, %v1063_v63  ;;  %v3352_v63 = vld [vmem:[%s4378_s30 + $0x18] sm:$0xff]  }
  0x42   : > { %v4549_v34 = vadd.f32 %v4410_v46, %v1065_v24  ;;  %v1068_v43 = vmul.f32 %v3328_v38, %v4401_v40  ;;  %v1069_v44 = vmul.f32 %v3329_v41, %v4401_v40  ;;  %v3276_v24 = vunpack.c.l.bf16 %v3352_v63 }
  0x43   : > { %7269 = vst [vmem:[#allocation4_spill] sm:$0xff] %v4501_v49  ;;  %v1060_v59 = vmul.f32 %v3312_v52, %v4401_v40  ;;  %v1061_v60 = vmul.f32 %v3313_v53, %v4401_v40  ;;  %v1040_v53 = vld [vmem:[%s4509_s24 + $0x30] sm:$0x3] }
  0x44   : > { %v4570_v23 = vadd.f32 %v4410_v46, %v1068_v43  ;;  %v4573_v1 = vadd.f32 %v4410_v46, %v1069_v44  ;;  %v682_v44 = vmul.f32 %v3276_v24, %v4401_v40 }
  0x45   : > { %997 = vperm.xlu0 %3458, %v946_v61   ;;  %1002 = vperm.xlu1 %3459, %v947_v62   ;;  %v1132_v61 = vmul.f32 %v4468_v29, %v4307_v15  ;;  %v1062_v62 = vmul.f32 %v3316_v57, %v4401_v40  ;;  %v4527_v4 = vadd.f32 %v4410_v46, %v1060_v59  ;;  %v3350_v59 = vld [vmem:[%s4378_s30 + $0x8] sm:$0xff]  }
  0x46   : > { %v4530_v6 = vadd.f32 %v4410_v46, %v1061_v60  ;;  %v3263_v60 = vld [vmem:[%s4378_s30] sm:$0xff]  }
  0x47   : > { %v4533_v15 = vadd.f32 %v4410_v46, %v1062_v62  ;;  %v3351_v62 = vld [vmem:[%s4378_s30 + $0x10] sm:$0xff]   ;;  %v3264_v11 = vunpack.c.l.bf16 %v3263_v60  ;;  %v3265_v10 = vunpack.c.h.bf16 %v3263_v60  ;;  %s4140_s30 = smov 8  }
  0x49   : > { %1007 = vperm.xlu0 %3458, %v948_v25   ;;  %1012 = vperm.xlu1 %3459, %v949_v28   ;;  %v3324_v25 = vunpack.c.l.bf16 %v3362_v21  ;;  %v4546_v28 = vadd.f32 %v4410_v46, %v1064_v20  ;;  %v3272_v20 = vunpack.c.l.bf16 %v3351_v62  ;;  %v3277_v21 = vunpack.c.h.bf16 %v3352_v63 }
  0x4b   : > { %v1066_v35 = vmul.f32 %v3324_v25, %v4401_v40  ;;  %v3281_v25 = vunpack.c.h.bf16 %v3353_v7  ;;  %v680_v41 = vmul.f32 %v3272_v20, %v4401_v40  ;;  %v683_v43 = vmul.f32 %v3277_v21, %v4401_v40 }
  0x4d   : > { %1141 = vperm.xlu0 %3458, %v1126_v27   ;;  %1146 = vperm.xlu1 %3459, %v1127_v36   ;;  %v1137_v27 = vmul.f32 %v4468_v29, %v4342_v22  ;;  %v1067_v36 = vmul.f32 %v3325_v33, %v4401_v40  ;;  %v4559_v39 = vadd.f32 %v4410_v46, %v1066_v35 }
  0x4e   : > { %v1138_v22 = vmul.f32 %v4468_v29, %v4357_v26  ;;  %v1053_v26 = vunpack.c.l.bf16 %v1040_v53  ;;  %v676_v33 = vmul.f32 %v3264_v11, %v4401_v40 }
  0x4f   : > { %v4562_v42 = vadd.f32 %v4410_v46, %v1067_v36 }
  0x50   : > { %v1072_v57 = vmul.f32 %v4401_v40, %v1053_v26 }
  0x51   : > { %1151 = vperm.xlu0 %3458, %v1128_v2   ;;  %1156 = vperm.xlu1 %3459, %v1129_v5   ;;  %v3364_v2 = vld [vmem:[%s4509_s24 + $0x28] sm:$0xff]   ;;  %s4151_s24 = smov 96  }
  0x52   : > { %v3332_v5 = vunpack.c.l.bf16 %v3364_v2  ;;  %v4586_v58 = vadd.f32 %v4410_v46, %v1072_v57  ;;  %v699_v57 = vadd.f32 %v4410_v46, %v680_v41 }
  0x54   : > { %7271 = vst [vmem:[#allocation6_spill] sm:$0xff] %v4586_v58  ;;  %vm712_vm5 = vcmp.ge.f32.partialorder %v699_v57, 0.0  ;;  %v725_v20 = vmul.f32 0.2, %v699_v57 }
  0x55   : > { %1161 = vperm.xlu0 %3458, %v1130_v3   ;;  %1166 = vperm.xlu1 %3459, %v1131_v51   ;;  %v3333_v3 = vunpack.c.h.bf16 %v3364_v2  ;;  %v1070_v51 = vmul.f32 %v3332_v5, %v4401_v40  ;;  %v685_v2 = vmul.f32 %v3281_v25, %v4401_v40  ;;  %v695_v5 = vadd.f32 %v4410_v46, %v676_v33 }
  0x57   : > { %v1071_v52 = vmul.f32 %v3333_v3, %v4401_v40  ;;  %v4579_v56 = vadd.f32 %v4410_v46, %v1070_v51  ;;  %v3284_v51 = vunpack.c.l.bf16 %v3354_v19  ;;  %vm708_vm1 = vcmp.ge.f32.partialorder %v695_v5, 0.0 }
  0x58   : > { %v721_v11 = vmul.f32 0.2, %v695_v5 }
  0x59   : > { %1171 = vperm.xlu0 %3458, %v1132_v61   ;;  %1176 = vperm.xlu1 %3459, %v1133_v8   ;;  %v4582_v29 = vadd.f32 %v4410_v46, %v1071_v52  ;;  %v3268_v61 = vunpack.c.l.bf16 %v3350_v59  ;;  %v3269_v8 = vunpack.c.h.bf16 %v3350_v59  ;;  %v702_v59 = vadd.f32 %v4410_v46, %v683_v43 }
  0x5a   : > { %v738_v43 = vsel %vm712_vm5, %v699_v57, %v725_v20  ;;  %vm904_vm5 = vcmp.ge.f32.partialorder %v4474_v31, 0.0 }
  0x5b   : > { %v679_v35 = vmul.f32 %v3269_v8, %v4401_v40  ;;  %v686_v8 = vmul.f32 %v3284_v51, %v4401_v40  ;;  %v728_v21 = vmul.f32 0.2, %v702_v59  ;;  %vm715_vm6 = vcmp.ge.f32.partialorder %v702_v59, 0.0 }
  0x5c   : > { %v910_v51 = vmul.f32 0.2, %v4420_v48 }
  0x5d   : > { %1181 = vperm.xlu0 %3458, %v1134_v14   ;;  %1186 = vperm.xlu1 %3459, %v1135_v17   ;;  %v678_v14 = vmul.f32 %v3268_v61, %v4401_v40  ;;  %v3273_v17 = vunpack.c.h.bf16 %v3351_v62  ;;  %v698_v3 = vadd.f32 %v4410_v46, %v679_v35  ;;  %v701_v61 = vadd.f32 %v4410_v46, %v682_v44 }
  0x5e   : > { %v704_v62 = vadd.f32 %v4410_v46, %v685_v2  ;;  %v705_v35 = vadd.f32 %v4410_v46, %v686_v8  ;;  %v4624_v44 = vsel %vm715_vm6, %v702_v59, %v728_v21  ;;  %v4657_v8 = vsel %vm897_vm14, %v4420_v48, %v910_v51 }
  0x5f   : > { %v697_v36 = vadd.f32 %v4410_v46, %v678_v14  ;;  %v681_v38 = vmul.f32 %v3273_v17, %v4401_v40  ;;  %vm711_vm2 = vcmp.ge.f32.partialorder %v698_v3, 0.0  ;;  %v727_v24 = vmul.f32 0.2, %v701_v61 }
  0x60   : > { %v730_v25 = vmul.f32 0.2, %v704_v62  ;;  %vm714_vm7 = vcmp.ge.f32.partialorder %v701_v61, 0.0  ;;  %vm717_vm8 = vcmp.ge.f32.partialorder %v704_v62, 0.0  ;;  %vm718_vm11 = vcmp.ge.f32.partialorder %v705_v35, 0.0 }
  0x61   : > { %1191 = vperm.xlu0 %3458, %v1136_v18   ;;  %1196 = vperm.xlu1 %3459, %v1137_v27   ;;  %v677_v18 = vmul.f32 %v3265_v10, %v4401_v40  ;;  %v3280_v27 = vunpack.c.l.bf16 %v3353_v7  ;;  %vm710_vm0 = vcmp.ge.f32.partialorder %v697_v36, 0.0  ;;  %v700_v26 = vadd.f32 %v4410_v46, %v681_v38 }
  0x62   : > { %v723_v60 = vmul.f32 0.2, %v697_v36  ;;  %v724_v7 = vmul.f32 0.2, %v698_v3  ;;  %v4626_v2 = vsel %vm714_vm7, %v701_v61, %v727_v24  ;;  %v914_v61 = vmul.f32 0.2, %v4456_v13 }
  0x63   : > { %v696_v52 = vadd.f32 %v4410_v46, %v677_v18  ;;  %v684_v53 = vmul.f32 %v3280_v27, %v4401_v40  ;;  %vm713_vm4 = vcmp.ge.f32.partialorder %v700_v26, 0.0  ;;  %v726_v17 = vmul.f32 0.2, %v700_v26 }
  0x64   : > { %v737_v18 = vsel %vm711_vm2, %v698_v3, %v724_v7  ;;  %v733_v3 = vmul.f32 0.2, %v4413_v47  ;;  %vm901_vm2 = vcmp.ge.f32.partialorder %v4456_v13, 0.0  ;;  %vm905_vm6 = vcmp.ge.f32.partialorder %v4477_v32, 0.0 }
  0x65   : > { %1201 = vperm.xlu0 %3458, %v1138_v22   ;;  %v3285_v22 = vunpack.c.h.bf16 %v3354_v19  ;;  %vm709_vm3 = vcmp.ge.f32.partialorder %v696_v52, 0.0  ;;  %v722_v10 = vmul.f32 0.2, %v696_v52  ;;  %v703_v14 = vadd.f32 %v4410_v46, %v684_v53 }
  0x66   : > { %v734_v19 = vsel %vm708_vm1, %v695_v5, %v721_v11  ;;  %v739_v41 = vsel %vm713_vm4, %v700_v26, %v726_v17  ;;  %v912_v53 = vmul.f32 0.2, %v4433_v55  ;;  %vm900_vm1 = vcmp.ge.f32.partialorder %v4453_v12, 0.0 }
  0x67   : > { %v687_v63 = vmul.f32 %v3285_v22, %v4401_v40  ;;  %v736_v40 = vsel %vm710_vm0, %v697_v36, %v723_v60  ;;  %v729_v27 = vmul.f32 0.2, %v703_v14  ;;  %v735_v38 = vsel %vm709_vm3, %v696_v52, %v722_v10 }
  0x68   : > { %vm716_vm9 = vcmp.ge.f32.partialorder %v703_v14, 0.0  ;;  %v4628_v22 = vsel %vm717_vm8, %v704_v62, %v730_v25  ;;  %v731_v36 = vmul.f32 0.2, %v705_v35  ;;  %v911_v52 = vmul.f32 0.2, %v4430_v54 }
  0x69   : > { %v706_v33 = vadd.f32 %v4410_v46, %v687_v63  ;;  %v4631_v5 = vsel %vm716_vm9, %v703_v14, %v729_v27  ;;  %vm899_vm0 = vcmp.ge.f32.partialorder %v4433_v55, 0.0  ;;  %v913_v60 = vmul.f32 0.2, %v4453_v12 }
  0x6a   : > { %v915_v62 = vmul.f32 0.2, %v4459_v16  ;;  %v4646_v63 = vsel %vm718_vm11, %v705_v35, %v731_v36  ;;  %vm902_vm3 = vcmp.ge.f32.partialorder %v4459_v16, 0.0  ;;  %v4654_v11 = vsel %vm720_vm12, %v4413_v47, %v733_v3 }
  0x6b   : > { %v732_v46 = vmul.f32 0.2, %v706_v33  ;;  %vm719_vm10 = vcmp.ge.f32.partialorder %v706_v33, 0.0  ;;  %v4660_v7 = vsel %vm898_vm15, %v4430_v54, %v911_v52  ;;  %v916_v10 = vmul.f32 0.2, %v4471_v30 }
  0x6c   : > { %v4670_v20 = vsel %vm899_vm0, %v4433_v55, %v912_v53  ;;  %vm903_vm4 = vcmp.ge.f32.partialorder %v4471_v30, 0.0  ;;  %v4674_v48 = vsel %vm900_vm1, %v4453_v12, %v913_v60  ;;  %v4677_v54 = vsel %vm901_vm2, %v4456_v13, %v914_v61 }
  0x6d   : > { %v4640_v59 = vsel %vm719_vm10, %v706_v33, %v732_v46  ;;  %v4680_v24 = vsel %vm902_vm3, %v4459_v16, %v915_v62  ;;  %v917_v55 = vmul.f32 0.2, %v4474_v31  ;;  %v4690_v35 = vsel %vm903_vm4, %v4471_v30, %v916_v10 }
  0x6e   : > { %v918_v12 = vmul.f32 0.2, %v4477_v32  ;;  %vm906_vm7 = vcmp.ge.f32.partialorder %v4487_v37, 0.0  ;;  %v919_v13 = vmul.f32 0.2, %v4487_v37  ;;  %vm1086_vm8 = vcmp.ge.f32.partialorder %v4527_v4, 0.0 }
  0x6f   : > { %v1099_v30 = vmul.f32 0.2, %v4527_v4  ;;  %vm1087_vm9 = vcmp.ge.f32.partialorder %v4530_v6, 0.0  ;;  %v1100_v46 = vmul.f32 0.2, %v4530_v6  ;;  %vm1277_vm10 = vcmask 1045504  }
  0x70   : > { %v4724_v60 = vsel %vm906_vm7, %v4487_v37, %v919_v13  ;;  %vm1088_vm11 = vcmp.ge.f32.partialorder %v4533_v15, 0.0  ;;  %vm1089_vm12 = vcmp.ge.f32.partialorder %v4536_v9, 0.0  ;;  %v1102_v10 = vmul.f32 0.2, %v4536_v9 }
  0x71   : > { %v4733_v62 = vsel %vm1086_vm8, %v4527_v4, %v1099_v30  ;;  %v4738_v37 = vsel %vm1087_vm9, %v4530_v6, %v1100_v46  ;;  %vm1090_vm14 = vcmp.ge.f32.partialorder %v4546_v28, 0.0  ;;  %v1103_v6 = vmul.f32 0.2, %v4546_v28 }
  0x72   : > { %vm1091_vm15 = vcmp.ge.f32.partialorder %v4549_v34, 0.0  ;;  %vm1092_vm0 = vcmp.ge.f32.partialorder %v4559_v39, 0.0  ;;  %vm1093_vm1 = vcmp.ge.f32.partialorder %v4562_v42, 0.0  ;;  %vm1094_vm2 = vcmp.ge.f32.partialorder %v4570_v23, 0.0 }
  0x73   : > { %vm1095_vm3 = vcmp.ge.f32.partialorder %v4573_v1, 0.0  ;;  %vm1096_vm4 = vcmp.ge.f32.partialorder %v4579_v56, 0.0  ;;  %vm1413_vm7 = vcmask 1043456   ;;  %vm1498_vm8 = vcmask 1042432  }
  0x74   : > { %vm1550_vm9 = vcmask 1041408  }
  0x98   : > { %v774_v26 = vpop.permute.xlu1 %773  ;;  %v764_v57 = vpop.permute.xlu0 %763 }
  0x99   : > { %v4663_v14 = vmul.f32 %v774_v26, %v736_v40  ;;  %v4665_v17 = vmul.f32 %v764_v57, %v734_v19  ;;  %v4712_v26 = vsel %vm904_vm5, %v4474_v31, %v917_v55  ;;  %v4717_v57 = vsel %vm905_vm6, %v4477_v32, %v918_v12 }
  0x9a   : > { %vm1097_vm5 = vcmp.ge.f32.partialorder %v4582_v29, 0.0  ;;  %vm1361_vm6 = vcmask 1044480  }
  0x9b   : > { %7272 = vst [vmem:[#allocation7_spill] sm:$0xff] %v4663_v14  ;;  %7273 = vst [vmem:[#allocation8_spill] sm:$0xff] %v4665_v17  ;;  %v1228_v16 = vrot.slane %v4665_v17, 1  ;;  %v1231_v19 = vrot.slane %v4663_v14, 1 }
  0x9c   : > { %v779_v47 = vpop.permute.xlu1 %778  ;;  %v769_v21 = vpop.permute.xlu0 %768 }
  0x9d   : > { %v4683_v25 = vmul.f32 %v779_v47, %v737_v18  ;;  %v4685_v33 = vmul.f32 %v769_v21, %v735_v38 }
  0x9f   : > { %7274 = vst [vmem:[#allocation9_spill] sm:$0xff] %v4683_v25  ;;  %7275 = vst [vmem:[#allocation10_spill] sm:$0xff] %v4685_v33  ;;  %v1229_v40 = vrot.slane %v4685_v33, 1  ;;  %v1233_v38 = vrot.slane %v4683_v25, 1  ;;  %v1365_v50 = vrot.slane %v4683_v25, 3 }
  0xa0   : > { %v789_v18 = vpop.permute.xlu1 %788  ;;  %v784_v27 = vpop.permute.xlu0 %783 }
  0xa1   : > { %v4703_v36 = vmul.f32 %v789_v18, %v739_v41  ;;  %v4705_v3 = vmul.f32 %v784_v27, %v738_v43  ;;  %v1230_v51 = vsel %vm1227_vm13, %v1228_v16, %v1229_v40  ;;  %v1232_v52 = vsel %vm1227_vm13, %v1229_v40, %v1231_v19 }
  0xa2   : > { %v3460_v53 = vpack.i.bf16 %v1232_v52, %v1230_v51  ;;  %v1101_v41 = vmul.f32 0.2, %v4533_v15  ;;  %v1234_v55 = vsel %vm1227_vm13, %v1231_v19, %v1233_v38  ;;  %v1106_v18 = vmul.f32 0.2, %v4562_v42 }
  0xa3   : > { %7276 = vst [vmem:[#allocation11_spill] sm:$0xff] %v4703_v36  ;;  %7277 = vst [vmem:[#allocation12_spill] sm:$0xff] %v4705_v3  ;;  %v1235_v43 = vrot.slane %v4705_v3, 1  ;;  %v1237_v32 = vrot.slane %v4703_v36, 1  ;;  %v1279_v52 = vrot.slane %v4685_v33, 2 }
  0xa4   : > { %v799_v31 = vpop.permute.xlu1 %798  ;;  %v794_v61 = vpop.permute.xlu0 %793  ;;  %3461 = vrot.lane.b32.xlu1 %v3460_v53, %s4140_s30  ;;  %v4750_v4 = vsel %vm1088_vm11, %v4533_v15, %v1101_v41  ;;  %v1105_v15 = vmul.f32 0.2, %v4559_v39  ;;  %v4775_v53 = vsel %vm1089_vm12, %v4536_v9, %v1102_v10  ;;  %vm2370_vm11 = vcmask 1040384  }
  0xa5   : > { %v4742_v47 = vmul.f32 %v799_v31, %v4624_v44  ;;  %v4745_v21 = vmul.f32 %v794_v61, %v4626_v2  ;;  %v1236_v12 = vsel %vm1227_vm13, %v1233_v38, %v1235_v43  ;;  %v1104_v44 = vmul.f32 0.2, %v4549_v34 }
  0xa6   : > { %v3465_v13 = vpack.i.bf16 %v1236_v12, %v1234_v55  ;;  %v1238_v19 = vsel %vm1227_vm13, %v1235_v43, %v1237_v32  ;;  %v1285_v43 = vrot.slane %v4705_v3, 2  ;;  %v1278_v61 = vrot.slane %v4665_v17, 2 }
  0xa7   : > { %7278 = vst [vmem:[#allocation13_spill] sm:$0xff] %v4742_v47  ;;  %7279 = vst [vmem:[#allocation14_spill] sm:$0xff] %v4745_v21  ;;  %v1239_v16 = vrot.slane %v4745_v21, 1  ;;  %v1241_v46 = vrot.slane %v4742_v47, 1  ;;  %v4788_v31 = vsel %vm1091_vm15, %v4549_v34, %v1104_v44  ;;  %v4798_v10 = vsel %vm1092_vm0, %v4559_v39, %v1105_v15 }
  0xa8   : > { %v809_v2 = vpop.permute.xlu1 %808  ;;  %v804_v40 = vpop.permute.xlu0 %803  ;;  %3466 = vrot.lane.b32.xlu0 %v3465_v13, %s4140_s30  ;;  %v4803_v55 = vsel %vm1093_vm1, %v4562_v42, %v1106_v18  ;;  %v1107_v39 = vmul.f32 0.2, %v4570_v23  ;;  %v1362_v17 = vrot.slane %v4685_v33, 3  ;;  %vm1920_vm1 = vcmask 130048  }
  0xa9   : > { %v4764_v27 = vmul.f32 %v809_v2, %v4628_v22  ;;  %v4767_v38 = vmul.f32 %v804_v40, %v4631_v5  ;;  %v1240_v30 = vsel %vm1227_vm13, %v1237_v32, %v1239_v16  ;;  %v4780_v22 = vsel %vm1090_vm14, %v4546_v28, %v1103_v6  ;;  %7282 = vst [vmem:[#allocation17_spill] sm:$0xff] %v4803_v55 }
  0xaa   : > { %v3470_v51 = vpack.i.bf16 %v1240_v30, %v1238_v19  ;;  %v1281_v28 = vrot.slane %v4663_v14, 2  ;;  %v1242_v34 = vsel %vm1227_vm13, %v1239_v16, %v1241_v46  ;;  %v1283_v6 = vrot.slane %v4683_v25, 2 }
  0xab   : > { %7280 = vst [vmem:[#allocation15_spill] sm:$0xff] %v4764_v27  ;;  %7281 = vst [vmem:[#allocation16_spill] sm:$0xff] %v4767_v38  ;;  %v1243_v5 = vrot.slane %v4767_v38, 1  ;;  %v1245_v41 = vrot.slane %v4764_v27, 1  ;;  %v1280_v40 = vsel %vm1277_vm10, %v1278_v61, %v1279_v52  ;;  %v1289_v16 = vrot.slane %v4745_v21, 2 }
  0xac   : > { %v4791_v9 = vpop.permute.xlu1 %818  ;;  %v814_v32 = vpop.permute.xlu0 %813  ;;  %3471 = vrot.lane.b32.xlu1 %v3470_v51, %s4140_s30  ;;  %v4812_v19 = vsel %vm1277_vm10, %v1279_v52, %v1281_v28  ;;  %v4815_v42 = vsel %vm1277_vm10, %v1283_v6, %v1285_v43  ;;  %v1293_v15 = vrot.slane %v4767_v38, 2  ;;  %v1109_v51 = vmul.f32 0.2, %v4579_v56 }
  0xad   : > { %v1244_v12 = vsel %vm1227_vm13, %v1241_v46, %v1243_v5  ;;  %v1246_v13 = vsel %vm1227_vm13, %v1243_v5, %v1245_v41  ;;  %v1108_v46 = vmul.f32 0.2, %v4573_v1  ;;  %v1284_v52 = vsel %vm1277_vm10, %v1281_v28, %v1283_v6 }
  0xae   : > { %v3475_v44 = vpack.i.bf16 %v1244_v12, %v1242_v34  ;;  %v3480_v2 = vpack.i.bf16 %v1245_v41, %v1246_v13  ;;  %v1287_v5 = vrot.slane %v4703_v36, 2  ;;  %v1291_v41 = vrot.slane %v4742_v47, 2 }
  0xaf   : > { %v3485_v61 = vpack.i.bf16 %v4812_v19, %v1280_v40  ;;  %v3490_v34 = vpack.i.bf16 %v4815_v42, %v1284_v52  ;;  %v1110_v12 = vmul.f32 0.2, %v4582_v29  ;;  %v4836_v13 = vmul.f32 %v814_v32, %v4646_v63 }
  0xb0   : > { %v824_v18 = vpop.permute.xlu0 %823  ;;  %v4819_v30 = vpop.permute.xlu1 %952  ;;  %3476 = vrot.lane.b32.xlu0 %v3475_v44, %s4140_s30  ;;  %3481 = vrot.lane.b32.xlu1 %v3480_v2, %s4140_s30  ;;  %v4839_v44 = vsel %vm1277_vm10, %v1287_v5, %v1289_v16  ;;  %v4842_v28 = vsel %vm1277_vm10, %v1291_v41, %v1293_v15  ;;  %v1295_v6 = vrot.slane %v4764_v27, 2  ;;  %v4854_v63 = vsel %vm1094_vm2, %v4570_v23, %v1107_v39 }
  0xb1   : > { %7283 = vst [vmem:[#allocation18_spill] sm:$0xff] %v4854_v63  ;;  %v4859_v32 = vsel %vm1095_vm3, %v4573_v1, %v1108_v46  ;;  %v4864_v0 = vsel %vm1096_vm4, %v4579_v56, %v1109_v51  ;;  %v1367_v1 = vrot.slane %v4705_v3, 3  ;;  %v4876_v46 = vsel %vm1097_vm5, %v4582_v29, %v1110_v12 }
  0xb2   : > { %7284 = vst [vmem:[#allocation19_spill] sm:$0xff] %v4859_v32  ;;  %7285 = vst [vmem:[#allocation20_spill] sm:$0xff] %v4864_v0  ;;  %v4879_v56 = vsel %vm1277_vm10, %v1293_v15, %v1295_v6  ;;  %v1369_v51 = vrot.slane %v4703_v36, 3  ;;  %v1414_v29 = vrot.slane %v4685_v33, 4  ;;  %v1415_v15 = vrot.slane %v4663_v14, 4 }
  0xb3   : > { %7286 = vst [vmem:[#allocation21_spill] sm:$0xff] %v4876_v46  ;;  %v3510_v49 = vpack.i.bf16 %v1284_v52, %v4812_v19  ;;  %v4905_v0 = vsel %vm1361_vm6, %v1365_v50, %v1367_v1  ;;  %v1373_v12 = vrot.slane %v4742_v47, 3  ;;  %v4910_v19 = vmul.f32 %v4791_v9, %v4640_v59 }
  0xb4   : > { %v4845_v2 = vpop.permute.xlu0 %957  ;;  %v4847_v40 = vpop.permute.xlu1 %962  ;;  %3486 = vrot.lane.b32.xlu0 %v3485_v61, %s4141_s14  ;;  %3491 = vrot.lane.b32.xlu1 %v3490_v34, %s4141_s14  ;;  %v1288_v61 = vsel %vm1277_vm10, %v1285_v43, %v1287_v5  ;;  %v1292_v34 = vsel %vm1277_vm10, %v1289_v16, %v1291_v41  ;;  %v1328_v43 = vrot.slane %v4836_v13, 2  ;;  %v1363_v16 = vrot.slane %v4663_v14, 3 }
  0xb5   : > { %v3495_v23 = vpack.i.bf16 %v4839_v44, %v1288_v61  ;;  %v3500_v39 = vpack.i.bf16 %v4842_v28, %v1292_v34  ;;  %v3515_v33 = vpack.i.bf16 %v1288_v61, %v4815_v42  ;;  %v4914_v52 = vsel %vm1361_vm6, %v1367_v1, %v1369_v51 }
  0xb6   : > { %v4896_v58 = vsel %vm1361_vm6, %v1362_v17, %v1363_v16  ;;  %v4899_v46 = vsel %vm1361_vm6, %v1363_v16, %v1365_v50  ;;  %v1329_v17 = vsel %vm1277_vm10, %v1295_v6, %v1328_v43  ;;  %v1375_v16 = vrot.slane %v4767_v38, 3 }
  0xb7   : > { %v4918_v45 = vmul.f32 %v824_v18, %v4654_v11  ;;  %v3520_v59 = vpack.i.bf16 %v1292_v34, %v4839_v44  ;;  %v3535_v9 = vpack.i.bf16 %v4899_v46, %v4896_v58  ;;  %v4932_v11 = vmul.f32 %v4819_v30, %v4657_v8 }
  0xb8   : > { %v4884_v5 = vpop.permute.xlu0 %967  ;;  %v4886_v41 = vpop.permute.xlu1 %972  ;;  %3496 = vrot.lane.b32.xlu0 %v3495_v23, %s4141_s14  ;;  %3501 = vrot.lane.b32.xlu1 %v3500_v39, %s4141_s14  ;;  %v1371_v23 = vrot.slane %v4745_v21, 3  ;;  %v3505_v39 = vpack.i.bf16 %v1295_v6, %v4879_v56  ;;  %v1417_v6 = vrot.slane %v4683_v25, 4  ;;  %v3525_v18 = vpack.i.bf16 %v4879_v56, %v4842_v28 }
  0xb9   : > { %v1377_v1 = vrot.slane %v4764_v27, 3  ;;  %v3540_v44 = vpack.i.bf16 %v4914_v52, %v4905_v0  ;;  %v1379_v34 = vrot.slane %v4836_v13, 3  ;;  %v4947_v8 = vsel %vm1361_vm6, %v1373_v12, %v1375_v16 }
  0xba   : > { %v4937_v61 = vsel %vm1361_vm6, %v1369_v51, %v1371_v23  ;;  %v4943_v58 = vsel %vm1361_vm6, %v1371_v23, %v1373_v12  ;;  %v1381_v30 = vrot.slane %v4910_v19, 3  ;;  %v1419_v28 = vrot.slane %v4705_v3, 4 }
  0xbb   : > { %v1421_v46 = vrot.slane %v4703_v36, 4  ;;  %v1466_v56 = vrot.slane %v4918_v45, 4  ;;  %v1423_v12 = vrot.slane %v4745_v21, 4  ;;  %v1425_v23 = vrot.slane %v4742_v47, 4 }
  0xbc   : > { %v4920_v42 = vpop.permute.xlu0 %977  ;;  %v4922_v50 = vpop.permute.xlu1 %982  ;;  %3506 = vrot.lane.b32.xlu0 %v3505_v39, %s4141_s14  ;;  %3511 = vrot.lane.b32.xlu1 %v3510_v49, %s7249_s27  ;;  %v3530_v49 = vpack.i.bf16 %v1328_v43, %v1329_v17  ;;  %v3545_v17 = vpack.i.bf16 %v4943_v58, %v4937_v61  ;;  %v1378_v52 = vsel %vm1361_vm6, %v1375_v16, %v1377_v1  ;;  %v1427_v43 = vrot.slane %v4767_v38, 4 }
  0xbd   : > { %v4969_v32 = vmul.f32 %v4845_v2, %v4660_v7  ;;  %v4978_v63 = vsel %vm1413_vm7, %v1415_v15, %v1417_v6  ;;  %v4981_v39 = vsel %vm1361_vm6, %v1379_v34, %v1381_v30  ;;  %v4984_v16 = vsel %vm1413_vm7, %v1417_v6, %v1419_v28 }
  0xbe   : > { %v4987_v61 = vsel %vm1413_vm7, %v1419_v28, %v1421_v46  ;;  %v1429_v7 = vrot.slane %v4764_v27, 4  ;;  %v4992_v2 = vmul.f32 %v4847_v40, %v4670_v20  ;;  %v5002_v6 = vsel %vm1413_vm7, %v1423_v12, %v1425_v23 }
  0xbf   : > { %7287 = vst [vmem:[#allocation22_spill] sm:$0xff] %v4969_v32  ;;  %v5011_v40 = vsel %vm1413_vm7, %v1425_v23, %v1427_v43  ;;  %v5020_v30 = vmul.f32 %v4886_v41, %v4677_v54  ;;  %v1642_v41 = vrot.slane %v4932_v11, 1  ;;  %vm1931_vm2 = vcmask 195584  }
  0xc0   : > { %v4954_v51 = vpop.permute.xlu0 %987  ;;  %v4956_v0 = vpop.permute.xlu1 %992  ;;  %3516 = vrot.lane.b32.xlu0 %v3515_v33, %s7249_s27  ;;  %3521 = vrot.lane.b32.xlu1 %v3520_v59, %s7249_s27  ;;  %v4972_v33 = vsel %vm1361_vm6, %v1377_v1, %v1379_v34  ;;  %v4975_v59 = vsel %vm1413_vm7, %v1414_v29, %v1415_v15  ;;  %7288 = vst [vmem:[#allocation23_spill] sm:$0xff] %v4992_v2  ;;  %v1431_v1 = vrot.slane %v4836_v13, 4  ;;  %vm1942_vm3 = vcmask 261120  }
  0xc1   : > { %v4999_v15 = vsel %vm1413_vm7, %v1421_v46, %v1423_v12  ;;  %v3550_v34 = vpack.i.bf16 %v1378_v52, %v4947_v8  ;;  %v3560_v20 = vpack.i.bf16 %v4978_v63, %v4975_v59  ;;  %7291 = vst [vmem:[#allocation26_spill] sm:$0xff] %v5020_v30  ;;  %v3555_v28 = vpack.i.bf16 %v4981_v39, %v4972_v33 }
  0xc2   : > { %v5029_v12 = vsel %vm1413_vm7, %v1427_v43, %v1429_v7  ;;  %v5039_v54 = vsel %vm1413_vm7, %v1429_v7, %v1431_v1  ;;  %v1502_v39 = vrot.slane %v4705_v3, 5  ;;  %v5048_v52 = vmul.f32 %v4920_v42, %v4680_v24 }
  0xc3   : > { %v5059_v59 = vmul.f32 %v4922_v50, %v4690_v35  ;;  %v1504_v7 = vrot.slane %v4703_v36, 5  ;;  %v1510_v43 = vrot.slane %v4767_v38, 5  ;;  %v1508_v50 = vrot.slane %v4742_v47, 5 }
  0xc4   : > { %v4994_v29 = vpop.permute.xlu0 %997  ;;  %3526 = vrot.lane.b32.xlu0 %v3525_v18, %s7249_s27  ;;  %3531 = vrot.lane.b32.xlu1 %v3530_v49, %s7249_s27  ;;  %v5005_v58 = vpop.permute.xlu1 %1002  ;;  %v1433_v18 = vrot.slane %v4910_v19, 4  ;;  %v5016_v49 = vmul.f32 %v4884_v5, %v4674_v48  ;;  %v1500_v5 = vrot.slane %v4683_v25, 5  ;;  %7293 = vst [vmem:[#allocation28_spill] sm:$0xff] %v5048_v52  ;;  %v5098_v46 = vmul.f32 %v4956_v0, %v4717_v57 }
  0xc5   : > { %7289 = vst [vmem:[#allocation24_spill] sm:$0xff] %v5005_v58  ;;  %7294 = vst [vmem:[#allocation29_spill] sm:$0xff] %v5059_v59  ;;  %v5101_v48 = vsel %vm1498_vm8, %v1502_v39, %v1504_v7  ;;  %v1558_v58 = vrot.slane %v4745_v21, 6  ;;  %v1643_v57 = vrot.slane %v4969_v32, 1  ;;  %vm1953_vm4 = vcmask 326656  }
  0xc6   : > { %7290 = vst [vmem:[#allocation25_spill] sm:$0xff] %v5016_v49  ;;  %v5051_v33 = vsel %vm1413_vm7, %v1431_v1, %v1433_v18  ;;  %v5085_v1 = vsel %vm1498_vm8, %v1500_v5, %v1502_v39  ;;  %7298 = vst [vmem:[#allocation32_spill] sm:$0xff] %v5098_v46  ;;  %v1516_v39 = vrot.slane %v4910_v19, 5  ;;  %v5156_v46 = vmul.f32 %v4994_v29, %v4724_v60 }
  0xc7   : > { %v3580_v24 = vpack.i.bf16 %v5051_v33, %v5039_v54  ;;  %v7305_v29 = vrot.slane %v4663_v14, 6  ;;  %v7156_v60 = vrot.slane %v4992_v2, 2  ;;  %vm1964_vm5 = vcmask 392192  }
  0xc8   : > { %v5034_v23 = vpop.permute.xlu0 %1007  ;;  %3536 = vrot.lane.b32.xlu0 %v3535_v9, %s4143_s17  ;;  %3541 = vrot.lane.b32.xlu1 %v3540_v44, %s4143_s17  ;;  %v5054_v9 = vsel %vm1413_vm7, %v1433_v18, %v1466_v56  ;;  %v1506_v44 = vrot.slane %v4745_v21, 5  ;;  %v5065_v42 = vpop.permute.xlu1 %1012  ;;  %v7296_v18 = vrot.slane %v4663_v14, 5  ;;  %7302 = vst [vmem:[#allocation34_spill] sm:$0xff] %v5156_v46 }
  0xc9   : > { %7292 = vst [vmem:[#allocation27_spill] sm:$0xff] %v5034_v23  ;;  %7295 = vst [vmem:[#allocation30_spill] sm:$0xff] %v5065_v42 }
  0xca   : > { %v5074_v35 = vsel %vm1498_vm8, %v7296_v18, %v1500_v5  ;;  %v5089_v18 = vmul.f32 %v4954_v51, %v4712_v26  ;;  %v5092_v56 = vsel %vm1498_vm8, %v1504_v7, %v1506_v44  ;;  %v5104_v5 = vsel %vm1498_vm8, %v1508_v50, %v1510_v43 }
  0xcb   : > { %v1554_v26 = vrot.slane %v4705_v3, 6  ;;  %v5110_v42 = vsel %vm1498_vm8, %v1506_v44, %v1508_v50  ;;  %v1552_v7 = vrot.slane %v4683_v25, 6  ;;  %v7300_v3 = vrot.slane %v4918_v45, 5 }
  0xcc   : > { %3546 = vrot.lane.b32.xlu0 %v3545_v17, %s4143_s17  ;;  %3551 = vrot.lane.b32.xlu1 %v3550_v34, %s4143_s17  ;;  %7297 = vst [vmem:[#allocation31_spill] sm:$0xff] %v5089_v18  ;;  %v1512_v17 = vrot.slane %v4764_v27, 5  ;;  %v1514_v34 = vrot.slane %v4836_v13, 5  ;;  %v1142_v8 = vpop.permute.xlu0 %1141  ;;  %v1147_v44 = vpop.permute.xlu1 %1146  ;;  %v7301_v50 = vrot.slane %v4992_v2, 1 }
  0xcd   : > { %v5136_v25 = vsel %vm1498_vm8, %v1516_v39, %v7300_v3  ;;  %v5139_v51 = vsel %vm1550_vm9, %v1552_v7, %v1554_v26  ;;  %v1691_v3 = vrot.slane %v4932_v11, 2 }
  0xce   : > { %v5124_v21 = vsel %vm1498_vm8, %v1512_v17, %v1514_v34  ;;  %v5131_v0 = vsel %vm1498_vm8, %v1510_v43, %v1512_v17  ;;  %v5144_v23 = vsel %vm1227_vm13, %v1643_v57, %v7301_v50  ;;  %v1562_v43 = vrot.slane %v4767_v38, 6 }
  0xcf   : > { %v7304_v50 = vpack.i.bf16 %v5002_v6, %v4999_v15  ;;  %v5169_v38 = vsel %vm1498_vm8, %v1514_v34, %v1516_v39  ;;  %v1564_v39 = vrot.slane %v4764_v27, 6  ;;  %v5189_v17 = vmul.f32 %v1142_v8, %v4733_v62 }
  0xd0   : > { %3556 = vrot.lane.b32.xlu0 %v3555_v28, %s4143_s17  ;;  %3561 = vrot.lane.b32.xlu1 %v3560_v20, %s4144_s28  ;;  %v1556_v28 = vrot.slane %v4703_v36, 6  ;;  %v5128_v20 = vsel %vm1227_vm13, %v1642_v41, %v1643_v57  ;;  %v1560_v41 = vrot.slane %v4742_v47, 6  ;;  %v1152_v55 = vpop.permute.xlu0 %1151  ;;  %v7303_v57 = vpack.i.bf16 %v4987_v61, %v4984_v16 }
  0xd1   : > { %7299 = vst [vmem:[#allocation33_spill] sm:$0xff] %v5128_v20  ;;  %v5176_v47 = vsel %vm1550_vm9, %v7305_v29, %v1552_v7  ;;  %v1692_v20 = vrot.slane %v4969_v32, 2  ;;  %v1157_v7 = vpop.permute.xlu1 %1156  ;;  %v7306_v34 = vpack.i.bf16 %v5029_v12, %v5011_v40  ;;  %v1568_v62 = vrot.slane %v4910_v19, 6 }
  0xd2   : > { %v5147_v36 = vsel %vm1550_vm9, %v1556_v28, %v1558_v58  ;;  %v5192_v29 = vsel %vm1550_vm9, %v1558_v58, %v1560_v41  ;;  %v5223_v19 = vmul.f32 %v1157_v7, %v4775_v53  ;;  %v7309_v53 = vpack.i.bf16 %v4984_v16, %v4978_v63 }
  0xd3   : > { %v5208_v58 = vsel %vm1277_vm10, %v1691_v3, %v1692_v20  ;;  %v5213_v8 = vsel %vm1277_vm10, %v1692_v20, %v7156_v60  ;;  %v1700_v3 = vrot.slane %v5048_v52, 2  ;;  %v7157_v20 = vrot.slane %v5089_v18, 2 }
  0xd4   : > { %3566 = vrot.lane.b32.xlu0 %v7303_v57, %s4144_s28  ;;  %3571 = vrot.lane.b32.xlu1 %v7304_v50, %s4144_s28  ;;  %v5179_v57 = vsel %vm1550_vm9, %v1554_v26, %v1556_v28  ;;  %v5195_v26 = vsel %vm1550_vm9, %v1560_v41, %v1562_v43  ;;  %v1566_v28 = vrot.slane %v4836_v13, 6  ;;  %v5199_v50 = vmul.f32 %v1147_v44, %v4738_v37  ;;  %v1162_v41 = vpop.permute.xlu0 %1161 }
  0xd5   : > { %v5216_v37 = vmul.f32 %v1152_v55, %v4750_v4  ;;  %7308 = vst [vmem:[#allocation36_spill] sm:$0xff] %v5223_v19  ;;  %v5231_v55 = vsel %vm1550_vm9, %v1562_v43, %v1564_v39  ;;  %v2123_v60 = vrot.slane %v5189_v17, 3  ;;  %v7310_v7 = vpack.i.bf16 %v4999_v15, %v4987_v61 }
  0xd6   : > { %v5234_v13 = vsel %vm1550_vm9, %v1564_v39, %v1566_v28  ;;  %v2124_v44 = vrot.slane %v5199_v50, 3  ;;  %v2227_v63 = vrot.slane %v5189_v17, 5  ;;  %v5259_v16 = vmul.f32 %v1162_v41, %v4780_v22 }
  0xd7   : > { %7307 = vst [vmem:[#allocation35_spill] sm:$0xff] %v5216_v37  ;;  %v7314_v61 = vrot.slane %v5016_v49, 2  ;;  %v2175_v22 = vrot.slane %v5189_v17, 4  ;;  %v2176_v41 = vrot.slane %v5199_v50, 4 }
  0xd8   : > { %3576 = vrot.lane.b32.xlu0 %v7306_v34, %s4144_s28  ;;  %3581 = vrot.lane.b32.xlu1 %v3580_v24, %s4144_s28  ;;  %v1698_v24 = vrot.slane %v5020_v30, 2  ;;  %v1702_v34 = vrot.slane %v5059_v59, 2 }
  0xda   : > { %v5246_v4 = vsel %vm1277_vm10, %v1700_v3, %v1702_v34  ;;  %v5251_v43 = vsel %vm1277_vm10, %v1702_v34, %v7157_v20  ;;  %v5254_v39 = vsel %vm1277_vm10, %v1698_v24, %v1700_v3  ;;  %v5264_v15 = vsel %vm1277_vm10, %v7314_v61, %v1698_v24 }
  0xdb   : > { %7311 = vst [vmem:[#allocation37_spill] sm:$0xff] %v5246_v4  ;;  %7312 = vst [vmem:[#allocation38_spill] sm:$0xff] %v5251_v43  ;;  %v2125_v3 = vsel %vm1361_vm6, %v2123_v60, %v2124_v44  ;;  %v7159_v20 = vrot.slane %v5223_v19, 3  ;;  %v2178_v24 = vrot.slane %v5216_v37, 4  ;;  %v7316_v61 = vpack.i.bf16 %v5011_v40, %v5002_v6  ;;  %v1167_v6 = vpop.permute.xlu1 %1166  ;;  %v1172_v40 = vpop.permute.xlu0 %1171 }
  0xdc   : > { %3586 = vrot.lane.b32.xlu0 %v7309_v53, %s4145_s12  ;;  %3591 = vrot.lane.b32.xlu1 %v7310_v7, %s4145_s12  ;;  %7313 = vst [vmem:[#allocation39_spill] sm:$0xff] %v5254_v39  ;;  %7315 = vst [vmem:[#allocation40_spill] sm:$0xff] %v5264_v15  ;;  %v2126_v7 = vrot.slane %v5216_v37, 3  ;;  %v5273_v27 = vpack.i.bf16 %v2125_v3, %v2123_v60  ;;  %v7317_v53 = vpack.i.bf16 %v5039_v54, %v5029_v12 }
  0xdd   : > { %v7161_v60 = vrot.slane %v5223_v19, 4  ;;  %v5296_v3 = vrot.slane %v5199_v50, 5  ;;  %v5301_v54 = vsel %vm1550_vm9, %v1566_v28, %v1568_v62  ;;  %v7318_v28 = vrot.slane %v4918_v45, 6 }
  0xde   : > { %v5287_v34 = vsel %vm1361_vm6, %v2124_v44, %v2126_v7  ;;  %v5292_v17 = vsel %vm1361_vm6, %v2126_v7, %v7159_v20  ;;  %v5329_v44 = vmul.f32 %v1167_v6, %v4788_v31  ;;  %v7320_v45 = vpack.i.bf16 %v5085_v1, %v5074_v35 }
  0xdf   : > { %v5314_v20 = vsel %vm1413_vm7, %v2178_v24, %v7161_v60  ;;  %v2229_v12 = vsel %vm1498_vm8, %v2227_v63, %v5296_v3  ;;  %v5321_v14 = vsel %vm1550_vm9, %v1568_v62, %v7318_v28  ;;  %v2319_v6 = vrot.slane %v5223_v19, 6  ;;  %v1182_v62 = vpop.permute.xlu0 %1181 }
  0xe0   : > { %3596 = vrot.lane.b32.xlu0 %v7316_v61, %s4145_s12  ;;  %3601 = vrot.lane.b32.xlu1 %v7317_v53, %s4145_s12  ;;  %v2177_v53 = vsel %vm1413_vm7, %v2175_v22, %v2176_v41  ;;  %v5309_v61 = vsel %vm1413_vm7, %v2176_v41, %v2178_v24  ;;  %v2230_v41 = vrot.slane %v5216_v37, 5  ;;  %v7319_v24 = vpack.i.bf16 %v5054_v9, %v5051_v33 }
  0xe1   : > { %v5306_v7 = vpack.i.bf16 %v2177_v53, %v2175_v22  ;;  %v5325_v53 = vpack.i.bf16 %v2229_v12, %v2227_v63  ;;  %v2232_v63 = vrot.slane %v5223_v19, 5  ;;  %v7162_v12 = vrot.slane %v5259_v16, 5  ;;  %v1177_v22 = vpop.permute.xlu1 %1176 }
  0xe2   : > { %v5345_v31 = vsel %vm1498_vm8, %v5296_v3, %v2230_v41  ;;  %v2316_v33 = vrot.slane %v5199_v50, 6  ;;  %v2317_v9 = vrot.slane %v5216_v37, 6  ;;  %v2371_v35 = vrot.slane %v5199_v50, 7 }
  0xe3   : > { %v5351_v1 = vsel %vm1498_vm8, %v2230_v41, %v2232_v63  ;;  %v5358_v28 = vsel %vm1498_vm8, %v2232_v63, %v7162_v12  ;;  %v7321_v63 = vpack.i.bf16 %v5092_v56, %v5101_v48  ;;  %v2374_v56 = vrot.slane %v5223_v19, 7 }
  0xe4   : > { %3606 = vrot.lane.b32.xlu0 %v7319_v24, %s4145_s12  ;;  %3611 = vrot.lane.b32.xlu1 %v7320_v45, %s4146_s29  ;;  %v7163_v24 = vrot.slane %v5259_v16, 6  ;;  %v5362_v45 = vmul.f32 %v1172_v40, %v4798_v10  ;;  %v7322_v10 = vpack.i.bf16 %v5104_v5, %v5110_v42  ;;  %v2318_v40 = vsel %vm1550_vm9, %v2316_v33, %v2317_v9  ;;  %v7323_v5 = vld [vmem:[#allocation17_spill] sm:$0xff] }
  0xe5   : > { %v5380_v60 = vsel %vm1550_vm9, %v2317_v9, %v2319_v6  ;;  %v5388_v12 = vpack.i.bf16 %v2318_v40, %v2316_v33  ;;  %v5393_v42 = vrot.slane %v5216_v37, 7  ;;  %v5397_v9 = vmul.f32 %v1177_v22, %v7323_v5 }
  0xe6   : > { %v5385_v41 = vsel %vm1550_vm9, %v2319_v6, %v7163_v24  ;;  %v2376_v6 = vrot.slane %v5259_v16, 7  ;;  %v7327_v5 = vpack.i.bf16 %v5136_v25, %v5169_v38  ;;  %v3655_v22 = vpack.i.bf16 %v5321_v14, %v5301_v54 }
  0xe7   : > { %7324 = vst [vmem:[#allocation17_spill] sm:$0xff] %v5397_v9  ;;  %v2373_v33 = vsel %vm2370_vm11, %v2371_v35, %v5393_v42  ;;  %v5408_v40 = vsel %vm2370_vm11, %v5393_v42, %v2374_v56  ;;  %v1647_v50 = vrot.slane %v5016_v49, 1  ;;  %v1649_v38 = vrot.slane %v5020_v30, 1 }
  0xe8   : > { %3616 = vrot.lane.b32.xlu0 %v7321_v63, %s4146_s29  ;;  %3621 = vrot.lane.b32.xlu1 %v7322_v10, %s4146_s29  ;;  %v7325_v63 = vld [vmem:[#allocation18_spill] sm:$0xff]  ;;  %v5425_v24 = vsel %vm2370_vm11, %v2374_v56, %v2376_v6  ;;  %v7164_v56 = vrot.slane %v5259_v16, 3  ;;  %v2134_v14 = vrot.slane %v5362_v45, 3  ;;  %v2136_v54 = vrot.slane %v5397_v9, 3 }
  0xe9   : > { %v5400_v10 = vmul.f32 %v1182_v62, %v7325_v63  ;;  %v7326_v62 = vpack.i.bf16 %v5124_v21, %v5131_v0  ;;  %v5422_v63 = vpack.i.bf16 %v2373_v33, %v2371_v35  ;;  %v7328_v0 = vrot.slane %v5329_v44, 7 }
  0xea   : > { %v7331_v35 = vrot.slane %v5223_v19, 3  ;;  %v2495_v21 = vrot.slane %v5223_v19, 1  ;;  %v2499_v33 = vrot.slane %v5329_v44, 1 }
  0xeb   : > { %v5437_v25 = vsel %vm2370_vm11, %v2376_v6, %v7328_v0  ;;  %v7329_v6 = vpack.i.bf16 %v5139_v51, %v5176_v47  ;;  %v7330_v0 = vpack.i.bf16 %v5147_v36, %v5179_v57  ;;  %v7333_v47 = vrot.slane %v5329_v44, 3 }
  0xec   : > { %3626 = vrot.lane.b32.xlu0 %v7326_v62, %s4146_s29  ;;  %3631 = vrot.lane.b32.xlu1 %v7327_v5, %s4146_s29  ;;  %v2494_v5 = vrot.slane %v5216_v37, 1  ;;  %v5461_v48 = vsel %vm1361_vm6, %v7331_v35, %v7164_v56  ;;  %v2497_v62 = vrot.slane %v5259_v16, 1  ;;  %v5472_v36 = vsel %vm1361_vm6, %v2134_v14, %v2136_v54 }
  0xed   : > { %7332 = vst [vmem:[#allocation18_spill] sm:$0xff] %v5461_v48  ;;  %v5469_v51 = vsel %vm1361_vm6, %v7333_v47, %v2134_v14  ;;  %7335 = vst [vmem:[#allocation42_spill] sm:$0xff] %v5472_v36  ;;  %v7336_v57 = vrot.slane %v5400_v10, 3  ;;  %v7168_v35 = vrot.slane %v5362_v45, 1  ;;  %v1187_v14 = vpop.permute.xlu1 %1186  ;;  %v1651_v37 = vrot.slane %v5048_v52, 1 }
  0xee   : > { %7334 = vst [vmem:[#allocation41_spill] sm:$0xff] %v5469_v51  ;;  %v5485_v43 = vsel %vm1227_vm13, %v2494_v5, %v2495_v21  ;;  %v5488_v47 = vsel %vm1227_vm13, %v2495_v21, %v2497_v62  ;;  %v7342_v5 = vpack.i.bf16 %v5195_v26, %v5192_v29  ;;  %v7343_v21 = vpack.i.bf16 %v5234_v13, %v5231_v55  ;;  %v7345_v55 = vld [vmem:[#allocation19_spill] sm:$0xff] }
  0xef   : > { %7338 = vst [vmem:[#allocation44_spill] sm:$0xff] %v5485_v43  ;;  %7339 = vst [vmem:[#allocation45_spill] sm:$0xff] %v5488_v47  ;;  %v1653_v29 = vrot.slane %v5059_v59, 1  ;;  %v2188_v26 = vrot.slane %v5397_v9, 4  ;;  %v2238_v13 = vrot.slane %v5362_v45, 5 }
  0xf0   : > { %3636 = vrot.lane.b32.xlu0 %v7329_v6, %s4147_s15  ;;  %3641 = vrot.lane.b32.xlu1 %v7330_v0, %s4147_s15  ;;  %v5477_v6 = vsel %vm1361_vm6, %v2136_v54, %v7336_v57  ;;  %v5494_v57 = vsel %vm1227_vm13, %v2497_v62, %v2499_v33  ;;  %v5499_v0 = vsel %vm1227_vm13, %v2499_v33, %v7168_v35  ;;  %v7172_v62 = vrot.slane %v5259_v16, 4 }
  0xf1   : > { %7337 = vst [vmem:[#allocation43_spill] sm:$0xff] %v5477_v6  ;;  %7340 = vst [vmem:[#allocation46_spill] sm:$0xff] %v5494_v57  ;;  %v2186_v33 = vrot.slane %v5362_v45, 4  ;;  %v7344_v35 = vrot.slane %v4992_v2, 1  ;;  %v7346_v54 = vrot.slane %v5223_v19, 4  ;;  %v7396_v19 = vrot.slane %v5016_v49, 2 }
  0xf2   : > { %7341 = vst [vmem:[#allocation47_spill] sm:$0xff] %v5499_v0  ;;  %v2236_v0 = vrot.slane %v5329_v44, 5 }
  0xf3   : > { %v1648_v43 = vsel %vm1227_vm13, %v7344_v35, %v1647_v50  ;;  %v5529_v56 = vsel %vm1413_vm7, %v7346_v54, %v7172_v62  ;;  %v7348_v35 = vrot.slane %v5329_v44, 4  ;;  %v7353_v54 = vpack.i.bf16 %v4969_v32, %v4932_v11  ;;  %v1197_v32 = vpop.permute.xlu1 %1196 }
  0xf4   : > { %3646 = vrot.lane.b32.xlu0 %v7342_v5, %s4147_s15  ;;  %3651 = vrot.lane.b32.xlu1 %v7343_v21, %s4147_s15  ;;  %v5521_v5 = vmul.f32 %v1187_v14, %v7345_v55  ;;  %v1650_v21 = vsel %vm1227_vm13, %v1647_v50, %v1649_v38  ;;  %7347 = vst [vmem:[#allocation19_spill] sm:$0xff] %v5529_v56  ;;  %v7351_v50 = vrot.slane %v5400_v10, 4  ;;  %v1655_v62 = vrot.slane %v5089_v18, 1 }
  0xf5   : > { %v5534_v57 = vsel %vm1413_vm7, %v7348_v35, %v2186_v33  ;;  %v5539_v14 = vsel %vm1413_vm7, %v2186_v33, %v2188_v26  ;;  %v1652_v35 = vsel %vm1227_vm13, %v1649_v38, %v1651_v37  ;;  %v3675_v11 = vpack.i.bf16 %v5089_v18, %v5059_v59 }
  0xf6   : > { %7349 = vst [vmem:[#allocation48_spill] sm:$0xff] %v5534_v57  ;;  %7350 = vst [vmem:[#allocation49_spill] sm:$0xff] %v5539_v14  ;;  %v5544_v55 = vsel %vm1413_vm7, %v2188_v26, %v7351_v50  ;;  %v2240_v26 = vrot.slane %v5397_v9, 5  ;;  %v1654_v50 = vsel %vm1227_vm13, %v1651_v37, %v1653_v29  ;;  %v2242_v57 = vrot.slane %v5400_v10, 5  ;;  %v1192_v14 = vpop.permute.xlu0 %1191 }
  0xf7   : > { %7352 = vst [vmem:[#allocation50_spill] sm:$0xff] %v5544_v55  ;;  %v7358_v55 = vrot.slane %v5259_v16, 5  ;;  %v5582_v18 = vrot.slane %v5521_v5, 5  ;;  %v7361_v37 = vpack.i.bf16 %v5048_v52, %v5020_v30  ;;  %v5594_v47 = vpack.i.bf16 %v1654_v50, %v1652_v35  ;;  %v7365_v35 = vld [vmem:[#allocation20_spill] sm:$0xff]  ;;  %v7366_v52 = vld [vmem:[#allocation21_spill] sm:$0xff] }
  0xf8   : > { %3656 = vrot.lane.b32.xlu0 %v3655_v22, %s4147_s15  ;;  %3661 = vrot.lane.b32.xlu1 %v7353_v54, %s4148_s26  ;;  %v7354_v22 = vld [vmem:[#allocation32_spill] sm:$0xff]  ;;  %v5566_v54 = vsel %vm1498_vm8, %v2236_v0, %v2238_v13  ;;  %v5569_v33 = vsel %vm1498_vm8, %v2238_v13, %v2240_v26  ;;  %v5574_v56 = vsel %vm1498_vm8, %v2240_v26, %v2242_v57 }
  0xf9   : > { %v3680_v38 = vpack.i.bf16 %v5156_v46, %v7354_v22  ;;  %7355 = vst [vmem:[#allocation51_spill] sm:$0xff] %v5566_v54  ;;  %7356 = vst [vmem:[#allocation52_spill] sm:$0xff] %v5569_v33  ;;  %v5579_v59 = vsel %vm1498_vm8, %v7358_v55, %v2236_v0  ;;  %v7360_v13 = vpack.i.bf16 %v5016_v49, %v4992_v2  ;;  %v5597_v0 = vrot.slane %v5156_v46, 1 }
  0xfa   : > { %7357 = vst [vmem:[#allocation53_spill] sm:$0xff] %v5574_v56  ;;  %7359 = vst [vmem:[#allocation54_spill] sm:$0xff] %v5582_v18  ;;  %v5592_v26 = vpack.i.bf16 %v1650_v21, %v1648_v43  ;;  %v7362_v36 = vrot.slane %v7354_v22, 1  ;;  %v5613_v21 = vsel %vm1498_vm8, %v2242_v57, %v5582_v18  ;;  %v5616_v50 = vmul.f32 %v1192_v14, %v7365_v35  ;;  %v7377_v56 = vld [vmem:[#allocation6_spill] sm:$0xff] }
  0xfb   : > { %v7190_v55 = vrot.slane %v5329_v44, 6  ;;  %v2329_v43 = vrot.slane %v5400_v10, 6  ;;  %v7368_v14 = vrot.slane %v5259_v16, 6  ;;  %vm1098_vm12 = vcmp.ge.f32.partialorder %v7377_v56, 0.0 }
  0xfc   : > { %3666 = vrot.lane.b32.xlu0 %v7360_v13, %s4148_s26  ;;  %3671 = vrot.lane.b32.xlu1 %v7361_v37, %s4148_s26  ;;  %v5604_v6 = vsel %vm1227_vm13, %v1655_v62, %v7362_v36  ;;  %v5607_v13 = vsel %vm1227_vm13, %v1653_v29, %v1655_v62  ;;  %v7195_v36 = vrot.slane %v5362_v45, 6  ;;  %v5623_v62 = vmul.f32 %v1197_v32, %v7366_v52 }
  0xfd   : > { %7363 = vst [vmem:[#allocation55_spill] sm:$0xff] %v5604_v6  ;;  %7364 = vst [vmem:[#allocation56_spill] sm:$0xff] %v5607_v13  ;;  %v2327_v29 = vrot.slane %v5397_v9, 6  ;;  %v5635_v35 = vsel %vm1550_vm9, %v7368_v14, %v7190_v55  ;;  %v2380_v32 = vrot.slane %v5362_v45, 7  ;;  %v2382_v52 = vrot.slane %v5397_v9, 7 }
  0xfe   : > { %7367 = vst [vmem:[#allocation20_spill] sm:$0xff] %v5623_v62  ;;  %7369 = vst [vmem:[#allocation21_spill] sm:$0xff] %v5635_v35  ;;  %v2384_v37 = vrot.slane %v5400_v10, 7  ;;  %v2386_v14 = vrot.slane %v5521_v5, 7  ;;  %v3700_v55 = vpack.i.bf16 %v5604_v6, %v5607_v13  ;;  %v7211_v35 = vrot.slane %v5521_v5, 3 }
  0xff   : > { %v5643_v57 = vsel %vm1550_vm9, %v7195_v36, %v2327_v29  ;;  %v5659_v46 = vsel %vm2370_vm11, %v2380_v32, %v2382_v52 }
 0x100   : > { %3676 = vrot.lane.b32.xlu0 %v3675_v11, %s4148_s26  ;;  %3681 = vrot.lane.b32.xlu1 %v3680_v38, %s4148_s26  ;;  %7370 = vst [vmem:[#allocation57_spill] sm:$0xff] %v5643_v57  ;;  %v5646_v11 = vsel %vm1550_vm9, %v2327_v29, %v2329_v43  ;;  %v7372_v38 = vrot.slane %v5521_v5, 6  ;;  %v5662_v36 = vsel %vm2370_vm11, %v2382_v52, %v2384_v37  ;;  %v7378_v52 = vld [vmem:[#allocation33_spill] sm:$0xff]  ;;  %v2511_v29 = vrot.slane %v5623_v62, 1 }
 0x101   : > { %7371 = vst [vmem:[#allocation58_spill] sm:$0xff] %v5646_v11  ;;  %7374 = vst [vmem:[#allocation60_spill] sm:$0xff] %v5662_v36  ;;  %v1111_v11 = vmul.f32 0.2, %v7377_v56  ;;  %v2503_v57 = vrot.slane %v5397_v9, 1  ;;  %v1775_v9 = vrot.slane %v4992_v2, 3 }
 0x102   : > { %v5651_v33 = vsel %vm1550_vm9, %v2329_v43, %v7372_v38  ;;  %v5667_v43 = vsel %vm2370_vm11, %v2384_v37, %v2386_v14  ;;  %v7376_v38 = vrot.slane %v5329_v44, 7  ;;  %v2507_v37 = vrot.slane %v5521_v5, 1 }
 0x103   : > { %7373 = vst [vmem:[#allocation59_spill] sm:$0xff] %v5651_v33  ;;  %7375 = vst [vmem:[#allocation61_spill] sm:$0xff] %v5667_v43  ;;  %v7379_v33 = vpack.i.bf16 %v5144_v23, %v7378_v52  ;;  %v7380_v23 = vrot.slane %v5616_v50, 7  ;;  %v2505_v52 = vrot.slane %v5400_v10, 1  ;;  %v2509_v43 = vrot.slane %v5616_v50, 1 }
 0x104   : > { %v5672_v30 = vsel %vm2370_vm11, %v7376_v38, %v2380_v32  ;;  %3691 = vrot.lane.b32.xlu1 %v5592_v26, %s7225_s16  ;;  %v7381_v32 = vrot.slane %v5329_v44, 3  ;;  %v7382_v38 = vrot.slane %v5259_v16, 3 }
 0x105   : > { %3686 = vrot.lane.b32.xlu0 %v7379_v33, %s7225_s16  ;;  %v5694_v33 = vsel %vm2370_vm11, %v2386_v14, %v7380_v23  ;;  %v7384_v14 = vrot.slane %v7354_v22, 1  ;;  %v5737_v48 = vsel %vm1227_vm13, %v2505_v52, %v2507_v37  ;;  %v5743_v51 = vsel %vm1227_vm13, %v2509_v43, %v2511_v29 }
 0x106   : > { %v5705_v36 = vsel %vm1361_vm6, %v7382_v38, %v7381_v32  ;;  %v7386_v32 = vrot.slane %v5400_v10, 3  ;;  %7390 = vst [vmem:[#allocation64_spill] sm:$0xff] %v5737_v48  ;;  %7392 = vst [vmem:[#allocation66_spill] sm:$0xff] %v5743_v51  ;;  %v7393_v22 = vrot.slane %v5329_v44, 4 }
 0x107   : > { %7383 = vst [vmem:[#allocation6_spill] sm:$0xff] %v5705_v36  ;;  %v5713_v23 = vsel %vm1227_vm13, %v7384_v14, %v5597_v0  ;;  %v7388_v14 = vrot.slane %v5362_v45, 1  ;;  %v7394_v36 = vrot.slane %v5259_v16, 4 }
 0x108   : > { %7385 = vst [vmem:[#allocation33_spill] sm:$0xff] %v5713_v23  ;;  %3701 = vrot.lane.b32.xlu1 %v3700_v55, %s7225_s16  ;;  %v5727_v38 = vsel %vm1361_vm6, %v7386_v32, %v7211_v35  ;;  %v5740_v55 = vsel %vm1227_vm13, %v2507_v37, %v2509_v43  ;;  %v3705_v32 = vpack.i.bf16 %v5597_v0, %v5713_v23  ;;  %v1202_v37 = vpop.permute.xlu0 %1201  ;;  %v7397_v23 = vrot.slane %v4992_v2, 2 }
 0x109   : > { %3696 = vrot.lane.b32.xlu0 %v5594_v47, %s7225_s16  ;;  %7387 = vst [vmem:[#allocation62_spill] sm:$0xff] %v5727_v38  ;;  %v5732_v6 = vsel %vm1227_vm13, %v7388_v14, %v2503_v57  ;;  %7391 = vst [vmem:[#allocation65_spill] sm:$0xff] %v5740_v55  ;;  %v5756_v38 = vsel %vm1413_vm7, %v7394_v36, %v7393_v22  ;;  %v1124_v43 = vsel %vm1098_vm12, %v7377_v56, %v1111_v11  ;;  %v7468_v55 = vld [vmem:[#allocation28_spill] sm:$0xff]  ;;  %vm1997_vm12 = vcmask 588800  }
 0x10a   : > { %7389 = vst [vmem:[#allocation63_spill] sm:$0xff] %v5732_v6  ;;  %7395 = vst [vmem:[#allocation67_spill] sm:$0xff] %v5756_v38  ;;  %v5764_v13 = vsel %vm1277_vm10, %v7397_v23, %v7396_v19  ;;  %v7217_v35 = vrot.slane %v5521_v5, 4  ;;  %v7398_v22 = vpack.i.bf16 %v5213_v8, %v5208_v58  ;;  %v7399_v56 = vrot.slane %v5400_v10, 4 }
 0x10b   : > { %v5779_v11 = vmul.f32 %v1202_v37, %v1124_v43  ;;  %v3715_v19 = vpack.i.bf16 %v5264_v15, %v5764_v13  ;;  %v3720_v23 = vpack.i.bf16 %v5246_v4, %v5254_v39  ;;  %v7402_v37 = vrot.slane %v5362_v45, 6 }
 0x10c   : > { %3711 = vrot.lane.b32.xlu1 %v7398_v22, %s7223_s23  ;;  %v5777_v36 = vsel %vm1413_vm7, %v7399_v56, %v7217_v35  ;;  %v7218_v22 = vrot.slane %v5616_v50, 5  ;;  %v7403_v43 = vrot.slane %v5329_v44, 6  ;;  %v2333_v35 = vrot.slane %v5616_v50, 6 }
 0x10d   : > { %3706 = vrot.lane.b32.xlu0 %v3705_v32, %s7225_s16  ;;  %7400 = vst [vmem:[#allocation68_spill] sm:$0xff] %v5777_v36  ;;  %7401 = vst [vmem:[#allocation69_spill] sm:$0xff] %v5779_v11  ;;  %v2335_v14 = vrot.slane %v5623_v62, 6  ;;  %v2390_v58 = vrot.slane %v5623_v62, 7  ;;  %v5834_v4 = vsel %vm1227_vm13, %v2503_v57, %v2505_v52  ;;  %v7412_v32 = vrot.slane %v5616_v50, 7  ;;  %s7445_s16 = smov 80  }
 0x10e   : > { %v5797_v56 = vsel %vm1550_vm9, %v7403_v43, %v7402_v37  ;;  %v7406_v37 = vrot.slane %v5521_v5, 6  ;;  %7409 = vst [vmem:[#allocation74_spill] sm:$0xff] %v5834_v4  ;;  %v7415_v57 = vpack.i.bf16 %v5292_v17, %v5287_v34  ;;  %v7416_v52 = vmov 0   ;;  %v4087_v17 = vld [vmem:[%s7134_s6 + $0x10] sm:$0xff]   ;;  %v7465_v36 = vld [vmem:[#allocation31_spill] sm:$0xff] }
 0x10f   : > { %7404 = vst [vmem:[#allocation70_spill] sm:$0xff] %v5797_v56  ;;  %v7417_v34 = vpack.i.bf16 %v5314_v20, %v5309_v61  ;;  %v7419_v20 = vpack.i.bf16 %v5351_v1, %v5345_v31  ;;  %v4088_v61 = vld [vmem:[%s7134_s6 + $0x18] sm:$0xff]   ;;  %v7466_v15 = vrot.slane %v7465_v36, 2  ;;  %v7476_v6 = vrot.slane %v7468_v55, 3 }
 0x110   : > { %3721 = vrot.lane.b32.xlu1 %v3720_v23, %s7223_s23  ;;  %v2426_v23 = vrot.slane %v5779_v11, 7  ;;  %v5817_v43 = vsel %vm1550_vm9, %v7406_v37, %v2333_v35  ;;  %v5831_v37 = vsel %vm1550_vm9, %v2333_v35, %v2335_v14  ;;  %v4086_v14 = vld [vmem:[%s7134_s6 + $0x8] sm:$0xff]   ;;  %vm1975_vm9 = vcmask 457728  }
 0x111   : > { %3716 = vrot.lane.b32.xlu0 %v3715_v19, %s7223_s23  ;;  %v5805_v19 = vsel %vm1498_vm8, %v5582_v18, %v7218_v22  ;;  %7407 = vst [vmem:[#allocation72_spill] sm:$0xff] %v5817_v43  ;;  %7408 = vst [vmem:[#allocation73_spill] sm:$0xff] %v5831_v37  ;;  %v7410_v22 = vrot.slane %v5779_v11, 1  ;;  %v5844_v43 = vsel %vm2370_vm11, %v7412_v32, %v2390_v58  ;;  %s4152_s23 = smov 104  }
 0x112   : > { %7405 = vst [vmem:[#allocation71_spill] sm:$0xff] %v5805_v19  ;;  %7413 = vst [vmem:[#allocation76_spill] sm:$0xff] %v5844_v43  ;;  %v5847_v19 = vsel %vm2370_vm11, %v2390_v58, %v2426_v23  ;;  %v7420_v23 = vld [vmem:[#allocation3_spill] sm:$0xff]  ;;  %v7456_v43 = vrot.slane %v5016_v49, 3  ;;  %vm1986_vm11 = vcmask 523264  }
 0x113   : > { %v5839_v56 = vsel %vm1227_vm13, %v2511_v29, %v7410_v22  ;;  %7414 = vst [vmem:[#allocation77_spill] sm:$0xff] %v5847_v19  ;;  %vm907_vm15 = vcmp.ge.f32.partialorder %v7420_v23, 0.0 }
 0x114   : > { %3731 = vrot.lane.b32.xlu1 %v5594_v47, %s4140_s30  ;;  %7411 = vst [vmem:[#allocation75_spill] sm:$0xff] %v5839_v56  ;;  %v7452_v56 = vld [vmem:[#allocation22_spill] sm:$0xff]  ;;  %v1778_v37 = vsel %vm1361_vm6, %v1775_v9, %v7456_v43 }
 0x115   : > { %3726 = vrot.lane.b32.xlu0 %v5592_v26, %s4140_s30  ;;  %v4085_v26 = vld [vmem:[%s7134_s6] sm:$0xff]   ;;  %v1774_v11 = vrot.slane %v7452_v56, 3 }
 0x116   : > { %2844 = vmatpush1.bf16.msra.mxu0 %v4085_v26  ;;  %3382 = vmatpush1.bf16.msra.mxu1 %v4085_v26  ;;  %v920_v26 = vmul.f32 0.2, %v7420_v23 }
 0x117   : > { %2845 = vmatprep.subr.bf16.mxu0 %v7416_v52  ;;  %3369 = vmatprep.subr.bf16.mxu1 %v7416_v52  ;;  %v1776_v43 = vsel %vm1361_vm6, %v1774_v11, %v1775_v9 }
 0x118   : > { %3741 = vrot.lane.b32.xlu1 %v7415_v57, %s4141_s14 }
 0x119   : > { %3736 = vrot.lane.b32.xlu0 %v5273_v27, %s4141_s14  ;;  %v5864_v27 = vpop.permute.xlu1 %3461 }
 0x11a   : > { %2846 = vmatpush1.bf16.msra.mxu0 %v4086_v14  ;;  %3383 = vmatpush1.bf16.msra.mxu1 %v4086_v14  ;;  %v5876_v32 = vpop.permute.xlu0 %3466 }
 0x11b   : > { %2847 = vmatprep.subr.bf16.mxu0 %v7416_v52  ;;  %3370 = vmatprep.subr.bf16.mxu1 %v7416_v52  ;;  %v3468_v51 = vunpack.i.l.bf16 %v5876_v32 }
 0x11c   : > { %3751 = vrot.lane.b32.xlu1 %v7417_v34, %s7249_s27  ;;  %v7421_v34 = vpack.i.bf16 %v5345_v31, %v5296_v3  ;;  %v7423_v3 = vld [vmem:[#allocation27_spill] sm:$0xff] }
 0x11d   : > { %3746 = vrot.lane.b32.xlu0 %v5306_v7, %s7249_s27  ;;  %v7418_v7 = vld [vmem:[#allocation4_spill] sm:$0xff] }
 0x11e   : > { %v5878_v58 = vpop.permute.xlu1 %3471  ;;  %2848 = vmatpush1.bf16.msra.mxu0 %v4087_v17  ;;  %3384 = vmatpush1.bf16.msra.mxu1 %v4087_v17  ;;  %v921_v22 = vmul.f32 0.2, %v7418_v7  ;;  %vm908_vm14 = vcmp.ge.f32.partialorder %v7418_v7, 0.0  ;;  %v7422_v17 = vpack.i.bf16 %v5358_v28, %v5351_v1  ;;  %v7425_v1 = vpack.i.bf16 %v5385_v41, %v5380_v60 }
 0x11f   : > { %2849 = vmatprep.subr.bf16.mxu0 %v7416_v52  ;;  %3371 = vmatprep.subr.bf16.mxu1 %v7416_v52  ;;  %v7428_v60 = vpack.i.bf16 %v5425_v24, %v5408_v40 }
 0x120   : > { %3761 = vrot.lane.b32.xlu1 %v7419_v20, %s4143_s17  ;;  %v934_v14 = vsel %vm908_vm14, %v7418_v7, %v921_v22  ;;  %v4089_v20 = vld [vmem:[%s7134_s6 + $0x20] sm:$0xff]   ;;  %v7426_v22 = vld [vmem:[#allocation24_spill] sm:$0xff]  ;;  %vm2008_vm14 = vcmask 654336  }
 0x121   : > { %3756 = vrot.lane.b32.xlu0 %v5325_v53, %s4143_s17  ;;  %v5920_v31 = vmul.f32 %v7423_v3, %v934_v14  ;;  %v7429_v3 = vpack.i.bf16 %v5408_v40, %v5393_v42 }
 0x122   : > { %v5895_v57 = vpop.permute.xlu0 %3476  ;;  %v5897_v53 = vpop.permute.xlu1 %3481  ;;  %2850 = vmatpush1.bf16.msra.mxu0 %v4088_v61  ;;  %3385 = vmatpush1.bf16.msra.mxu1 %v4088_v61  ;;  %v933_v61 = vsel %vm907_vm15, %v7420_v23, %v920_v26  ;;  %v4090_v26 = vld [vmem:[%s7134_s6 + $0x28] sm:$0xff]   ;;  %vm2019_vm15 = vcmask 719872  }
 0x123   : > { %2851 = vmatprep.subr.bf16.mxu0 %v7416_v52  ;;  %3372 = vmatprep.subr.bf16.mxu1 %v7416_v52  ;;  %7424 = vst [vmem:[#allocation4_spill] sm:$0xff] %v5920_v31  ;;  %v5929_v23 = vmul.f32 %v7426_v22, %v933_v61  ;;  %v3479_v36 = vunpack.i.h.bf16 %v5895_v57 }
 0x124   : > { %3771 = vrot.lane.b32.xlu1 %v7422_v17, %s4144_s28  ;;  %v4091_v17 = vld [vmem:[%s7134_s6 + $0x30] sm:$0xff]  }
 0x125   : > { %3766 = vrot.lane.b32.xlu0 %v7421_v34, %s4144_s28  ;;  %7427 = vst [vmem:[#allocation3_spill] sm:$0xff] %v5929_v23  ;;  %v2074_v41 = vrot.slane %v5929_v23, 1 }
 0x126   : > { %v5914_v29 = vpop.permute.xlu0 %3486  ;;  %v5916_v7 = vpop.permute.xlu1 %3491  ;;  %2852 = vmatpush1.bf16.msra.mxu0 %v4089_v20  ;;  %3386 = vmatpush1.bf16.msra.mxu1 %v4089_v20 }
 0x127   : > { %2853 = vmatprep.subr.bf16.mxu0 %v7416_v52  ;;  %3373 = vmatprep.subr.bf16.mxu1 %v7416_v52  ;;  %v2075_v22 = vsel %vm1227_vm13, %v5597_v0, %v2074_v41 }
 0x128   : > { %3781 = vrot.lane.b32.xlu1 %v7425_v1, %s4145_s12  ;;  %v7430_v1 = vpack.i.bf16 %v5437_v25, %v5425_v24  ;;  %v7433_v24 = vld [vmem:[#allocation5_spill] sm:$0xff] }
 0x129   : > { %3776 = vrot.lane.b32.xlu0 %v5388_v12, %s4145_s12  ;;  %v7227_v12 = vrot.slane %v5920_v31, 1  ;;  %vm909_vm0 = vcmp.ge.f32.partialorder %v7433_v24, 0.0 }
 0x12a   : > { %v5935_v14 = vpop.permute.xlu0 %3496  ;;  %v5937_v34 = vpop.permute.xlu1 %3501  ;;  %2854 = vmatpush1.bf16.msra.mxu0 %v4090_v26  ;;  %3387 = vmatpush1.bf16.msra.mxu1 %v4090_v26  ;;  %v4092_v26 = vld [vmem:[%s7134_s6 + $0x38] sm:$0xff]  }
 0x12b   : > { %2855 = vmatprep.subr.bf16.mxu0 %v7416_v52  ;;  %3374 = vmatprep.subr.bf16.mxu1 %v7416_v52 }
 0x12c   : > { %3791 = vrot.lane.b32.xlu1 %v7428_v60, %s4146_s29  ;;  %v7431_v60 = vld [vmem:[#allocation56_spill] sm:$0xff] }
 0x12d   : > { %3786 = vrot.lane.b32.xlu0 %v5422_v63, %s4146_s29  ;;  %v2077_v63 = vsel %vm1227_vm13, %v2074_v41, %v7227_v12 }
 0x12e   : > { %v5952_v20 = vpop.permute.xlu0 %3506  ;;  %v5954_v61 = vpop.permute.xlu1 %3511  ;;  %2856 = vmatpush1.bf16.msra.mxu0 %v4091_v17  ;;  %3388 = vmatpush1.bf16.msra.mxu1 %v4091_v17  ;;  %v7432_v17 = vld [vmem:[#allocation33_spill] sm:$0xff]  ;;  %v3810_v40 = vpack.i.bf16 %v2077_v63, %v2075_v22  ;;  %v4093_v63 = vld [vmem:[%s7134_s6 + $0x40] sm:$0xff]   ;;  %v7434_v22 = vld [vmem:[#allocation36_spill] sm:$0xff] }
 0x12f   : > { %2857 = vmatprep.subr.bf16.mxu0 %v7416_v52  ;;  %v3805_v47 = vpack.i.bf16 %v7432_v17, %v7431_v60  ;;  %3375 = vmatprep.subr.bf16.mxu1 %v7416_v52  ;;  %v7437_v60 = vpack.i.bf16 %v5329_v44, %v5259_v16  ;;  %v4094_v17 = vld [vmem:[%s7134_s6 + $0x48] sm:$0xff]   ;;  %v7439_v16 = vld [vmem:[#allocation41_spill] sm:$0xff]  ;;  %v7440_v44 = vld [vmem:[#allocation18_spill] sm:$0xff] }
 0x130   : > { %3801 = vrot.lane.b32.xlu1 %v7430_v1, %s4147_s15 }
 0x131   : > { %3796 = vrot.lane.b32.xlu0 %v7429_v3, %s4147_s15  ;;  %v922_v3 = vmul.f32 0.2, %v7433_v24 }
 0x132   : > { %v5976_v35 = vpop.permute.xlu0 %3516  ;;  %v5978_v42 = vpop.permute.xlu1 %3521  ;;  %2858 = vmatpush1.bf16.msra.mxu0 %v4092_v26  ;;  %3389 = vmatpush1.bf16.msra.mxu1 %v4092_v26  ;;  %v7435_v26 = vld [vmem:[#allocation35_spill] sm:$0xff] }
 0x133   : > { %2859 = vmatprep.subr.bf16.mxu0 %v7416_v52  ;;  %3376 = vmatprep.subr.bf16.mxu1 %v7416_v52  ;;  %v935_v1 = vsel %vm909_vm0, %v7433_v24, %v922_v3  ;;  %v7441_v3 = vpack.i.bf16 %v7439_v16, %v7440_v44  ;;  %v7446_v44 = vld [vmem:[#allocation45_spill] sm:$0xff]  ;;  %v4096_v16 = vld [vmem:[%s7134_s6 + $0x58] sm:$0xff]   ;;  %vm2063_vm0 = vcmask 982016  }
 0x134   : > { %3811 = vrot.lane.b32.xlu1 %v3810_v40, %s4140_s30  ;;  %v7438_v40 = vld [vmem:[#allocation30_spill] sm:$0xff] }
 0x135   : > { %3806 = vrot.lane.b32.xlu0 %v3805_v47, %s4140_s30  ;;  %v7436_v47 = vpack.i.bf16 %v7434_v22, %v7435_v26  ;;  %v6007_v12 = vmul.f32 %v7438_v40, %v935_v1  ;;  %v7442_v22 = vld [vmem:[#allocation43_spill] sm:$0xff]  ;;  %v7443_v26 = vld [vmem:[#allocation42_spill] sm:$0xff]  ;;  %v4095_v1 = vld [vmem:[%s7134_s6 + $0x50] sm:$0xff]  }
 0x136   : > { %v5986_v0 = vpop.permute.xlu0 %3526  ;;  %v5988_v41 = vpop.permute.xlu1 %3531  ;;  %2860 = vmatpush1.bf16.msra.mxu0 %v4093_v63  ;;  %3390 = vmatpush1.bf16.msra.mxu1 %v4093_v63 }
 0x137   : > { %2861 = vmatprep.subr.bf16.mxu0 %v7416_v52  ;;  %3377 = vmatprep.subr.bf16.mxu1 %v7416_v52  ;;  %v7453_v62 = vrot.slane %v6007_v12, 1 }
 0x138   : > { %3821 = vrot.lane.b32.xlu1 %v7437_v60, %s4148_s26 }
 0x139   : > { %3816 = vrot.lane.b32.xlu0 %v7436_v47, %s4148_s26  ;;  %v7444_v47 = vpack.i.bf16 %v7442_v22, %v7443_v26  ;;  %v7449_v26 = vld [vmem:[#allocation47_spill] sm:$0xff] }
 0x13a   : > { %v6009_v4 = vpop.permute.xlu0 %3536  ;;  %v6011_v24 = vpop.permute.xlu1 %3541  ;;  %2862 = vmatpush1.bf16.msra.mxu0 %v4094_v17  ;;  %3391 = vmatpush1.bf16.msra.mxu1 %v4094_v17  ;;  %v1828_v17 = vrot.slane %v5016_v49, 4 }
 0x13b   : > { %2863 = vmatprep.subr.bf16.mxu0 %v7416_v52  ;;  %3378 = vmatprep.subr.bf16.mxu1 %v7416_v52 }
 0x13c   : > { %3831 = vrot.lane.b32.xlu1 %v7444_v47, %s4141_s14  ;;  %v7450_v47 = vld [vmem:[#allocation46_spill] sm:$0xff] }
 0x13d   : > { %3826 = vrot.lane.b32.xlu0 %v7441_v3, %s4141_s14  ;;  %v7447_v3 = vld [vmem:[#allocation44_spill] sm:$0xff]  ;;  %v7451_v60 = vpack.i.bf16 %v7449_v26, %v7450_v47  ;;  %v7455_v47 = vld [vmem:[#allocation26_spill] sm:$0xff] }
 0x13e   : > { %v6027_v63 = vpop.permute.xlu0 %3546  ;;  %v6029_v40 = vpop.permute.xlu1 %3551  ;;  %v7448_v22 = vpack.i.bf16 %v7446_v44, %v7447_v3  ;;  %2864 = vmatpush1.bf16.msra.mxu0 %v4095_v1  ;;  %v7454_v44 = vrot.slane %v5920_v31, 1  ;;  %3392 = vmatpush1.bf16.msra.mxu1 %v4095_v1  ;;  %v1825_v31 = vrot.slane %v7452_v56, 4  ;;  %v7461_v1 = vld [vmem:[#allocation34_spill] sm:$0xff]  ;;  %v1779_v39 = vrot.slane %v7455_v47, 3 }
 0x13f   : > { %2865 = vmatprep.subr.bf16.mxu0 %v7416_v52  ;;  %3379 = vmatprep.subr.bf16.mxu1 %v7416_v52  ;;  %v6076_v18 = vrot.slane %v7461_v1, 2  ;;  %v7485_v1 = vld [vmem:[#allocation7_spill] sm:$0xff] }
 0x140   : > { %3841 = vrot.lane.b32.xlu1 %v7451_v60, %s7445_s16  ;;  %v6053_v3 = vsel %vm1227_vm13, %v7454_v44, %v7453_v62  ;;  %v3845_v60 = vpack.i.bf16 %v5764_v13, %v5213_v8  ;;  %v1826_v62 = vrot.slane %v4992_v2, 4  ;;  %v7457_v44 = vld [vmem:[#allocation32_spill] sm:$0xff]  ;;  %v7459_v13 = vld [vmem:[#allocation19_spill] sm:$0xff]  ;;  %vm1909_vm13 = vcmask 64512  }
 0x141   : > { %3836 = vrot.lane.b32.xlu0 %v7448_v22, %s7445_s16  ;;  %v1706_v23 = vrot.slane %v7457_v44, 2  ;;  %v7458_v8 = vld [vmem:[#allocation48_spill] sm:$0xff]  ;;  %7462 = vst [vmem:[#allocation27_spill] sm:$0xff] %v6076_v18  ;;  %v4097_v2 = vld [vmem:[%s7134_s6 + $0x60] sm:$0xff]   ;;  %v6145_v48 = vsel %vm1361_vm6, %v1779_v39, %v7476_v6 }
 0x142   : > { %v6057_v22 = vpop.permute.xlu0 %3556  ;;  %v6059_v26 = vpop.permute.xlu1 %3561  ;;  %v7460_v19 = vpack.i.bf16 %v7458_v8, %v7459_v13  ;;  %v6080_v56 = vsel %vm1413_vm7, %v1826_v62, %v1828_v17  ;;  %2866 = vmatpush1.bf16.msra.mxu0 %v4096_v16  ;;  %v7463_v44 = vld [vmem:[#allocation55_spill] sm:$0xff]  ;;  %v3860_v8 = vpack.i.bf16 %v1778_v37, %v1776_v43  ;;  %v7464_v13 = vrot.slane %v7455_v47, 4  ;;  %3393 = vmatpush1.bf16.msra.mxu1 %v4096_v16  ;;  %v7470_v43 = vld [vmem:[#allocation49_spill] sm:$0xff] }
 0x143   : > { %2867 = vmatprep.subr.bf16.mxu0 %v7416_v52  ;;  %v1827_v11 = vsel %vm1413_vm7, %v1825_v31, %v1826_v62  ;;  %3380 = vmatprep.subr.bf16.mxu1 %v7416_v52  ;;  %v3464_v37 = vunpack.i.h.bf16 %v5864_v27  ;;  %v6115_v31 = vsel %vm1277_vm10, %v1706_v23, %v6076_v18  ;;  %v3463_v62 = vunpack.i.l.bf16 %v5864_v27  ;;  %7477 = vst [vmem:[#allocation5_spill] sm:$0xff] %v6145_v48 }
 0x144   : > { %3851 = vrot.lane.b32.xlu1 %v7460_v19, %s7249_s27  ;;  %v6094_v9 = vsel %vm1413_vm7, %v1828_v17, %v7464_v13  ;;  %v7469_v17 = vld [vmem:[#allocation50_spill] sm:$0xff]  ;;  %7472 = vst [vmem:[#allocation56_spill] sm:$0xff] %v6115_v31  ;;  %v3469_v13 = vunpack.i.h.bf16 %v5876_v32  ;;  %v7474_v18 = vrot.slane %v5016_v49, 3  ;;  %v3478_v47 = vunpack.i.l.bf16 %v5895_v57  ;;  %v7480_v49 = vld [vmem:[#allocation53_spill] sm:$0xff] }
 0x145   : > { %3846 = vrot.lane.b32.xlu0 %v3845_v60, %s4151_s24  ;;  %v6101_v60 = vsel %vm1277_vm10, %v7466_v15, %v1706_v23  ;;  %v7471_v16 = vpack.i.bf16 %v7469_v17, %v7470_v43  ;;  %v3875_v15 = vpack.i.bf16 %v6080_v56, %v1827_v11  ;;  %v3474_v11 = vunpack.i.h.bf16 %v5878_v58  ;;  %v7478_v32 = vld [vmem:[#allocation10_spill] sm:$0xff] }
 0x146   : > { %v6087_v38 = vpop.permute.xlu0 %3566  ;;  %v6089_v19 = vpop.permute.xlu1 %3571  ;;  %7467 = vst [vmem:[#allocation24_spill] sm:$0xff] %v6101_v60  ;;  %2868 = vmatpush1.bf16.msra.mxu0 %v4097_v2  ;;  %v3473_v17 = vunpack.i.l.bf16 %v5878_v58  ;;  %3394 = vmatpush1.bf16.msra.mxu1 %v4097_v2  ;;  %v6140_v58 = vsel %vm1361_vm6, %v7474_v18, %v1779_v39  ;;  %v1911_v2 = vsel %vm1909_vm13, %v7478_v32, %v3464_v37  ;;  %v7481_v39 = vld [vmem:[#allocation52_spill] sm:$0xff]  ;;  %v7484_v37 = vld [vmem:[#allocation9_spill] sm:$0xff]  ;;  %v3484_v48 = vunpack.i.h.bf16 %v5897_v53 }
 0x147   : > { %2869 = vmatprep.subr.bf16.mxu0 %v7416_v52  ;;  %7475 = vst [vmem:[#allocation33_spill] sm:$0xff] %v6140_v58  ;;  %3381 = vmatprep.subr.bf16.mxu1 %v7416_v52  ;;  %v7479_v18 = vpack.i.bf16 %v5566_v54, %v5358_v28  ;;  %v7482_v6 = vpack.i.bf16 %v7480_v49, %v7481_v39  ;;  %v7483_v52 = vld [vmem:[#allocation8_spill] sm:$0xff]  ;;  %v7486_v28 = vld [vmem:[#allocation11_spill] sm:$0xff]  ;;  %v3488_v58 = vunpack.i.l.bf16 %v5914_v29  ;;  %v3504_v31 = vunpack.i.h.bf16 %v5937_v34 }
 0x148   : > { %3861 = vrot.lane.b32.xlu1 %v3860_v8, %s4152_s23  ;;  %v4098_v8 = vld [vmem:[%s7134_s6 + $0x68] ss:$0 sps:$4 sm:$0xff]   ;;  %v1910_v55 = vsel %vm1909_vm13, %v7483_v52, %v3463_v62  ;;  %v1913_v32 = vsel %vm1909_vm13, %v7484_v37, %v3469_v13  ;;  %v1912_v57 = vsel %vm1909_vm13, %v7485_v1, %v3468_v51  ;;  %v3489_v51 = vunpack.i.h.bf16 %v5914_v29  ;;  %v7488_v37 = vld [vmem:[#allocation13_spill] sm:$0xff] }
 0x149   : > { %3856 = vrot.lane.b32.xlu0 %v7471_v16, %s7249_s27  ;;  %v2841_v16 = vsel %vm1413_vm7, %v4098_v8, 0  ;;  %v7487_v54 = vld [vmem:[#allocation12_spill] sm:$0xff]  ;;  %v3483_v8 = vunpack.i.l.bf16 %v5897_v53  ;;  %v3494_v1 = vunpack.i.h.bf16 %v5916_v7  ;;  %v3493_v13 = vunpack.i.l.bf16 %v5916_v7  ;;  %s4153_s27 = smov 112   ;;  %v7491_v7 = vld [vmem:[#allocation15_spill] sm:$0xff] }
 0x14a   : > { %v6127_v23 = vpop.permute.xlu0 %3576  ;;  %v6129_v43 = vpop.permute.xlu1 %3581  ;;  %2870 = vmatpush1.bf16.msra.mxu0 %v2841_v16  ;;  %3395 = vmatpush1.bf16.msra.mxu1 %v2841_v16  ;;  %v7490_v29 = vpack.i.bf16 %v7481_v39, %v5579_v59  ;;  %v1919_v16 = vsel %vm1909_vm13, %v7491_v7, %v3484_v48  ;;  %v1921_v27 = vsel %vm1920_vm1, %v1910_v55, %v3488_v58  ;;  %v3513_v60 = vunpack.i.l.bf16 %v5954_v61 }
 0x14b   : > { %v1922_v48 = vsel %vm1920_vm1, %v1911_v2, %v3489_v51  ;;  %v1923_v7 = vsel %vm1920_vm1, %v1912_v57, %v3493_v13  ;;  %v3519_v58 = vunpack.i.h.bf16 %v5976_v35  ;;  %v7494_v2 = vpack.i.bf16 %v6094_v9, %v6080_v56 }
 0x14c   : > { %3871 = vrot.lane.b32.xlu1 %v7482_v6, %s4143_s17  ;;  %v1914_v6 = vsel %vm1909_vm13, %v7487_v54, %v3473_v17  ;;  %v1917_v54 = vsel %vm1909_vm13, %v7488_v37, %v3479_v36  ;;  %v7489_v17 = vld [vmem:[#allocation14_spill] sm:$0xff]  ;;  %v3503_v36 = vunpack.i.l.bf16 %v5937_v34  ;;  %v7492_v37 = vld [vmem:[#allocation16_spill] sm:$0xff]  ;;  %v1924_v34 = vsel %vm1920_vm1, %v1913_v32, %v3494_v1 }
 0x14d   : > { %3866 = vrot.lane.b32.xlu0 %v7479_v18, %s4143_s17  ;;  %v1915_v18 = vsel %vm1909_vm13, %v7486_v28, %v3474_v11  ;;  %v3498_v11 = vunpack.i.l.bf16 %v5935_v14  ;;  %v1916_v53 = vsel %vm1909_vm13, %v7489_v17, %v3478_v47  ;;  %v3499_v28 = vunpack.i.h.bf16 %v5935_v14 }
 0x14e   : > { %v6175_v62 = vpop.permute.xlu0 %3586  ;;  %v6177_v52 = vpop.permute.xlu1 %3591  ;;  %v3509_v47 = vunpack.i.h.bf16 %v5952_v20  ;;  %v3508_v14 = vunpack.i.l.bf16 %v5952_v20  ;;  %v1918_v17 = vsel %vm1909_vm13, %v7492_v37, %v3483_v8  ;;  %v1928_v55 = vsel %vm1920_vm1, %v1917_v54, %v3504_v31 }
 0x14f   : > { %v1925_v20 = vsel %vm1920_vm1, %v1914_v6, %v3498_v11  ;;  %v1926_v8 = vsel %vm1920_vm1, %v1915_v18, %v3499_v28  ;;  %v7493_v37 = vpack.i.bf16 %v5613_v21, %v7480_v49  ;;  %v1927_v32 = vsel %vm1920_vm1, %v1916_v53, %v3503_v36  ;;  %v7496_v36 = vld [vmem:[#allocation21_spill] sm:$0xff] }
 0x150   : > { %3881 = vrot.lane.b32.xlu1 %v7490_v29, %s4144_s28  ;;  %v1929_v57 = vsel %vm1920_vm1, %v1918_v17, %v3508_v14  ;;  %v1930_v31 = vsel %vm1920_vm1, %v1919_v16, %v3509_v47  ;;  %v3523_v18 = vunpack.i.l.bf16 %v5978_v42  ;;  %v3524_v49 = vunpack.i.h.bf16 %v5978_v42  ;;  %v7495_v16 = vld [vmem:[#allocation57_spill] sm:$0xff]  ;;  %v7499_v14 = vld [vmem:[#allocation58_spill] sm:$0xff] }
 0x151   : > { %3876 = vrot.lane.b32.xlu0 %v3875_v15, %s4153_s27  ;;  %v3514_v15 = vunpack.i.h.bf16 %v5954_v61  ;;  %v3518_v61 = vunpack.i.l.bf16 %v5976_v35  ;;  %v1932_v35 = vsel %vm1931_vm2, %v1921_v27, %v3513_v60  ;;  %v3528_v51 = vunpack.i.l.bf16 %v5986_v0 }
 0x152   : > { %v6204_v39 = vpop.permute.xlu0 %3596  ;;  %v6206_v29 = vpop.permute.xlu1 %3601  ;;  %v3529_v13 = vunpack.i.h.bf16 %v5986_v0  ;;  %v3534_v11 = vunpack.i.h.bf16 %v5988_v41  ;;  %v3533_v54 = vunpack.i.l.bf16 %v5988_v41  ;;  %v3538_v53 = vunpack.i.l.bf16 %v6009_v4  ;;  %v7498_v0 = vld [vmem:[#allocation59_spill] sm:$0xff] }
 0x153   : > { %v1933_v6 = vsel %vm1931_vm2, %v1922_v48, %v3514_v15  ;;  %v1934_v60 = vsel %vm1931_vm2, %v1923_v7, %v3518_v61  ;;  %v1935_v27 = vsel %vm1931_vm2, %v1924_v34, %v3519_v58  ;;  %v3539_v42 = vunpack.i.h.bf16 %v6009_v4 }
 0x154   : > { %3891 = vrot.lane.b32.xlu1 %v7494_v2, %s4154_s25  ;;  %v3543_v28 = vunpack.i.l.bf16 %v6011_v24  ;;  %v7497_v47 = vpack.i.bf16 %v7495_v16, %v7496_v36  ;;  %v7500_v17 = vpack.i.bf16 %v7498_v0, %v7499_v14  ;;  %v1936_v41 = vsel %vm1931_vm2, %v1925_v20, %v3523_v18 }
 0x155   : > { %3886 = vrot.lane.b32.xlu0 %v7493_v37, %s4144_s28  ;;  %v3544_v15 = vunpack.i.h.bf16 %v6011_v24  ;;  %v3549_v48 = vunpack.i.h.bf16 %v6027_v63  ;;  %v3548_v4 = vunpack.i.l.bf16 %v6027_v63  ;;  %v1937_v34 = vsel %vm1931_vm2, %v1926_v8, %v3524_v49 }
 0x156   : > { %v6232_v1 = vpop.permute.xlu0 %3606  ;;  %v6234_v56 = vpop.permute.xlu1 %3611  ;;  %v1938_v7 = vsel %vm1931_vm2, %v1927_v32, %v3528_v51  ;;  %v3554_v58 = vunpack.i.h.bf16 %v6029_v40  ;;  %v3553_v61 = vunpack.i.l.bf16 %v6029_v40  ;;  %v1939_v20 = vsel %vm1931_vm2, %v1928_v55, %v3529_v13  ;;  %v7502_v55 = vld [vmem:[#allocation61_spill] sm:$0xff] }
 0x157   : > { %v1940_v24 = vsel %vm1931_vm2, %v1929_v57, %v3533_v54  ;;  %v1941_v18 = vsel %vm1931_vm2, %v1930_v31, %v3534_v11  ;;  %v1943_v63 = vsel %vm1942_vm3, %v1932_v35, %v3538_v53  ;;  %v1944_v8 = vsel %vm1942_vm3, %v1933_v6, %v3539_v42  ;;  %v7503_v57 = vld [vmem:[#allocation60_spill] sm:$0xff] }
 0x158   : > { %3901 = vrot.lane.b32.xlu1 %v7500_v17, %s4145_s12  ;;  %v1945_v32 = vsel %vm1942_vm3, %v1934_v60, %v3543_v28  ;;  %v3559_v49 = vunpack.i.h.bf16 %v6057_v22  ;;  %v3558_v40 = vunpack.i.l.bf16 %v6057_v22  ;;  %v7501_v51 = vpack.i.bf16 %v5659_v46, %v5437_v25 }
 0x159   : > { %3896 = vrot.lane.b32.xlu0 %v7497_v47, %s4145_s12  ;;  %v7504_v13 = vpack.i.bf16 %v7502_v55, %v7503_v57  ;;  %v1946_v31 = vsel %vm1942_vm3, %v1935_v27, %v3544_v15  ;;  %v1947_v35 = vsel %vm1942_vm3, %v1936_v41, %v3548_v4  ;;  %v1948_v6 = vsel %vm1942_vm3, %v1937_v34, %v3549_v48 }
 0x15a   : > { %v6260_v37 = vpop.permute.xlu0 %3616  ;;  %v6262_v2 = vpop.permute.xlu1 %3621  ;;  %v3563_v11 = vunpack.i.l.bf16 %v6059_v26  ;;  %v1949_v22 = vsel %vm1942_vm3, %v1938_v7, %v3553_v61  ;;  %v1950_v54 = vsel %vm1942_vm3, %v1939_v20, %v3554_v58  ;;  %v3564_v25 = vunpack.i.h.bf16 %v6059_v26 }
 0x15b   : > { %v3568_v53 = vunpack.i.l.bf16 %v6087_v38  ;;  %v3569_v27 = vunpack.i.h.bf16 %v6087_v38  ;;  %v3574_v28 = vunpack.i.h.bf16 %v6089_v19  ;;  %v3573_v16 = vunpack.i.l.bf16 %v6089_v19 }
 0x15c   : > { %3911 = vrot.lane.b32.xlu1 %v7504_v13, %s4146_s29  ;;  %v3578_v36 = vunpack.i.l.bf16 %v6127_v23  ;;  %v1951_v47 = vsel %vm1942_vm3, %v1940_v24, %v3558_v40  ;;  %v1952_v0 = vsel %vm1942_vm3, %v1941_v18, %v3559_v49  ;;  %v3579_v26 = vunpack.i.h.bf16 %v6127_v23 }
 0x15d   : > { %3906 = vrot.lane.b32.xlu0 %v7501_v51, %s4146_s29  ;;  %v3583_v14 = vunpack.i.l.bf16 %v6129_v43  ;;  %v7505_v17 = vpack.i.bf16 %v7503_v57, %v5672_v30  ;;  %v7506_v38 = vpack.i.bf16 %v5694_v33, %v7502_v55  ;;  %v1954_v19 = vsel %vm1953_vm4, %v1943_v63, %v3563_v11 }
 0x15e   : > { %v6288_v60 = vpop.permute.xlu0 %3626  ;;  %v6290_v42 = vpop.permute.xlu1 %3631  ;;  %v3584_v41 = vunpack.i.h.bf16 %v6129_v43  ;;  %v3589_v15 = vunpack.i.h.bf16 %v6175_v62  ;;  %v3588_v23 = vunpack.i.l.bf16 %v6175_v62  ;;  %v1955_v48 = vsel %vm1953_vm4, %v1944_v8, %v3564_v25 }
 0x15f   : > { %v1956_v4 = vsel %vm1953_vm4, %v1945_v32, %v3568_v53  ;;  %v3594_v34 = vunpack.i.h.bf16 %v6177_v52  ;;  %v3593_v7 = vunpack.i.l.bf16 %v6177_v52  ;;  %v1957_v20 = vsel %vm1953_vm4, %v1946_v31, %v3569_v27 }
 0x160   : > { %3921 = vrot.lane.b32.xlu1 %v7506_v38, %s4147_s15  ;;  %v1958_v43 = vsel %vm1953_vm4, %v1947_v35, %v3573_v16  ;;  %v1959_v24 = vsel %vm1953_vm4, %v1948_v6, %v3574_v28  ;;  %v1960_v62 = vsel %vm1953_vm4, %v1949_v22, %v3578_v36  ;;  %v1961_v18 = vsel %vm1953_vm4, %v1950_v54, %v3579_v26 }
 0x161   : > { %3916 = vrot.lane.b32.xlu0 %v7505_v17, %s4147_s15  ;;  %v1962_v63 = vsel %vm1953_vm4, %v1951_v47, %v3583_v14  ;;  %v3599_v8 = vunpack.i.h.bf16 %v6204_v39  ;;  %v3598_v52 = vunpack.i.l.bf16 %v6204_v39  ;;  %v7507_v32 = vpack.i.bf16 %v6053_v3, %v7463_v44 }
 0x162   : > { %v6316_v58 = vpop.permute.xlu0 %3636  ;;  %v6318_v61 = vpop.permute.xlu1 %3641  ;;  %v7508_v49 = vrot.slane %v6007_v12, 1  ;;  %v1963_v40 = vsel %vm1953_vm4, %v1952_v0, %v3584_v41  ;;  %v1965_v51 = vsel %vm1964_vm5, %v1954_v19, %v3588_v23  ;;  %v1966_v55 = vsel %vm1964_vm5, %v1955_v48, %v3589_v15  ;;  %v7512_v48 = vld [vmem:[#allocation24_spill] sm:$0xff] }
 0x163   : > { %v3603_v57 = vunpack.i.l.bf16 %v6206_v29  ;;  %v1967_v13 = vsel %vm1964_vm5, %v1956_v4, %v3593_v7  ;;  %v1968_v39 = vsel %vm1964_vm5, %v1957_v20, %v3594_v34  ;;  %v3604_v31 = vunpack.i.h.bf16 %v6206_v29  ;;  %v7515_v34 = vld [vmem:[#allocation62_spill] sm:$0xff] }
 0x164   : > { %2100 = vrot.lane.b32.xlu1 %v7508_v49, %s4140_s30  ;;  %v3608_v3 = vunpack.i.l.bf16 %v6232_v1  ;;  %v3609_v6 = vunpack.i.h.bf16 %v6232_v1  ;;  %v3614_v11 = vunpack.i.h.bf16 %v6234_v56  ;;  %v3613_v22 = vunpack.i.l.bf16 %v6234_v56  ;;  %v7516_v7 = vld [vmem:[#allocation6_spill] sm:$0xff] }
 0x165   : > { %3926 = vrot.lane.b32.xlu0 %v7507_v32, %s4140_s30  ;;  %v3618_v54 = vunpack.i.l.bf16 %v6260_v37  ;;  %v1969_v25 = vsel %vm1964_vm5, %v1958_v43, %v3598_v52  ;;  %v1970_v53 = vsel %vm1964_vm5, %v1959_v24, %v3599_v8  ;;  %v3619_v27 = vunpack.i.h.bf16 %v6260_v37  ;;  %s7511_s30 = smov 88  }
 0x166   : > { %v3647_v44 = vpop.permute.xlu0 %3646  ;;  %v3652_v35 = vpop.permute.xlu1 %3651  ;;  %v3623_v29 = vunpack.i.l.bf16 %v6262_v2  ;;  %v7509_v28 = vpack.i.bf16 %v5400_v10, %v5362_v45  ;;  %v7510_v1 = vpack.i.bf16 %v5616_v50, %v5521_v5  ;;  %v1971_v56 = vsel %vm1964_vm5, %v1960_v62, %v3603_v57 }
 0x167   : > { %v3624_v16 = vunpack.i.h.bf16 %v6262_v2  ;;  %v3629_v36 = vunpack.i.h.bf16 %v6288_v60  ;;  %v3628_v37 = vunpack.i.l.bf16 %v6288_v60  ;;  %v1972_v47 = vsel %vm1964_vm5, %v1961_v18, %v3604_v31 }
 0x168   : > { %3936 = vrot.lane.b32.xlu1 %v7510_v1, %s4148_s26  ;;  %v1973_v0 = vsel %vm1964_vm5, %v1962_v63, %v3608_v3  ;;  %v3634_v45 = vunpack.i.h.bf16 %v6290_v42  ;;  %v3633_v10 = vunpack.i.l.bf16 %v6290_v42  ;;  %v1974_v17 = vsel %vm1964_vm5, %v1963_v40, %v3609_v6  ;;  %v7513_v42 = vld [vmem:[#allocation38_spill] sm:$0xff] }
 0x169   : > { %3931 = vrot.lane.b32.xlu0 %v7509_v28, %s4148_s26  ;;  %v1976_v38 = vsel %vm1975_vm9, %v1965_v51, %v3613_v22  ;;  %v1977_v2 = vsel %vm1975_vm9, %v1966_v55, %v3614_v11  ;;  %v1978_v19 = vsel %vm1975_vm9, %v1967_v13, %v3618_v54  ;;  %v1979_v60 = vsel %vm1975_vm9, %v1968_v39, %v3619_v27  ;;  %v7520_v11 = vld [vmem:[#allocation63_spill] sm:$0xff] }
 0x16a   : > { %v3657_v26 = vpop.permute.xlu0 %3656  ;;  %v6367_v14 = vpop.permute.xlu1 %3661  ;;  %v1980_v41 = vsel %vm1975_vm9, %v1969_v25, %v3623_v29  ;;  %v3649_v15 = vunpack.i.h.bf16 %v3647_v44  ;;  %v3648_v23 = vunpack.i.l.bf16 %v3647_v44  ;;  %v7514_v4 = vpack.i.bf16 %v7512_v48, %v7513_v42 }
 0x16b   : > { %v7517_v20 = vpack.i.bf16 %v7515_v34, %v7516_v7  ;;  %v1981_v43 = vsel %vm1975_vm9, %v1970_v53, %v3624_v16  ;;  %v1982_v24 = vsel %vm1975_vm9, %v1971_v56, %v3628_v37  ;;  %v1983_v62 = vsel %vm1975_vm9, %v1972_v47, %v3629_v36 }
 0x16c   : > { %v3638_v18 = vunpack.i.l.bf16 %v6316_v58  ;;  %v1984_v63 = vsel %vm1975_vm9, %v1973_v0, %v3633_v10  ;;  %v1985_v8 = vsel %vm1975_vm9, %v1974_v17, %v3634_v45  ;;  %v3654_v52 = vunpack.i.h.bf16 %v3652_v35  ;;  %v7522_v17 = vld [vmem:[#allocation66_spill] sm:$0xff] }
 0x16d   : > { %3941 = vrot.lane.b32.xlu0 %v7514_v4, %s7511_s30  ;;  %3946 = vrot.lane.b32.xlu1 %v7517_v20, %s4141_s14  ;;  %v3653_v32 = vunpack.i.l.bf16 %v3652_v35  ;;  %v3639_v51 = vunpack.i.h.bf16 %v6316_v58  ;;  %v3644_v55 = vunpack.i.h.bf16 %v6318_v61  ;;  %v1991_v39 = vsel %vm1986_vm11, %v1980_v41, %v3648_v23  ;;  %v7519_v35 = vld [vmem:[#allocation64_spill] sm:$0xff] }
 0x16e   : > { %v3667_v49 = vpop.permute.xlu0 %3666  ;;  %v3672_v40 = vpop.permute.xlu1 %3671  ;;  %v1992_v31 = vsel %vm1986_vm11, %v1981_v43, %v3649_v15  ;;  %v3659_v3 = vunpack.i.h.bf16 %v3657_v26  ;;  %v3658_v44 = vunpack.i.l.bf16 %v3657_v26  ;;  %v7518_v6 = vrot.slane %v5521_v5, 3  ;;  %v7525_v15 = vld [vmem:[#allocation39_spill] sm:$0xff] }
 0x16f   : > { %v3674_v57 = vunpack.i.h.bf16 %v3672_v40  ;;  %v3673_v13 = vunpack.i.l.bf16 %v3672_v40  ;;  %v7521_v22 = vpack.i.bf16 %v7519_v35, %v7520_v11  ;;  %v1987_v58 = vsel %vm1986_vm11, %v1976_v38, %v3638_v18  ;;  %v7523_v38 = vld [vmem:[#allocation65_spill] sm:$0xff] }
 0x170   : > { %v3643_v54 = vunpack.i.l.bf16 %v6318_v61  ;;  %v1993_v27 = vsel %vm1986_vm11, %v1982_v24, %v3653_v32  ;;  %v1994_v29 = vsel %vm1986_vm11, %v1983_v62, %v3654_v52  ;;  %v3664_v28 = vunpack.i.h.bf16 %v6367_v14 }
 0x171   : > { %2162 = vrot.lane.b32.xlu0 %v7518_v6, %s4141_s14  ;;  %3951 = vrot.lane.b32.xlu1 %v7521_v22, %s7445_s16  ;;  %v2002_v25 = vsel %vm1997_vm12, %v1991_v39, %v3673_v13  ;;  %v2003_v53 = vsel %vm1997_vm12, %v1992_v31, %v3674_v57  ;;  %v3663_v1 = vunpack.i.l.bf16 %v6367_v14  ;;  %v1995_v61 = vsel %vm1986_vm11, %v1984_v63, %v3658_v44  ;;  %v7526_v14 = vld [vmem:[#allocation40_spill] sm:$0xff]  ;;  %s7530_s14 = smov 24  }
 0x172   : > { %v3677_v56 = vpop.permute.xlu0 %3676  ;;  %v3682_v16 = vpop.permute.xlu1 %3681  ;;  %v1996_v45 = vsel %vm1986_vm11, %v1985_v8, %v3659_v3  ;;  %v3669_v10 = vunpack.i.h.bf16 %v3667_v49  ;;  %v3668_v26 = vunpack.i.l.bf16 %v3667_v49  ;;  %v7524_v41 = vpack.i.bf16 %v7522_v17, %v7523_v38  ;;  %v7534_v31 = vld [vmem:[#allocation32_spill] sm:$0xff] }
 0x173   : > { %v3679_v36 = vunpack.i.h.bf16 %v3677_v56  ;;  %v3678_v37 = vunpack.i.l.bf16 %v3677_v56  ;;  %v3684_v47 = vunpack.i.h.bf16 %v3682_v16  ;;  %v3683_v0 = vunpack.i.l.bf16 %v3682_v16  ;;  %v7539_v56 = vld [vmem:[#allocation28_spill] sm:$0xff] }
 0x174   : > { %v7527_v23 = vpack.i.bf16 %v7525_v15, %v7526_v14  ;;  %v1988_v43 = vsel %vm1986_vm11, %v1977_v2, %v3639_v51  ;;  %v1989_v24 = vsel %vm1986_vm11, %v1978_v19, %v3643_v54  ;;  %v1990_v62 = vsel %vm1986_vm11, %v1979_v60, %v3644_v55  ;;  %v7528_v2 = vld [vmem:[#allocation56_spill] sm:$0xff]  ;;  %v7532_v51 = vld [vmem:[#allocation67_spill] sm:$0xff]  ;;  %v7535_v54 = vld [vmem:[#allocation33_spill] sm:$0xff] }
 0x175   : > { %3956 = vrot.lane.b32.xlu0 %v7524_v41, %s7445_s16  ;;  %v2004_v4 = vsel %vm1997_vm12, %v1993_v27, %v3678_v37  ;;  %v2005_v34 = vsel %vm1997_vm12, %v1994_v29, %v3679_v36  ;;  %v2006_v7 = vsel %vm1997_vm12, %v1995_v61, %v3683_v0  ;;  %v2007_v20 = vsel %vm1997_vm12, %v1996_v45, %v3684_v47  ;;  %v7531_v60 = vld [vmem:[#allocation68_spill] sm:$0xff]  ;;  %v7537_v29 = vld [vmem:[#allocation34_spill] sm:$0xff]  ;;  %v7541_v45 = vld [vmem:[#allocation31_spill] sm:$0xff] }
 0x176   : > { %3961 = vrot.lane.b32.xlu1 %v7527_v23, %s4151_s24  ;;  %v1998_v18 = vsel %vm1997_vm12, %v1987_v58, %v3663_v1  ;;  %v3692_v8 = vpop.permute.xlu1 %3691  ;;  %v1999_v57 = vsel %vm1997_vm12, %v1988_v43, %v3664_v28  ;;  %v2000_v13 = vsel %vm1997_vm12, %v1989_v24, %v3668_v26  ;;  %v2001_v39 = vsel %vm1997_vm12, %v1990_v62, %v3669_v10  ;;  %v7543_v43 = vld [vmem:[#allocation26_spill] sm:$0xff] }
 0x177   : > { %v3687_v63 = vpop.permute.xlu0 %3686  ;;  %v3694_v49 = vunpack.i.h.bf16 %v3692_v8  ;;  %v3693_v40 = vunpack.i.l.bf16 %v3692_v8  ;;  %v7529_v19 = vpack.i.bf16 %v7528_v2, %v7512_v48  ;;  %v7533_v55 = vpack.i.bf16 %v7531_v60, %v7532_v51  ;;  %v7536_v48 = vld [vmem:[#allocation5_spill] sm:$0xff] }
 0x178   : > { %v3689_v52 = vunpack.i.h.bf16 %v3687_v63  ;;  %v3688_v32 = vunpack.i.l.bf16 %v3687_v63  ;;  %v1787_v3 = vrot.slane %v7534_v31, 3  ;;  %v3975_v27 = vpack.i.bf16 %v7536_v48, %v7535_v54 }
 0x179   : > { %3966 = vrot.lane.b32.xlu0 %v7529_v19, %s4151_s24  ;;  %v2011_v35 = vsel %vm2008_vm14, %v2000_v13, %v3693_v40  ;;  %v2012_v11 = vsel %vm2008_vm14, %v2001_v39, %v3694_v49  ;;  %v7538_v28 = vrot.slane %v7537_v29, 3  ;;  %v1832_v16 = vrot.slane %v7539_v56, 4  ;;  %v7546_v19 = vld [vmem:[#allocation29_spill] sm:$0xff] }
 0x17a   : > { %3971 = vrot.lane.b32.xlu1 %v7533_v55, %s7530_s14  ;;  %v2009_v44 = vsel %vm2008_vm14, %v1998_v18, %v3688_v32  ;;  %v2010_v6 = vsel %vm2008_vm14, %v1999_v57, %v3689_v52  ;;  %v3702_v58 = vpop.permute.xlu1 %3701  ;;  %v7540_v61 = vrot.slane %v5521_v5, 4  ;;  %v7542_v10 = vrot.slane %v7541_v45, 3 }
 0x17b   : > { %v3697_v22 = vpop.permute.xlu0 %3696  ;;  %v1790_v1 = vsel %vm1361_vm6, %v1787_v3, %v7538_v28  ;;  %v3704_v47 = vunpack.i.h.bf16 %v3702_v58  ;;  %v3703_v0 = vunpack.i.l.bf16 %v3702_v58  ;;  %v7544_v24 = vrot.slane %v7543_v43, 4  ;;  %v7548_v28 = vld [vmem:[#allocation3_spill] sm:$0xff] }
 0x17c   : > { %v3699_v36 = vunpack.i.h.bf16 %v3697_v22  ;;  %v3698_v37 = vunpack.i.l.bf16 %v3697_v22  ;;  %v1788_v26 = vsel %vm1361_vm6, %v7542_v10, %v1787_v3  ;;  %v1840_v18 = vrot.slane %v7537_v29, 4 }
 0x17d   : > { %2214 = vrot.lane.b32.xlu0 %v7540_v61, %s7530_s14  ;;  %v6458_v41 = vsel %vm2008_vm14, %v2004_v4, %v3703_v0  ;;  %v6461_v15 = vsel %vm2008_vm14, %v2005_v34, %v3704_v47  ;;  %v3980_v23 = vpack.i.bf16 %v1790_v1, %v1788_v26  ;;  %v1833_v62 = vsel %vm1413_vm7, %v7544_v24, %v1832_v16 }
 0x17e   : > { %3976 = vrot.lane.b32.xlu1 %v3975_v27, %s4152_s23  ;;  %v2013_v17 = vsel %vm2008_vm14, %v2002_v25, %v3698_v37  ;;  %v2014_v38 = vsel %vm2008_vm14, %v2003_v53, %v3699_v36  ;;  %v3712_v5 = vpop.permute.xlu1 %3711  ;;  %v7545_v4 = vpack.i.bf16 %v5613_v21, %v5579_v59  ;;  %v1836_v34 = vrot.slane %v7541_v45, 4  ;;  %v7549_v36 = vld [vmem:[#allocation71_spill] sm:$0xff] }
 0x17f   : > { %v3707_v14 = vpop.permute.xlu0 %3706  ;;  %v3714_v8 = vunpack.i.h.bf16 %v3712_v5  ;;  %v3713_v53 = vunpack.i.l.bf16 %v3712_v5  ;;  %v1838_v52 = vrot.slane %v7534_v31, 4  ;;  %v3990_v59 = vpack.i.bf16 %v1833_v62, %v6094_v9  ;;  %v7550_v37 = vld [vmem:[#allocation51_spill] sm:$0xff] }
 0x180   : > { %v3709_v63 = vunpack.i.h.bf16 %v3707_v14  ;;  %v3708_v25 = vunpack.i.l.bf16 %v3707_v14  ;;  %v1834_v60 = vrot.slane %v7546_v19, 4  ;;  %v7551_v47 = vpack.i.bf16 %v7549_v36, %v7550_v37  ;;  %v7562_v36 = vld [vmem:[#allocation17_spill] sm:$0xff] }
 0x181   : > { %3981 = vrot.lane.b32.xlu0 %v3980_v23, %s4152_s23  ;;  %v6481_v40 = vsel %vm2019_vm15, %v2009_v44, %v3713_v53  ;;  %v6484_v57 = vsel %vm2019_vm15, %v2010_v6, %v3714_v8  ;;  %v1841_v21 = vsel %vm1413_vm7, %v1838_v52, %v1840_v18  ;;  %v6495_v44 = vsel %vm1413_vm7, %v1836_v34, %v1838_v52  ;;  %v7556_v52 = vld [vmem:[#allocation73_spill] sm:$0xff] }
 0x182   : > { %3986 = vrot.lane.b32.xlu1 %v7545_v4, %s4143_s17  ;;  %v6475_v32 = vsel %vm2008_vm14, %v2006_v7, %v3708_v25  ;;  %v6478_v49 = vsel %vm2008_vm14, %v2007_v20, %v3709_v63  ;;  %v3722_v39 = vpop.permute.xlu1 %3721  ;;  %v7547_v20 = vld [vmem:[#allocation54_spill] sm:$0xff]  ;;  %v3995_v27 = vpack.i.bf16 %v1841_v21, %v6495_v44 }
 0x183   : > { %v3717_v13 = vpop.permute.xlu0 %3716  ;;  %v3724_v55 = vunpack.i.h.bf16 %v3722_v39  ;;  %v3723_v3 = vunpack.i.l.bf16 %v3722_v39  ;;  %v7554_v63 = vld [vmem:[#allocation70_spill] sm:$0xff] }
 0x184   : > { %v3719_v51 = vunpack.i.h.bf16 %v3717_v13  ;;  %v3718_v7 = vunpack.i.l.bf16 %v3717_v13  ;;  %v7557_v13 = vpack.i.bf16 %v5694_v33, %v5672_v30 }
 0x185   : > { %2266 = vrot.lane.b32.xlu0 %v7547_v20, %s4143_s17  ;;  %v6504_v22 = vsel %vm2019_vm15, %v2013_v17, %v3723_v3  ;;  %v6507_v58 = vsel %vm2019_vm15, %v2014_v38, %v3724_v55  ;;  %v7552_v38 = vrot.slane %v5616_v50, 5  ;;  %s3400_s17 = smul.u32 10, %s4315_s13 }
 0x186   : > { %3991 = vrot.lane.b32.xlu1 %v3990_v59, %s4153_s27  ;;  %v6498_v9 = vsel %vm2019_vm15, %v2011_v35, %v3718_v7  ;;  %v6501_v6 = vsel %vm2019_vm15, %v2012_v11, %v3719_v51  ;;  %v6511_v48 = vpop.permute.xlu1 %3731  ;;  %v6517_v35 = vsel %vm1413_vm7, %v1832_v16, %v1834_v60  ;;  %v1842_v11 = vrot.slane %v7548_v28, 4  ;;  %v7558_v7 = vld [vmem:[#allocation76_spill] sm:$0xff] }
 0x187   : > { %v6509_v54 = vpop.permute.xlu0 %3726  ;;  %v3734_v1 = vunpack.i.h.bf16 %v6511_v48  ;;  %v4005_v10 = vpack.i.bf16 %v6517_v35, %v1833_v62  ;;  %v7559_v55 = vpack.i.bf16 %v7558_v7, %v5659_v46  ;;  %v1741_v46 = vrot.slane %v7548_v28, 2 }
 0x188   : > { %v6535_v26 = vsel %vm1413_vm7, %v1840_v18, %v1842_v11  ;;  %v7553_v18 = vld [vmem:[#allocation72_spill] sm:$0xff] }
 0x189   : > { %3996 = vrot.lane.b32.xlu0 %v3995_v27, %s4153_s27  ;;  %v2551_v17 = vsel %vm1909_vm13, %v7539_v56, %v3734_v1  ;;  %v4010_v24 = vpack.i.bf16 %v6535_v26, %v1841_v21  ;;  %v7555_v25 = vpack.i.bf16 %v7553_v18, %v7554_v63  ;;  %v7560_v27 = vld [vmem:[#allocation77_spill] sm:$0xff]  ;;  %v7561_v1 = vld [vmem:[#allocation20_spill] sm:$0xff] }
 0x18a   : > { %4001 = vrot.lane.b32.xlu1 %v7551_v47, %s4144_s28  ;;  %v6528_v61 = vpop.permute.xlu1 %3741  ;;  %v7563_v37 = vpack.i.bf16 %v7561_v1, %v7562_v36  ;;  %v7570_v1 = vld [vmem:[#allocation74_spill] sm:$0xff] }
 0x18b   : > { %v6526_v0 = vpop.permute.xlu0 %3736  ;;  %v3744_v16 = vunpack.i.h.bf16 %v6528_v61 }
 0x18d   : > { %2302 = vrot.lane.b32.xlu0 %v7552_v38, %s4144_s28  ;;  %v2562_v14 = vsel %vm1920_vm1, %v2551_v17, %v3744_v16  ;;  %v7564_v17 = vld [vmem:[#allocation27_spill] sm:$0xff]  ;;  %s3401_s28 = smul.u32 80, %s7594_s18 }
 0x18e   : > { %4006 = vrot.lane.b32.xlu1 %v4005_v10, %s4154_s25  ;;  %v6546_v23 = vpop.permute.xlu1 %3751  ;;  %v4035_v38 = vpack.i.bf16 %v7564_v17, %v7528_v2 }
 0x18f   : > { %v6544_v5 = vpop.permute.xlu0 %3746  ;;  %v3754_v62 = vunpack.i.h.bf16 %v6546_v23 }
 0x191   : > { %4011 = vrot.lane.b32.xlu0 %v4010_v24, %s4154_s25  ;;  %v2573_v50 = vsel %vm1931_vm2, %v2562_v14, %v3754_v62  ;;  %v1783_v24 = vrot.slane %v7546_v19, 3  ;;  %v7565_v62 = vld [vmem:[#allocation4_spill] sm:$0xff] }
 0x192   : > { %4016 = vrot.lane.b32.xlu1 %v7555_v25, %s4145_s12  ;;  %v6558_v53 = vpop.permute.xlu1 %3761  ;;  %v1793_v18 = vrot.slane %v7565_v62, 3  ;;  %v1844_v63 = vrot.slane %v7565_v62, 4  ;;  %v7566_v25 = vld [vmem:[#allocation69_spill] sm:$0xff] }
 0x193   : > { %v6556_v8 = vpop.permute.xlu0 %3756  ;;  %v3764_v4 = vunpack.i.h.bf16 %v6558_v53 }
 0x195   : > { %2357 = vrot.lane.b32.xlu0 %v7556_v52, %s4145_s12  ;;  %v2584_v39 = vsel %vm1942_vm3, %v2573_v50, %v3764_v4  ;;  %v6611_v50 = vsel %vm1413_vm7, %v1834_v60, %v1836_v34  ;;  %v1742_v4 = vsel %vm1277_vm10, %v7564_v17, %v1741_v46  ;;  %v7568_v34 = vrot.slane %v7539_v56, 3  ;;  %s611_s12 = sadd.s32 %s3401_s28, %s3400_s17 }
 0x196   : > { %4021 = vrot.lane.b32.xlu1 %v7557_v13, %s4146_s29  ;;  %v6570_v21 = vpop.permute.xlu1 %3771  ;;  %v6644_v56 = vsel %vm1413_vm7, %v1842_v11, %v1844_v63  ;;  %v7573_v11 = vrot.slane %v7537_v29, 3  ;;  %vm2030_vm10 = vcmask 785408  }
 0x197   : > { %v6568_v59 = vpop.permute.xlu0 %3766  ;;  %v3774_v51 = vunpack.i.h.bf16 %v6570_v21  ;;  %v1784_v60 = vsel %vm1361_vm6, %v7568_v34, %v1783_v24  ;;  %v3739_v34 = vunpack.i.h.bf16 %v6526_v0 }
 0x199   : > { %2412 = vrot.lane.b32.xlu0 %v7558_v7, %s4146_s29  ;;  %v2595_v3 = vsel %vm1953_vm4, %v2584_v39, %v3774_v51  ;;  %v7567_v39 = vrot.slane %v7541_v45, 3  ;;  %v1791_v7 = vrot.slane %v7548_v28, 3  ;;  %s3211_s29 = sshll.u32 %s611_s12, 2 }
 0x19a   : > { %4026 = vrot.lane.b32.xlu1 %v7559_v55, %s4147_s15  ;;  %v6582_v33 = vpop.permute.xlu1 %3781  ;;  %v1877_v55 = vrot.slane %v6007_v12, 4 }
 0x19b   : > { %v6580_v30 = vpop.permute.xlu0 %3776  ;;  %v3784_v20 = vunpack.i.h.bf16 %v6582_v33  ;;  %v1786_v51 = vsel %vm1361_vm6, %v1783_v24, %v7567_v39  ;;  %v1794_v17 = vsel %vm1361_vm6, %v1791_v7, %v1793_v18  ;;  %v3738_v24 = vunpack.i.l.bf16 %v6526_v0 }
 0x19c   : > { %v4055_v39 = vpack.i.bf16 %v1786_v51, %v1784_v60  ;;  %v4070_v51 = vpack.i.bf16 %v6644_v56, %v6535_v26  ;;  %v6663_v0 = vsel %vm1413_vm7, %v1844_v63, %v1877_v55  ;;  %v7577_v26 = vld [vmem:[#allocation25_spill] sm:$0xff]  ;;  %vm2052_vm7 = vcmask 916480  }
 0x19d   : > { %2448 = vrot.lane.b32.xlu0 %v7560_v27, %s4147_s15  ;;  %v2606_v47 = vsel %vm1964_vm5, %v2595_v3, %v3784_v20  ;;  %v4065_v3 = vpack.i.bf16 %v6611_v50, %v6517_v35  ;;  %v3728_v20 = vunpack.i.l.bf16 %v6509_v54  ;;  %v7569_v27 = vld [vmem:[#allocation75_spill] sm:$0xff] }
 0x19e   : > { %4031 = vrot.lane.b32.xlu1 %v7563_v37, %s4148_s26  ;;  %v6595_v16 = vpop.permute.xlu1 %3791  ;;  %v7571_v36 = vpack.i.bf16 %v7569_v27, %v7570_v1  ;;  %v7572_v37 = vrot.slane %v7566_v25, 1  ;;  %v1792_v27 = vsel %vm1361_vm6, %v7573_v11, %v1791_v7  ;;  %v3753_v1 = vunpack.i.l.bf16 %v6546_v23  ;;  %v7575_v7 = vld [vmem:[#allocation37_spill] sm:$0xff] }
 0x19f   : > { %v6593_v10 = vpop.permute.xlu0 %3786  ;;  %v3794_v14 = vunpack.i.h.bf16 %v6595_v16  ;;  %v3763_v23 = vunpack.i.l.bf16 %v6558_v53  ;;  %vm2041_vm6 = vcmask 850944  }
 0x1a1   : > { %2481 = vrot.lane.b32.xlu0 %v7566_v25, %s4148_s26  ;;  %v6614_v2 = vsel %vm1975_vm9, %v2606_v47, %v3794_v14  ;;  %v4050_v47 = vpack.i.bf16 %v1741_v46, %v1742_v4  ;;  %v3733_v14 = vunpack.i.l.bf16 %v6511_v48  ;;  %v3743_v25 = vunpack.i.l.bf16 %v6528_v61  ;;  %v7574_v61 = vld [vmem:[#allocation23_spill] sm:$0xff] }
 0x1a2   : > { %4036 = vrot.lane.b32.xlu1 %v4035_v38, %s7511_s30  ;;  %v6620_v13 = vpop.permute.xlu1 %3801  ;;  %v3729_v38 = vunpack.i.h.bf16 %v6509_v54  ;;  %v3748_v46 = vunpack.i.l.bf16 %v6544_v5  ;;  %v3749_v54 = vunpack.i.h.bf16 %v6544_v5  ;;  %v4060_v48 = vpack.i.bf16 %v1794_v17, %v1792_v27 }
 0x1a3   : > { %v6618_v52 = vpop.permute.xlu0 %3796  ;;  %v2548_v60 = vsel %vm1909_vm13, %v7574_v61, %v3728_v20  ;;  %v7576_v5 = vpack.i.bf16 %v7513_v42, %v7575_v7  ;;  %v2550_v55 = vsel %vm1909_vm13, %v7543_v43, %v3733_v14  ;;  %v3768_v42 = vunpack.i.l.bf16 %v6568_v59 }
 0x1a4   : > { %v2549_v63 = vsel %vm1909_vm13, %v7577_v26, %v3729_v38  ;;  %v2559_v20 = vsel %vm1920_vm1, %v2548_v60, %v3738_v24  ;;  %v3769_v61 = vunpack.i.h.bf16 %v6568_v59  ;;  %v3773_v43 = vunpack.i.l.bf16 %v6570_v21 }
 0x1a5   : > { %4041 = vrot.lane.b32.xlu0 %v7571_v36, %s7445_s16  ;;  %v3759_v36 = vunpack.i.h.bf16 %v6556_v8  ;;  %v2560_v17 = vsel %vm1920_vm1, %v2549_v63, %v3739_v34  ;;  %v2570_v11 = vsel %vm1931_vm2, %v2559_v20, %v3748_v46  ;;  %v3778_v14 = vunpack.i.l.bf16 %v6580_v30 }
 0x1a6   : > { %2535 = vrot.lane.b32.xlu1 %v7572_v37, %s7445_s16  ;;  %v6654_v18 = vpop.permute.xlu1 %3811  ;;  %v3758_v37 = vunpack.i.l.bf16 %v6556_v8  ;;  %v2561_v8 = vsel %vm1920_vm1, %v2550_v55, %v3743_v25  ;;  %v2571_v38 = vsel %vm1931_vm2, %v2560_v17, %v3749_v54  ;;  %v3779_v25 = vunpack.i.h.bf16 %v6580_v30  ;;  %s7027_s16 = scalar_lea.vmem %s7136_s8, %s3211_s29 }
 0x1a7   : > { %v6652_v4 = vpop.permute.xlu0 %3806  ;;  %v2572_v53 = vsel %vm1931_vm2, %v2561_v8, %v3753_v1  ;;  %v2582_v34 = vsel %vm1942_vm3, %v2571_v38, %v3759_v36  ;;  %v3783_v59 = vunpack.i.l.bf16 %v6582_v33  ;;  %v3789_v21 = vunpack.i.h.bf16 %v6593_v10 }
 0x1a8   : > { %v2581_v24 = vsel %vm1942_vm3, %v2570_v11, %v3758_v37  ;;  %v2583_v46 = vsel %vm1942_vm3, %v2572_v53, %v3763_v23  ;;  %v3788_v54 = vunpack.i.l.bf16 %v6593_v10  ;;  %v3793_v1 = vunpack.i.l.bf16 %v6595_v16 }
 0x1a9   : > { %4046 = vrot.lane.b32.xlu0 %v7576_v5, %s4151_s24  ;;  %v2592_v60 = vsel %vm1953_vm4, %v2581_v24, %v3768_v42  ;;  %v3799_v36 = vunpack.i.h.bf16 %v6618_v52  ;;  %v3798_v30 = vunpack.i.l.bf16 %v6618_v52  ;;  %v2594_v33 = vsel %vm1953_vm4, %v2583_v46, %v3773_v43 }
 0x1aa   : > { %4051 = vrot.lane.b32.xlu1 %v4050_v47, %s4151_s24  ;;  %v6685_v47 = vpop.permute.xlu1 %3821  ;;  %v2603_v7 = vsel %vm1964_vm5, %v2592_v60, %v3778_v14  ;;  %v3803_v10 = vunpack.i.l.bf16 %v6620_v13  ;;  %v2605_v52 = vsel %vm1964_vm5, %v2594_v33, %v3783_v59  ;;  %v4075_v23 = vpack.i.bf16 %v6495_v44, %v6611_v50 }
 0x1ab   : > { %v3817_v27 = vpop.permute.xlu0 %3816  ;;  %v3823_v63 = vunpack.i.l.bf16 %v6685_v47  ;;  %v2614_v55 = vsel %vm1975_vm9, %v2603_v7, %v3788_v54  ;;  %v2616_v17 = vsel %vm1975_vm9, %v2605_v52, %v3793_v1 }
 0x1ac   : > { %v3819_v26 = vunpack.i.h.bf16 %v3817_v27  ;;  %v3818_v16 = vunpack.i.l.bf16 %v3817_v27  ;;  %v2625_v8 = vsel %vm1986_vm11, %v2614_v55, %v3798_v30 }
 0x1ad   : > { %4056 = vrot.lane.b32.xlu0 %v4055_v39, %s4152_s23 }
 0x1ae   : > { %4061 = vrot.lane.b32.xlu1 %v4060_v48, %s4152_s23  ;;  %v6707_v39 = vpop.permute.xlu1 %3831  ;;  %v2593_v48 = vsel %vm1953_vm4, %v2582_v34, %v3769_v61  ;;  %v2636_v44 = vsel %vm1997_vm12, %v2625_v8, %v3818_v16 }
 0x1af   : > { %v6705_v37 = vpop.permute.xlu0 %3826  ;;  %v2604_v5 = vsel %vm1964_vm5, %v2593_v48, %v3779_v25 }
 0x1b0   : > { %v2615_v20 = vsel %vm1975_vm9, %v2604_v5, %v3789_v21 }
 0x1b1   : > { %4066 = vrot.lane.b32.xlu0 %v4065_v3, %s4153_s27  ;;  %v2626_v11 = vsel %vm1986_vm11, %v2615_v20, %v3799_v36  ;;  %v4080_v3 = vpack.i.bf16 %v6663_v0, %v6644_v56 }
 0x1b2   : > { %4071 = vrot.lane.b32.xlu1 %v4070_v51, %s4153_s27  ;;  %v6728_v35 = vpop.permute.xlu1 %3841  ;;  %v2627_v51 = vsel %vm1986_vm11, %v2616_v17, %v3803_v10  ;;  %v2637_v50 = vsel %vm1997_vm12, %v2626_v11, %v3819_v26  ;;  %s3213_s27 = sshll.u32 %s7594_s18, 6 }
 0x1b3   : > { %v3837_v42 = vpop.permute.xlu0 %3836  ;;  %v3843_v61 = vunpack.i.l.bf16 %v6728_v35  ;;  %v2638_v43 = vsel %vm1997_vm12, %v2627_v51, %v3823_v63 }
 0x1b4   : > { %v3839_v27 = vunpack.i.h.bf16 %v3837_v42  ;;  %v3838_v38 = vunpack.i.l.bf16 %v3837_v42 }
 0x1b5   : > { %4076 = vrot.lane.b32.xlu0 %v4075_v23, %s4154_s25  ;;  %v6742_v0 = vsel %vm2008_vm14, %v2638_v43, %v3843_v61  ;;  %v3804_v43 = vunpack.i.h.bf16 %v6620_v13  ;;  %v3829_v13 = vunpack.i.h.bf16 %v6705_v37 }
 0x1b6   : > { %4081 = vrot.lane.b32.xlu1 %v4080_v3, %s4154_s25  ;;  %v2647_v14 = vsel %vm2008_vm14, %v2636_v44, %v3838_v38  ;;  %v2648_v56 = vsel %vm2008_vm14, %v2637_v50, %v3839_v27  ;;  %v2672_v34 = vrot.slane %v6742_v0, 5  ;;  %v6745_v46 = vpop.permute.xlu1 %3851  ;;  %s3212_s25 = sshll.u32 %s4315_s13, 3 }
 0x1b7   : > { %v2669_v53 = vrot.slane %v2647_v14, 5  ;;  %v2670_v24 = vrot.slane %v2648_v56, 5  ;;  %v3847_v25 = vpop.permute.xlu0 %3846  ;;  %v3809_v14 = vunpack.i.h.bf16 %v6652_v4  ;;  %v3808_v56 = vunpack.i.l.bf16 %v6652_v4  ;;  %s620_s30 = sadd.s32 %s3213_s27, %s3212_s25 }
 0x1b8   : > { %v3849_v48 = vunpack.i.h.bf16 %v3847_v25  ;;  %v3848_v33 = vunpack.i.l.bf16 %v3847_v25  ;;  %v3834_v4 = vunpack.i.h.bf16 %v6707_v39  ;;  %s3214_s29 = sshll.u32 %s620_s30, 3 }
 0x1b9   : > { %v2671_v59 = vsel %vm1498_vm8, %v2669_v53, %v2670_v24  ;;  %v2673_v21 = vsel %vm1498_vm8, %v2670_v24, %v2672_v34  ;;  %v3814_v53 = vunpack.i.h.bf16 %v6654_v18  ;;  %v3824_v24 = vunpack.i.h.bf16 %v6685_v47  ;;  %s7055_s15 = scalar_lea.vmem %s7139_s11, %s3214_s29 }
 0x1ba   : > { %v3862_v60 = vpop.permute.xlu1 %3861  ;;  %v2701_v1 = vpack.c.bf16 %v2673_v21, %v2671_v59  ;;  %v2031_v52 = vsel %vm2030_vm10, %v6481_v40, %v3848_v33  ;;  %v2032_v55 = vsel %vm2030_vm10, %v6484_v57, %v3849_v48  ;;  %v3813_v21 = vunpack.i.l.bf16 %v6654_v18 }
 0x1bb   : > { %v6751_v54 = vpop.permute.xlu0 %3856  ;;  %v3864_v5 = vunpack.i.h.bf16 %v3862_v60  ;;  %v3863_v26 = vunpack.i.l.bf16 %v3862_v60  ;;  %v3828_v60 = vunpack.i.l.bf16 %v6705_v37  ;;  %v2628_v48 = vsel %vm1986_vm11, %v6614_v2, %v3804_v43 }
 0x1bc   : > { %3235 = vmatprep.mubr.msk.bf16.mxu0 %vm2019_vm15, %v2701_v1  ;;  %v3844_v1 = vunpack.i.h.bf16 %v6728_v35  ;;  %v3833_v33 = vunpack.i.l.bf16 %v6707_v39  ;;  %v2554_v47 = vsel %vm1909_vm13, %v7534_v31, %v3809_v14  ;;  %v2556_v18 = vsel %vm1909_vm13, %v7548_v28, %v3814_v53 }
 0x1bd   : > { %v2042_v17 = vsel %vm2041_vm6, %v2031_v52, %v3863_v26  ;;  %v2043_v8 = vsel %vm2041_vm6, %v2032_v55, %v3864_v5  ;;  %v2639_v35 = vsel %vm1997_vm12, %v2628_v48, %v3824_v24  ;;  %v2555_v2 = vsel %vm1909_vm13, %v7537_v29, %v3813_v21 }
 0x1be   : > { %v6756_v30 = vpop.permute.xlu1 %3871  ;;  %v6812_v26 = vsel %vm2008_vm14, %v2639_v35, %v3844_v1  ;;  %v3854_v31 = vunpack.i.h.bf16 %v6745_v46  ;;  %v3853_v28 = vunpack.i.l.bf16 %v6745_v46  ;;  %v2566_v52 = vsel %vm1920_vm1, %v2555_v2, %v3833_v33 }
 0x1bf   : > { %v6754_v36 = vpop.permute.xlu0 %3866  ;;  %v2567_v55 = vsel %vm1920_vm1, %v2556_v18, %v3834_v4 }
 0x1c0   : > { %v3869_v29 = vunpack.i.h.bf16 %v6754_v36 }
 0x1c2   : > { %v6758_v10 = vpop.permute.xlu1 %3881 }
 0x1c3   : > { %v3877_v7 = vpop.permute.xlu0 %3876  ;;  %v3883_v46 = vunpack.i.l.bf16 %v6758_v10 }
 0x1c4   : > { %v3879_v16 = vunpack.i.h.bf16 %v3877_v7  ;;  %v3878_v63 = vunpack.i.l.bf16 %v3877_v7  ;;  %v2552_v7 = vsel %vm1909_vm13, %v7546_v19, %v3808_v56  ;;  %v2565_v19 = vsel %vm1920_vm1, %v2554_v47, %v3829_v13 }
 0x1c5   : > { %v2563_v39 = vsel %vm1920_vm1, %v2552_v7, %v3828_v60 }
 0x1c6   : > { %v3892_v23 = vpop.permute.xlu1 %3891  ;;  %v2053_v3 = vsel %vm2052_vm7, %v2042_v17, %v3878_v63  ;;  %v2054_v51 = vsel %vm2052_vm7, %v2043_v8, %v3879_v16  ;;  %v3859_v16 = vunpack.i.h.bf16 %v6751_v54  ;;  %v3858_v63 = vunpack.i.l.bf16 %v6751_v54 }
 0x1c7   : > { %v6764_v20 = vpop.permute.xlu0 %3886  ;;  %v3894_v11 = vunpack.i.h.bf16 %v3892_v23  ;;  %v3893_v42 = vunpack.i.l.bf16 %v3892_v23  ;;  %v3868_v23 = vunpack.i.l.bf16 %v6754_v36  ;;  %v2674_v17 = vrot.slane %v6812_v26, 5 }
 0x1c8   : > { %v3874_v8 = vunpack.i.h.bf16 %v6756_v30  ;;  %v2576_v54 = vsel %vm1931_vm2, %v2565_v19, %v3854_v31  ;;  %v2574_v36 = vsel %vm1931_vm2, %v2563_v39, %v3853_v28  ;;  %v2578_v43 = vsel %vm1931_vm2, %v2567_v55, %v3859_v16 }
 0x1c9   : > { %v2064_v27 = vsel %vm2063_vm0, %v2053_v3, %v3893_v42  ;;  %v2065_v40 = vsel %vm2063_vm0, %v2054_v51, %v3894_v11  ;;  %v3873_v11 = vunpack.i.l.bf16 %v6756_v30  ;;  %v3884_v51 = vunpack.i.h.bf16 %v6758_v10 }
 0x1ca   : > { %v6774_v57 = vpop.permute.xlu1 %3901  ;;  %v2700_v61 = vpack.c.bf16 %v2065_v40, %v2064_v27  ;;  %v3889_v27 = vunpack.i.h.bf16 %v6764_v20  ;;  %v3888_v40 = vunpack.i.l.bf16 %v6764_v20  ;;  %v2585_v14 = vsel %vm1942_vm3, %v2574_v36, %v3868_v23 }
 0x1cb   : > { %v6772_v38 = vpop.permute.xlu0 %3896  ;;  %v2587_v56 = vsel %vm1942_vm3, %v2576_v54, %v3869_v29  ;;  %v3903_v10 = vunpack.i.l.bf16 %v6774_v57  ;;  %v2589_v20 = vsel %vm1942_vm3, %v2578_v43, %v3874_v8  ;;  %v2596_v21 = vsel %vm1953_vm4, %v2585_v14, %v3883_v46 }
 0x1cc   : > { %2876 = vmatmul.mubr.bf16.vlgmr.msra.gmra.mrb[0].mxu0 %v2700_v61  ;;  %v2577_v61 = vsel %vm1931_vm2, %v2566_v52, %v3858_v63  ;;  %v3898_v30 = vunpack.i.l.bf16 %v6772_v38  ;;  %v3899_v53 = vunpack.i.h.bf16 %v6772_v38  ;;  %v2598_v48 = vsel %vm1953_vm4, %v2587_v56, %v3884_v51 }
 0x1cd   : > { %v2588_v24 = vsel %vm1942_vm3, %v2577_v61, %v3873_v11  ;;  %v2600_v38 = vsel %vm1953_vm4, %v2589_v20, %v3889_v27  ;;  %v3904_v7 = vunpack.i.h.bf16 %v6774_v57 }
 0x1ce   : > { %v6778_v50 = vpop.permute.xlu1 %3911  ;;  %v2599_v4 = vsel %vm1953_vm4, %v2588_v24, %v3888_v40  ;;  %v2607_v47 = vsel %vm1964_vm5, %v2596_v21, %v3898_v30  ;;  %v2609_v2 = vsel %vm1964_vm5, %v2598_v48, %v3899_v53  ;;  %v2675_v48 = vsel %vm1498_vm8, %v2672_v34, %v2674_v17 }
 0x1cf   : > { %v6776_v44 = vpop.permute.xlu0 %3906  ;;  %v2610_v39 = vsel %vm1964_vm5, %v2599_v4, %v3903_v10  ;;  %v3913_v31 = vunpack.i.l.bf16 %v6778_v50  ;;  %v3914_v16 = vunpack.i.h.bf16 %v6778_v50  ;;  %v2611_v50 = vsel %vm1964_vm5, %v2600_v38, %v3904_v7 }
 0x1d0   : > { %v3908_v60 = vunpack.i.l.bf16 %v6776_v44  ;;  %v3909_v18 = vunpack.i.h.bf16 %v6776_v44 }
 0x1d1   : > { %v2621_v51 = vsel %vm1975_vm9, %v2610_v39, %v3913_v31  ;;  %v2622_v40 = vsel %vm1975_vm9, %v2611_v50, %v3914_v16 }
 0x1d2   : > { %v6787_v59 = vpop.permute.xlu1 %3921  ;;  %v2618_v28 = vsel %vm1975_vm9, %v2607_v47, %v3908_v60  ;;  %v2620_v11 = vsel %vm1975_vm9, %v2609_v2, %v3909_v18 }
 0x1d3   : > { %v6785_v25 = vpop.permute.xlu0 %3916  ;;  %v3923_v63 = vunpack.i.l.bf16 %v6787_v59  ;;  %v3924_v29 = vunpack.i.h.bf16 %v6787_v59 }
 0x1d4   : > { %v3918_v33 = vunpack.i.l.bf16 %v6785_v25  ;;  %v3919_v19 = vunpack.i.h.bf16 %v6785_v25 }
 0x1d5   : > { %v2632_v59 = vsel %vm1986_vm11, %v2621_v51, %v3923_v63 }
 0x1d6   : > { %v6806_v37 = vpop.permute.xlu1 %2100  ;;  %v2629_v44 = vsel %vm1986_vm11, %v2618_v28, %v3918_v33 }
 0x1d7   : > { %v6804_v5 = vpop.permute.xlu0 %3926 }
 0x1da   : > { %v3937_v3 = vpop.permute.xlu1 %3936 }
 0x1db   : > { %v3932_v42 = vpop.permute.xlu0 %3931  ;;  %v3939_v46 = vunpack.i.h.bf16 %v3937_v3  ;;  %v3938_v54 = vunpack.i.l.bf16 %v3937_v3  ;;  %v2633_v3 = vsel %vm1986_vm11, %v2622_v40, %v3924_v29 }
 0x1dc   : > { %v3933_v35 = vunpack.i.l.bf16 %v3932_v42  ;;  %v3934_v52 = vunpack.i.h.bf16 %v3932_v42  ;;  %v2631_v42 = vsel %vm1986_vm11, %v2620_v11, %v3919_v19 }
 0x1dd   : > { %v2643_v10 = vsel %vm1997_vm12, %v2632_v59, %v3938_v54  ;;  %v2644_v24 = vsel %vm1997_vm12, %v2633_v3, %v3939_v46 }
 0x1de   : > { %v2640_v25 = vsel %vm1997_vm12, %v2629_v44, %v3933_v35  ;;  %v2642_v36 = vsel %vm1997_vm12, %v2631_v42, %v3934_v52 }
 0x1df   : > { %v6843_v1 = vpop.permute.xlu0 %3941  ;;  %v6845_v13 = vpop.permute.xlu1 %3946 }
 0x1e0   : > { %v3943_v11 = vunpack.i.l.bf16 %v6843_v1 }
 0x1e3   : > { %v6861_v55 = vpop.permute.xlu0 %2162  ;;  %v3952_v57 = vpop.permute.xlu1 %3951 }
 0x1e4   : > { %v3954_v23 = vunpack.i.h.bf16 %v3952_v57  ;;  %v3953_v8 = vunpack.i.l.bf16 %v3952_v57 }
 0x1e6   : > { %v6871_v27 = vsel %vm2008_vm14, %v2640_v25, %v3953_v8  ;;  %v6879_v14 = vsel %vm2008_vm14, %v2642_v36, %v3954_v23  ;;  %v3944_v8 = vunpack.i.h.bf16 %v6843_v1 }
 0x1e7   : > { %v2676_v61 = vrot.slane %v6871_v27, 5  ;;  %v3957_v43 = vpop.permute.xlu0 %3956  ;;  %v2680_v4 = vrot.slane %v6879_v14, 5 }
 0x1e8   : > { %v3962_v30 = vpop.permute.xlu1 %3961  ;;  %v3959_v56 = vunpack.i.h.bf16 %v3957_v43  ;;  %v3958_v53 = vunpack.i.l.bf16 %v3957_v43 }
 0x1e9   : > { %v2677_v20 = vsel %vm1498_vm8, %v2674_v17, %v2676_v61  ;;  %v3964_v28 = vunpack.i.h.bf16 %v3962_v30  ;;  %v3963_v16 = vunpack.i.l.bf16 %v3962_v30 }
 0x1ea   : > { %v2654_v21 = vsel %vm2008_vm14, %v2643_v10, %v3958_v53  ;;  %v6890_v60 = vsel %vm2008_vm14, %v2644_v24, %v3959_v56  ;;  %v2703_v18 = vpack.c.bf16 %v2677_v20, %v2675_v48  ;;  %v2027_v10 = vsel %vm2019_vm15, %v6461_v15, %v3944_v8 }
 0x1eb   : > { %v2682_v38 = vrot.slane %v2654_v21, 5  ;;  %v2684_v33 = vrot.slane %v6890_v60, 5  ;;  %v3967_v47 = vpop.permute.xlu0 %3966  ;;  %v2033_v25 = vsel %vm2030_vm10, %v6498_v9, %v3963_v16  ;;  %v2034_v46 = vsel %vm2030_vm10, %v6501_v6, %v3964_v28 }
 0x1ec   : > { %v6899_v7 = vpop.permute.xlu1 %3971  ;;  %3236 = vmatprep.mubr.msk.bf16.mxu0 %vm2019_vm15, %v2703_v18  ;;  %v3969_v54 = vunpack.i.h.bf16 %v3967_v47  ;;  %v3968_v50 = vunpack.i.l.bf16 %v3967_v47  ;;  %v2026_v6 = vsel %vm2019_vm15, %v6458_v41, %v3943_v11  ;;  %v3948_v11 = vunpack.i.l.bf16 %v6845_v13 }
 0x1ed   : > { %v2683_v35 = vsel %vm1498_vm8, %v2680_v4, %v2682_v38  ;;  %v2685_v0 = vsel %vm1498_vm8, %v2682_v38, %v2684_v33 }
 0x1ee   : > { %v2707_v17 = vpack.c.bf16 %v2685_v0, %v2683_v35  ;;  %v2037_v21 = vsel %vm2030_vm10, %v2026_v6, %v3968_v50  ;;  %v2038_v48 = vsel %vm2030_vm10, %v2027_v10, %v3969_v54 }
 0x1ef   : > { %v6908_v34 = vpop.permute.xlu0 %2214 }
 0x1f0   : > { %v3977_v26 = vpop.permute.xlu1 %3976  ;;  %3238 = vmatprep.mubr.msk.bf16.mxu1 %vm2019_vm15, %v2707_v17 }
 0x1f1   : > { %v3979_v63 = vunpack.i.h.bf16 %v3977_v26  ;;  %v3978_v52 = vunpack.i.l.bf16 %v3977_v26 }
 0x1f3   : > { %v3982_v2 = vpop.permute.xlu0 %3981  ;;  %v2044_v51 = vsel %vm2041_vm6, %v2033_v25, %v3978_v52  ;;  %v2045_v42 = vsel %vm2041_vm6, %v2034_v46, %v3979_v63  ;;  %v3929_v52 = vunpack.i.h.bf16 %v6804_v5  ;;  %v3974_v25 = vunpack.i.h.bf16 %v6899_v7 }
 0x1f4   : > { %v6911_v39 = vpop.permute.xlu1 %3986  ;;  %v3984_v36 = vunpack.i.h.bf16 %v3982_v2  ;;  %v3983_v43 = vunpack.i.l.bf16 %v3982_v2  ;;  %v3973_v46 = vunpack.i.l.bf16 %v6899_v7 }
 0x1f5   : > { %v2557_v54 = vsel %vm1909_vm13, %v7565_v62, %v3929_v52  ;;  %v3988_v50 = vunpack.i.l.bf16 %v6911_v39 }
 0x1f6   : > { %v2048_v35 = vsel %vm2041_vm6, %v2037_v21, %v3983_v43  ;;  %v2049_v0 = vsel %vm2041_vm6, %v2038_v48, %v3984_v36 }
 0x1f7   : > { %v6913_v31 = vpop.permute.xlu0 %2266 }
 0x1f8   : > { %v3992_v19 = vpop.permute.xlu1 %3991 }
 0x1f9   : > { %v3994_v29 = vunpack.i.h.bf16 %v3992_v19  ;;  %v3993_v23 = vunpack.i.l.bf16 %v3992_v19 }
 0x1fb   : > { %v3997_v57 = vpop.permute.xlu0 %3996  ;;  %v2055_v1 = vsel %vm2052_vm7, %v2044_v51, %v3993_v23  ;;  %v2056_v56 = vsel %vm2052_vm7, %v2045_v42, %v3994_v29  ;;  %v3949_v29 = vunpack.i.h.bf16 %v6845_v13  ;;  %v3989_v13 = vunpack.i.h.bf16 %v6911_v39 }
 0x1fc   : > { %v6915_v44 = vpop.permute.xlu1 %4001  ;;  %v3999_v9 = vunpack.i.h.bf16 %v3997_v57  ;;  %v3998_v53 = vunpack.i.l.bf16 %v3997_v57  ;;  %v3928_v57 = vunpack.i.l.bf16 %v6804_v5  ;;  %v2558_v5 = vsel %vm1909_vm13, %v6007_v12, %v6806_v37 }
 0x1fd   : > { %v2568_v42 = vsel %vm1920_vm1, %v2557_v54, %v3949_v29  ;;  %v2569_v62 = vsel %vm1920_vm1, %v2558_v5, %v6861_v55  ;;  %v4004_v43 = vunpack.i.h.bf16 %v6915_v44 }
 0x1fe   : > { %v2059_v17 = vsel %vm2052_vm7, %v2048_v35, %v3998_v53  ;;  %v2060_v15 = vsel %vm2052_vm7, %v2049_v0, %v3999_v9  ;;  %v2553_v51 = vsel %vm1909_vm13, %v7541_v45, %v3928_v57  ;;  %v2580_v12 = vsel %vm1931_vm2, %v2569_v62, %v6908_v34 }
 0x1ff   : > { %v2303_v40 = vpop.permute.xlu0 %2302  ;;  %v2564_v7 = vsel %vm1920_vm1, %v2553_v51, %v3948_v11  ;;  %vm2983_vm1 = vcmask 58368  }
 0x200   : > { %v4007_v59 = vpop.permute.xlu1 %4006  ;;  %v2575_v45 = vsel %vm1931_vm2, %v2564_v7, %v3973_v46 }
 0x201   : > { %v4009_v30 = vunpack.i.h.bf16 %v4007_v59  ;;  %v4008_v3 = vunpack.i.l.bf16 %v4007_v59  ;;  %v2586_v39 = vsel %vm1942_vm3, %v2575_v45, %v3988_v50 }
 0x203   : > { %v2066_v24 = vsel %vm2063_vm0, %v2055_v1, %v4008_v3  ;;  %v2067_v20 = vsel %vm2063_vm0, %v2056_v56, %v4009_v30  ;;  %v4012_v38 = vpop.permute.xlu0 %4011  ;;  %v4003_v30 = vunpack.i.l.bf16 %v6915_v44  ;;  %v2579_v3 = vsel %vm1931_vm2, %v2568_v42, %v3974_v25 }
 0x204   : > { %v4017_v47 = vpop.permute.xlu1 %4016  ;;  %v2702_v18 = vpack.c.bf16 %v2067_v20, %v2066_v24  ;;  %v4014_v26 = vunpack.i.h.bf16 %v4012_v38  ;;  %v4013_v41 = vunpack.i.l.bf16 %v4012_v38  ;;  %v2591_v1 = vsel %vm1942_vm3, %v2580_v12, %v6913_v31 }
 0x205   : > { %v4018_v37 = vunpack.i.l.bf16 %v4017_v47  ;;  %v4019_v56 = vunpack.i.h.bf16 %v4017_v47  ;;  %v2590_v55 = vsel %vm1942_vm3, %v2579_v3, %v3989_v13  ;;  %v2602_v53 = vsel %vm1953_vm4, %v2591_v1, %v2303_v40 }
 0x206   : > { %2884 = vmatmul.mubr.bf16.gmra.mrb[4].mxu0 %v2702_v18  ;;  %v2070_v2 = vsel %vm2063_vm0, %v2059_v17, %v4013_v41  ;;  %v2071_v19 = vsel %vm2063_vm0, %v2060_v15, %v4014_v26  ;;  %v2597_v20 = vsel %vm1953_vm4, %v2586_v39, %v4003_v30  ;;  %v2601_v34 = vsel %vm1953_vm4, %v2590_v55, %v4004_v43 }
 0x207   : > { %v2358_v28 = vpop.permute.xlu0 %2357  ;;  %v2706_v63 = vpack.c.bf16 %v2071_v19, %v2070_v2  ;;  %v2608_v38 = vsel %vm1964_vm5, %v2597_v20, %v4018_v37  ;;  %v2612_v35 = vsel %vm1964_vm5, %v2601_v34, %v4019_v56  ;;  %vm2985_vm2 = vcmask 64516  }
 0x208   : > { %v4022_v16 = vpop.permute.xlu1 %4021  ;;  %v2613_v21 = vsel %vm1964_vm5, %v2602_v53, %v2358_v28  ;;  %vm2987_vm3 = vcmask 60416   ;;  %vm2989_vm4 = vcmask 64518   ;;  %vm2991_vm5 = vcmask 62464  }
 0x209   : > { %2900 = vmatmul.mubr.bf16.vlgmr.msra.gmra.mrb[0].mxu1 %v2706_v63  ;;  %v4023_v9 = vunpack.i.l.bf16 %v4022_v16  ;;  %v4024_v44 = vunpack.i.h.bf16 %v4022_v16 }
 0x20b   : > { %v2413_v23 = vpop.permute.xlu0 %2412  ;;  %v2619_v40 = vsel %vm1975_vm9, %v2608_v38, %v4023_v9  ;;  %v2623_v26 = vsel %vm1975_vm9, %v2612_v35, %v4024_v44 }
 0x20c   : > { %v4027_v8 = vpop.permute.xlu1 %4026  ;;  %v2624_v31 = vsel %vm1975_vm9, %v2613_v21, %v2413_v23 }
 0x20d   : > { %v4028_v6 = vunpack.i.l.bf16 %v4027_v8  ;;  %v4029_v48 = vunpack.i.h.bf16 %v4027_v8 }
 0x20f   : > { %v2449_v59 = vpop.permute.xlu0 %2448  ;;  %v2630_v41 = vsel %vm1986_vm11, %v2619_v40, %v4028_v6  ;;  %v2634_v19 = vsel %vm1986_vm11, %v2623_v26, %v4029_v48 }
 0x210   : > { %v4032_v36 = vpop.permute.xlu1 %4031  ;;  %v2635_v0 = vsel %vm1986_vm11, %v2624_v31, %v2449_v59 }
 0x211   : > { %v4034_v47 = vunpack.i.h.bf16 %v4032_v36  ;;  %v4033_v18 = vunpack.i.l.bf16 %v4032_v36 }
 0x213   : > { %v2482_v10 = vpop.permute.xlu0 %2481  ;;  %v2641_v52 = vsel %vm1997_vm12, %v2630_v41, %v4033_v18  ;;  %v2645_v57 = vsel %vm1997_vm12, %v2634_v19, %v4034_v47 }
 0x214   : > { %v4037_v24 = vpop.permute.xlu1 %4036  ;;  %v2646_v17 = vsel %vm1997_vm12, %v2635_v0, %v2482_v10 }
 0x215   : > { %v4039_v62 = vunpack.i.h.bf16 %v4037_v24  ;;  %v4038_v43 = vunpack.i.l.bf16 %v4037_v24 }
 0x217   : > { %v4042_v15 = vpop.permute.xlu0 %4041  ;;  %v2028_v37 = vsel %vm2019_vm15, %v6475_v32, %v4038_v43  ;;  %v2029_v39 = vsel %vm2019_vm15, %v6478_v49, %v4039_v62 }
 0x218   : > { %v2536_v2 = vpop.permute.xlu1 %2535  ;;  %v4044_v28 = vunpack.i.h.bf16 %v4042_v15  ;;  %v4043_v16 = vunpack.i.l.bf16 %v4042_v15 }
 0x219   : > { %v2657_v63 = vsel %vm2008_vm14, %v2646_v17, %v2536_v2  ;;  %v3335_v2 = vld [vmem:[%s7027_s16] sm:$0xff]  }
 0x21a   : > { %v2652_v29 = vsel %vm2008_vm14, %v2641_v52, %v4043_v16  ;;  %v2656_v23 = vsel %vm2008_vm14, %v2645_v57, %v4044_v28  ;;  %v2688_v25 = vrot.slane %v2657_v63, 5  ;;  %v3336_v19 = vunpack.c.l.bf16 %v3335_v2  ;;  %v7033_v28 = vld [vmem:[%s7137_s9] ss:$0 sm:$0xff] }
 0x21b   : > { %v2678_v8 = vrot.slane %v2652_v29, 5  ;;  %v2686_v11 = vrot.slane %v2656_v23, 5  ;;  %v4047_v46 = vpop.permute.xlu0 %4046  ;;  %v3337_v16 = vunpack.c.h.bf16 %v3335_v2  ;;  %v7041_v52 = vld [vmem:[%s7138_s10] ss:$0 sm:$0xff] }
 0x21c   : > { %v4052_v54 = vpop.permute.xlu1 %4051  ;;  %v4049_v27 = vunpack.i.h.bf16 %v4047_v46  ;;  %v2943_v63 = vmul.f32 %v3336_v19, %v7033_v28  ;;  %v7047_v29 = vld [vmem:[%s7135_s7] ss:$0 sm:$0xff] }
 0x21d   : > { %v2689_v50 = vsel %vm1498_vm8, %v2686_v11, %v2688_v25  ;;  %v2679_v51 = vsel %vm1498_vm8, %v2676_v61, %v2678_v8  ;;  %v2681_v5 = vsel %vm1498_vm8, %v2678_v8, %v2680_v4  ;;  %v2687_v42 = vsel %vm1498_vm8, %v2684_v33, %v2686_v11 }
 0x21e   : > { %v2705_v36 = vpack.c.bf16 %v2681_v5, %v2679_v51  ;;  %v2709_v7 = vpack.c.bf16 %v2689_v50, %v2687_v42  ;;  %v4048_v61 = vunpack.i.l.bf16 %v4047_v46  ;;  %v4054_v30 = vunpack.i.h.bf16 %v4052_v54 }
 0x21f   : > { %v4057_v13 = vpop.permute.xlu0 %4056  ;;  %v4053_v14 = vunpack.i.l.bf16 %v4052_v54  ;;  %v2036_v44 = vsel %vm2030_vm10, %v6507_v58, %v4049_v27  ;;  %v2944_v57 = vmul.f32 %v3337_v16, %v7033_v28  ;;  %v2960_v23 = vadd.f32 %v7041_v52, %v2943_v63 }
 0x220   : > { %v4062_v59 = vpop.permute.xlu1 %4061  ;;  %3237 = vmatprep.mubr.msk.bf16.mxu0 %vm2019_vm15, %v2705_v36  ;;  %3239 = vmatprep.mubr.msk.bf16.mxu1 %vm2019_vm15, %v2709_v7  ;;  %v4059_v45 = vunpack.i.h.bf16 %v4057_v13  ;;  %v4058_v4 = vunpack.i.l.bf16 %v4057_v13  ;;  %v2035_v53 = vsel %vm2030_vm10, %v6504_v22, %v4048_v61  ;;  %v2040_v10 = vsel %vm2030_vm10, %v2029_v39, %v4054_v30  ;;  %v3365_v13 = vld [vmem:[%s7027_s16 + $0x8] sm:$0xff]   ;;  %v3367_v36 = vld [vmem:[%s7027_s16 + $0x18] sm:$0xff]  }
 0x221   : > { %v4064_v3 = vunpack.i.h.bf16 %v4062_v59  ;;  %v4063_v60 = vunpack.i.l.bf16 %v4062_v59  ;;  %v2039_v6 = vsel %vm2030_vm10, %v2028_v37, %v4053_v14  ;;  %v2961_v46 = vadd.f32 %v7041_v52, %v2944_v57 }
 0x222   : > { %v2046_v24 = vsel %vm2041_vm6, %v2035_v53, %v4058_v4  ;;  %v2047_v32 = vsel %vm2041_vm6, %v2036_v44, %v4059_v45  ;;  %vm2981_vm8 = vcmask 64514   ;;  %v3340_v59 = vunpack.c.l.bf16 %v3365_v13 }
 0x223   : > { %v4067_v12 = vpop.permute.xlu0 %4066  ;;  %v2050_v49 = vsel %vm2041_vm6, %v2039_v6, %v4063_v60  ;;  %v2051_v20 = vsel %vm2041_vm6, %v2040_v10, %v4064_v3  ;;  %v3341_v7 = vunpack.c.h.bf16 %v3365_v13  ;;  %v3348_v43 = vunpack.c.l.bf16 %v3367_v36 }
 0x224   : > { %v4072_v33 = vpop.permute.xlu1 %4071  ;;  %v4069_v1 = vunpack.i.h.bf16 %v4067_v12  ;;  %v4068_v56 = vunpack.i.l.bf16 %v4067_v12  ;;  %v2945_v62 = vmul.f32 %v3340_v59, %v7033_v28  ;;  %v3349_v61 = vunpack.c.h.bf16 %v3367_v36 }
 0x225   : > { %v4074_v9 = vunpack.i.h.bf16 %v4072_v33  ;;  %v4073_v55 = vunpack.i.l.bf16 %v4072_v33  ;;  %v2946_v27 = vmul.f32 %v3341_v7, %v7033_v28  ;;  %v2949_v14 = vmul.f32 %v3348_v43, %v7033_v28 }
 0x226   : > { %v2057_v31 = vsel %vm2052_vm7, %v2046_v24, %v4068_v56  ;;  %v2058_v47 = vsel %vm2052_vm7, %v2047_v32, %v4069_v1  ;;  %v2962_v30 = vadd.f32 %v7041_v52, %v2945_v62  ;;  %v2950_v12 = vmul.f32 %v3349_v61, %v7033_v28 }
 0x227   : > { %v4077_v34 = vpop.permute.xlu0 %4076  ;;  %v2061_v18 = vsel %vm2052_vm7, %v2050_v49, %v4073_v55  ;;  %v2062_v35 = vsel %vm2052_vm7, %v2051_v20, %v4074_v9  ;;  %v2963_v60 = vadd.f32 %v7041_v52, %v2946_v27  ;;  %v2966_v56 = vadd.f32 %v7041_v52, %v2949_v14 }
 0x228   : > { %v4082_v21 = vpop.permute.xlu1 %4081  ;;  %v4079_v48 = vunpack.i.h.bf16 %v4077_v34  ;;  %v4078_v22 = vunpack.i.l.bf16 %v4077_v34  ;;  %v2967_v6 = vadd.f32 %v7041_v52, %v2950_v12  ;;  %v3366_v34 = vld [vmem:[%s7027_s16 + $0x10] sm:$0xff]  }
 0x229   : > { %v4084_v38 = vunpack.i.h.bf16 %v4082_v21  ;;  %v4083_v58 = vunpack.i.l.bf16 %v4082_v21  ;;  %v2924_v21 = vld [vmem:[%s7027_s16 + $0x20] sm:$0xf] }
 0x22a   : > { %v2068_v40 = vsel %vm2063_vm0, %v2057_v31, %v4078_v22  ;;  %v2069_v0 = vsel %vm2063_vm0, %v2058_v47, %v4079_v48  ;;  %v2925_v48 = vld [vmem:[%s7027_s16 + $0x24] sm:$0x7]  ;;  %v3344_v22 = vunpack.c.l.bf16 %v3366_v34 }
 0x22b   : > { %v2072_v26 = vsel %vm2063_vm0, %v2061_v18, %v4083_v58  ;;  %v2073_v41 = vsel %vm2063_vm0, %v2062_v35, %v4084_v38  ;;  %v2704_v17 = vpack.c.bf16 %v2069_v0, %v2068_v40  ;;  %v2934_v38 = vunpack.c.l.bf16 %v2924_v21 }
 0x22c   : > { %v2708_v15 = vpack.c.bf16 %v2073_v41, %v2072_v26  ;;  %v3345_v58 = vunpack.c.h.bf16 %v3366_v34  ;;  %v2935_v31 = vunpack.c.l.bf16 %v2925_v48  ;;  %v2947_v47 = vmul.f32 %v3344_v22, %v7033_v28 }
 0x22d   : > { %2892 = vmatmul.mubr.bf16.gmra.mrb[8].mxu0 %v2704_v17  ;;  %v2951_v18 = vmul.f32 %v7033_v28, %v2934_v38 }
 0x22e   : > { %2908 = vmatmul.mubr.bf16.gmra.mrb[4].mxu1 %v2708_v15  ;;  %v2948_v35 = vmul.f32 %v3345_v58, %v7033_v28  ;;  %v2952_v40 = vmul.f32 %v7033_v28, %v2935_v31  ;;  %v2964_v0 = vadd.f32 %v7041_v52, %v2947_v47 }
 0x22f   : > { %v2968_v26 = vadd.f32 %v7041_v52, %v2951_v18 }
 0x230   : > { %v2965_v63 = vadd.f32 %v7041_v52, %v2948_v35  ;;  %v2969_v28 = vadd.f32 %v7041_v52, %v2952_v40 }
 0x29f   : > { %v2877_v8 = vpop.f32.mrb[0].mxu0 }
 0x2a0   : > { %v2878_v11 = vadd.f32 %v7047_v29, %v2877_v8  ;;  %v2879_v25 = vpop.f32.mrb[1].mxu0 }
 0x2a1   : > { %v2880_v54 = vpop.f32.mrb[2].mxu0 }
 0x2a2   : > { %v2970_v50 = vadd.f32 %v2960_v23, %v2878_v11  ;;  %v2881_v51 = vadd.f32 %v7047_v29, %v2880_v54  ;;  %v2882_v5 = vpop.f32.mrb[3].mxu0 }
 0x2a4   : > { %2980 = vst.msk [vmem:[%s7055_s15] sm:$0xff] %vm1909_vm13, %v2970_v50  ;;  %v2971_v42 = vadd.f32 %v2961_v46, %v2881_v51 }
 0x2a6   : > { %2982 = vst.msk [vmem:[%s7055_s15 + $0x6] sm:$0xfc] %vm2981_vm8, %v2971_v42 }
 0x2d9   : > { %v2885_v45 = vpop.f32.mrb[4].mxu0 }
 0x2da   : > { %v2886_v4 = vadd.f32 %v7047_v29, %v2885_v45  ;;  %v2887_v3 = vpop.f32.mrb[5].mxu0 }
 0x2db   : > { %v2888_v33 = vpop.f32.mrb[6].mxu0 }
 0x2dc   : > { %v2972_v37 = vadd.f32 %v2962_v30, %v2886_v4  ;;  %v2889_v39 = vadd.f32 %v7047_v29, %v2888_v33  ;;  %v2890_v1 = vpop.f32.mrb[7].mxu0  ;;  %v2901_v9 = vpop.f32.mrb[0].mxu1 }
 0x2dd   : > { %v2902_v53 = vadd.f32 %v7047_v29, %v2901_v9  ;;  %v2903_v44 = vpop.f32.mrb[1].mxu1 }
 0x2de   : > { %2984 = vst.msk [vmem:[%s7055_s15 + $0xe] sm:$0x3] %vm2983_vm1, %v2972_v37  ;;  %v2973_v55 = vadd.f32 %v2963_v60, %v2889_v39  ;;  %v2904_v10 = vpop.f32.mrb[2].mxu1 }
 0x2df   : > { %2986 = vst.msk [vmem:[%s7055_s15 + $0xc] sm:$0xf0] %vm2985_vm2, %v2972_v37  ;;  %v2976_v24 = vadd.f32 %v2966_v56, %v2902_v53  ;;  %v2905_v32 = vadd.f32 %v7047_v29, %v2904_v10  ;;  %v2906_v49 = vpop.f32.mrb[3].mxu1 }
 0x2e0   : > { %2988 = vst.msk [vmem:[%s7055_s15 + $0x14] sm:$0xf] %vm2987_vm3, %v2973_v55 }
 0x2e1   : > { %2990 = vst.msk [vmem:[%s7055_s15 + $0x12] sm:$0xc0] %vm2989_vm4, %v2973_v55  ;;  %v2977_v20 = vadd.f32 %v2967_v6, %v2905_v32 }
 0x2e2   : > { %2994 = vst.msk [vmem:[%s7055_s15 + $0x26] sm:$0xfc] %vm2981_vm8, %v2976_v24 }
 0x2e3   : > { %2995 = vst.msk [vmem:[%s7055_s15 + $0x2e] sm:$0x3] %vm2983_vm1, %v2977_v20 }
 0x2e4   : > { %2996 = vst.msk [vmem:[%s7055_s15 + $0x2c] sm:$0xf0] %vm2985_vm2, %v2977_v20 }
 0x300   : > { %v2893_v41 = vpop.f32.mrb[8].mxu0 }
 0x301   : > { %v2909_v17 = vpop.f32.mrb[4].mxu1  ;;  %v2894_v15 = vadd.f32 %v7047_v29, %v2893_v41  ;;  %v2895_v19 = vpop.f32.mrb[9].mxu0 }
 0x302   : > { %v2910_v2 = vadd.f32 %v7047_v29, %v2909_v17  ;;  %v2911_v16 = vpop.f32.mrb[5].mxu1  ;;  %v2896_v57 = vpop.f32.mrb[10].mxu0 }
 0x303   : > { %v2912_v23 = vpop.f32.mrb[6].mxu1  ;;  %v2974_v8 = vadd.f32 %v2964_v0, %v2894_v15  ;;  %v2897_v25 = vadd.f32 %v7047_v29, %v2896_v57  ;;  %v2898_v54 = vpop.f32.mrb[11].mxu0 }
 0x304   : > { %v2978_v11 = vadd.f32 %v2968_v26, %v2910_v2  ;;  %v2913_v46 = vadd.f32 %v7047_v29, %v2912_v23  ;;  %v2914_v50 = vpop.f32.mrb[7].mxu1 }
 0x305   : > { %2992 = vst.msk [vmem:[%s7055_s15 + $0x1a] sm:$0x3f] %vm2991_vm5, %v2974_v8  ;;  %v2975_v51 = vadd.f32 %v2965_v63, %v2897_v25 }
 0x306   : > { %2997 = vst.msk [vmem:[%s7055_s15 + $0x34] sm:$0xf] %vm2987_vm3, %v2978_v11  ;;  %v2979_v5 = vadd.f32 %v2969_v28, %v2913_v46 }
 0x307   : > { %2998 = vst.msk [vmem:[%s7055_s15 + $0x32] sm:$0xc0] %vm2989_vm4, %v2978_v11 }
 0x308   : > { %2993 = vst.msk [vmem:[%s7055_s15 + $0x20] sm:$0xff] %vm1909_vm13, %v2975_v51 }
 0x309   : > { %2999 = vst.msk [vmem:[%s7055_s15 + $0x3a] sm:$0x3f] %vm2991_vm5, %v2979_v5 }
 0x30a PF: > { %s21_s21 = sadd.s32 1, %s4137_s21   ;;  %s7578_s26 = sld [smem:[#allocation2_spill]] }
 0x30b   : > { %p18_p10 = scmp.ge.s32.totalorder %s21_s21, 18   ;;  %s7579_s17 = smov %s4129_s19 }
 0x30c   : > { %s7580_s18 = smov %s4133_s20  ;;  %s7581_s19 = smov %s7584_s22 }
 0x30d   :  { %20 = sbr.rel (!%p18_p10) target bundleno = 3 (0x3), region = 103 }
 0x310   : > { %s7582_s20 = smov %s7578_s26 }

// kernel: residual_block_forward.4
= control target key start
LH: loop header
LB: loop body
LE: loop exit
PB: predicated region body
PF: predicated region fallthrough
CT: control target
= control target key end

     0   :  { %s7056_s29 = smov 0   ;;  %s7058_s30 = smov 0   ;;  %s11107_s0 = inlined_call_operand.vmem [shape: f32[2,10,100,4], index: 0, kind: input, shape index: {}, may-alias: {0,1,2}]   ;;  %s11108_s1 = inlined_call_operand.vmem [shape: f32[2,10,100,4], index: 1, kind: input, shape index: {}, may-alias: {0,1,2}]   ;;  %s11109_s2 = inlined_call_operand.vmem [shape: f32[2,10,100,4], index: 2, kind: input, shape index: {}, may-alias: {0,1,2}]   ;;  %s11110_s3 = inlined_call_operand.vmem [shape: f32[100,1], index: 3, kind: input, shape index: {}]   ;;  %s11111_s4 = inlined_call_operand.vmem [shape: f32[78,1], index: 4, kind: input, shape index: {}]   ;;  %s11112_s5 = inlined_call_operand.vmem [shape: f32[1,4], index: 5, kind: input, shape index: {}]   ;;  %s11113_s6 = inlined_call_operand.vmem [shape: f32[1,4], index: 6, kind: input, shape index: {}]   ;;  %s11114_s7 = inlined_call_operand.vmem [shape: bf16[108,8], index: 7, kind: input, shape index: {}]   ;;  %s11115_s8 = inlined_call_operand.vmem [shape: f32[1,8], index: 8, kind: input, shape index: {}]   ;;  %s11116_s9 = inlined_call_operand.vmem [shape: bf16[108,8], index: 9, kind: input, shape index: {}]   ;;  %s11117_s10 = inlined_call_operand.vmem [shape: f32[1,8], index: 10, kind: input, shape index: {}]   ;;  %s11118_s11 = inlined_call_operand.vmem [shape: bf16[2,8,100,8], index: 11, kind: output, shape index: {0}]   ;;  %s11119_s12 = inlined_call_operand.vmem [shape: bf16[2,8,78,8], index: 12, kind: output, shape index: {1}]   ;;  %s11120_s13 = inlined_call_operand.vmem [shape: f32[2,8,2,8], index: 13, kind: output, shape index: {2}]   ;;  %s11121_s14 = inlined_call_operand.vmem [shape: f32[2,8,2,8], index: 14, kind: output, shape index: {3}]  }
   0x1   :  { %11330 = sst [smem:[#allocation92_spill]] %s11107_s0  ;;  %s7060_s15 = smov 0  }
   0x2   :  { %s7062_s16 = smov 0   ;;  %s7064_s17 = smov 0  }
   0x3 LB: > { %11331 = sst [smem:[#allocation2_spill]] %s6956_s16  ;;  %s34_s18 = sadd.s32 1, %s6952_s15  ;;  %s6960_s17 = sphi %s7064_s17, %s25_s17   ;;  %s6956_s16 = sphi %s7062_s16, %s11887_s16   ;;  %s6952_s15 = sphi %s7060_s15, %s11889_s15   ;;  %s6948_s30 = sphi %s7058_s30, %s11885_s30   ;;  %s6944_s29 = sphi %s7056_s29, %s11888_s29  }
   0x4   : > { %s37_s19 = sadd.s32 1, %s6956_s16  ;;  %p35_p0 = scmp.ge.s32.totalorder %s34_s18, 8 }
   0x5   : > { %p5250_p1 = scmp.ge.s32.totalorder %s6960_s17, 1  ;;  %p485_p2 = scmp.lt.s32.totalorder %s6960_s17, 17 }
   0x6   : > { %s11891_s18 = smov (%p35_p0, %s34_s18), 0  ;;  %s11893_s19 = smov (!%p35_p0, %s37_s19), %s6956_s16 }
   0x7   : > { %11332 = sst [smem:[#allocation3_spill]] %s11891_s18  ;;  %p486_p3 = pnand %p5250_p1, %p485_p2 }
   0x8   : > { %p39_p4 = scmp.ge.s32.totalorder %s11893_s19, 2 }
   0x9   : > { %489 = sbr.rel (%p486_p3) target bundleno = 1238 (0x4d6), region = 64 }
   0xa   : > { %s11895_s19 = smov (%p39_p4, %s11893_s19), 0 }
   0xb   : > { %11333 = sst [smem:[#allocation4_spill]] %s11895_s19 }
  0x10   : > { %p586_p5 = scmp.lt.s32.totalorder %s6944_s29, 9  ;;  %p678_p6 = scmp.ge.s32.totalorder %s6944_s29, 1  ;;  %v11129_v0 = vmov 0   ;;  %v7099_v1 = vld [vmem:[%s11110_s3 + $0x10] sm:$0xff]  ;;  %v7104_v2 = vld [vmem:[%s11110_s3] sm:$0xff]  ;;  %v7110_v3 = vld [vmem:[%s11110_s3 + $0x18] sm:$0xff] }
  0x11   : > { %5493 = vset.pattern.permute.xlu1 %v11129_v0  ;;  %5492 = vset.pattern.permute.xlu0 %v11129_v0  ;;  %p584_p8 = scmp.lt.s32.totalorder %s6948_s30, 1  ;;  %v7115_v5 = vld [vmem:[%s11110_s3 + $0x8] sm:$0xff]  ;;  %s7120_s20 = sadd.s32 1, %s6944_s29  ;;  %v7135_v11 = vld [vmem:[%s11110_s3 + $0x20] sm:$0xff]  ;;  %v7153_v14 = vld [vmem:[%s11110_s3 + $0x38] sm:$0xff]  ;;  %vm1214_vm6 = vcmask 1046528  }
  0x12   : > { %p680_p7 = pnand %p678_p6, %p586_p5  ;;  %v7125_v8 = vld [vmem:[%s11110_s3 + $0x28] sm:$0xff]  ;;  %p596_p9 = scmp.lt.s32.totalorder %s7120_s20, 9  ;;  %v7158_v15 = vld [vmem:[%s11110_s3 + $0x30] sm:$0xff]  ;;  %v7177_v19 = vld [vmem:[%s11110_s3 + $0x40] sm:$0xff]  ;;  %vm1264_vm11 = vcmask 1045504   ;;  %vm1348_vm14 = vcmask 1044480  }
  0x13   : > { %s11897_s30 = smov (!%p584_p8, %s6948_s30), 1  ;;  %s7139_s25 = sadd.s32 2, %s6944_s29  ;;  %v7172_v18 = vld [vmem:[%s11110_s3 + $0x48] sm:$0xff]  ;;  %v7189_v22 = vld [vmem:[%s11110_s3 + $0x58] sm:$0xff]  ;;  %v7194_v23 = vld [vmem:[%s11110_s3 + $0x50] sm:$0xff]  ;;  %vm1400_vm15 = vcmask 1043456  }
  0x14   : > { %s5260_s22 = scalar_select %p680_p7, 0.0, 1.0  ;;  %v664_v27 = vld [vmem:[%s11110_s3 + $0x60] sm:$0xf] }
  0x15   : > { %s597_s26 = scalar_select %p596_p9, %s7120_s20, 9  ;;  %v7240_v56 = vld [vmem:[%s11112_s5] ss:$0 sm:$0xff] }
  0x16   : > { %v760_v4 = vstv %s5260_s22  ;;  %s7145_s27 = smul.u32 130, %s11897_s30  ;;  %p607_p10 = scmp.lt.s32.totalorder %s7139_s25, 9  ;;  %v7250_v62 = vld [vmem:[%s11113_s6] ss:$0 sm:$0xff] }
  0x17   : > { %v763_v6 = vmul.f32 %v760_v4, %v7099_v1  ;;  %v761_v7 = vmul.f32 %v760_v4, %v7104_v2  ;;  %v764_v9 = vmul.f32 %v760_v4, %v7110_v3  ;;  %v762_v10 = vmul.f32 %v760_v4, %v7115_v5  ;;  %s5427_s24 = smul.u32 13, %s597_s26  ;;  %p866_p11 = scmp.ge.s32.totalorder %s7120_s20, 1 }
  0x18   : > { %v766_v12 = vmul.f32 %v760_v4, %v7125_v8  ;;  %v765_v13 = vmul.f32 %v760_v4, %v7135_v11  ;;  %s608_s19 = scalar_select %p607_p10, %s7139_s25, 9  ;;  %v768_v16 = vmul.f32 %v760_v4, %v7153_v14  ;;  %v767_v17 = vmul.f32 %v760_v4, %v7158_v15 }
  0x19   : > { %786 = vperm.xlu1 %5493, %v763_v6   ;;  %776 = vperm.xlu0 %5492, %v761_v7   ;;  %s7165_s18 = sadd.s32 %s5427_s24, %s7145_s27  ;;  %p868_p12 = pnand %p866_p11, %p596_p9  ;;  %v770_v20 = vmul.f32 %v760_v4, %v7172_v18  ;;  %v769_v21 = vmul.f32 %v760_v4, %v7177_v19  ;;  %v772_v24 = vmul.f32 %v760_v4, %v7189_v22 }
  0x1a   : > { %s5428_s26 = smul.u32 13, %s608_s19  ;;  %v771_v25 = vmul.f32 %v760_v4, %v7194_v23  ;;  %v773_v29 = vmul.f32 %v760_v4, %v664_v27  ;;  %p1042_p13 = scmp.ge.s32.totalorder %s7139_s25, 1 }
  0x1b   : > { %s5263_s19 = scalar_select %p868_p12, 0.0, 1.0 }
  0x1c   : > { %s7182_s24 = sadd.s32 %s5428_s26, %s7145_s27  ;;  %p1044_p0 = pnand %p1042_p13, %p607_p10 }
  0x1d   : > { %791 = vperm.xlu1 %5493, %v764_v9   ;;  %781 = vperm.xlu0 %5492, %v762_v10   ;;  %v936_v26 = vstv %s5263_s19  ;;  %s587_s25 = scalar_select %p586_p5, %s6944_s29, 9 }
  0x1e   : > { %v937_v28 = vmul.f32 %v936_v26, %v7104_v2  ;;  %v939_v30 = vmul.f32 %v936_v26, %v7099_v1  ;;  %v938_v31 = vmul.f32 %v936_v26, %v7115_v5  ;;  %v941_v32 = vmul.f32 %v936_v26, %v7135_v11  ;;  %s5264_s16 = scalar_select %p1044_p0, 0.0, 1.0 }
  0x1f   : > { %v940_v33 = vmul.f32 %v936_v26, %v7110_v3  ;;  %v943_v34 = vmul.f32 %v936_v26, %v7158_v15  ;;  %v942_v35 = vmul.f32 %v936_v26, %v7125_v8  ;;  %v945_v36 = vmul.f32 %v936_v26, %v7177_v19  ;;  %s5425_s26 = smul.u32 13, %s587_s25  ;;  %s11334_s0 = sld [smem:[#allocation92_spill]] }
  0x20   : > { %v944_v37 = vmul.f32 %v936_v26, %v7153_v14  ;;  %v947_v38 = vmul.f32 %v936_v26, %v7194_v23  ;;  %v946_v39 = vmul.f32 %v936_v26, %v7172_v18  ;;  %v949_v40 = vmul.f32 %v936_v26, %v664_v27  ;;  %s5252_s23 = sshll.u32 %s7165_s18, 3  ;;  %s11212_s19 = smov 16  }
  0x21   : > { %801 = vperm.xlu1 %5493, %v766_v12   ;;  %796 = vperm.xlu0 %5492, %v765_v13   ;;  %v948_v41 = vmul.f32 %v936_v26, %v7189_v22  ;;  %v1112_v42 = vstv %s5264_s16  ;;  %s590_s28 = sadd.s32 %s7145_s27, %s5425_s26  ;;  %s11278_s26 = smov 4  }
  0x22   : > { %v1114_v43 = vmul.f32 %v1112_v42, %v7115_v5  ;;  %v1113_v44 = vmul.f32 %v1112_v42, %v7104_v2  ;;  %v1116_v45 = vmul.f32 %v1112_v42, %v7110_v3  ;;  %v1115_v46 = vmul.f32 %v1112_v42, %v7099_v1  ;;  %s5251_s21 = sshll.u32 %s590_s28, 3  ;;  %s11269_s28 = smov 8  }
  0x23   : > { %v1118_v47 = vmul.f32 %v1112_v42, %v7125_v8  ;;  %v1117_v48 = vmul.f32 %v1112_v42, %v7135_v11  ;;  %v1120_v49 = vmul.f32 %v1112_v42, %v7153_v14  ;;  %v1119_v50 = vmul.f32 %v1112_v42, %v7158_v15  ;;  %s7404_s16 = scalar_lea.vmem %s11108_s1, %s5252_s23  ;;  %s11127_s27 = smov 20  }
  0x24   : > { %v1122_v51 = vmul.f32 %v1112_v42, %v7172_v18  ;;  %v1121_v52 = vmul.f32 %v1112_v42, %v7177_v19  ;;  %v1124_v53 = vmul.f32 %v1112_v42, %v7189_v22  ;;  %v1123_v54 = vmul.f32 %v1112_v42, %v7194_v23  ;;  %s11125_s25 = smov 24   ;;  %s11123_s23 = smov 28  }
  0x25   : > { %811 = vperm.xlu1 %5493, %v768_v16   ;;  %806 = vperm.xlu0 %5492, %v767_v17   ;;  %v1125_v55 = vmul.f32 %v1112_v42, %v664_v27  ;;  %s7235_s20 = scalar_lea.vmem %s11334_s0, %s5251_s21  ;;  %s11243_s21 = smov 12  }
  0x26   : > { %v667_v57 = vld [vmem:[%s7235_s20 + $0x10] sm:$0xff]  ;;  %v665_v58 = vld [vmem:[%s7235_s20] sm:$0xff]  ;;  %v668_v59 = vld [vmem:[%s7235_s20 + $0x18] sm:$0xff]  ;;  %s11240_s18 = smov 32   ;;  %s5253_s22 = sshll.u32 %s7182_s24, 3 }
  0x27   : > { %v691_v60 = vmul.f32 %v7240_v56, %v667_v57  ;;  %v666_v61 = vld [vmem:[%s7235_s20 + $0x8] sm:$0xff]  ;;  %v689_v63 = vmul.f32 %v7240_v56, %v665_v58  ;;  %v692_v1 = vmul.f32 %v7240_v56, %v668_v59  ;;  %v669_v4 = vld [vmem:[%s7235_s20 + $0x20] sm:$0xff]  ;;  %v672_v11 = vld [vmem:[%s7235_s20 + $0x38] sm:$0xff]  ;;  %s11147_s24 = smov 52   ;;  %s11604_s0 = smov 4  }
  0x28   : > { %v690_v2 = vmul.f32 %v7240_v56, %v666_v61  ;;  %v670_v3 = vld [vmem:[%s7235_s20 + $0x28] sm:$0xff]  ;;  %v693_v9 = vmul.f32 %v7240_v56, %v669_v4  ;;  %v671_v12 = vld [vmem:[%s7235_s20 + $0x30] sm:$0xff]  ;;  %v673_v22 = vld [vmem:[%s7235_s20 + $0x40] sm:$0xff]  ;;  %p617_p1 = scmp.lt.s32.totalorder %s6944_s29, 7 }
  0x29   : > { %821 = vperm.xlu1 %5493, %v770_v20   ;;  %816 = vperm.xlu0 %5492, %v769_v21   ;;  %v710_v5 = vadd.f32 %v7250_v62, %v691_v60  ;;  %v708_v6 = vadd.f32 %v7250_v62, %v689_v63  ;;  %v711_v7 = vadd.f32 %v7250_v62, %v692_v1  ;;  %v674_v18 = vld [vmem:[%s7235_s20 + $0x48] sm:$0xff] }
  0x2a   : > { %v694_v8 = vmul.f32 %v7240_v56, %v670_v3  ;;  %v709_v10 = vadd.f32 %v7250_v62, %v690_v2  ;;  %v712_v17 = vadd.f32 %v7250_v62, %v693_v9  ;;  %v696_v20 = vmul.f32 %v7240_v56, %v672_v11  ;;  %v675_v9 = vld [vmem:[%s7235_s20 + $0x50] sm:$0xff]  ;;  %s11899_s29 = smov (!%p617_p1, %s6944_s29), 7 }
  0x2b   : > { %vm723_vm0 = vcmp.ge.f32.partialorder %v710_v5, 0.0  ;;  %v736_v13 = vmul.f32 0.2, %v710_v5  ;;  %v734_v14 = vmul.f32 0.2, %v708_v6  ;;  %vm721_vm1 = vcmp.ge.f32.partialorder %v708_v6, 0.0 }
  0x2c   : > { %v737_v15 = vmul.f32 0.2, %v711_v7  ;;  %vm724_vm2 = vcmp.ge.f32.partialorder %v711_v7, 0.0  ;;  %v713_v16 = vadd.f32 %v7250_v62, %v694_v8  ;;  %v735_v19 = vmul.f32 0.2, %v709_v10 }
  0x2d   : > { %831 = vperm.xlu1 %5493, %v772_v24   ;;  %826 = vperm.xlu0 %5492, %v771_v25   ;;  %v695_v21 = vmul.f32 %v7240_v56, %v671_v12  ;;  %vm722_vm3 = vcmp.ge.f32.partialorder %v709_v10, 0.0  ;;  %v749_v24 = vsel %vm723_vm0, %v710_v5, %v736_v13  ;;  %v747_v26 = vsel %vm721_vm1, %v708_v6, %v734_v14 }
  0x2e   : > { %v750_v27 = vsel %vm724_vm2, %v711_v7, %v737_v15  ;;  %vm726_vm4 = vcmp.ge.f32.partialorder %v713_v16, 0.0  ;;  %vm725_vm5 = vcmp.ge.f32.partialorder %v712_v17, 0.0 }
  0x31   : > { %952 = vperm.xlu1 %5493, %v937_v28   ;;  %836 = vperm.xlu0 %5492, %v773_v29   ;;  %v698_v28 = vmul.f32 %v7240_v56, %v674_v18  ;;  %v739_v29 = vmul.f32 0.2, %v713_v16 }
  0x33   : > { %v752_v42 = vsel %vm726_vm4, %v713_v16, %v739_v29  ;;  %v699_v16 = vmul.f32 %v7240_v56, %v675_v9 }
  0x35   : > { %962 = vperm.xlu1 %5493, %v939_v30   ;;  %957 = vperm.xlu0 %5492, %v938_v31   ;;  %v738_v30 = vmul.f32 0.2, %v712_v17  ;;  %v748_v31 = vsel %vm722_vm3, %v709_v10, %v735_v19  ;;  %vm1485_vm3 = vcmask 1042432  }
  0x39   : > { %972 = vperm.xlu1 %5493, %v941_v32   ;;  %967 = vperm.xlu0 %5492, %v940_v33   ;;  %v715_v32 = vadd.f32 %v7250_v62, %v696_v20  ;;  %v714_v33 = vadd.f32 %v7250_v62, %v695_v21 }
  0x3b   : > { %vm728_vm7 = vcmp.ge.f32.partialorder %v715_v32, 0.0  ;;  %vm727_vm8 = vcmp.ge.f32.partialorder %v714_v33, 0.0 }
  0x3d   : > { %982 = vperm.xlu1 %5493, %v943_v34   ;;  %977 = vperm.xlu0 %5492, %v942_v35   ;;  %v697_v34 = vmul.f32 %v7240_v56, %v673_v22 }
  0x41   : > { %992 = vperm.xlu1 %5493, %v945_v36   ;;  %987 = vperm.xlu0 %5492, %v944_v37  }
  0x45   : > { %1002 = vperm.xlu1 %5493, %v947_v38   ;;  %997 = vperm.xlu0 %5492, %v946_v39   ;;  %v717_v39 = vadd.f32 %v7250_v62, %v698_v28  ;;  %v718_v28 = vadd.f32 %v7250_v62, %v699_v16 }
  0x47   : > { %vm730_vm9 = vcmp.ge.f32.partialorder %v717_v39, 0.0  ;;  %vm731_vm12 = vcmp.ge.f32.partialorder %v718_v28, 0.0 }
  0x49   : > { %1012 = vperm.xlu1 %5493, %v949_v40   ;;  %1007 = vperm.xlu0 %5492, %v948_v41  }
  0x4d   : > { %1133 = vperm.xlu1 %5493, %v1114_v43   ;;  %1128 = vperm.xlu0 %5492, %v1113_v44   ;;  %v751_v43 = vsel %vm725_vm5, %v712_v17, %v738_v30  ;;  %v741_v44 = vmul.f32 0.2, %v715_v32 }
  0x4f   : > { %v754_v59 = vsel %vm728_vm7, %v715_v32, %v741_v44 }
  0x51   : > { %1143 = vperm.xlu1 %5493, %v1116_v45   ;;  %1138 = vperm.xlu0 %5492, %v1115_v46   ;;  %v740_v45 = vmul.f32 0.2, %v714_v33  ;;  %v716_v46 = vadd.f32 %v7250_v62, %v697_v34 }
  0x53   : > { %v753_v60 = vsel %vm727_vm8, %v714_v33, %v740_v45  ;;  %v742_v63 = vmul.f32 0.2, %v716_v46  ;;  %vm729_vm10 = vcmp.ge.f32.partialorder %v716_v46, 0.0  ;;  %vm1537_vm8 = vcmask 1041408  }
  0x55   : > { %1153 = vperm.xlu1 %5493, %v1118_v47   ;;  %1148 = vperm.xlu0 %5492, %v1117_v48   ;;  %v755_v11 = vsel %vm729_vm10, %v716_v46, %v742_v63  ;;  %v744_v46 = vmul.f32 0.2, %v718_v28 }
  0x59   : > { %1163 = vperm.xlu1 %5493, %v1120_v49   ;;  %1158 = vperm.xlu0 %5492, %v1119_v50  }
  0x5d   : > { %1173 = vperm.xlu1 %5493, %v1122_v51   ;;  %1168 = vperm.xlu0 %5492, %v1121_v52   ;;  %v743_v52 = vmul.f32 0.2, %v717_v39 }
  0x5f   : > { %v756_v10 = vsel %vm730_vm9, %v717_v39, %v743_v52  ;;  %v676_v39 = vld [vmem:[%s7235_s20 + $0x58] sm:$0xff] }
  0x61   : > { %1183 = vperm.xlu1 %5493, %v1124_v53   ;;  %1178 = vperm.xlu0 %5492, %v1123_v54  }
  0x65   : > { %1188 = vperm.xlu0 %5492, %v1125_v55  }
  0x98   : > { %v787_v23 = vpop.permute.xlu1 %786  ;;  %v777_v25 = vpop.permute.xlu0 %776 }
  0x99   : > { %v7276_v35 = vmul.f32 %v787_v23, %v749_v24  ;;  %v7278_v36 = vmul.f32 %v777_v25, %v747_v26 }
  0x9b   : > { %11335 = vst [vmem:[#allocation5_spill] sm:$0xff] %v7276_v35  ;;  %11336 = vst [vmem:[#allocation6_spill] sm:$0xff] %v7278_v36  ;;  %v1215_v47 = vrot.slane %v7278_v36, 1  ;;  %v1218_v49 = vrot.slane %v7276_v35, 1  ;;  %v1268_v29 = vrot.slane %v7276_v35, 2 }
  0x9c   : > { %v792_v37 = vpop.permute.xlu1 %791  ;;  %v782_v38 = vpop.permute.xlu0 %781 }
  0x9d   : > { %v7281_v40 = vmul.f32 %v792_v37, %v750_v27  ;;  %v7283_v41 = vmul.f32 %v782_v38, %v748_v31  ;;  %v1265_v27 = vrot.slane %v7278_v36, 2 }
  0x9f   : > { %11337 = vst [vmem:[#allocation7_spill] sm:$0xff] %v7281_v40  ;;  %11338 = vst [vmem:[#allocation8_spill] sm:$0xff] %v7283_v41  ;;  %v1216_v48 = vrot.slane %v7283_v41, 1  ;;  %v1220_v53 = vrot.slane %v7281_v40, 1  ;;  %v1266_v23 = vrot.slane %v7283_v41, 2  ;;  %v1270_v33 = vrot.slane %v7281_v40, 2 }
  0xa0   : > { %v802_v50 = vpop.permute.xlu1 %801  ;;  %v797_v51 = vpop.permute.xlu0 %796 }
  0xa1   : > { %v7291_v54 = vmul.f32 %v802_v50, %v752_v42  ;;  %v7293_v55 = vmul.f32 %v797_v51, %v751_v43  ;;  %v1217_v57 = vsel %vm1214_vm6, %v1215_v47, %v1216_v48  ;;  %v1219_v58 = vsel %vm1214_vm6, %v1216_v48, %v1218_v49 }
  0xa2   : > { %v5494_v61 = vpack.i.bf16 %v1219_v58, %v1217_v57  ;;  %v1221_v7 = vsel %vm1214_vm6, %v1218_v49, %v1220_v53  ;;  %v1267_v38 = vsel %vm1264_vm11, %v1265_v27, %v1266_v23  ;;  %v1269_v42 = vsel %vm1264_vm11, %v1266_v23, %v1268_v29 }
  0xa3   : > { %11339 = vst [vmem:[#allocation9_spill] sm:$0xff] %v7291_v54  ;;  %11340 = vst [vmem:[#allocation10_spill] sm:$0xff] %v7293_v55  ;;  %v1222_v1 = vrot.slane %v7293_v55, 1  ;;  %v1224_v4 = vrot.slane %v7291_v54, 1  ;;  %v1272_v26 = vrot.slane %v7293_v55, 2  ;;  %v1271_v47 = vsel %vm1264_vm11, %v1268_v29, %v1270_v33 }
  0xa4   : > { %v812_v2 = vpop.permute.xlu1 %811  ;;  %v807_v3 = vpop.permute.xlu0 %806  ;;  %5495 = vrot.lane.b32.xlu1 %v5494_v61, %s11278_s26  ;;  %v1274_v48 = vrot.slane %v7291_v54, 2  ;;  %v700_v50 = vmul.f32 %v7240_v56, %v676_v39  ;;  %v5519_v51 = vpack.i.bf16 %v1269_v42, %v1267_v38  ;;  %v1356_v23 = vrot.slane %v7291_v54, 3  ;;  %v677_v39 = vld [vmem:[%s7235_s20 + $0x60] sm:$0xf] }
  0xa5   : > { %v7301_v5 = vmul.f32 %v812_v2, %v754_v59  ;;  %v7303_v6 = vmul.f32 %v807_v3, %v753_v60  ;;  %v1223_v8 = vsel %vm1214_vm6, %v1220_v53, %v1222_v1  ;;  %v1225_v17 = vsel %vm1214_vm6, %v1222_v1, %v1224_v4 }
  0xa6   : > { %v5499_v12 = vpack.i.bf16 %v1223_v8, %v1221_v7  ;;  %v1273_v43 = vsel %vm1264_vm11, %v1270_v33, %v1272_v26  ;;  %v757_v60 = vsel %vm731_vm12, %v718_v28, %v744_v46  ;;  %v1275_v61 = vsel %vm1264_vm11, %v1272_v26, %v1274_v48 }
  0xa7   : > { %11341 = vst [vmem:[#allocation11_spill] sm:$0xff] %v7301_v5  ;;  %11342 = vst [vmem:[#allocation12_spill] sm:$0xff] %v7303_v6  ;;  %v1226_v13 = vrot.slane %v7303_v6, 1  ;;  %v1228_v21 = vrot.slane %v7301_v5, 1  ;;  %v1276_v44 = vrot.slane %v7303_v6, 2  ;;  %v1278_v49 = vrot.slane %v7301_v5, 2 }
  0xa8   : > { %v822_v14 = vpop.permute.xlu1 %821  ;;  %v817_v15 = vpop.permute.xlu0 %816  ;;  %5500 = vrot.lane.b32.xlu0 %v5499_v12, %s11278_s26  ;;  %v5524_v52 = vpack.i.bf16 %v1273_v43, %v1271_v47  ;;  %v719_v1 = vadd.f32 %v7250_v62, %v700_v50  ;;  %v1349_v12 = vrot.slane %v7283_v41, 3  ;;  %v5549_v16 = vpack.i.bf16 %v1275_v61, %v1273_v43 }
  0xa9   : > { %v7312_v18 = vmul.f32 %v822_v14, %v756_v10  ;;  %v7314_v19 = vmul.f32 %v817_v15, %v755_v11  ;;  %v1227_v20 = vsel %vm1214_vm6, %v1224_v4, %v1226_v13  ;;  %v1229_v30 = vsel %vm1214_vm6, %v1226_v13, %v1228_v21 }
  0xaa   : > { %v5504_v22 = vpack.i.bf16 %v1227_v20, %v1225_v17  ;;  %v1277_v53 = vsel %vm1264_vm11, %v1274_v48, %v1276_v44  ;;  %v1279_v63 = vsel %vm1264_vm11, %v1276_v44, %v1278_v49  ;;  %v745_v8 = vmul.f32 0.2, %v719_v1 }
  0xab   : > { %11343 = vst [vmem:[#allocation13_spill] sm:$0xff] %v7312_v18  ;;  %11344 = vst [vmem:[#allocation14_spill] sm:$0xff] %v7314_v19  ;;  %v1230_v24 = vrot.slane %v7314_v19, 1  ;;  %v1232_v25 = vrot.slane %v7312_v18, 1  ;;  %v1280_v45 = vrot.slane %v7314_v19, 2  ;;  %v1282_v58 = vrot.slane %v7312_v18, 2 }
  0xac   : > { %5505 = vrot.lane.b32.xlu1 %v5504_v22, %s11278_s26  ;;  %v827_v59 = vpop.permute.xlu0 %826  ;;  %v5529_v2 = vpack.i.bf16 %v1277_v53, %v1275_v61  ;;  %v5544_v10 = vpack.i.bf16 %v1271_v47, %v1269_v42  ;;  %vm732_vm13 = vcmp.ge.f32.partialorder %v719_v1, 0.0  ;;  %v1352_v13 = vrot.slane %v7281_v40, 3  ;;  %v832_v14 = vpop.permute.xlu1 %831 }
  0xad   : > { %v1231_v31 = vsel %vm1214_vm6, %v1228_v21, %v1230_v24  ;;  %v1233_v32 = vsel %vm1214_vm6, %v1230_v24, %v1232_v25  ;;  %v1281_v57 = vsel %vm1264_vm11, %v1278_v49, %v1280_v45  ;;  %v7350_v4 = vmul.f32 %v827_v59, %v757_v60 }
  0xae   : > { %v5509_v34 = vpack.i.bf16 %v1231_v31, %v1229_v30  ;;  %v5514_v37 = vpack.i.bf16 %v1232_v25, %v1233_v32  ;;  %v5534_v3 = vpack.i.bf16 %v1281_v57, %v1279_v63  ;;  %v1283_v7 = vsel %vm1264_vm11, %v1280_v45, %v1282_v58 }
  0xaf   : > { %v5539_v9 = vpack.i.bf16 %v1282_v58, %v1283_v7  ;;  %v1315_v11 = vrot.slane %v7350_v4, 2  ;;  %v758_v15 = vsel %vm732_vm13, %v719_v1, %v745_v8  ;;  %v5554_v17 = vpack.i.bf16 %v1279_v63, %v1277_v53 }
  0xb0   : > { %5510 = vrot.lane.b32.xlu0 %v5509_v34, %s11278_s26  ;;  %5515 = vrot.lane.b32.xlu1 %v5514_v37, %s11278_s26  ;;  %v1350_v20 = vrot.slane %v7276_v35, 3  ;;  %v1354_v22 = vrot.slane %v7293_v55, 3  ;;  %v7367_v25 = vmul.f32 %v832_v14, %v758_v15  ;;  %v1358_v27 = vrot.slane %v7303_v6, 3 }
  0xb1   : > { %v1316_v21 = vsel %vm1264_vm11, %v1282_v58, %v1315_v11  ;;  %v1360_v28 = vrot.slane %v7301_v5, 3  ;;  %v5559_v29 = vpack.i.bf16 %v1283_v7, %v1281_v57  ;;  %v1362_v31 = vrot.slane %v7314_v19, 3 }
  0xb2   : > { %v1351_v24 = vsel %vm1348_vm14, %v1349_v12, %v1350_v20  ;;  %v1353_v26 = vsel %vm1348_vm14, %v1350_v20, %v1352_v13  ;;  %v5564_v30 = vpack.i.bf16 %v1315_v11, %v1316_v21  ;;  %v1364_v32 = vrot.slane %v7312_v18, 3  ;;  %v852_v11 = vld [vmem:[%s7404_s16] sm:$0xff] }
  0xb3   : > { %v1355_v33 = vsel %vm1348_vm14, %v1352_v13, %v1354_v22  ;;  %v1357_v34 = vsel %vm1348_vm14, %v1354_v22, %v1356_v23  ;;  %v1401_v37 = vrot.slane %v7283_v41, 4  ;;  %v1404_v38 = vrot.slane %v7281_v40, 4 }
  0xb4   : > { %5520 = vrot.lane.b32.xlu0 %v5519_v51, %s11269_s28  ;;  %5525 = vrot.lane.b32.xlu1 %v5524_v52, %s11269_s28  ;;  %v5569_v42 = vpack.i.bf16 %v1353_v26, %v1351_v24  ;;  %v1359_v43 = vsel %vm1348_vm14, %v1356_v23, %v1358_v27  ;;  %v1361_v44 = vsel %vm1348_vm14, %v1358_v27, %v1360_v28  ;;  %v1366_v45 = vrot.slane %v7350_v4, 3  ;;  %v854_v24 = vld [vmem:[%s7404_s16 + $0x10] sm:$0xff] }
  0xb5   : > { %v5574_v46 = vpack.i.bf16 %v1357_v34, %v1355_v33  ;;  %v1363_v47 = vsel %vm1348_vm14, %v1360_v28, %v1362_v31  ;;  %v1365_v48 = vsel %vm1348_vm14, %v1362_v31, %v1364_v32  ;;  %v1368_v49 = vrot.slane %v7367_v25, 3 }
  0xb6   : > { %v1402_v50 = vrot.slane %v7276_v35, 4  ;;  %v701_v51 = vmul.f32 %v7240_v56, %v677_v39  ;;  %v5579_v52 = vpack.i.bf16 %v1361_v44, %v1359_v43  ;;  %v5584_v53 = vpack.i.bf16 %v1365_v48, %v1363_v47  ;;  %v853_v39 = vld [vmem:[%s7404_s16 + $0x8] sm:$0xff] }
  0xb7   : > { %v1367_v57 = vsel %vm1348_vm14, %v1364_v32, %v1366_v45  ;;  %v1369_v60 = vsel %vm1348_vm14, %v1366_v45, %v1368_v49  ;;  %v1406_v61 = vrot.slane %v7293_v55, 4  ;;  %v1408_v63 = vrot.slane %v7291_v54, 4  ;;  %v856_v49 = vld [vmem:[%s7404_s16 + $0x20] sm:$0xff] }
  0xb8   : > { %5530 = vrot.lane.b32.xlu0 %v5529_v2, %s11269_s28  ;;  %5535 = vrot.lane.b32.xlu1 %v5534_v3, %s11269_s28  ;;  %v1403_v58 = vsel %vm1400_vm15, %v1401_v37, %v1402_v50  ;;  %v7395_v59 = vsel %vm1400_vm15, %v1402_v50, %v1404_v38  ;;  %v1410_v1 = vrot.slane %v7303_v6, 4  ;;  %v1412_v2 = vrot.slane %v7301_v5, 4  ;;  %v837_v3 = vpop.permute.xlu0 %836 }
  0xb9   : > { %v720_v7 = vadd.f32 %v7250_v62, %v701_v51  ;;  %v5589_v8 = vpack.i.bf16 %v1369_v60, %v1367_v57  ;;  %v1407_v12 = vsel %vm1400_vm15, %v1404_v38, %v1406_v61  ;;  %v1409_v13 = vsel %vm1400_vm15, %v1406_v61, %v1408_v63 }
  0xba   : > { %v1411_v14 = vsel %vm1400_vm15, %v1408_v63, %v1410_v1  ;;  %v1414_v15 = vrot.slane %v7314_v19, 4  ;;  %v1418_v20 = vrot.slane %v7350_v4, 4  ;;  %v1420_v21 = vrot.slane %v7367_v25, 4  ;;  %v855_v63 = vld [vmem:[%s7404_s16 + $0x18] sm:$0xff] }
  0xbb   : > { %v746_v22 = vmul.f32 0.2, %v720_v7  ;;  %v871_v23 = vmul.f32 %v7240_v56, %v852_v11  ;;  %vm733_vm0 = vcmp.ge.f32.partialorder %v720_v7, 0.0  ;;  %v5599_v27 = vpack.i.bf16 %v1409_v13, %v1407_v12  ;;  %v857_v11 = vld [vmem:[%s7404_s16 + $0x28] sm:$0xff] }
  0xbc   : > { %5540 = vrot.lane.b32.xlu0 %v5539_v9, %s11269_s28  ;;  %5545 = vrot.lane.b32.xlu1 %v5544_v10, %s11243_s21  ;;  %v5594_v9 = vpack.i.bf16 %v7395_v59, %v1403_v58  ;;  %v7411_v10 = vpop.permute.xlu1 %952  ;;  %v7428_v26 = vpop.permute.xlu0 %957  ;;  %v7435_v32 = vsel %vm1400_vm15, %v1418_v20, %v1420_v21  ;;  %v873_v38 = vmul.f32 %v7240_v56, %v854_v24  ;;  %v1489_v57 = vrot.slane %v7293_v55, 5 }
  0xbd   : > { %v759_v33 = vsel %vm733_vm0, %v720_v7, %v746_v22  ;;  %v884_v37 = vadd.f32 %v7250_v62, %v871_v23  ;;  %v872_v45 = vmul.f32 %v7240_v56, %v853_v39  ;;  %v5619_v51 = vpack.i.bf16 %v1407_v12, %v7395_v59 }
  0xbe   : > { %v7445_v44 = vmul.f32 %v837_v3, %v759_v33  ;;  %v886_v48 = vadd.f32 %v7250_v62, %v873_v38  ;;  %v875_v60 = vmul.f32 %v7240_v56, %v856_v49  ;;  %v1491_v24 = vrot.slane %v7291_v54, 5  ;;  %v861_v49 = vld [vmem:[%s7404_s16 + $0x48] sm:$0xff] }
  0xbf   : > { %v910_v47 = vmul.f32 0.2, %v884_v37  ;;  %vm897_vm1 = vcmp.ge.f32.partialorder %v884_v37, 0.0  ;;  %v885_v58 = vadd.f32 %v7250_v62, %v872_v45  ;;  %v1501_v39 = vrot.slane %v7350_v4, 5 }
  0xc0   : > { %5550 = vrot.lane.b32.xlu0 %v5549_v16, %s11243_s21  ;;  %5555 = vrot.lane.b32.xlu1 %v5554_v17, %s11243_s21  ;;  %v7419_v16 = vsel %vm1400_vm15, %v1410_v1, %v1412_v2  ;;  %v1416_v17 = vrot.slane %v7312_v18, 4  ;;  %v7437_v34 = vpop.permute.xlu1 %962  ;;  %vm899_vm2 = vcmp.ge.f32.partialorder %v886_v48, 0.0  ;;  %v912_v59 = vmul.f32 0.2, %v886_v48 }
  0xc1   : > { %v5604_v28 = vpack.i.bf16 %v7419_v16, %v1411_v14  ;;  %v7463_v61 = vsel %vm897_vm1, %v884_v37, %v910_v47  ;;  %v1487_v1 = vrot.slane %v7281_v40, 5  ;;  %vm898_vm4 = vcmp.ge.f32.partialorder %v885_v58, 0.0 }
  0xc2   : > { %v1419_v31 = vsel %vm1400_vm15, %v1416_v17, %v1418_v20  ;;  %v888_v20 = vadd.f32 %v7250_v62, %v875_v60  ;;  %v1505_v33 = vrot.slane %v7445_v44, 5 }
  0xc3   : > { %v5614_v43 = vpack.i.bf16 %v7435_v32, %v1419_v31 }
  0xc4   : > { %5560 = vrot.lane.b32.xlu0 %v5559_v29, %s11243_s21  ;;  %5565 = vrot.lane.b32.xlu1 %v5564_v30, %s11243_s21  ;;  %v1415_v29 = vsel %vm1400_vm15, %v1412_v2, %v1414_v15  ;;  %v1417_v30 = vsel %vm1400_vm15, %v1414_v15, %v1416_v17  ;;  %v7454_v50 = vpop.permute.xlu1 %972  ;;  %v1497_v15 = vrot.slane %v7314_v19, 5  ;;  %v911_v17 = vmul.f32 0.2, %v885_v58 }
  0xc5   : > { %v5629_v3 = vpack.i.bf16 %v1415_v29, %v7419_v16  ;;  %v5634_v7 = vpack.i.bf16 %v1419_v31, %v1417_v30  ;;  %v874_v16 = vmul.f32 %v7240_v56, %v855_v63  ;;  %vm901_vm5 = vcmp.ge.f32.partialorder %v888_v20, 0.0 }
  0xc7   : > { %v7500_v45 = vadd.f32 %v7250_v62, %v874_v16 }
  0xc8   : > { %5570 = vrot.lane.b32.xlu0 %v5569_v42, %s11212_s19  ;;  %5575 = vrot.lane.b32.xlu1 %v5574_v46, %s11212_s19  ;;  %v5609_v42 = vpack.i.bf16 %v1417_v30, %v1415_v29  ;;  %v7448_v46 = vpop.permute.xlu0 %967  ;;  %v7479_v22 = vpop.permute.xlu1 %982  ;;  %v876_v29 = vmul.f32 %v7240_v56, %v857_v11 }
  0xc9   : > { %vm900_vm7 = vcmp.ge.f32.partialorder %v7500_v45, 0.0  ;;  %v913_v11 = vmul.f32 0.2, %v7500_v45 }
  0xcc   : > { %5580 = vrot.lane.b32.xlu0 %v5579_v52, %s11212_s19  ;;  %5585 = vrot.lane.b32.xlu1 %v5584_v53, %s11212_s19  ;;  %v5624_v52 = vpack.i.bf16 %v1411_v14, %v1409_v13  ;;  %v1453_v53 = vrot.slane %v7445_v44, 4  ;;  %v7467_v2 = vpop.permute.xlu0 %977  ;;  %v1490_v13 = vsel %vm1485_vm3, %v1487_v1, %v1489_v57  ;;  %v1493_v14 = vrot.slane %v7303_v6, 5  ;;  %v7519_v63 = vpop.permute.xlu1 %992 }
  0xce   : > { %v1454_v12 = vsel %vm1400_vm15, %v1420_v21, %v1453_v53  ;;  %v7484_v21 = vsel %vm899_vm2, %v886_v48, %v912_v59  ;;  %v1494_v37 = vsel %vm1485_vm3, %v1491_v24, %v1493_v14  ;;  %v859_v48 = vld [vmem:[%s7404_s16 + $0x38] sm:$0xff]  ;;  %v1499_v53 = vrot.slane %v7312_v18, 5 }
  0xcf   : > { %v5639_v30 = vpack.i.bf16 %v1454_v12, %v7435_v32  ;;  %v860_v32 = vld [vmem:[%s7404_s16 + $0x40] sm:$0xff]  ;;  %v7517_v59 = vadd.f32 %v7250_v62, %v876_v29 }
  0xd0   : > { %5590 = vrot.lane.b32.xlu0 %v5589_v8, %s11212_s19  ;;  %5595 = vrot.lane.b32.xlu1 %v5594_v9, %s11127_s27  ;;  %v1486_v8 = vrot.slane %v7276_v35, 5  ;;  %v858_v9 = vld [vmem:[%s7404_s16 + $0x30] sm:$0xff]  ;;  %v7502_v47 = vpop.permute.xlu0 %987  ;;  %v879_v12 = vmul.f32 %v7240_v56, %v860_v32  ;;  %v7546_v32 = vpop.permute.xlu1 %1002 }
  0xd1   : > { %vm902_vm10 = vcmp.ge.f32.partialorder %v7517_v59, 0.0 }
  0xd2   : > { %v1488_v23 = vsel %vm1485_vm3, %v1486_v8, %v1487_v1  ;;  %v1541_v8 = vrot.slane %v7293_v55, 6 }
  0xd3   : > { %v5644_v31 = vpack.i.bf16 %v1490_v13, %v1488_v23  ;;  %v878_v13 = vmul.f32 %v7240_v56, %v859_v48  ;;  %v1539_v23 = vrot.slane %v7281_v40, 6 }
  0xd4   : > { %5600 = vrot.lane.b32.xlu0 %v5599_v27, %s11127_s27  ;;  %5605 = vrot.lane.b32.xlu1 %v5604_v28, %s11127_s27  ;;  %v1495_v27 = vrot.slane %v7301_v5, 5  ;;  %v877_v28 = vmul.f32 %v7240_v56, %v858_v9  ;;  %v1545_v9 = vrot.slane %v7303_v6, 6 }
  0xd6   : > { %v1498_v38 = vsel %vm1485_vm3, %v1495_v27, %v1497_v15  ;;  %v7514_v60 = vadd.f32 %v7250_v62, %v877_v28 }
  0xd8   : > { %5610 = vrot.lane.b32.xlu0 %v5609_v42, %s11127_s27  ;;  %5615 = vrot.lane.b32.xlu1 %v5614_v43, %s11127_s27  ;;  %v7497_v42 = vsel %vm898_vm4, %v885_v58, %v911_v17  ;;  %v914_v43 = vmul.f32 0.2, %v888_v20  ;;  %v1503_v58 = vrot.slane %v7367_v25, 5  ;;  %v1500_v17 = vsel %vm1485_vm3, %v1497_v15, %v1499_v53  ;;  %s11137_s27 = smov 36  }
  0xd9   : > { %v1549_v15 = vrot.slane %v7314_v19, 6  ;;  %vm903_vm9 = vcmp.ge.f32.partialorder %v7514_v60, 0.0 }
  0xda   : > { %v1504_v16 = vsel %vm1485_vm3, %v1501_v39, %v1503_v58 }
  0xdc   : > { %5620 = vrot.lane.b32.xlu0 %v5619_v51, %s11125_s25  ;;  %5625 = vrot.lane.b32.xlu1 %v5624_v52, %s11125_s25  ;;  %v1492_v51 = vsel %vm1485_vm3, %v1489_v57, %v1491_v24  ;;  %v1496_v52 = vsel %vm1485_vm3, %v1493_v14, %v1495_v27  ;;  %v1506_v57 = vsel %vm1485_vm3, %v1503_v58, %v1505_v33  ;;  %v1543_v24 = vrot.slane %v7291_v54, 6  ;;  %v7536_v27 = vpop.permute.xlu0 %997 }
  0xdd   : > { %v5649_v1 = vpack.i.bf16 %v1494_v37, %v1492_v51  ;;  %v880_v14 = vmul.f32 %v7240_v56, %v861_v49  ;;  %v5664_v29 = vpack.i.bf16 %v1506_v57, %v1504_v16  ;;  %v1553_v37 = vrot.slane %v7350_v4, 6  ;;  %v862_v49 = vld [vmem:[%s7404_s16 + $0x50] sm:$0xff] }
  0xde   : > { %v1546_v33 = vsel %vm1537_vm8, %v1543_v24, %v1545_v9  ;;  %v1547_v4 = vrot.slane %v7301_v5, 6 }
  0xdf   : > { %v893_v48 = vadd.f32 %v7250_v62, %v880_v14  ;;  %v881_v14 = vmul.f32 %v7240_v56, %v862_v49  ;;  %v863_v49 = vld [vmem:[%s7404_s16 + $0x58] sm:$0xff] }
  0xe0   : > { %5630 = vrot.lane.b32.xlu0 %v5629_v3, %s11125_s25  ;;  %5635 = vrot.lane.b32.xlu1 %v5634_v7, %s11125_s25  ;;  %v5654_v3 = vpack.i.bf16 %v1498_v38, %v1496_v52  ;;  %v1502_v7 = vsel %vm1485_vm3, %v1499_v53, %v1501_v39  ;;  %v927_v38 = vsel %vm901_vm5, %v888_v20, %v914_v43  ;;  %v1551_v20 = vrot.slane %v7312_v18, 6 }
  0xe1   : > { %v5659_v28 = vpack.i.bf16 %v1502_v7, %v1500_v17  ;;  %v891_v39 = vadd.f32 %v7250_v62, %v878_v13  ;;  %v1544_v52 = vsel %vm1537_vm8, %v1541_v8, %v1543_v24  ;;  %v916_v43 = vmul.f32 0.2, %v7514_v60  ;;  %v7564_v17 = vpop.permute.xlu0 %1007 }
  0xe2   : > { %v5674_v58 = vpack.i.bf16 %v1546_v33, %v1544_v52  ;;  %v1550_v7 = vsel %vm1537_vm8, %v1547_v4, %v1549_v15  ;;  %v1554_v57 = vsel %vm1537_vm8, %v1551_v20, %v1553_v37  ;;  %v1548_v16 = vsel %vm1537_vm8, %v1545_v9, %v1547_v4 }
  0xe3   : > { %vm904_vm12 = vcmp.ge.f32.partialorder %v891_v39, 0.0  ;;  %v917_v13 = vmul.f32 0.2, %v891_v39  ;;  %v1555_v24 = vrot.slane %v7367_v25, 6  ;;  %vm906_vm13 = vcmp.ge.f32.partialorder %v893_v48, 0.0 }
  0xe4   : > { %5640 = vrot.lane.b32.xlu0 %v5639_v30, %s11125_s25  ;;  %5645 = vrot.lane.b32.xlu1 %v5644_v31, %s11123_s23  ;;  %v1538_v30 = vrot.slane %v7276_v35, 6  ;;  %v1542_v31 = vsel %vm1537_vm8, %v1539_v23, %v1541_v8  ;;  %v892_v8 = vadd.f32 %v7250_v62, %v879_v12  ;;  %v7573_v12 = vmul.f32 %v7428_v26, %v7497_v42  ;;  %s7619_s25 = scalar_lea.vmem %s11109_s2, %s5253_s22  ;;  %s11156_s22 = smov 44  }
  0xe5   : > { %v929_v9 = vsel %vm903_vm9, %v7514_v60, %v916_v43  ;;  %v7589_v42 = vmul.f32 %v7411_v10, %v7463_v61  ;;  %v930_v60 = vsel %vm904_vm12, %v891_v39, %v917_v13  ;;  %v1556_v10 = vsel %vm1537_vm8, %v1553_v37, %v1555_v24  ;;  %v1030_v43 = vld [vmem:[%s7619_s25 + $0x10] sm:$0xff] }
  0xe6   : > { %v1540_v51 = vsel %vm1537_vm8, %v1538_v30, %v1539_v23  ;;  %v1552_v23 = vsel %vm1537_vm8, %v1549_v15, %v1551_v20  ;;  %vm905_vm0 = vcmp.ge.f32.partialorder %v892_v8, 0.0  ;;  %v918_v33 = vmul.f32 0.2, %v892_v8  ;;  %v1031_v20 = vld [vmem:[%s7619_s25 + $0x18] sm:$0xff] }
  0xe7   : > { %v5669_v53 = vpack.i.bf16 %v1542_v31, %v1540_v51  ;;  %v5684_v30 = vpack.i.bf16 %v1554_v57, %v1552_v23  ;;  %v926_v31 = vsel %vm900_vm7, %v7500_v45, %v913_v11  ;;  %v894_v15 = vadd.f32 %v7250_v62, %v881_v14  ;;  %v7609_v51 = vpop.permute.xlu0 %1128 }
  0xe8   : > { %5650 = vrot.lane.b32.xlu0 %v5649_v1, %s11123_s23  ;;  %5655 = vrot.lane.b32.xlu1 %v5654_v3, %s11123_s23  ;;  %v1557_v1 = vrot.slane %v7445_v44, 6  ;;  %v915_v3 = vmul.f32 0.2, %v7517_v59  ;;  %v919_v44 = vmul.f32 0.2, %v893_v48  ;;  %v7597_v45 = vmul.f32 %v7437_v34, %v7484_v21 }
  0xe9   : > { %v7603_v61 = vmul.f32 %v7448_v46, %v926_v31  ;;  %v5694_v34 = vpack.i.bf16 %v7573_v12, %v7589_v42  ;;  %v7614_v21 = vmul.f32 %v7454_v50, %v927_v38  ;;  %v931_v46 = vsel %vm905_vm0, %v892_v8, %v918_v33 }
  0xea   : > { %v928_v25 = vsel %vm902_vm10, %v7517_v59, %v915_v3  ;;  %v1558_v26 = vsel %vm1537_vm8, %v1555_v24, %v1557_v1  ;;  %v932_v59 = vsel %vm906_vm13, %v893_v48, %v919_v44  ;;  %vm907_vm1 = vcmp.ge.f32.partialorder %v894_v15, 0.0  ;;  %v864_v48 = vld [vmem:[%s7404_s16 + $0x60] sm:$0xf] }
  0xeb   : > { %v7606_v11 = vmul.f32 %v7467_v2, %v928_v25  ;;  %v5689_v52 = vpack.i.bf16 %v1558_v26, %v1556_v10  ;;  %v920_v2 = vmul.f32 0.2, %v894_v15  ;;  %v7627_v50 = vmul.f32 %v7479_v22, %v929_v9  ;;  %v7656_v14 = vpop.permute.xlu0 %1138 }
  0xec   : > { %5660 = vrot.lane.b32.xlu0 %v5659_v28, %s11123_s23  ;;  %5665 = vrot.lane.b32.xlu1 %v5664_v29, %s11123_s23  ;;  %v7575_v28 = vpop.permute.xlu1 %1012  ;;  %v5679_v29 = vpack.i.bf16 %v1550_v7, %v1548_v16  ;;  %v7630_v38 = vmul.f32 %v7502_v47, %v930_v60  ;;  %v7633_v39 = vmul.f32 %v7536_v27, %v932_v59  ;;  %v1630_v22 = vrot.slane %v7573_v12, 1  ;;  %v1033_v16 = vld [vmem:[%s7619_s25 + $0x28] sm:$0xff]  ;;  %s11238_s23 = smov 40  }
  0xed   : > { %11345 = vst [vmem:[#allocation15_spill] sm:$0xff] %v7627_v50  ;;  %v882_v4 = vmul.f32 %v7240_v56, %v863_v49  ;;  %v1632_v47 = vrot.slane %v7597_v45, 1  ;;  %v7646_v1 = vmul.f32 %v7519_v63, %v931_v46  ;;  %v1634_v27 = vrot.slane %v7603_v61, 1 }
  0xee   : > { %11346 = vst [vmem:[#allocation16_spill] sm:$0xff] %v7633_v39  ;;  %v1636_v3 = vrot.slane %v7614_v21, 1  ;;  %v1629_v7 = vrot.slane %v7589_v42, 1  ;;  %v7652_v57 = vsel %vm907_vm1, %v894_v15, %v920_v2  ;;  %v883_v8 = vmul.f32 %v7240_v56, %v864_v48  ;;  %v1035_v48 = vld [vmem:[%s7619_s25 + $0x38] sm:$0xff] }
  0xef   : > { %11347 = vst [vmem:[#allocation17_spill] sm:$0xff] %v7646_v1  ;;  %v1050_v13 = vmul.f32 %v7240_v56, %v1031_v20  ;;  %v7661_v63 = vadd.f32 %v7250_v62, %v882_v4  ;;  %v1049_v44 = vmul.f32 %v7240_v56, %v1030_v43  ;;  %v5709_v23 = vpack.i.bf16 %v7630_v38, %v7627_v50  ;;  %v1034_v4 = vld [vmem:[%s7619_s25 + $0x30] sm:$0xff]  ;;  %v7698_v43 = vpop.permute.xlu0 %1148 }
  0xf0   : > { %5670 = vrot.lane.b32.xlu0 %v5669_v53, %s11240_s18  ;;  %5675 = vrot.lane.b32.xlu1 %v5674_v58, %s11240_s18  ;;  %v7622_v37 = vpop.permute.xlu1 %1133  ;;  %v5699_v53 = vpack.i.bf16 %v7603_v61, %v7597_v45  ;;  %v5704_v58 = vpack.i.bf16 %v7606_v11, %v7614_v21  ;;  %v5714_v24 = vpack.i.bf16 %v7633_v39, %v7646_v1  ;;  %v1638_v25 = vrot.slane %v7606_v11, 1 }
  0xf1   : > { %v1631_v31 = vsel %vm1214_vm6, %v1629_v7, %v1630_v22  ;;  %v1633_v9 = vsel %vm1214_vm6, %v1630_v22, %v1632_v47  ;;  %v1640_v26 = vrot.slane %v7627_v50, 1  ;;  %v1635_v33 = vsel %vm1214_vm6, %v1632_v47, %v1634_v27 }
  0xf2   : > { %v1637_v15 = vsel %vm1214_vm6, %v1634_v27, %v1636_v3  ;;  %v1642_v60 = vrot.slane %v7630_v38, 1  ;;  %v1644_v59 = vrot.slane %v7646_v1, 1  ;;  %v7681_v10 = vadd.f32 %v7250_v62, %v883_v8 }
  0xf3   : > { %v7684_v49 = vadd.f32 %v7250_v62, %v1050_v13  ;;  %v7693_v46 = vadd.f32 %v7250_v62, %v1049_v44  ;;  %v5719_v20 = vpack.i.bf16 %v1633_v9, %v1631_v31  ;;  %v7702_v22 = vpack.i.bf16 %v1637_v15, %v1635_v33  ;;  %v1038_v15 = vld [vmem:[%s7619_s25 + $0x50] sm:$0xff] }
  0xf4   : > { %5680 = vrot.lane.b32.xlu0 %v5679_v29, %s11240_s18  ;;  %5685 = vrot.lane.b32.xlu1 %v5684_v30, %s11240_s18  ;;  %v7669_v29 = vpop.permute.xlu1 %1143  ;;  %v1032_v30 = vld [vmem:[%s7619_s25 + $0x20] sm:$0xff]  ;;  %v1639_v47 = vsel %vm1214_vm6, %v1636_v3, %v1638_v25  ;;  %v1641_v27 = vsel %vm1214_vm6, %v1638_v25, %v1640_v26  ;;  %v7707_v7 = vrot.slane %v7633_v39, 1  ;;  %v1643_v8 = vsel %vm1214_vm6, %v1640_v26, %v1642_v60 }
  0xf5   : > { %v1051_v2 = vmul.f32 %v7240_v56, %v1032_v30  ;;  %v1645_v13 = vsel %vm1214_vm6, %v1642_v60, %v1644_v59  ;;  %v1679_v44 = vrot.slane %v7573_v12, 2  ;;  %v1054_v30 = vmul.f32 %v7240_v56, %v1035_v48 }
  0xf6   : > { %v1053_v31 = vmul.f32 %v7240_v56, %v1034_v4  ;;  %v1678_v9 = vrot.slane %v7589_v42, 2  ;;  %vm908_vm2 = vcmp.ge.f32.partialorder %v7661_v63, 0.0  ;;  %vm1076_vm4 = vcmp.ge.f32.partialorder %v7684_v49, 0.0 }
  0xf7   : > { %v7731_v33 = vpack.i.bf16 %v1641_v27, %v1639_v47  ;;  %vm1075_vm5 = vcmp.ge.f32.partialorder %v7693_v46, 0.0  ;;  %v7735_v60 = vpack.i.bf16 %v1645_v13, %v1643_v8  ;;  %v1683_v42 = vrot.slane %v7603_v61, 2  ;;  %v7752_v8 = vpop.permute.xlu0 %1158 }
  0xf8   : > { %5690 = vrot.lane.b32.xlu0 %v5689_v52, %s11240_s18  ;;  %5695 = vrot.lane.b32.xlu1 %v5694_v34, %s11137_s27  ;;  %v1052_v52 = vmul.f32 %v7240_v56, %v1033_v16  ;;  %v7690_v34 = vmul.f32 0.2, %v7661_v63  ;;  %v1681_v16 = vrot.slane %v7597_v45, 2  ;;  %v1685_v48 = vrot.slane %v7614_v21, 2 }
  0xf9   : > { %11348 = vst [vmem:[#allocation18_spill] sm:$0xff] %v7735_v60  ;;  %v1680_v4 = vsel %vm1264_vm11, %v1678_v9, %v1679_v44  ;;  %v1088_v47 = vmul.f32 0.2, %v7693_v46  ;;  %v1064_v27 = vadd.f32 %v7250_v62, %v1051_v2  ;;  %v1066_v13 = vadd.f32 %v7250_v62, %v1053_v31 }
  0xfa   : > { %v7719_v3 = vadd.f32 %v7250_v62, %v1052_v52  ;;  %v7739_v52 = vsel %vm1214_vm6, %v1644_v59, %v7707_v7  ;;  %v1067_v59 = vadd.f32 %v7250_v62, %v1054_v30  ;;  %v1057_v0 = vmul.f32 %v7240_v56, %v1038_v15 }
  0xfb   : > { %v5739_v2 = vpack.i.bf16 %v7707_v7, %v7739_v52  ;;  %v7766_v31 = vsel %vm1264_vm11, %v1681_v16, %v1683_v42  ;;  %v7769_v18 = vsel %vm1264_vm11, %v1683_v42, %v1685_v48  ;;  %v1691_v6 = vrot.slane %v7630_v38, 2 }
  0xfc   : > { %5700 = vrot.lane.b32.xlu0 %v5699_v53, %s11137_s27  ;;  %5705 = vrot.lane.b32.xlu1 %v5704_v58, %s11137_s27  ;;  %v1037_v53 = vld [vmem:[%s7619_s25 + $0x48] sm:$0xff]  ;;  %v1036_v58 = vld [vmem:[%s7619_s25 + $0x40] sm:$0xff]  ;;  %vm1078_vm7 = vcmp.ge.f32.partialorder %v7719_v3, 0.0  ;;  %vm1077_vm9 = vcmp.ge.f32.partialorder %v1064_v27, 0.0  ;;  %v1090_v15 = vmul.f32 0.2, %v1064_v27  ;;  %v5749_v55 = vpack.i.bf16 %v7769_v18, %v7766_v31 }
  0xfd   : > { %v1056_v25 = vmul.f32 %v7240_v56, %v1037_v53  ;;  %v1055_v26 = vmul.f32 %v7240_v56, %v1036_v58  ;;  %v1687_v53 = vrot.slane %v7606_v11, 2  ;;  %v1689_v58 = vrot.slane %v7627_v50, 2 }
  0xfe   : > { %v1693_v56 = vrot.slane %v7646_v1, 2  ;;  %vm1080_vm10 = vcmp.ge.f32.partialorder %v1067_v59, 0.0  ;;  %v1093_v42 = vmul.f32 0.2, %v1067_v59  ;;  %vm1079_vm12 = vcmp.ge.f32.partialorder %v1066_v13, 0.0 }
  0xff   : > { %v1068_v9 = vadd.f32 %v7250_v62, %v1055_v26  ;;  %v7780_v26 = vrot.slane %v7633_v39, 2  ;;  %v7797_v35 = vsel %vm1264_vm11, %v1689_v58, %v1691_v6  ;;  %v934_v41 = vsel %vm908_vm2, %v7661_v63, %v7690_v34 }
 0x100   : > { %5710 = vrot.lane.b32.xlu0 %v5709_v23, %s11137_s27  ;;  %5715 = vrot.lane.b32.xlu1 %v5714_v24, %s11137_s27  ;;  %v7714_v23 = vmul.f32 0.2, %v7684_v49  ;;  %v7716_v24 = vpop.permute.xlu1 %1153  ;;  %v7800_v40 = vsel %vm1264_vm11, %v1691_v6, %v1693_v56  ;;  %v7816_v6 = vmul.f32 %v7546_v32, %v7652_v57  ;;  %v1101_v63 = vsel %vm1075_vm5, %v7693_v46, %v1088_v47  ;;  %s11154_s27 = smov 48  }
 0x101   : > { %v1094_v5 = vmul.f32 0.2, %v1068_v9  ;;  %v1696_v36 = vsel %vm1264_vm11, %v1693_v56, %v7780_v26  ;;  %vm1081_vm0 = vcmp.ge.f32.partialorder %v1068_v9, 0.0  ;;  %v7831_v57 = vmul.f32 %v7564_v17, %v934_v41 }
 0x102   : > { %v5764_v32 = vpack.i.bf16 %v7780_v26, %v1696_v36  ;;  %v1728_v17 = vrot.slane %v7816_v6, 2  ;;  %v1761_v56 = vrot.slane %v7573_v12, 3  ;;  %vm909_vm2 = vcmp.ge.f32.partialorder %v7681_v10, 0.0 }
 0x103   : > { %v1107_v46 = vsel %vm1081_vm0, %v1068_v9, %v1094_v5  ;;  %vm1918_vm0 = vcmask 97280  }
 0x104   : > { %5720 = vrot.lane.b32.xlu0 %v5719_v20, %s11238_s23  ;;  %5725 = vrot.lane.b32.xlu1 %v7702_v22, %s11238_s23  ;;  %v7745_v20 = vsel %vm1264_vm11, %v1679_v44, %v1681_v16  ;;  %v1069_v44 = vadd.f32 %v7250_v62, %v1056_v25  ;;  %v1164_v30 = vpop.permute.xlu1 %1163  ;;  %v7773_v25 = vsel %vm1264_vm11, %v1685_v48, %v1687_v53  ;;  %v1091_v16 = vmul.f32 0.2, %v7719_v3 }
 0x105   : > { %v5744_v19 = vpack.i.bf16 %v7745_v20, %v1680_v4  ;;  %v7776_v62 = vsel %vm1264_vm11, %v1687_v53, %v1689_v58  ;;  %v1092_v48 = vmul.f32 0.2, %v1066_v13  ;;  %v1169_v53 = vpop.permute.xlu0 %1168 }
 0x106   : > { %v1095_v4 = vmul.f32 0.2, %v1069_v44  ;;  %v5754_v54 = vpack.i.bf16 %v7776_v62, %v7773_v25  ;;  %vm1082_vm13 = vcmp.ge.f32.partialorder %v1069_v44, 0.0  ;;  %v1104_v34 = vsel %vm1078_vm7, %v7719_v3, %v1091_v16 }
 0x107   : > { %v7837_v3 = vmul.f32 %v7656_v14, %v1101_v63  ;;  %v1762_v16 = vrot.slane %v7597_v45, 3  ;;  %v1813_v63 = vrot.slane %v7597_v45, 4 }
 0x108   : > { %5730 = vrot.lane.b32.xlu0 %v7731_v33, %s11238_s23  ;;  %5735 = vrot.lane.b32.xlu1 %v7735_v60, %s11238_s23  ;;  %v1102_v60 = vsel %vm1076_vm4, %v7684_v49, %v7714_v23  ;;  %v1103_v49 = vsel %vm1077_vm9, %v1064_v27, %v1090_v15  ;;  %v1106_v23 = vsel %vm1080_vm10, %v1067_v59, %v1093_v42  ;;  %vm11242_vm9 = vcmask 1040384  }
 0x109   : > { %v1108_v58 = vsel %vm1082_vm13, %v1069_v44, %v1095_v4  ;;  %v7834_v47 = vmul.f32 %v7669_v29, %v1102_v60  ;;  %v7840_v27 = vmul.f32 %v7716_v24, %v1104_v34  ;;  %v1179_v59 = vpop.permute.xlu0 %1178  ;;  %v7845_v41 = vmul.f32 %v7698_v43, %v1103_v49 }
 0x10a   : > { %v7847_v5 = vmul.f32 %v1164_v30, %v1106_v23  ;;  %v1764_v29 = vrot.slane %v7603_v61, 3  ;;  %v5769_v60 = vpack.i.bf16 %v7766_v31, %v7745_v20  ;;  %v5774_v44 = vpack.i.bf16 %v7773_v25, %v7769_v18 }
 0x10b   : > { %v1768_v43 = vrot.slane %v7606_v11, 3  ;;  %v7863_v30 = vmul.f32 %v1169_v53, %v1107_v46  ;;  %v5779_v18 = vpack.i.bf16 %v7797_v35, %v7776_v62  ;;  %v1766_v20 = vrot.slane %v7614_v21, 3 }
 0x10c   : > { %5740 = vrot.lane.b32.xlu0 %v5739_v2, %s11238_s23  ;;  %5745 = vrot.lane.b32.xlu1 %v5744_v19, %s11156_s22  ;;  %v7793_v2 = vld [vmem:[%s11113_s6] ss:$0 sm:$0xff]  ;;  %v5784_v31 = vpack.i.bf16 %v1696_v36, %v7800_v40  ;;  %v1729_v25 = vsel %vm1264_vm11, %v7780_v26, %v1728_v17  ;;  %v1765_v42 = vsel %vm1348_vm14, %v1762_v16, %v1764_v29  ;;  %v2481_v49 = vrot.slane %v7837_v3, 1 }
 0x10d   : > { %v1070_v19 = vadd.f32 %v7793_v2, %v1057_v0  ;;  %v1174_v0 = vpop.permute.xlu1 %1173  ;;  %v7879_v4 = vpop.permute.xlu0 %1188  ;;  %v1763_v26 = vsel %vm1348_vm14, %v1761_v56, %v1762_v16  ;;  %v1767_v34 = vsel %vm1348_vm14, %v1764_v29, %v1766_v20  ;;  %v2482_v23 = vrot.slane %v7834_v47, 1 }
 0x10e   : > { %v7861_v9 = vmul.f32 %v1174_v0, %v1108_v58  ;;  %v1770_v0 = vrot.slane %v7627_v50, 3  ;;  %v1776_v16 = vrot.slane %v7633_v39, 3  ;;  %vm1907_vm13 = vcmask 64512  }
 0x10f   : > { %vm1083_vm1 = vcmp.ge.f32.partialorder %v1070_v19, 0.0 }
 0x110   : > { %5750 = vrot.lane.b32.xlu0 %v5749_v55, %s11156_s22  ;;  %5755 = vrot.lane.b32.xlu1 %v5754_v54, %s11156_s22  ;;  %v1105_v55 = vsel %vm1079_vm12, %v1066_v13, %v1092_v48  ;;  %v5759_v54 = vpack.i.bf16 %v7800_v40, %v7797_v35  ;;  %v1096_v13 = vmul.f32 0.2, %v1070_v19  ;;  %v1772_v48 = vrot.slane %v7630_v38, 3 }
 0x111   : > { %v7852_v14 = vmul.f32 %v7752_v8, %v1105_v55  ;;  %v7854_v24 = vpop.permute.xlu1 %1183  ;;  %v1780_v8 = vrot.slane %v7831_v57, 3  ;;  %v2484_v55 = vrot.slane %v7845_v41, 1  ;;  %vm1896_vm12 = vcmask 31744  }
 0x112   : > { %v1109_v15 = vsel %vm1083_vm1, %v1070_v19, %v1096_v13  ;;  %v1769_v19 = vsel %vm1348_vm14, %v1766_v20, %v1768_v43  ;;  %v1773_v46 = vsel %vm1348_vm14, %v1770_v0, %v1772_v48  ;;  %vm11260_vm1 = vcmask 130048  }
 0x113   : > { %v7890_v40 = vmul.f32 %v1179_v59, %v1109_v15  ;;  %v5799_v58 = vpack.i.bf16 %v1769_v19, %v1767_v34  ;;  %v7911_v29 = vsel %vm1214_vm6, %v2482_v23, %v2484_v55  ;;  %v2488_v56 = vrot.slane %v7852_v14, 1 }
 0x114   : > { %5760 = vrot.lane.b32.xlu0 %v5759_v54, %s11156_s22  ;;  %5765 = vrot.lane.b32.xlu1 %v5764_v32, %s11156_s22  ;;  %v5789_v54 = vpack.i.bf16 %v1728_v17, %v1729_v25  ;;  %v5794_v32 = vpack.i.bf16 %v1765_v42, %v1763_v26  ;;  %v1774_v17 = vrot.slane %v7646_v1, 3  ;;  %v2492_v25 = vrot.slane %v7863_v30, 1  ;;  %s11192_s22 = smov 60  }
 0x115   : > { %v2494_v42 = vrot.slane %v7861_v9, 1  ;;  %v1771_v19 = vsel %vm1348_vm14, %v1768_v43, %v1770_v0  ;;  %v1778_v26 = vrot.slane %v7816_v6, 3  ;;  %v11144_v43 = vrot.slane %v7890_v40, 1 }
 0x116   : > { %v7881_v53 = vpop.permute.xlu1 %5495  ;;  %v1777_v0 = vsel %vm1348_vm14, %v1774_v17, %v1776_v16  ;;  %v1819_v15 = vrot.slane %v7606_v11, 4 }
 0x117   : > { %v1781_v34 = vsel %vm1348_vm14, %v1778_v26, %v1780_v8  ;;  %v1779_v8 = vsel %vm1348_vm14, %v1776_v16, %v1778_v26  ;;  %v1823_v16 = vrot.slane %v7630_v38, 4  ;;  %v922_v26 = vmul.f32 0.2, %v7681_v10 }
 0x118   : > { %5770 = vrot.lane.b32.xlu0 %v5769_v60, %s11154_s27  ;;  %5775 = vrot.lane.b32.xlu1 %v5774_v44, %s11154_s27  ;;  %v7908_v60 = vsel %vm1214_vm6, %v2481_v49, %v2482_v23  ;;  %v2486_v44 = vrot.slane %v7840_v27, 1 }
 0x11a   : > { %v7903_v59 = vpop.permute.xlu0 %5500  ;;  %v7923_v20 = vsel %vm1214_vm6, %v2484_v55, %v2486_v44 }
 0x11c   : > { %5780 = vrot.lane.b32.xlu0 %v5779_v18, %s11154_s27  ;;  %5785 = vrot.lane.b32.xlu1 %v5784_v31, %s11154_s27  ;;  %v2490_v18 = vrot.slane %v7847_v5, 1  ;;  %v7926_v31 = vsel %vm1214_vm6, %v2486_v44, %v2488_v56  ;;  %v7945_v44 = vsel %vm1214_vm6, %v2492_v25, %v2494_v42 }
 0x11e   : > { %v7905_v13 = vpop.permute.xlu1 %5505  ;;  %v7935_v49 = vsel %vm1214_vm6, %v2488_v56, %v2490_v18  ;;  %v1815_v56 = vrot.slane %v7603_v61, 4 }
 0x120   : > { %5790 = vrot.lane.b32.xlu0 %v5789_v54, %s11154_s27  ;;  %5795 = vrot.lane.b32.xlu1 %v5794_v32, %s11147_s24  ;;  %v5804_v54 = vpack.i.bf16 %v1773_v46, %v1771_v19  ;;  %v7942_v32 = vsel %vm1214_vm6, %v2490_v18, %v2492_v25  ;;  %v1775_v46 = vsel %vm1348_vm14, %v1772_v48, %v1774_v17  ;;  %v1812_v19 = vrot.slane %v7573_v12, 4  ;;  %s11390_s27 = smov 20  }
 0x121   : > { %v7960_v25 = vsel %vm1214_vm6, %v2494_v42, %v11144_v43  ;;  %v5809_v48 = vpack.i.bf16 %v1777_v0, %v1775_v46  ;;  %v5814_v17 = vpack.i.bf16 %v1781_v34, %v1779_v8  ;;  %v1816_v42 = vsel %vm1400_vm15, %v1813_v63, %v1815_v56 }
 0x122   : > { %v7937_v23 = vpop.permute.xlu0 %5510  ;;  %v7939_v55 = vpop.permute.xlu1 %5515  ;;  %v1827_v12 = vrot.slane %v7633_v39, 4  ;;  %v1814_v34 = vsel %vm1400_vm15, %v1812_v19, %v1813_v63  ;;  %v1821_v46 = vrot.slane %v7627_v50, 4  ;;  %v1825_v8 = vrot.slane %v7646_v1, 4  ;;  %v1028_v19 = vld [vmem:[%s7619_s25] sm:$0xff] }
 0x123   : > { %v5819_v35 = vpack.i.bf16 %v1816_v42, %v1814_v34  ;;  %v935_v63 = vsel %vm909_vm2, %v7681_v10, %v922_v26  ;;  %vm11258_vm2 = vcmask 162816  }
 0x124   : > { %5800 = vrot.lane.b32.xlu0 %v5799_v58, %s11147_s24  ;;  %5805 = vrot.lane.b32.xlu1 %v5804_v54, %s11147_s24  ;;  %v1817_v58 = vrot.slane %v7614_v21, 4  ;;  %v1826_v34 = vsel %vm1400_vm15, %v1823_v16, %v1825_v8  ;;  %v8004_v10 = vmul.f32 %v7575_v28, %v935_v63 }
 0x126   : > { %v7966_v36 = vpop.permute.xlu0 %5520  ;;  %v7968_v54 = vpop.permute.xlu1 %5525  ;;  %v1820_v43 = vsel %vm1400_vm15, %v1817_v58, %v1819_v15  ;;  %v1818_v0 = vsel %vm1400_vm15, %v1815_v56, %v1817_v58  ;;  %v1029_v56 = vld [vmem:[%s7619_s25 + $0x8] sm:$0xff]  ;;  %v1822_v58 = vsel %vm1400_vm15, %v1819_v15, %v1821_v46 }
 0x127   : > { %11349 = vst [vmem:[#allocation19_spill] sm:$0xff] %v7966_v36  ;;  %11350 = vst [vmem:[#allocation20_spill] sm:$0xff] %v7968_v54  ;;  %v5824_v54 = vpack.i.bf16 %v1820_v43, %v1818_v0  ;;  %v1831_v36 = vrot.slane %v7831_v57, 4  ;;  %v5844_v63 = vpack.i.bf16 %v1818_v0, %v1816_v42 }
 0x128   : > { %5810 = vrot.lane.b32.xlu0 %v5809_v48, %s11147_s24  ;;  %5815 = vrot.lane.b32.xlu1 %v5814_v17, %s11147_s24  ;;  %v1824_v48 = vsel %vm1400_vm15, %v1821_v46, %v1823_v16  ;;  %v1828_v17 = vsel %vm1400_vm15, %v1825_v8, %v1827_v12  ;;  %s11201_s24 = smov 56  }
 0x129   : > { %v5829_v39 = vpack.i.bf16 %v1824_v48, %v1822_v58  ;;  %v5834_v50 = vpack.i.bf16 %v1828_v17, %v1826_v34 }
 0x12a   : > { %v7984_v18 = vpop.permute.xlu0 %5530  ;;  %v7986_v62 = vpop.permute.xlu1 %5535 }
 0x12b   : > { %11351 = vst [vmem:[#allocation21_spill] sm:$0xff] %v7984_v18  ;;  %11352 = vst [vmem:[#allocation22_spill] sm:$0xff] %v7986_v62  ;;  %v1829_v62 = vrot.slane %v7816_v6, 4 }
 0x12c   : > { %5820 = vrot.lane.b32.xlu0 %v5819_v35, %s11201_s24  ;;  %5825 = vrot.lane.b32.xlu1 %v5824_v54, %s11201_s24  ;;  %v8009_v35 = vld [vmem:[%s11112_s5] ss:$0 sm:$0xff] }
 0x12d   : > { %v1047_v15 = vmul.f32 %v8009_v35, %v1028_v19  ;;  %v1832_v54 = vsel %vm1400_vm15, %v1829_v62, %v1831_v36  ;;  %v1048_v16 = vmul.f32 %v8009_v35, %v1029_v56  ;;  %v1830_v26 = vsel %vm1400_vm15, %v1827_v12, %v1829_v62 }
 0x12e   : > { %v7999_v18 = vpop.permute.xlu0 %5540  ;;  %v8001_v1 = vpop.permute.xlu1 %5545  ;;  %v5839_v8 = vpack.i.bf16 %v1832_v54, %v1830_v26  ;;  %v5849_v62 = vpack.i.bf16 %v1822_v58, %v1820_v43  ;;  %v5854_v12 = vpack.i.bf16 %v1826_v34, %v1824_v48  ;;  %v2061_v48 = vrot.slane %v7816_v6, 1  ;;  %v8042_v34 = vld [vmem:[%s7235_s20 + $0x8] sm:$0xff] }
 0x12f   : > { %11353 = vst [vmem:[#allocation23_spill] sm:$0xff] %v7999_v18  ;;  %11354 = vst [vmem:[#allocation24_spill] sm:$0xff] %v8001_v1  ;;  %v1864_v1 = vrot.slane %v8004_v10, 4  ;;  %v1060_v19 = vadd.f32 %v7793_v2, %v1047_v15  ;;  %v1061_v18 = vadd.f32 %v7793_v2, %v1048_v16 }
 0x130   : > { %5830 = vrot.lane.b32.xlu0 %v5829_v39, %s11201_s24  ;;  %5835 = vrot.lane.b32.xlu1 %v5834_v50, %s11201_s24 }
 0x131   : > { %v1086_v56 = vmul.f32 0.2, %v1060_v19  ;;  %v1865_v42 = vsel %vm1400_vm15, %v1831_v36, %v1864_v1  ;;  %v1087_v0 = vmul.f32 0.2, %v1061_v18  ;;  %vm1073_vm4 = vcmp.ge.f32.partialorder %v1060_v19, 0.0  ;;  %v6860_v1 = vld [vmem:[%s7235_s20] sm:$0xff] }
 0x132   : > { %v8017_v46 = vpop.permute.xlu0 %5550  ;;  %v8019_v28 = vpop.permute.xlu1 %5555  ;;  %vm1074_vm5 = vcmp.ge.f32.partialorder %v1061_v18, 0.0  ;;  %v2733_v36 = vrot.slane %v6860_v1, 1 }
 0x133   : > { %11355 = vst [vmem:[#allocation25_spill] sm:$0xff] %v8017_v46  ;;  %11356 = vst [vmem:[#allocation26_spill] sm:$0xff] %v8019_v28  ;;  %v1099_v43 = vsel %vm1073_vm4, %v1060_v19, %v1086_v56  ;;  %v1100_v58 = vsel %vm1074_vm5, %v1061_v18, %v1087_v0  ;;  %v2065_v18 = vrot.slane %v8004_v10, 1  ;;  %v2062_v19 = vsel %vm1214_vm6, %v7707_v7, %v2061_v48 }
 0x134   : > { %5840 = vrot.lane.b32.xlu0 %v5839_v8, %s11201_s24  ;;  %5845 = vrot.lane.b32.xlu1 %v5844_v63, %s11192_s22  ;;  %v5859_v8 = vpack.i.bf16 %v1830_v26, %v1828_v17  ;;  %v5864_v63 = vpack.i.bf16 %v1865_v42, %v1832_v54  ;;  %v8055_v26 = vmul.f32 %v7622_v37, %v1100_v58  ;;  %s11406_s24 = smov 28   ;;  %vm11257_vm4 = vcmask 195584  }
 0x135   : > { %v5884_v42 = vpack.i.bf16 %v2062_v19, %v7739_v52  ;;  %vm11256_vm5 = vcmask 228352  }
 0x136   : > { %v8026_v50 = vpop.permute.xlu0 %5560  ;;  %v8028_v39 = vpop.permute.xlu1 %5565 }
 0x137   : > { %11357 = vst [vmem:[#allocation27_spill] sm:$0xff] %v8026_v50  ;;  %11358 = vst [vmem:[#allocation28_spill] sm:$0xff] %v8028_v39  ;;  %v2231_v39 = vrot.slane %v7861_v9, 5 }
 0x138   : > { %5850 = vrot.lane.b32.xlu0 %v5849_v62, %s11192_s22  ;;  %5855 = vrot.lane.b32.xlu1 %v5854_v12, %s11192_s22  ;;  %v11161_v62 = vrot.slane %v8042_v34, 1  ;;  %v2063_v12 = vrot.slane %v7831_v57, 1 }
 0x13a   : > { %v8033_v15 = vpop.permute.xlu0 %5570  ;;  %v8035_v16 = vpop.permute.xlu1 %5575  ;;  %v2064_v7 = vsel %vm1214_vm6, %v2061_v48, %v2063_v12  ;;  %v2117_v48 = vrot.slane %v7845_v41, 3 }
 0x13b   : > { %11359 = vst [vmem:[#allocation29_spill] sm:$0xff] %v8033_v15  ;;  %11360 = vst [vmem:[#allocation30_spill] sm:$0xff] %v8035_v16  ;;  %v8047_v16 = vmul.f32 %v7609_v51, %v1099_v43  ;;  %v2735_v51 = vsel %vm1214_vm6, %v2733_v36, %v11161_v62  ;;  %v11365_v43 = vld [vmem:[#allocation18_spill] sm:$0xff]  ;;  %v2121_v62 = vrot.slane %v7852_v14, 3 }
 0x13c   : > { %5860 = vrot.lane.b32.xlu0 %v5859_v8, %s11192_s22  ;;  %5865 = vrot.lane.b32.xlu1 %v5864_v63, %s11192_s22  ;;  %v2066_v8 = vsel %vm1214_vm6, %v2063_v12, %v2065_v18  ;;  %v2115_v63 = vrot.slane %v7834_v47, 3  ;;  %v5894_v52 = vpack.i.bf16 %v2735_v51, %v2065_v18  ;;  %v2119_v12 = vrot.slane %v7840_v27, 3  ;;  %s11397_s22 = smov 24  }
 0x13d   : > { %v2110_v56 = vrot.slane %v8047_v16, 3  ;;  %v5889_v19 = vpack.i.bf16 %v2066_v8, %v2064_v7  ;;  %v2782_v18 = vrot.slane %v6860_v1, 2  ;;  %v2783_v51 = vrot.slane %v8042_v34, 2 }
 0x13e   : > { %v8049_v17 = vpop.permute.xlu0 %5580  ;;  %v8051_v54 = vpop.permute.xlu1 %5585  ;;  %v2127_v1 = vrot.slane %v7861_v9, 3 }
 0x13f   : > { %11361 = vst [vmem:[#allocation31_spill] sm:$0xff] %v8049_v17  ;;  %11362 = vst [vmem:[#allocation32_spill] sm:$0xff] %v8051_v54  ;;  %v2118_v54 = vsel %vm1348_vm14, %v2115_v63, %v2117_v48 }
 0x140   : > { %5870 = vrot.lane.b32.xlu0 %v7702_v22, %s11278_s26  ;;  %5875 = vrot.lane.b32.xlu1 %v7731_v33, %s11278_s26  ;;  %v2111_v22 = vrot.slane %v8055_v26, 3  ;;  %v2113_v33 = vrot.slane %v7837_v3, 3 }
 0x142   : > { %v8068_v0 = vpop.permute.xlu0 %5590  ;;  %v8070_v37 = vpop.permute.xlu1 %5595 }
 0x143   : > { %11363 = vst [vmem:[#allocation33_spill] sm:$0xff] %v8068_v0  ;;  %11364 = vst [vmem:[#allocation34_spill] sm:$0xff] %v8070_v37  ;;  %v2112_v37 = vsel %vm1348_vm14, %v2110_v56, %v2111_v22  ;;  %v2114_v0 = vsel %vm1348_vm14, %v2111_v22, %v2113_v33  ;;  %v2120_v22 = vsel %vm1348_vm14, %v2117_v48, %v2119_v12 }
 0x144   : > { %5880 = vrot.lane.b32.xlu0 %v11365_v43, %s11278_s26  ;;  %5885 = vrot.lane.b32.xlu1 %v5884_v42, %s11278_s26  ;;  %v2116_v43 = vsel %vm1348_vm14, %v2113_v33, %v2115_v63  ;;  %v2123_v42 = vrot.slane %v7847_v5, 3  ;;  %v2122_v33 = vsel %vm1348_vm14, %v2119_v12, %v2121_v62  ;;  %v5909_v63 = vpack.i.bf16 %v2120_v22, %v2118_v54 }
 0x146   : > { %v8080_v58 = vpop.permute.xlu0 %5600  ;;  %v8082_v36 = vpop.permute.xlu1 %5605  ;;  %v2124_v17 = vsel %vm1348_vm14, %v2121_v62, %v2123_v42  ;;  %v2163_v62 = vrot.slane %v8055_v26, 4 }
 0x147   : > { %11366 = vst [vmem:[#allocation18_spill] sm:$0xff] %v8080_v58  ;;  %11367 = vst [vmem:[#allocation35_spill] sm:$0xff] %v8082_v36  ;;  %v5899_v36 = vpack.i.bf16 %v2112_v37, %v2110_v56  ;;  %v5904_v58 = vpack.i.bf16 %v2116_v43, %v2114_v0  ;;  %v2162_v56 = vrot.slane %v8047_v16, 4  ;;  %v5914_v48 = vpack.i.bf16 %v2124_v17, %v2122_v33 }
 0x148   : > { %5890 = vrot.lane.b32.xlu0 %v5889_v19, %s11278_s26  ;;  %5895 = vrot.lane.b32.xlu1 %v5894_v52, %s11278_s26  ;;  %v2125_v19 = vrot.slane %v7863_v30, 3  ;;  %v2784_v52 = vsel %vm1264_vm11, %v2782_v18, %v2783_v51  ;;  %v2169_v18 = vrot.slane %v7845_v41, 4  ;;  %v2171_v33 = vrot.slane %v7840_v27, 4 }
 0x149   : > { %v5924_v22 = vpack.i.bf16 %v2784_v52, %v2127_v1 }
 0x14a   : > { %v8094_v7 = vpop.permute.xlu0 %5610  ;;  %v8096_v8 = vpop.permute.xlu1 %5615  ;;  %v2126_v12 = vsel %vm1348_vm14, %v2123_v42, %v2125_v19  ;;  %v2128_v43 = vsel %vm1348_vm14, %v2125_v19, %v2127_v1  ;;  %v2164_v42 = vsel %vm1400_vm15, %v2162_v56, %v2163_v62 }
 0x14b   : > { %11368 = vst [vmem:[#allocation36_spill] sm:$0xff] %v8094_v7  ;;  %11369 = vst [vmem:[#allocation37_spill] sm:$0xff] %v8096_v8  ;;  %v5919_v54 = vpack.i.bf16 %v2128_v43, %v2126_v12  ;;  %v5929_v43 = vpack.i.bf16 %v2164_v42, %v2162_v56  ;;  %v2179_v7 = vrot.slane %v7861_v9, 4 }
 0x14c   : > { %5900 = vrot.lane.b32.xlu0 %v5899_v36, %s11269_s28  ;;  %5905 = vrot.lane.b32.xlu1 %v5904_v58, %s11269_s28  ;;  %v2165_v36 = vrot.slane %v7837_v3, 4  ;;  %v2167_v58 = vrot.slane %v7834_v47, 4 }
 0x14e   : > { %v8108_v0 = vpop.permute.xlu0 %5620  ;;  %v8110_v37 = vpop.permute.xlu1 %5625  ;;  %v2166_v19 = vsel %vm1400_vm15, %v2163_v62, %v2165_v36 }
 0x14f   : > { %11370 = vst [vmem:[#allocation38_spill] sm:$0xff] %v8108_v0  ;;  %11371 = vst [vmem:[#allocation39_spill] sm:$0xff] %v8110_v37  ;;  %v2168_v0 = vsel %vm1400_vm15, %v2165_v36, %v2167_v58  ;;  %v2170_v36 = vsel %vm1400_vm15, %v2167_v58, %v2169_v18 }
 0x150   : > { %5910 = vrot.lane.b32.xlu0 %v5909_v63, %s11269_s28  ;;  %5915 = vrot.lane.b32.xlu1 %v5914_v48, %s11269_s28  ;;  %v2173_v63 = vrot.slane %v7852_v14, 4  ;;  %v2175_v48 = vrot.slane %v7847_v5, 4  ;;  %v5934_v62 = vpack.i.bf16 %v2168_v0, %v2166_v19  ;;  %v2214_v0 = vrot.slane %v8047_v16, 5 }
 0x151   : > { %v2215_v19 = vrot.slane %v8055_v26, 5 }
 0x152   : > { %v8120_v37 = vpop.permute.xlu0 %5630  ;;  %v8122_v17 = vpop.permute.xlu1 %5635  ;;  %v2174_v8 = vsel %vm1400_vm15, %v2171_v33, %v2173_v63 }
 0x153   : > { %11372 = vst [vmem:[#allocation40_spill] sm:$0xff] %v8120_v37  ;;  %11373 = vst [vmem:[#allocation41_spill] sm:$0xff] %v8122_v17  ;;  %v8133_v37 = vld [vmem:[%s7235_s20 + $0x10] sm:$0xff]  ;;  %v2172_v17 = vsel %vm1400_vm15, %v2169_v18, %v2171_v33 }
 0x154   : > { %5920 = vrot.lane.b32.xlu0 %v5919_v54, %s11269_s28  ;;  %5925 = vrot.lane.b32.xlu1 %v5924_v22, %s11269_s28  ;;  %v11175_v1 = vrot.slane %v8133_v37, 2  ;;  %v2176_v54 = vsel %vm1400_vm15, %v2173_v63, %v2175_v48  ;;  %v2177_v22 = vrot.slane %v7863_v30, 4  ;;  %v5939_v42 = vpack.i.bf16 %v2172_v17, %v2170_v36 }
 0x155   : > { %v5944_v33 = vpack.i.bf16 %v2176_v54, %v2174_v8  ;;  %v2216_v36 = vsel %vm1485_vm3, %v2214_v0, %v2215_v19  ;;  %v2223_v54 = vrot.slane %v7840_v27, 5 }
 0x156   : > { %v8136_v52 = vpop.permute.xlu0 %5640  ;;  %v8138_v12 = vpop.permute.xlu1 %5645  ;;  %v8151_v56 = vsel %vm1264_vm11, %v2783_v51, %v11175_v1  ;;  %v2178_v63 = vsel %vm1400_vm15, %v2175_v48, %v2177_v22  ;;  %v2221_v48 = vrot.slane %v7845_v41, 5 }
 0x157   : > { %11374 = vst [vmem:[#allocation42_spill] sm:$0xff] %v8136_v52  ;;  %11375 = vst [vmem:[#allocation43_spill] sm:$0xff] %v8138_v12  ;;  %v2219_v12 = vrot.slane %v7834_v47, 5  ;;  %v5954_v16 = vpack.i.bf16 %v8151_v56, %v2179_v7  ;;  %v1039_v52 = vld [vmem:[%s7619_s25 + $0x58] sm:$0xff] }
 0x158   : > { %5930 = vrot.lane.b32.xlu0 %v5929_v43, %s11243_s21  ;;  %5935 = vrot.lane.b32.xlu1 %v5934_v62, %s11243_s21  ;;  %11376 = vst [vmem:[#allocation44_spill] sm:$0xff] %v8151_v56  ;;  %v2180_v43 = vsel %vm1400_vm15, %v2177_v22, %v2179_v7  ;;  %v2217_v62 = vrot.slane %v7837_v3, 5  ;;  %v2227_v7 = vrot.slane %v7847_v5, 5 }
 0x159   : > { %v5949_v8 = vpack.i.bf16 %v2180_v43, %v2178_v63  ;;  %v2865_v63 = vrot.slane %v8042_v34, 3 }
 0x15a   : > { %v8154_v58 = vpop.permute.xlu0 %5650  ;;  %v8156_v18 = vpop.permute.xlu1 %5655  ;;  %v2218_v22 = vsel %vm1485_vm3, %v2215_v19, %v2217_v62 }
 0x15b   : > { %11377 = vst [vmem:[#allocation45_spill] sm:$0xff] %v8154_v58  ;;  %11378 = vst [vmem:[#allocation46_spill] sm:$0xff] %v8156_v18  ;;  %v2224_v58 = vsel %vm1485_vm3, %v2221_v48, %v2223_v54 }
 0x15c   : > { %5940 = vrot.lane.b32.xlu0 %v5939_v42, %s11243_s21  ;;  %5945 = vrot.lane.b32.xlu1 %v5944_v33, %s11243_s21  ;;  %v2220_v42 = vsel %vm1485_vm3, %v2217_v62, %v2219_v12  ;;  %v2225_v33 = vrot.slane %v7852_v14, 5  ;;  %v2222_v62 = vsel %vm1485_vm3, %v2219_v12, %v2221_v48 }
 0x15d   : > { %v5964_v18 = vpack.i.bf16 %v2220_v42, %v2218_v22  ;;  %v5969_v48 = vpack.i.bf16 %v2224_v58, %v2222_v62 }
 0x15e   : > { %v8166_v51 = vpop.permute.xlu0 %5660  ;;  %v8168_v17 = vpop.permute.xlu1 %5665  ;;  %v2226_v15 = vsel %vm1485_vm3, %v2223_v54, %v2225_v33 }
 0x15f   : > { %11379 = vst [vmem:[#allocation47_spill] sm:$0xff] %v8166_v51  ;;  %11380 = vst [vmem:[#allocation48_spill] sm:$0xff] %v8168_v17  ;;  %v5959_v51 = vpack.i.bf16 %v2216_v36, %v2214_v0  ;;  %v1058_v0 = vmul.f32 %v8009_v35, %v1039_v52 }
 0x160   : > { %5950 = vrot.lane.b32.xlu0 %v5949_v8, %s11243_s21  ;;  %5955 = vrot.lane.b32.xlu1 %v5954_v16, %s11243_s21  ;;  %v2228_v8 = vsel %vm1485_vm3, %v2225_v33, %v2227_v7  ;;  %v2229_v16 = vrot.slane %v7863_v30, 5  ;;  %s11254_s21 = smov 64  }
 0x161   : > { %v5974_v43 = vpack.i.bf16 %v2228_v8, %v2226_v15  ;;  %v1071_v52 = vadd.f32 %v7793_v2, %v1058_v0  ;;  %v2916_v0 = vrot.slane %v8042_v34, 4 }
 0x162   : > { %v8181_v1 = vpop.permute.xlu0 %5670  ;;  %v8183_v17 = vpop.permute.xlu1 %5675  ;;  %v2230_v54 = vsel %vm1485_vm3, %v2227_v7, %v2229_v16  ;;  %v2232_v33 = vsel %vm1485_vm3, %v2229_v16, %v2231_v39 }
 0x163   : > { %11381 = vst [vmem:[#allocation49_spill] sm:$0xff] %v8181_v1  ;;  %11382 = vst [vmem:[#allocation50_spill] sm:$0xff] %v8183_v17  ;;  %v11385_v17 = vrot.slane %v8133_v37, 3  ;;  %v1097_v7 = vmul.f32 0.2, %v1071_v52  ;;  %vm1084_vm7 = vcmp.ge.f32.partialorder %v1071_v52, 0.0 }
 0x164   : > { %5960 = vrot.lane.b32.xlu0 %v5959_v51, %s11212_s19  ;;  %5965 = vrot.lane.b32.xlu1 %v5964_v18, %s11212_s19 }
 0x165   : > { %v2867_v1 = vsel %vm1348_vm14, %v2865_v63, %v11385_v17  ;;  %v5989_v63 = vpack.i.bf16 %v2218_v22, %v2215_v19 }
 0x166   : > { %v8195_v36 = vpop.permute.xlu0 %5680  ;;  %v8197_v12 = vpop.permute.xlu1 %5685 }
 0x167   : > { %11383 = vst [vmem:[#allocation51_spill] sm:$0xff] %v8195_v36  ;;  %11384 = vst [vmem:[#allocation52_spill] sm:$0xff] %v8197_v12  ;;  %v5979_v12 = vpack.i.bf16 %v2232_v33, %v2230_v54  ;;  %v5984_v36 = vpack.i.bf16 %v2867_v1, %v2231_v39  ;;  %v1110_v1 = vsel %vm1084_vm7, %v1071_v52, %v1097_v7  ;;  %v2303_v52 = vrot.slane %v8055_v26, 6 }
 0x168   : > { %5970 = vrot.lane.b32.xlu0 %v5969_v48, %s11212_s19  ;;  %5975 = vrot.lane.b32.xlu1 %v5974_v43, %s11212_s19  ;;  %v5994_v48 = vpack.i.bf16 %v2222_v62, %v2220_v42  ;;  %v2267_v43 = vrot.slane %v7890_v40, 5  ;;  %v2304_v42 = vrot.slane %v7837_v3, 6  ;;  %v2308_v62 = vrot.slane %v7845_v41, 6 }
 0x169   : > { %v2306_v7 = vrot.slane %v7834_v47, 6  ;;  %vm11253_vm7 = vcmask 261120  }
 0x16a   : > { %v8207_v18 = vpop.permute.xlu0 %5690  ;;  %v8209_v51 = vpop.permute.xlu1 %5695  ;;  %v2268_v19 = vsel %vm1485_vm3, %v2231_v39, %v2267_v43 }
 0x16b   : > { %11386 = vst [vmem:[#allocation53_spill] sm:$0xff] %v8207_v18  ;;  %11387 = vst [vmem:[#allocation54_spill] sm:$0xff] %v8209_v51  ;;  %v2917_v51 = vrot.slane %v8133_v37, 4 }
 0x16c   : > { %5980 = vrot.lane.b32.xlu0 %v5979_v12, %s11212_s19  ;;  %5985 = vrot.lane.b32.xlu1 %v5984_v36, %s11212_s19  ;;  %s11420_s19 = smov 36  }
 0x16d   : > { %v2918_v22 = vsel %vm1400_vm15, %v2916_v0, %v2917_v51  ;;  %v2310_v0 = vrot.slane %v7840_v27, 6 }
 0x16e   : > { %v8213_v16 = vpop.permute.xlu0 %5700  ;;  %v8215_v17 = vpop.permute.xlu1 %5705 }
 0x16f   : > { %11388 = vst [vmem:[#allocation55_spill] sm:$0xff] %v8213_v16  ;;  %11389 = vst [vmem:[#allocation56_spill] sm:$0xff] %v8215_v17  ;;  %v5999_v16 = vpack.i.bf16 %v2226_v15, %v2224_v58  ;;  %v6004_v17 = vpack.i.bf16 %v2230_v54, %v2228_v8  ;;  %v6009_v58 = vpack.i.bf16 %v2268_v19, %v2232_v33  ;;  %v2314_v33 = vrot.slane %v7847_v5, 6 }
 0x170   : > { %5990 = vrot.lane.b32.xlu0 %v5989_v63, %s11390_s27  ;;  %5995 = vrot.lane.b32.xlu1 %v5994_v48, %s11390_s27  ;;  %v8235_v63 = vmul.f32 %v7854_v24, %v1110_v1  ;;  %v6014_v8 = vpack.i.bf16 %v2918_v22, %v2267_v43  ;;  %v2305_v54 = vsel %vm1537_vm8, %v2303_v52, %v2304_v42  ;;  %v2316_v48 = vrot.slane %v7863_v30, 6 }
 0x171   : > { %v2307_v24 = vsel %vm1537_vm8, %v2304_v42, %v2306_v7  ;;  %v6019_v19 = vpack.i.bf16 %v2305_v54, %v2303_v52  ;;  %v2311_v52 = vsel %vm1537_vm8, %v2308_v62, %v2310_v0 }
 0x172   : > { %v8222_v36 = vpop.permute.xlu0 %5710  ;;  %v8224_v12 = vpop.permute.xlu1 %5715  ;;  %v2317_v42 = vsel %vm1537_vm8, %v2314_v33, %v2316_v48 }
 0x173   : > { %11391 = vst [vmem:[#allocation57_spill] sm:$0xff] %v8222_v36  ;;  %11392 = vst [vmem:[#allocation58_spill] sm:$0xff] %v8224_v12 }
 0x174   : > { %6000 = vrot.lane.b32.xlu0 %v5999_v16, %s11390_s27  ;;  %6005 = vrot.lane.b32.xlu1 %v6004_v17, %s11390_s27  ;;  %v2309_v16 = vsel %vm1537_vm8, %v2306_v7, %v2308_v62  ;;  %v2312_v17 = vrot.slane %v7852_v14, 6  ;;  %v2320_v7 = vrot.slane %v7890_v40, 6  ;;  %v8280_v62 = vrot.slane %v7837_v3, 7 }
 0x175   : > { %v6024_v22 = vpack.i.bf16 %v2309_v16, %v2307_v24  ;;  %v2318_v16 = vrot.slane %v7861_v9, 6 }
 0x176   : > { %v8237_v15 = vpop.permute.xlu0 %5720  ;;  %v8239_v39 = vpop.permute.xlu1 %5725  ;;  %v2315_v54 = vsel %vm1537_vm8, %v2312_v17, %v2314_v33 }
 0x177   : > { %11393 = vst [vmem:[#allocation59_spill] sm:$0xff] %v8237_v15  ;;  %11394 = vst [vmem:[#allocation60_spill] sm:$0xff] %v8239_v39  ;;  %v8255_v39 = vld [vmem:[%s7235_s20 + $0x18] sm:$0xff]  ;;  %v6034_v12 = vpack.i.bf16 %v2317_v42, %v2315_v54  ;;  %v2319_v33 = vsel %vm1537_vm8, %v2316_v48, %v2318_v16  ;;  %v2371_v48 = vrot.slane %v7863_v30, 7  ;;  %v2369_v54 = vrot.slane %v7847_v5, 7 }
 0x178   : > { %6010 = vrot.lane.b32.xlu0 %v6009_v58, %s11390_s27  ;;  %6015 = vrot.lane.b32.xlu1 %v6014_v8, %s11390_s27  ;;  %v2322_v58 = vrot.slane %v8235_v63, 6  ;;  %v2313_v8 = vsel %vm1537_vm8, %v2310_v0, %v2312_v17  ;;  %v11400_v36 = vrot.slane %v8255_v39, 4  ;;  %v2363_v17 = vrot.slane %v7845_v41, 7 }
 0x17a   : > { %v8250_v43 = vpop.permute.xlu0 %5730  ;;  %v8252_v1 = vpop.permute.xlu1 %5735  ;;  %v8275_v18 = vsel %vm1400_vm15, %v2917_v51, %v11400_v36  ;;  %v2358_v51 = vrot.slane %v8055_v26, 7  ;;  %v2361_v36 = vrot.slane %v7834_v47, 7 }
 0x17b   : > { %11395 = vst [vmem:[#allocation61_spill] sm:$0xff] %v8250_v43  ;;  %11396 = vst [vmem:[#allocation62_spill] sm:$0xff] %v8252_v1  ;;  %v1040_v43 = vld [vmem:[%s7619_s25 + $0x60] sm:$0xf]  ;;  %v6029_v1 = vpack.i.bf16 %v2313_v8, %v2311_v52 }
 0x17c   : > { %6020 = vrot.lane.b32.xlu0 %v6019_v19, %s11397_s22  ;;  %6025 = vrot.lane.b32.xlu1 %v6024_v22, %s11397_s22  ;;  %11401 = vst [vmem:[#allocation65_spill] sm:$0xff] %v8275_v18  ;;  %v2321_v19 = vsel %vm1537_vm8, %v2318_v16, %v2320_v7  ;;  %v2323_v22 = vsel %vm1537_vm8, %v2320_v7, %v2322_v58  ;;  %v2377_v16 = vrot.slane %v8235_v63, 7 }
 0x17d   : > { %v1059_v0 = vmul.f32 %v8009_v35, %v1040_v43  ;;  %v6039_v42 = vpack.i.bf16 %v2321_v19, %v2319_v33  ;;  %v6044_v7 = vpack.i.bf16 %v8275_v18, %v2323_v22  ;;  %v2367_v35 = vrot.slane %v7852_v14, 7 }
 0x17e   : > { %v8268_v24 = vpop.permute.xlu0 %5740  ;;  %v8270_v15 = vpop.permute.xlu1 %5745  ;;  %v2360_v43 = vsel %vm11242_vm9, %v2358_v51, %v8280_v62  ;;  %v2362_v52 = vsel %vm11242_vm9, %v8280_v62, %v2361_v36 }
 0x17f   : > { %11398 = vst [vmem:[#allocation63_spill] sm:$0xff] %v8268_v24  ;;  %11399 = vst [vmem:[#allocation64_spill] sm:$0xff] %v8270_v15  ;;  %v1072_v26 = vadd.f32 %v7793_v2, %v1059_v0  ;;  %v6049_v33 = vpack.i.bf16 %v2360_v43, %v2358_v51  ;;  %v2372_v0 = vsel %vm11242_vm9, %v2369_v54, %v2371_v48  ;;  %v2373_v43 = vrot.slane %v7861_v9, 7 }
 0x180   : > { %6030 = vrot.lane.b32.xlu0 %v6029_v1, %s11397_s22  ;;  %6035 = vrot.lane.b32.xlu1 %v6034_v12, %s11397_s22  ;;  %v2364_v12 = vsel %vm11242_vm9, %v2361_v36, %v2363_v17  ;;  %v2365_v1 = vrot.slane %v7840_v27, 7  ;;  %v2370_v51 = vsel %vm11242_vm9, %v2367_v35, %v2369_v54 }
 0x181   : > { %vm1085_vm10 = vcmp.ge.f32.partialorder %v1072_v26, 0.0  ;;  %v6064_v18 = vpack.i.bf16 %v2372_v0, %v2370_v51 }
 0x182   : > { %v8289_v8 = vpop.permute.xlu0 %5750  ;;  %v8291_v58 = vpop.permute.xlu1 %5755  ;;  %v2368_v2 = vsel %vm11242_vm9, %v2365_v1, %v2367_v35 }
 0x183   : > { %11402 = vst [vmem:[#allocation66_spill] sm:$0xff] %v8289_v8  ;;  %11403 = vst [vmem:[#allocation67_spill] sm:$0xff] %v8291_v58  ;;  %v6054_v58 = vpack.i.bf16 %v2364_v12, %v2362_v52  ;;  %v1098_v8 = vmul.f32 0.2, %v1072_v26 }
 0x184   : > { %6040 = vrot.lane.b32.xlu0 %v6039_v42, %s11397_s22  ;;  %6045 = vrot.lane.b32.xlu1 %v6044_v7, %s11397_s22  ;;  %v2375_v42 = vrot.slane %v7890_v40, 7  ;;  %v3000_v7 = vrot.slane %v8133_v37, 5 }
 0x185   : > { %v1111_v28 = vsel %vm1085_vm10, %v1072_v26, %v1098_v8  ;;  %v3051_v26 = vrot.slane %v8133_v37, 6  ;;  %vm11259_vm10 = vcmask 293888  }
 0x186   : > { %v8307_v19 = vpop.permute.xlu0 %5760  ;;  %v8309_v22 = vpop.permute.xlu1 %5765  ;;  %v2376_v36 = vsel %vm11242_vm9, %v2373_v43, %v2375_v42  ;;  %v2378_v50 = vsel %vm11242_vm9, %v2375_v42, %v2377_v16 }
 0x187   : > { %11404 = vst [vmem:[#allocation68_spill] sm:$0xff] %v8307_v19  ;;  %11405 = vst [vmem:[#allocation69_spill] sm:$0xff] %v8309_v22  ;;  %v2366_v22 = vsel %vm11242_vm9, %v2363_v17, %v2365_v1  ;;  %v2374_v17 = vsel %vm11242_vm9, %v2371_v48, %v2373_v43 }
 0x188   : > { %6050 = vrot.lane.b32.xlu0 %v6049_v33, %s11406_s24  ;;  %6055 = vrot.lane.b32.xlu1 %v6054_v58, %s11406_s24  ;;  %v6059_v24 = vpack.i.bf16 %v2368_v2, %v2366_v22  ;;  %v11409_v33 = vrot.slane %v8255_v39, 5  ;;  %v6069_v54 = vpack.i.bf16 %v2376_v36, %v2374_v17  ;;  %v6094_v43 = vpack.i.bf16 %v2374_v17, %v2372_v0 }
 0x189   : > { %v11421_v0 = vpack.i.bf16 %v7834_v47, %v7837_v3  ;;  %v11425_v17 = vpack.i.bf16 %v7847_v5, %v7852_v14  ;;  %v11426_v47 = vpack.i.bf16 %v7861_v9, %v7863_v30  ;;  %v6864_v3 = vld [vmem:[%s7404_s16] sm:$0xff]  ;;  %v8403_v30 = vld [vmem:[%s7404_s16 + $0x8] sm:$0xff] }
 0x18a   : > { %v8321_v19 = vpop.permute.xlu0 %5770  ;;  %v8323_v15 = vpop.permute.xlu1 %5775  ;;  %v3002_v58 = vsel %vm1485_vm3, %v3000_v7, %v11409_v33  ;;  %v11215_v7 = vrot.slane %v8255_v39, 6  ;;  %v3142_v9 = vrot.slane %v6864_v3, 1  ;;  %11431 = vst [vmem:[#allocation88_spill] sm:$0xff] %v8403_v30 }
 0x18b   : > { %11407 = vst [vmem:[#allocation70_spill] sm:$0xff] %v8321_v19  ;;  %11408 = vst [vmem:[#allocation71_spill] sm:$0xff] %v8323_v15  ;;  %v6074_v15 = vpack.i.bf16 %v3002_v58, %v2378_v50  ;;  %v1203_v19 = vmul.f32 %v7879_v4, %v1111_v28 }
 0x18c   : > { %6060 = vrot.lane.b32.xlu0 %v6059_v24, %s11406_s24  ;;  %6065 = vrot.lane.b32.xlu1 %v6064_v18, %s11406_s24  ;;  %v6079_v18 = vpack.i.bf16 %v2362_v52, %v8280_v62  ;;  %v6084_v24 = vpack.i.bf16 %v2366_v22, %v2364_v12  ;;  %v3053_v62 = vsel %vm1537_vm8, %v3051_v26, %v11215_v7 }
 0x18d   : > { %v2413_v48 = vrot.slane %v1203_v19, 7  ;;  %v6099_v22 = vpack.i.bf16 %v2378_v50, %v2376_v36  ;;  %v11432_v26 = vpack.i.bf16 %v7911_v29, %v7908_v60  ;;  %v11436_v60 = vpack.i.bf16 %v7942_v32, %v7935_v49 }
 0x18e   : > { %v8333_v35 = vpop.permute.xlu0 %5780  ;;  %v8335_v1 = vpop.permute.xlu1 %5785  ;;  %v11437_v29 = vpack.i.bf16 %v7960_v25, %v7945_v44 }
 0x18f   : > { %11410 = vst [vmem:[#allocation72_spill] sm:$0xff] %v8333_v35  ;;  %11411 = vst [vmem:[#allocation73_spill] sm:$0xff] %v8335_v1  ;;  %v2414_v33 = vsel %vm11242_vm9, %v2377_v16, %v2413_v48  ;;  %v11214_v48 = vrot.slane %v8403_v30, 1  ;;  %vm11245_vm9 = vcmask 326656  }
 0x190   : > { %6070 = vrot.lane.b32.xlu0 %v6069_v54, %s11406_s24  ;;  %6075 = vrot.lane.b32.xlu1 %v6074_v15, %s11406_s24  ;;  %v6089_v15 = vpack.i.bf16 %v2370_v51, %v2368_v2  ;;  %v6104_v58 = vpack.i.bf16 %v3053_v62, %v2414_v33  ;;  %v11422_v51 = vpack.i.bf16 %v7840_v27, %v7845_v41 }
 0x191   : > { %v6134_v54 = vpack.i.bf16 %v6864_v3, %v1203_v19  ;;  %v6129_v41 = vpack.i.bf16 %v8235_v63, %v7890_v40 }
 0x192   : > { %v8340_v42 = vpop.permute.xlu0 %5790  ;;  %v8342_v8 = vpop.permute.xlu1 %5795 }
 0x193   : > { %11412 = vst [vmem:[#allocation74_spill] sm:$0xff] %v8340_v42  ;;  %11413 = vst [vmem:[#allocation75_spill] sm:$0xff] %v8342_v8  ;;  %v11446_v42 = vld [vmem:[#allocation9_spill] sm:$0xff] }
 0x194   : > { %6080 = vrot.lane.b32.xlu0 %v6079_v18, %s11240_s18  ;;  %6085 = vrot.lane.b32.xlu1 %v6084_v24, %s11240_s18  ;;  %v2500_v24 = vrot.slane %v1203_v19, 1 }
 0x196   : > { %v8349_v4 = vpop.permute.xlu0 %5800  ;;  %v8351_v28 = vpop.permute.xlu1 %5805 }
 0x197   : > { %11414 = vst [vmem:[#allocation76_spill] sm:$0xff] %v8349_v4  ;;  %11415 = vst [vmem:[#allocation77_spill] sm:$0xff] %v8351_v28 }
 0x198   : > { %6090 = vrot.lane.b32.xlu0 %v6089_v15, %s11240_s18  ;;  %6095 = vrot.lane.b32.xlu1 %v6094_v43, %s11240_s18  ;;  %v11433_v15 = vpack.i.bf16 %v7926_v31, %v7923_v20  ;;  %v2498_v43 = vrot.slane %v8235_v63, 1  ;;  %v11438_v20 = vrot.slane %v7890_v40, 1 }
 0x19a   : > { %v8359_v12 = vpop.permute.xlu0 %5810  ;;  %v8361_v52 = vpop.permute.xlu1 %5815  ;;  %v2501_v62 = vsel %vm1214_vm6, %v2498_v43, %v2500_v24  ;;  %v2499_v31 = vsel %vm1214_vm6, %v11438_v20, %v2498_v43 }
 0x19b   : > { %11416 = vst [vmem:[#allocation78_spill] sm:$0xff] %v8359_v12  ;;  %11417 = vst [vmem:[#allocation79_spill] sm:$0xff] %v8361_v52  ;;  %v5503_v52 = vunpack.i.h.bf16 %v7903_v59  ;;  %v5507_v12 = vunpack.i.l.bf16 %v7905_v13 }
 0x19c   : > { %6100 = vrot.lane.b32.xlu0 %v6099_v22, %s11240_s18  ;;  %6105 = vrot.lane.b32.xlu1 %v6104_v58, %s11240_s18  ;;  %v3144_v22 = vsel %vm1214_vm6, %v3142_v9, %v11214_v48  ;;  %s11491_s18 = smov 12  }
 0x19e   : > { %v8365_v16 = vpop.permute.xlu0 %5820  ;;  %v8367_v2 = vpop.permute.xlu1 %5825 }
 0x19f   : > { %11418 = vst [vmem:[#allocation80_spill] sm:$0xff] %v8365_v16  ;;  %11419 = vst [vmem:[#allocation81_spill] sm:$0xff] %v8367_v2  ;;  %v11440_v2 = vld [vmem:[#allocation8_spill] sm:$0xff] }
 0x1a0   : > { %6110 = vrot.lane.b32.xlu0 %v11421_v0, %s11420_s19  ;;  %6115 = vrot.lane.b32.xlu1 %v11422_v51, %s11420_s19  ;;  %v6159_v0 = vpack.i.bf16 %v2501_v62, %v2499_v31  ;;  %v6164_v51 = vpack.i.bf16 %v3144_v22, %v2500_v24 }
 0x1a2   : > { %v8377_v50 = vpop.permute.xlu0 %5830  ;;  %v8379_v36 = vpop.permute.xlu1 %5835 }
 0x1a3   : > { %11423 = vst [vmem:[#allocation82_spill] sm:$0xff] %v8377_v50  ;;  %11424 = vst [vmem:[#allocation83_spill] sm:$0xff] %v8379_v36  ;;  %v5508_v36 = vunpack.i.h.bf16 %v7905_v13  ;;  %v5512_v50 = vunpack.i.l.bf16 %v7937_v23  ;;  %v11444_v13 = vld [vmem:[#allocation5_spill] sm:$0xff] }
 0x1a4   : > { %6120 = vrot.lane.b32.xlu0 %v11425_v17, %s11420_s19  ;;  %6125 = vrot.lane.b32.xlu1 %v11426_v47, %s11420_s19 }
 0x1a5   : > { %v8523_v1 = vsel %vm1896_vm12, %v11446_v42, %v5508_v36 }
 0x1a6   : > { %v8390_v18 = vpop.permute.xlu0 %5840  ;;  %v8392_v27 = vpop.permute.xlu1 %5845 }
 0x1a7   : > { %11427 = vst [vmem:[#allocation84_spill] sm:$0xff] %v8390_v18  ;;  %11428 = vst [vmem:[#allocation85_spill] sm:$0xff] %v8392_v27  ;;  %v5497_v18 = vunpack.i.l.bf16 %v7881_v53 }
 0x1a8   : > { %6130 = vrot.lane.b32.xlu0 %v6129_v41, %s11420_s19  ;;  %6135 = vrot.lane.b32.xlu1 %v6134_v54, %s11420_s19 }
 0x1aa   : > { %v8398_v5 = vpop.permute.xlu0 %5850  ;;  %v8400_v14 = vpop.permute.xlu1 %5855 }
 0x1ab   : > { %11429 = vst [vmem:[#allocation86_spill] sm:$0xff] %v8398_v5  ;;  %11430 = vst [vmem:[#allocation87_spill] sm:$0xff] %v8400_v14  ;;  %v5513_v14 = vunpack.i.h.bf16 %v7937_v23 }
 0x1ac   : > { %6140 = vrot.lane.b32.xlu0 %v11432_v26, %s11238_s23  ;;  %6145 = vrot.lane.b32.xlu1 %v11433_v15, %s11238_s23 }
 0x1ae   : > { %v8415_v33 = vpop.permute.xlu0 %5860  ;;  %v8417_v19 = vpop.permute.xlu1 %5865 }
 0x1af   : > { %11434 = vst [vmem:[#allocation89_spill] sm:$0xff] %v8415_v33  ;;  %11435 = vst [vmem:[#allocation90_spill] sm:$0xff] %v8417_v19  ;;  %v5498_v19 = vunpack.i.h.bf16 %v7881_v53  ;;  %v5502_v33 = vunpack.i.l.bf16 %v7903_v59  ;;  %v11441_v53 = vld [vmem:[#allocation6_spill] sm:$0xff]  ;;  %v11442_v59 = vld [vmem:[#allocation7_spill] sm:$0xff] }
 0x1b0   : > { %6150 = vrot.lane.b32.xlu0 %v11436_v60, %s11238_s23  ;;  %6155 = vrot.lane.b32.xlu1 %v11437_v29, %s11238_s23  ;;  %v8510_v16 = vsel %vm1896_vm12, %v11441_v53, %v5497_v18  ;;  %v8514_v4 = vsel %vm1896_vm12, %v11442_v59, %v5503_v52  ;;  %11447 = vst [vmem:[#allocation7_spill] sm:$0xff] %v8523_v1  ;;  %v11450_v53 = vld [vmem:[#allocation11_spill] sm:$0xff]  ;;  %v11458_v1 = vld [vmem:[#allocation17_spill] sm:$0xff] }
 0x1b1   : > { %v8506_v27 = vsel %vm1896_vm12, %v11440_v2, %v5498_v19  ;;  %11443 = vst [vmem:[#allocation8_spill] sm:$0xff] %v8514_v4  ;;  %v8518_v8 = vsel %vm1896_vm12, %v11444_v13, %v5502_v33  ;;  %v11448_v2 = vld [vmem:[#allocation10_spill] sm:$0xff]  ;;  %v8533_v59 = vsel %vm1896_vm12, %v11450_v53, %v5513_v14  ;;  %v11452_v33 = vld [vmem:[#allocation12_spill] sm:$0xff] }
 0x1b2   : > { %v8434_v63 = vpop.permute.xlu0 %5870  ;;  %v8436_v58 = vpop.permute.xlu1 %5875  ;;  %11445 = vst [vmem:[#allocation6_spill] sm:$0xff] %v8518_v8  ;;  %v8527_v19 = vsel %vm1896_vm12, %v11448_v2, %v5507_v12  ;;  %11451 = vst [vmem:[#allocation9_spill] sm:$0xff] %v8533_v59  ;;  %v8537_v13 = vsel %vm1896_vm12, %v11452_v33, %v5512_v50  ;;  %v11454_v33 = vrot.slane %v8133_v37, 1 }
 0x1b3   : > { %11449 = vst [vmem:[#allocation5_spill] sm:$0xff] %v8527_v19  ;;  %11453 = vst [vmem:[#allocation10_spill] sm:$0xff] %v8537_v13  ;;  %v5873_v23 = vunpack.i.h.bf16 %v8434_v63  ;;  %v5872_v42 = vunpack.i.l.bf16 %v8434_v63  ;;  %v5878_v2 = vunpack.i.h.bf16 %v8436_v58  ;;  %v5877_v52 = vunpack.i.l.bf16 %v8436_v58 }
 0x1b4   : > { %6160 = vrot.lane.b32.xlu0 %v6159_v0, %s11238_s23  ;;  %6165 = vrot.lane.b32.xlu1 %v6164_v51, %s11238_s23  ;;  %v11455_v63 = vrot.slane %v8042_v34, 1  ;;  %s11498_s23 = smov 16  }
 0x1b5   : > { %v2535_v59 = vsel %vm1896_vm12, %v7597_v45, %v5872_v42 }
 0x1b6   : > { %v8440_v49 = vpop.permute.xlu0 %5880  ;;  %v8442_v32 = vpop.permute.xlu1 %5885  ;;  %v8556_v35 = vsel %vm1214_vm6, %v11455_v63, %v11454_v33 }
 0x1b7   : > { %v5883_v18 = vunpack.i.h.bf16 %v8440_v49  ;;  %v5882_v14 = vunpack.i.l.bf16 %v8440_v49  ;;  %v5888_v53 = vunpack.i.h.bf16 %v8442_v32  ;;  %v5887_v50 = vunpack.i.l.bf16 %v8442_v32 }
 0x1b8   : > { %v2536_v32 = vsel %vm1896_vm12, %v7603_v61, %v5873_v23  ;;  %v11456_v23 = vld [vmem:[#allocation15_spill] sm:$0xff] }
 0x1b9   : > { %v2540_v61 = vsel %vm1896_vm12, %v7630_v38, %v5883_v18  ;;  %v2539_v45 = vsel %vm1896_vm12, %v11456_v23, %v5882_v14  ;;  %v2541_v19 = vsel %vm1896_vm12, %v11458_v1, %v5887_v50 }
 0x1ba   : > { %v8444_v44 = vpop.permute.xlu0 %5890  ;;  %v8446_v25 = vpop.permute.xlu1 %5895 }
 0x1bb   : > { %11439 = vst [vmem:[#allocation91_spill] sm:$0xff] %v8446_v25  ;;  %v5893_v56 = vunpack.i.h.bf16 %v8444_v44  ;;  %v5892_v58 = vunpack.i.l.bf16 %v8444_v44  ;;  %v5897_v13 = vunpack.i.l.bf16 %v8446_v25  ;;  %v2538_v44 = vsel %vm1896_vm12, %v7606_v11, %v5878_v2 }
 0x1bc   : > { %v2537_v25 = vsel %vm1896_vm12, %v7614_v21, %v5877_v52 }
 0x1bd   : > { %v2544_v11 = vsel %vm1896_vm12, %v7831_v57, %v5893_v56  ;;  %v2543_v21 = vsel %vm1896_vm12, %v7816_v6, %v5892_v58  ;;  %v2545_v38 = vsel %vm1896_vm12, %v8004_v10, %v5897_v13 }
 0x1be   : > { %v8448_v40 = vpop.permute.xlu0 %5900  ;;  %v8450_v17 = vpop.permute.xlu1 %5905 }
 0x1bf   : > { %v5902_v49 = vunpack.i.l.bf16 %v8448_v40  ;;  %v5903_v34 = vunpack.i.h.bf16 %v8448_v40  ;;  %v5907_v33 = vunpack.i.l.bf16 %v8450_v17  ;;  %v11457_v40 = vld [vmem:[#allocation16_spill] sm:$0xff]  ;;  %v5908_v8 = vunpack.i.h.bf16 %v8450_v17 }
 0x1c0   : > { %v2542_v42 = vsel %vm1896_vm12, %v11457_v40, %v5888_v53 }
 0x1c1   : > { %v2546_v18 = vsel %vm1907_vm13, %v2535_v59, %v5902_v49  ;;  %v2547_v52 = vsel %vm1907_vm13, %v2536_v32, %v5903_v34  ;;  %v2548_v2 = vsel %vm1907_vm13, %v2537_v25, %v5907_v33  ;;  %v2549_v59 = vsel %vm1907_vm13, %v2538_v44, %v5908_v8 }
 0x1c2   : > { %v8452_v47 = vpop.permute.xlu0 %5910  ;;  %v8454_v3 = vpop.permute.xlu1 %5915 }
 0x1c3   : > { %v5912_v4 = vunpack.i.l.bf16 %v8452_v47  ;;  %v5913_v1 = vunpack.i.h.bf16 %v8452_v47  ;;  %v5917_v17 = vunpack.i.l.bf16 %v8454_v3  ;;  %v5918_v57 = vunpack.i.h.bf16 %v8454_v3 }
 0x1c5   : > { %v2550_v25 = vsel %vm1907_vm13, %v2539_v45, %v5912_v4  ;;  %v2552_v32 = vsel %vm1907_vm13, %v2541_v19, %v5917_v17  ;;  %v2553_v33 = vsel %vm1907_vm13, %v2542_v42, %v5918_v57 }
 0x1c6   : > { %v8456_v54 = vpop.permute.xlu0 %5920  ;;  %v8458_v41 = vpop.permute.xlu1 %5925 }
 0x1c7   : > { %v5923_v6 = vunpack.i.h.bf16 %v8456_v54  ;;  %v5922_v10 = vunpack.i.l.bf16 %v8456_v54  ;;  %v5927_v56 = vunpack.i.l.bf16 %v8458_v41  ;;  %v2551_v54 = vsel %vm1907_vm13, %v2540_v61, %v5913_v1 }
 0x1c9   : > { %v2555_v44 = vsel %vm1907_vm13, %v2544_v11, %v5923_v6 }
 0x1ca   : > { %v8460_v24 = vpop.permute.xlu0 %5930  ;;  %v8462_v9 = vpop.permute.xlu1 %5935 }
 0x1cb   : > { %v5933_v47 = vunpack.i.h.bf16 %v8460_v24  ;;  %v5932_v13 = vunpack.i.l.bf16 %v8460_v24  ;;  %v5938_v50 = vunpack.i.h.bf16 %v8462_v9  ;;  %v5937_v58 = vunpack.i.l.bf16 %v8462_v9 }
 0x1cc   : > { %v2554_v9 = vsel %vm1907_vm13, %v2543_v21, %v5922_v10 }
 0x1cd   : > { %v2557_v61 = vsel %vm1918_vm0, %v2546_v18, %v5932_v13  ;;  %v2558_v19 = vsel %vm1918_vm0, %v2547_v52, %v5933_v47  ;;  %v2559_v45 = vsel %vm1918_vm0, %v2548_v2, %v5937_v58  ;;  %v2560_v40 = vsel %vm1918_vm0, %v2549_v59, %v5938_v50 }
 0x1ce   : > { %v8464_v26 = vpop.permute.xlu0 %5940  ;;  %v8466_v15 = vpop.permute.xlu1 %5945 }
 0x1cf   : > { %v5943_v3 = vunpack.i.h.bf16 %v8464_v26  ;;  %v5942_v49 = vunpack.i.l.bf16 %v8464_v26  ;;  %v5948_v8 = vunpack.i.h.bf16 %v8466_v15  ;;  %v5947_v4 = vunpack.i.l.bf16 %v8466_v15 }
 0x1d0   : > { %v2556_v26 = vsel %vm1907_vm13, %v2545_v38, %v5927_v56 }
 0x1d1   : > { %v2561_v42 = vsel %vm1918_vm0, %v2550_v25, %v5942_v49  ;;  %v2562_v21 = vsel %vm1918_vm0, %v2551_v54, %v5943_v3  ;;  %v2563_v11 = vsel %vm1918_vm0, %v2552_v32, %v5947_v4  ;;  %v2564_v38 = vsel %vm1918_vm0, %v2553_v33, %v5948_v8 }
 0x1d2   : > { %v8468_v43 = vpop.permute.xlu0 %5950  ;;  %v8470_v62 = vpop.permute.xlu1 %5955 }
 0x1d3   : > { %v5953_v23 = vunpack.i.h.bf16 %v8468_v43  ;;  %v5952_v15 = vunpack.i.l.bf16 %v8468_v43  ;;  %v5957_v18 = vunpack.i.l.bf16 %v8470_v62 }
 0x1d5   : > { %v2565_v10 = vsel %vm1918_vm0, %v2554_v9, %v5952_v15  ;;  %v2566_v56 = vsel %vm1918_vm0, %v2555_v44, %v5953_v23 }
 0x1d6   : > { %v8472_v22 = vpop.permute.xlu0 %5960  ;;  %v8474_v60 = vpop.permute.xlu1 %5965 }
 0x1d7   : > { %v5962_v52 = vunpack.i.l.bf16 %v8472_v22  ;;  %v5963_v2 = vunpack.i.h.bf16 %v8472_v22  ;;  %v5968_v17 = vunpack.i.h.bf16 %v8474_v60  ;;  %v5967_v57 = vunpack.i.l.bf16 %v8474_v60 }
 0x1d8   : > { %v2567_v60 = vsel %vm1918_vm0, %v2556_v26, %v5957_v18 }
 0x1d9   : > { %v2568_v58 = vsel %vm11260_vm1, %v2557_v61, %v5962_v52  ;;  %v2570_v32 = vsel %vm11260_vm1, %v2559_v45, %v5967_v57  ;;  %v11247_v52 = vmov 0.0  }
 0x1da   : > { %v8476_v29 = vpop.permute.xlu0 %5970  ;;  %v8478_v20 = vpop.permute.xlu1 %5975  ;;  %5357 = vmatprep.subr.bf16.mxu0 %v11247_v52  ;;  %5391 = vmatprep.subr.bf16.mxu1 %v11247_v52 }
 0x1db   : > { %v5972_v6 = vunpack.i.l.bf16 %v8476_v29  ;;  %v5973_v59 = vunpack.i.h.bf16 %v8476_v29  ;;  %v5977_v25 = vunpack.i.l.bf16 %v8478_v20  ;;  %v5978_v47 = vunpack.i.h.bf16 %v8478_v20 }
 0x1dc   : > { %v2569_v20 = vsel %vm11260_vm1, %v2558_v19, %v5963_v2 }
 0x1dd   : > { %v2572_v8 = vsel %vm11260_vm1, %v2561_v42, %v5972_v6  ;;  %v2573_v4 = vsel %vm11260_vm1, %v2562_v21, %v5973_v59  ;;  %v2574_v33 = vsel %vm11260_vm1, %v2563_v11, %v5977_v25  ;;  %v2575_v44 = vsel %vm11260_vm1, %v2564_v38, %v5978_v47 }
 0x1de   : > { %v8480_v31 = vpop.permute.xlu0 %5980  ;;  %v8482_v0 = vpop.permute.xlu1 %5985 }
 0x1df   : > { %v5983_v13 = vunpack.i.h.bf16 %v8480_v31  ;;  %v5982_v22 = vunpack.i.l.bf16 %v8480_v31  ;;  %v5987_v50 = vunpack.i.l.bf16 %v8482_v0  ;;  %v2571_v31 = vsel %vm11260_vm1, %v2560_v40, %v5968_v17 }
 0x1e1   : > { %v2576_v26 = vsel %vm11260_vm1, %v2565_v10, %v5982_v22  ;;  %v2577_v61 = vsel %vm11260_vm1, %v2566_v56, %v5983_v13  ;;  %v2578_v19 = vsel %vm11260_vm1, %v2567_v60, %v5987_v50 }
 0x1e2   : > { %v8484_v51 = vpop.permute.xlu0 %5990  ;;  %v8486_v48 = vpop.permute.xlu1 %5995 }
 0x1e3   : > { %v5993_v3 = vunpack.i.h.bf16 %v8484_v51  ;;  %v5992_v49 = vunpack.i.l.bf16 %v8484_v51  ;;  %v5998_v9 = vunpack.i.h.bf16 %v8486_v48  ;;  %v5997_v51 = vunpack.i.l.bf16 %v8486_v48  ;;  %v6844_v48 = vld [vmem:[%s11114_s7] sm:$0xff]  }
 0x1e4   : > { %5358 = vmatpush3.bf16.msra.mxu0 %v6844_v48 }
 0x1e5   : > { %v2579_v23 = vsel %vm11258_vm2, %v2568_v58, %v5992_v49  ;;  %v2580_v15 = vsel %vm11258_vm2, %v2569_v20, %v5993_v3  ;;  %v2581_v2 = vsel %vm11258_vm2, %v2570_v32, %v5997_v51  ;;  %v2582_v17 = vsel %vm11258_vm2, %v2571_v31, %v5998_v9  ;;  %5359 = vmatprep.subr.bf16.mxu0 %v11247_v52 }
 0x1e6   : > { %v8488_v7 = vpop.permute.xlu0 %6000  ;;  %v8490_v30 = vpop.permute.xlu1 %6005 }
 0x1e7   : > { %v6002_v45 = vunpack.i.l.bf16 %v8488_v7  ;;  %v6003_v21 = vunpack.i.h.bf16 %v8488_v7  ;;  %v6008_v11 = vunpack.i.h.bf16 %v8490_v30  ;;  %v6007_v38 = vunpack.i.l.bf16 %v8490_v30 }
 0x1e9   : > { %v2583_v59 = vsel %vm11258_vm2, %v2572_v8, %v6002_v45  ;;  %v2585_v50 = vsel %vm11258_vm2, %v2574_v33, %v6007_v38  ;;  %v2586_v60 = vsel %vm11258_vm2, %v2575_v44, %v6008_v11 }
 0x1ea   : > { %v8500_v28 = vpop.permute.xlu0 %6010  ;;  %v8502_v5 = vpop.permute.xlu1 %6015 }
 0x1eb   : > { %v6012_v18 = vunpack.i.l.bf16 %v8500_v28  ;;  %v6013_v57 = vunpack.i.h.bf16 %v8500_v28  ;;  %v6017_v6 = vunpack.i.l.bf16 %v8502_v5 }
 0x1ed   : > { %v2587_v58 = vsel %vm11258_vm2, %v2576_v26, %v6012_v18  ;;  %v2589_v3 = vsel %vm11258_vm2, %v2578_v19, %v6017_v6 }
 0x1ee   : > { %v8541_v36 = vpop.permute.xlu0 %6020  ;;  %v8543_v12 = vpop.permute.xlu1 %6025 }
 0x1ef   : > { %v6023_v7 = vunpack.i.h.bf16 %v8541_v36  ;;  %v6022_v30 = vunpack.i.l.bf16 %v8541_v36  ;;  %v6028_v10 = vunpack.i.h.bf16 %v8543_v12  ;;  %v6027_v56 = vunpack.i.l.bf16 %v8543_v12  ;;  %v6845_v36 = vld [vmem:[%s11114_s7 + $0x8] sm:$0xff]  }
 0x1f0   : > { %v2584_v12 = vsel %vm11258_vm2, %v2573_v4, %v6003_v21  ;;  %5360 = vmatpush3.bf16.msra.mxu0 %v6845_v36 }
 0x1f1   : > { %v2590_v32 = vsel %vm11257_vm4, %v2579_v23, %v6022_v30  ;;  %v2591_v31 = vsel %vm11257_vm4, %v2580_v15, %v6023_v7  ;;  %v2592_v8 = vsel %vm11257_vm4, %v2581_v2, %v6027_v56  ;;  %v2593_v4 = vsel %vm11257_vm4, %v2582_v17, %v6028_v10  ;;  %5361 = vmatprep.subr.bf16.mxu0 %v11247_v52 }
 0x1f2   : > { %v8569_v63 = vpop.permute.xlu0 %6030  ;;  %v8571_v46 = vpop.permute.xlu1 %6035 }
 0x1f3   : > { %v6033_v25 = vunpack.i.h.bf16 %v8569_v63  ;;  %v6032_v28 = vunpack.i.l.bf16 %v8569_v63  ;;  %v6037_v47 = vunpack.i.l.bf16 %v8571_v46  ;;  %v2588_v63 = vsel %vm11258_vm2, %v2577_v61, %v6013_v57  ;;  %v6846_v61 = vld [vmem:[%s11114_s7 + $0x10] sm:$0xff]  }
 0x1f4   : > { %v6038_v49 = vunpack.i.h.bf16 %v8571_v46  ;;  %5362 = vmatpush3.bf16.msra.mxu0 %v6846_v61 }
 0x1f5   : > { %v2594_v33 = vsel %vm11257_vm4, %v2583_v59, %v6032_v28  ;;  %v2595_v9 = vsel %vm11257_vm4, %v2584_v12, %v6033_v25  ;;  %v2596_v46 = vsel %vm11257_vm4, %v2585_v50, %v6037_v47  ;;  %5363 = vmatprep.subr.bf16.mxu0 %v11247_v52 }
 0x1f6   : > { %v8598_v14 = vpop.permute.xlu0 %6040  ;;  %v8600_v53 = vpop.permute.xlu1 %6045  ;;  %v2597_v48 = vsel %vm11257_vm4, %v2586_v60, %v6038_v49 }
 0x1f7   : > { %v6042_v20 = vunpack.i.l.bf16 %v8598_v14  ;;  %v6043_v51 = vunpack.i.h.bf16 %v8598_v14  ;;  %v6047_v19 = vunpack.i.l.bf16 %v8600_v53 }
 0x1f9   : > { %v2598_v14 = vsel %vm11257_vm4, %v2587_v58, %v6042_v20 }
 0x1fa   : > { %v8618_v34 = vpop.permute.xlu0 %6050  ;;  %v8620_v24 = vpop.permute.xlu1 %6055 }
 0x1fb   : > { %v6053_v23 = vunpack.i.h.bf16 %v8618_v34  ;;  %v6052_v15 = vunpack.i.l.bf16 %v8618_v34  ;;  %v6057_v45 = vunpack.i.l.bf16 %v8620_v24  ;;  %v6058_v21 = vunpack.i.h.bf16 %v8620_v24 }
 0x1fc   : > { %v2599_v34 = vsel %vm11257_vm4, %v2588_v63, %v6043_v51 }
 0x1fd   : > { %v2601_v10 = vsel %vm11256_vm5, %v2590_v32, %v6052_v15  ;;  %v2602_v56 = vsel %vm11256_vm5, %v2591_v31, %v6053_v23  ;;  %v2603_v59 = vsel %vm11256_vm5, %v2592_v8, %v6057_v45  ;;  %v6848_v32 = vld [vmem:[%s11114_s7 + $0x20] sm:$0xff]  }
 0x1fe   : > { %v8638_v1 = vpop.permute.xlu0 %6060  ;;  %v8640_v43 = vpop.permute.xlu1 %6065 }
 0x1ff   : > { %v6062_v11 = vunpack.i.l.bf16 %v8638_v1  ;;  %v6063_v38 = vunpack.i.h.bf16 %v8638_v1  ;;  %v6068_v18 = vunpack.i.h.bf16 %v8640_v43  ;;  %v6067_v2 = vunpack.i.l.bf16 %v8640_v43  ;;  %v6847_v1 = vld [vmem:[%s11114_s7 + $0x18] sm:$0xff]  }
 0x200   : > { %v2600_v43 = vsel %vm11257_vm4, %v2589_v3, %v6047_v19  ;;  %5364 = vmatpush3.bf16.msra.mxu0 %v6847_v1 }
 0x201   : > { %v2605_v25 = vsel %vm11256_vm5, %v2594_v33, %v6062_v11  ;;  %v2606_v36 = vsel %vm11256_vm5, %v2595_v9, %v6063_v38  ;;  %v2607_v12 = vsel %vm11256_vm5, %v2596_v46, %v6067_v2  ;;  %v2608_v50 = vsel %vm11256_vm5, %v2597_v48, %v6068_v18  ;;  %5365 = vmatprep.subr.bf16.mxu0 %v11247_v52 }
 0x202   : > { %v8658_v54 = vpop.permute.xlu0 %6070  ;;  %v8660_v29 = vpop.permute.xlu1 %6075 }
 0x203   : > { %v6072_v17 = vunpack.i.l.bf16 %v8658_v54  ;;  %v6073_v57 = vunpack.i.h.bf16 %v8658_v54  ;;  %v6077_v6 = vunpack.i.l.bf16 %v8660_v29  ;;  %v2604_v54 = vsel %vm11256_vm5, %v2593_v4, %v6058_v21 }
 0x204   : > { %5366 = vmatpush3.bf16.msra.mxu0 %v6848_v32 }
 0x205   : > { %v2609_v60 = vsel %vm11256_vm5, %v2598_v14, %v6072_v17  ;;  %v2610_v58 = vsel %vm11256_vm5, %v2599_v34, %v6073_v57  ;;  %v2611_v63 = vsel %vm11256_vm5, %v2600_v43, %v6077_v6  ;;  %5367 = vmatprep.subr.bf16.mxu0 %v11247_v52 }
 0x206   : > { %v8677_v40 = vpop.permute.xlu0 %6080  ;;  %v8679_v42 = vpop.permute.xlu1 %6085 }
 0x207   : > { %v6082_v24 = vunpack.i.l.bf16 %v8677_v40  ;;  %v6083_v28 = vunpack.i.h.bf16 %v8677_v40  ;;  %v6087_v47 = vunpack.i.l.bf16 %v8679_v42  ;;  %v6088_v40 = vunpack.i.h.bf16 %v8679_v42 }
 0x209   : > { %v2612_v3 = vsel %vm11253_vm7, %v2601_v10, %v6082_v24  ;;  %v2613_v9 = vsel %vm11253_vm7, %v2602_v56, %v6083_v28  ;;  %v2614_v46 = vsel %vm11253_vm7, %v2603_v59, %v6087_v47 }
 0x20a   : > { %v8703_v13 = vpop.permute.xlu0 %6090  ;;  %v8705_v22 = vpop.permute.xlu1 %6095 }
 0x20b   : > { %v6093_v31 = vunpack.i.h.bf16 %v8703_v13  ;;  %v6092_v8 = vunpack.i.l.bf16 %v8703_v13  ;;  %v6098_v4 = vunpack.i.h.bf16 %v8705_v22  ;;  %v6097_v33 = vunpack.i.l.bf16 %v8705_v22 }
 0x20c   : > { %v2615_v13 = vsel %vm11253_vm7, %v2604_v54, %v6088_v40 }
 0x20d   : > { %v2616_v11 = vsel %vm11253_vm7, %v2605_v25, %v6092_v8  ;;  %v2617_v38 = vsel %vm11253_vm7, %v2606_v36, %v6093_v31  ;;  %v2618_v18 = vsel %vm11253_vm7, %v2607_v12, %v6097_v33  ;;  %v2619_v2 = vsel %vm11253_vm7, %v2608_v50, %v6098_v4 }
 0x20e   : > { %v8727_v44 = vpop.permute.xlu0 %6100  ;;  %v8729_v26 = vpop.permute.xlu1 %6105 }
 0x20f   : > { %v6103_v42 = vunpack.i.h.bf16 %v8727_v44  ;;  %v6102_v51 = vunpack.i.l.bf16 %v8727_v44  ;;  %v6107_v61 = vunpack.i.l.bf16 %v8729_v26  ;;  %v6849_v44 = vld [vmem:[%s11114_s7 + $0x28] sm:$0xff]  }
 0x210   : > { %5368 = vmatpush3.bf16.msra.mxu0 %v6849_v44 }
 0x211   : > { %v2620_v17 = vsel %vm11253_vm7, %v2609_v60, %v6102_v51  ;;  %v2621_v34 = vsel %vm11253_vm7, %v2610_v58, %v6103_v42  ;;  %v2622_v24 = vsel %vm11253_vm7, %v2611_v63, %v6107_v61  ;;  %5369 = vmatprep.subr.bf16.mxu0 %v11247_v52 }
 0x212   : > { %v6111_v7 = vpop.permute.xlu0 %6110  ;;  %v6116_v30 = vpop.permute.xlu1 %6115 }
 0x213   : > { %v6113_v19 = vunpack.i.h.bf16 %v6111_v7  ;;  %v6112_v23 = vunpack.i.l.bf16 %v6111_v7  ;;  %v6117_v15 = vunpack.i.l.bf16 %v6116_v30  ;;  %v6118_v22 = vunpack.i.h.bf16 %v6116_v30 }
 0x215   : > { %v2623_v7 = vsel %vm11259_vm10, %v2612_v3, %v6112_v23  ;;  %v2624_v30 = vsel %vm11259_vm10, %v2613_v9, %v6113_v19  ;;  %v2625_v1 = vsel %vm11259_vm10, %v2614_v46, %v6117_v15  ;;  %v2626_v43 = vsel %vm11259_vm10, %v2615_v13, %v6118_v22 }
 0x216   : > { %v6121_v49 = vpop.permute.xlu0 %6120  ;;  %v6126_v20 = vpop.permute.xlu1 %6125 }
 0x217   : > { %v6123_v45 = vunpack.i.h.bf16 %v6121_v49  ;;  %v6122_v48 = vunpack.i.l.bf16 %v6121_v49  ;;  %v6128_v57 = vunpack.i.h.bf16 %v6126_v20  ;;  %v6127_v6 = vunpack.i.l.bf16 %v6126_v20 }
 0x219   : > { %v2627_v10 = vsel %vm11259_vm10, %v2616_v11, %v6122_v48  ;;  %v2628_v56 = vsel %vm11259_vm10, %v2617_v38, %v6123_v45  ;;  %v2629_v50 = vsel %vm11259_vm10, %v2618_v18, %v6127_v6  ;;  %v2630_v60 = vsel %vm11259_vm10, %v2619_v2, %v6128_v57 }
 0x21a   : > { %v6131_v14 = vpop.permute.xlu0 %6130  ;;  %v8785_v21 = vpop.permute.xlu1 %6135 }
 0x21b   : > { %v6132_v59 = vunpack.i.l.bf16 %v6131_v14  ;;  %v6133_v58 = vunpack.i.h.bf16 %v6131_v14  ;;  %v6137_v63 = vunpack.i.l.bf16 %v8785_v21 }
 0x21d   : > { %v2631_v32 = vsel %vm11259_vm10, %v2620_v17, %v6132_v59  ;;  %v2632_v19 = vsel %vm11259_vm10, %v2621_v34, %v6133_v58  ;;  %v2633_v44 = vsel %vm11259_vm10, %v2622_v24, %v6137_v63  ;;  %v11461_v58 = vrot.slane %v8133_v37, 1 }
 0x21e   : > { %v6141_v54 = vpop.permute.xlu0 %6140  ;;  %v6146_v25 = vpop.permute.xlu1 %6145 }
 0x21f   : > { %v6143_v28 = vunpack.i.h.bf16 %v6141_v54  ;;  %v6142_v47 = vunpack.i.l.bf16 %v6141_v54  ;;  %v6148_v36 = vunpack.i.h.bf16 %v6146_v25  ;;  %v6147_v12 = vunpack.i.l.bf16 %v6146_v25  ;;  %v6850_v25 = vld [vmem:[%s11114_s7 + $0x30] sm:$0x3f]  }
 0x221   : > { %v2634_v3 = vsel %vm11245_vm9, %v2623_v7, %v6142_v47  ;;  %v2635_v40 = vsel %vm11245_vm9, %v2624_v30, %v6143_v28  ;;  %v2636_v49 = vsel %vm11245_vm9, %v2625_v1, %v6147_v12  ;;  %v2637_v20 = vsel %vm11245_vm9, %v2626_v43, %v6148_v36 }
 0x222   : > { %v2656_v31 = vrot.slane %v2634_v3, 5  ;;  %v2657_v8 = vrot.slane %v2635_v40, 5  ;;  %v2659_v4 = vrot.slane %v2636_v49, 5  ;;  %v6151_v33 = vpop.permute.xlu0 %6150  ;;  %v6156_v9 = vpop.permute.xlu1 %6155  ;;  %v2661_v23 = vrot.slane %v2637_v20, 5  ;;  %v8840_v3 = vld [vmem:[%s7235_s20 + $0x20] sm:$0xff]  ;;  %v8844_v49 = vld [vmem:[%s7235_s20 + $0x28] sm:$0xff] }
 0x223   : > { %v6153_v46 = vunpack.i.h.bf16 %v6151_v33  ;;  %v6152_v42 = vunpack.i.l.bf16 %v6151_v33  ;;  %v6158_v51 = vunpack.i.h.bf16 %v6156_v9  ;;  %v6157_v61 = vunpack.i.l.bf16 %v6156_v9  ;;  %v8853_v9 = vld [vmem:[%s7235_s20 + $0x30] sm:$0xff] }
 0x224   : > { %v2658_v15 = vsel %vm1485_vm3, %v2656_v31, %v2657_v8  ;;  %v2660_v13 = vsel %vm1485_vm3, %v2657_v8, %v2659_v4  ;;  %v2662_v54 = vsel %vm1485_vm3, %v2659_v4, %v2661_v23  ;;  %v2740_v40 = vrot.slane %v8840_v3, 1 }
 0x225   : > { %v2638_v22 = vsel %vm11245_vm9, %v2627_v10, %v6152_v42  ;;  %v2639_v45 = vsel %vm11245_vm9, %v2628_v56, %v6153_v46  ;;  %v2640_v48 = vsel %vm11245_vm9, %v2629_v50, %v6157_v61  ;;  %v2641_v14 = vsel %vm11245_vm9, %v2630_v60, %v6158_v51  ;;  %v8857_v42 = vld [vmem:[%s7235_s20 + $0x38] sm:$0xff] }
 0x226   : > { %v2663_v11 = vrot.slane %v2638_v22, 5  ;;  %v2665_v38 = vrot.slane %v2639_v45, 5  ;;  %v2667_v18 = vrot.slane %v2640_v48, 5  ;;  %v6161_v2 = vpop.permute.xlu0 %6160  ;;  %v8820_v17 = vpop.permute.xlu1 %6165  ;;  %v2669_v34 = vrot.slane %v2641_v14, 5 }
 0x227   : > { %11459 = vst [vmem:[#allocation11_spill] sm:$0xff] %v8820_v17  ;;  %v6163_v57 = vunpack.i.h.bf16 %v6161_v2  ;;  %v6162_v6 = vunpack.i.l.bf16 %v6161_v2  ;;  %v6167_v7 = vunpack.i.l.bf16 %v8820_v17  ;;  %v6169_v30 = vpack.i.bf16 %v2660_v13, %v2658_v15  ;;  %v11464_v13 = vld [vmem:[#allocation19_spill] sm:$0xff] }
 0x228   : > { %v2664_v1 = vsel %vm1485_vm3, %v2661_v23, %v2663_v11  ;;  %v2666_v43 = vsel %vm1485_vm3, %v2663_v11, %v2665_v38  ;;  %v2668_v10 = vsel %vm1485_vm3, %v2665_v38, %v2667_v18  ;;  %v11460_v60 = vrot.slane %v8255_v39, 1  ;;  %v11463_v23 = vld [vmem:[#allocation13_spill] sm:$0xff] }
 0x229   : > { %v2642_v24 = vsel %vm11245_vm9, %v2631_v32, %v6162_v6  ;;  %v2643_v56 = vsel %vm11245_vm9, %v2632_v19, %v6163_v57  ;;  %v2644_v59 = vsel %vm11245_vm9, %v2633_v44, %v6167_v7  ;;  %6170 = vrot.lane.b32.xlu0 %v6169_v30, %s11254_s21  ;;  %v6174_v12 = vpack.i.bf16 %v2664_v1, %v2662_v54  ;;  %v8874_v11 = vld [vmem:[%s7235_s20 + $0x40] sm:$0xff]  ;;  %v11466_v57 = vld [vmem:[#allocation20_spill] sm:$0xff] }
 0x22a   : > { %v2671_v28 = vrot.slane %v2642_v24, 5  ;;  %v2673_v47 = vrot.slane %v2643_v56, 5  ;;  %v2675_v36 = vrot.slane %v2644_v59, 5  ;;  %v6179_v50 = vpack.i.bf16 %v2668_v10, %v2666_v43  ;;  %v8893_v10 = vld [vmem:[%s7404_s16 + $0x10] sm:$0xff]  ;;  %v8897_v56 = vld [vmem:[%s7404_s16 + $0x18] sm:$0xff] }
 0x22b   : > { %v2739_v63 = vsel %vm1214_vm6, %v11461_v58, %v11460_v60  ;;  %v2742_v20 = vrot.slane %v8844_v49, 1  ;;  %6175 = vrot.lane.b32.xlu1 %v6174_v12, %s11254_s21  ;;  %v2670_v32 = vsel %vm1485_vm3, %v2667_v18, %v2669_v34  ;;  %v2744_v46 = vrot.slane %v8853_v9, 1  ;;  %v8878_v18 = vld [vmem:[%s7235_s20 + $0x48] sm:$0xff] }
 0x22c   : > { %v2672_v31 = vsel %vm1485_vm3, %v2669_v34, %v2671_v28  ;;  %v2674_v8 = vsel %vm1485_vm3, %v2671_v28, %v2673_v47  ;;  %v2676_v4 = vsel %vm1485_vm3, %v2673_v47, %v2675_v36  ;;  %v2746_v51 = vrot.slane %v8857_v42, 1  ;;  %v11469_v47 = vld [vmem:[#allocation21_spill] sm:$0xff] }
 0x22d   : > { %v6184_v33 = vpack.i.bf16 %v2672_v31, %v2670_v32  ;;  %v4298_v61 = vsel %vm1264_vm11, %v6850_v25, 0  ;;  %v11462_v19 = vunpack.i.h.bf16 %v7939_v55  ;;  %v5522_v22 = vunpack.i.l.bf16 %v11464_v13  ;;  %6180 = vrot.lane.b32.xlu0 %v6179_v50, %s11254_s21  ;;  %v11468_v25 = vld [vmem:[#allocation14_spill] sm:$0xff] }
 0x22e   : > { %v6189_v45 = vpack.i.bf16 %v2676_v4, %v2674_v8  ;;  %5370 = vmatpush3.bf16.msra.mxu0 %v4298_v61  ;;  %v11465_v48 = vmov %v11460_v60  ;;  %v2743_v44 = vsel %vm1214_vm6, %v2740_v40, %v2742_v20  ;;  %v2748_v38 = vrot.slane %v8874_v11, 1  ;;  %v11471_v32 = vld [vmem:[#allocation22_spill] sm:$0xff]  ;;  %v11473_v61 = vld [vmem:[#allocation5_spill] sm:$0xff] }
 0x22f   : > { %v8865_v15 = vsel %vm1896_vm12, %v11463_v23, %v11462_v19  ;;  %v2741_v14 = vsel %vm1214_vm6, %v11465_v48, %v2740_v40  ;;  %v2750_v2 = vrot.slane %v8878_v18, 1  ;;  %vm11288_vm9 = vmmov 0   ;;  %6185 = vrot.lane.b32.xlu1 %v6184_v33, %s11254_s21  ;;  %v11472_v4 = vld [vmem:[#allocation6_spill] sm:$0xff]  ;;  %v11475_v48 = vld [vmem:[#allocation7_spill] sm:$0xff] }
 0x230   : > { %5371 = vmatprep.mubr.msk.bf16.mxu0 %vm11288_vm9, %v11247_v52  ;;  %5405 = vmatprep.mubr.msk.bf16.mxu1 %vm11288_vm9, %v11247_v52  ;;  %v5523_v34 = vunpack.i.h.bf16 %v11464_v13  ;;  %v5528_v6 = vunpack.i.h.bf16 %v11466_v57  ;;  %v5527_v7 = vunpack.i.l.bf16 %v11466_v57  ;;  %v6194_v30 = vpack.i.bf16 %v2739_v63, %v8556_v35  ;;  %v8912_v63 = vld [vmem:[%s7235_s20 + $0x18] sm:$0xff]  ;;  %v11474_v13 = vld [vmem:[#allocation23_spill] sm:$0xff] }
 0x231   : > { %v2745_v1 = vsel %vm1214_vm6, %v2742_v20, %v2744_v46  ;;  %v2747_v43 = vsel %vm1214_vm6, %v2744_v46, %v2746_v51  ;;  %v11246_v24 = vrot.slane %v8893_v10, 1  ;;  %v11252_v59 = vrot.slane %v8897_v56, 1  ;;  %6190 = vrot.lane.b32.xlu0 %v6189_v45, %s11254_s21  ;;  %v11470_v20 = vld [vmem:[#allocation8_spill] sm:$0xff]  ;;  %s11524_s21 = smov 32  }
 0x232   : > { %v11467_v54 = vunpack.i.l.bf16 %v7939_v55  ;;  %v1908_v35 = vsel %vm1907_vm13, %v8510_v16, %v5522_v22  ;;  %v5532_v36 = vunpack.i.l.bf16 %v11469_v47  ;;  %v6199_v12 = vpack.i.bf16 %v2743_v44, %v2741_v14 }
 0x233   : > { %v5533_v50 = vunpack.i.h.bf16 %v11469_v47  ;;  %v2749_v60 = vsel %vm1214_vm6, %v2746_v51, %v2748_v38  ;;  %v2751_v58 = vsel %vm1214_vm6, %v2748_v38, %v2750_v2  ;;  %v2787_v55 = vrot.slane %v8912_v63, 2  ;;  %6195 = vrot.lane.b32.xlu1 %v6194_v30, %s11278_s26 }
 0x234   : > { %v1905_v28 = vsel %vm1896_vm12, %v11468_v25, %v11467_v54  ;;  %v1909_v40 = vsel %vm1907_vm13, %v8506_v27, %v5523_v34  ;;  %v1911_v16 = vsel %vm1907_vm13, %v11470_v20, %v5528_v6  ;;  %v5538_v31 = vunpack.i.h.bf16 %v11471_v32  ;;  %v11477_v6 = vld [vmem:[#allocation9_spill] sm:$0xff] }
 0x235   : > { %v6204_v8 = vpack.i.bf16 %v2747_v43, %v2745_v1  ;;  %v1910_v33 = vsel %vm1907_vm13, %v11472_v4, %v5527_v7  ;;  %v8928_v46 = vsel %vm1214_vm6, %v11246_v24, %v11252_v59  ;;  %v2789_v27 = vrot.slane %v8840_v3, 2  ;;  %6200 = vrot.lane.b32.xlu0 %v6199_v12, %s11278_s26  ;;  %v11478_v1 = vld [vmem:[#allocation24_spill] sm:$0xff] }
 0x236   : > { %v2791_v51 = vrot.slane %v8844_v49, 2  ;;  %v1912_v19 = vsel %vm1907_vm13, %v11473_v61, %v5532_v36  ;;  %v5537_v23 = vunpack.i.l.bf16 %v11471_v32  ;;  %v5542_v22 = vunpack.i.l.bf16 %v11474_v13  ;;  %v11481_v32 = vld [vmem:[#allocation25_spill] sm:$0xff] }
 0x237   : > { %v6209_v45 = vpack.i.bf16 %v2751_v58, %v2749_v60  ;;  %v1913_v14 = vsel %vm1907_vm13, %v11475_v48, %v5533_v50  ;;  %v11476_v44 = vrot.slane %v8133_v37, 2  ;;  %v2793_v34 = vrot.slane %v8853_v9, 2  ;;  %6205 = vrot.lane.b32.xlu1 %v6204_v8, %s11278_s26  ;;  %v11479_v50 = vld [vmem:[#allocation10_spill] sm:$0xff]  ;;  %v11483_v48 = vld [vmem:[#allocation27_spill] sm:$0xff] }
 0x238   : > { %v2795_v57 = vrot.slane %v8857_v42, 2  ;;  %v1915_v7 = vsel %vm1907_vm13, %v11477_v6, %v5538_v31  ;;  %v5543_v30 = vunpack.i.h.bf16 %v11474_v13  ;;  %v5547_v43 = vunpack.i.l.bf16 %v11478_v1 }
 0x239   : > { %v8942_v38 = vsel %vm1264_vm11, %v11476_v44, %v2787_v55  ;;  %v6214_v54 = vpack.i.bf16 %v8928_v46, %v2750_v2  ;;  %v8953_v25 = vsel %vm1264_vm11, %v2787_v55, %v2789_v27  ;;  %v8956_v47 = vsel %vm1264_vm11, %v2789_v27, %v2791_v51  ;;  %6210 = vrot.lane.b32.xlu0 %v6209_v45, %s11278_s26  ;;  %v11480_v2 = vld [vmem:[#allocation44_spill] sm:$0xff] }
 0x23a   : > { %v2797_v36 = vrot.slane %v8874_v11, 2  ;;  %v8960_v12 = vrot.slane %v8878_v18, 2  ;;  %v1914_v60 = vsel %vm1907_vm13, %v11479_v50, %v5537_v23  ;;  %v1916_v58 = vsel %vm1907_vm13, %v1905_v28, %v5542_v22  ;;  %v11482_v23 = vld [vmem:[#allocation26_spill] sm:$0xff] }
 0x23b   : > { %v5548_v20 = vunpack.i.h.bf16 %v11478_v1  ;;  %v6219_v55 = vpack.i.bf16 %v8942_v38, %v11480_v2  ;;  %v5553_v31 = vunpack.i.h.bf16 %v11481_v32  ;;  %v5552_v8 = vunpack.i.l.bf16 %v11481_v32  ;;  %6215 = vrot.lane.b32.xlu1 %v6214_v54, %s11278_s26  ;;  %v11484_v54 = vld [vmem:[#allocation28_spill] sm:$0xff] }
 0x23c   : > { %v8972_v4 = vsel %vm1264_vm11, %v2791_v51, %v2793_v34  ;;  %v8975_v27 = vsel %vm1264_vm11, %v2793_v34, %v2795_v57  ;;  %v1917_v28 = vsel %vm1907_vm13, %v8865_v15, %v5543_v30  ;;  %v1919_v61 = vsel %vm1918_vm0, %v1908_v35, %v5547_v43  ;;  %v8999_v30 = vld [vmem:[%s7619_s25] sm:$0xff] }
 0x23d   : > { %v5557_v13 = vunpack.i.l.bf16 %v11482_v23  ;;  %v6224_v22 = vpack.i.bf16 %v8956_v47, %v8953_v25  ;;  %v5558_v45 = vunpack.i.h.bf16 %v11482_v23  ;;  %v5562_v51 = vunpack.i.l.bf16 %v11483_v48  ;;  %6220 = vrot.lane.b32.xlu0 %v6219_v55, %s11269_s28 }
 0x23e   : > { %v8987_v44 = vsel %vm1264_vm11, %v2795_v57, %v2797_v36  ;;  %v8991_v34 = vsel %vm1264_vm11, %v2797_v36, %v8960_v12  ;;  %v1920_v15 = vsel %vm1918_vm0, %v1909_v40, %v5548_v20  ;;  %v5563_v35 = vunpack.i.h.bf16 %v11483_v48  ;;  %v11485_v20 = vld [vmem:[#allocation29_spill] sm:$0xff] }
 0x23f   : > { %v6229_v6 = vpack.i.bf16 %v8975_v27, %v8972_v4  ;;  %v11251_v1 = vrot.slane %v8999_v30, 3  ;;  %v1921_v57 = vsel %vm1918_vm0, %v1910_v33, %v5552_v8  ;;  %v1922_v43 = vsel %vm1918_vm0, %v1911_v16, %v5553_v31  ;;  %6225 = vrot.lane.b32.xlu1 %v6224_v22, %s11269_s28  ;;  %v11486_v31 = vld [vmem:[#allocation30_spill] sm:$0xff] }
 0x240   : > { %v5568_v36 = vunpack.i.h.bf16 %v11484_v54  ;;  %v5567_v50 = vunpack.i.l.bf16 %v11484_v54  ;;  %v1923_v40 = vsel %vm1918_vm0, %v1912_v19, %v5557_v13  ;;  %v5573_v2 = vunpack.i.h.bf16 %v11485_v20  ;;  %v11487_v13 = vld [vmem:[#allocation31_spill] sm:$0xff] }
 0x241   : > { %v5572_v55 = vunpack.i.l.bf16 %v11485_v20  ;;  %v6234_v32 = vpack.i.bf16 %v8991_v34, %v8987_v44  ;;  %v1924_v33 = vsel %vm1918_vm0, %v1913_v14, %v5558_v45  ;;  %v1925_v16 = vsel %vm1918_vm0, %v1914_v60, %v5562_v51  ;;  %6230 = vrot.lane.b32.xlu0 %v6229_v6, %s11269_s28  ;;  %v11488_v45 = vld [vmem:[#allocation32_spill] sm:$0xff]  ;;  %v9027_v20 = vld [vmem:[%s7235_s20 + $0x50] sm:$0xff] }
 0x242   : > { %v5578_v8 = vunpack.i.h.bf16 %v11486_v31  ;;  %v5577_v23 = vunpack.i.l.bf16 %v11486_v31  ;;  %v1926_v19 = vsel %vm1918_vm0, %v1915_v7, %v5563_v35  ;;  %v5583_v48 = vunpack.i.h.bf16 %v11487_v13 }
 0x243   : > { %v5582_v54 = vunpack.i.l.bf16 %v11487_v13  ;;  %v6239_v22 = vpack.i.bf16 %v11251_v1, %v8960_v12  ;;  %v1927_v14 = vsel %vm1918_vm0, %v1916_v58, %v5567_v50  ;;  %v1928_v60 = vsel %vm1918_vm0, %v1917_v28, %v5568_v36  ;;  %6235 = vrot.lane.b32.xlu1 %v6234_v32, %s11269_s28  ;;  %v11489_v36 = vld [vmem:[#allocation33_spill] sm:$0xff] }
 0x244   : > { %v5587_v51 = vunpack.i.l.bf16 %v11488_v45  ;;  %v2832_v7 = vrot.slane %v9027_v20, 2  ;;  %v1930_v35 = vsel %vm11260_vm1, %v1919_v61, %v5572_v55  ;;  %v1931_v31 = vsel %vm11260_vm1, %v1920_v15, %v5573_v2  ;;  %v11490_v15 = vld [vmem:[#allocation34_spill] sm:$0xff] }
 0x245   : > { %v5588_v6 = vunpack.i.h.bf16 %v11488_v45  ;;  %v6244_v13 = vpack.i.bf16 %v8953_v25, %v8942_v38  ;;  %v1932_v58 = vsel %vm11260_vm1, %v1921_v57, %v5577_v23  ;;  %v1933_v28 = vsel %vm11260_vm1, %v1922_v43, %v5578_v8  ;;  %6240 = vrot.lane.b32.xlu0 %v6239_v22, %s11269_s28  ;;  %v11492_v23 = vld [vmem:[#allocation18_spill] sm:$0xff]  ;;  %v11494_v45 = vld [vmem:[#allocation35_spill] sm:$0xff] }
 0x246   : > { %v5593_v50 = vunpack.i.h.bf16 %v11489_v36  ;;  %v5592_v24 = vunpack.i.l.bf16 %v11489_v36  ;;  %v1934_v52 = vsel %vm11260_vm1, %v1923_v40, %v5582_v54  ;;  %v1935_v61 = vsel %vm11260_vm1, %v1924_v33, %v5583_v48 }
 0x247   : > { %v5597_v2 = vunpack.i.l.bf16 %v11490_v15  ;;  %v6249_v55 = vpack.i.bf16 %v8972_v4, %v8956_v47  ;;  %v1936_v38 = vsel %vm11260_vm1, %v1925_v16, %v5587_v51  ;;  %v2833_v25 = vsel %vm1264_vm11, %v8960_v12, %v2832_v7  ;;  %6245 = vrot.lane.b32.xlu1 %v6244_v13, %s11491_s18 }
 0x248   : > { %v2868_v57 = vrot.slane %v8912_v63, 3  ;;  %v2870_v43 = vrot.slane %v8840_v3, 3  ;;  %v1937_v40 = vsel %vm11260_vm1, %v1926_v19, %v5588_v6  ;;  %v5598_v32 = vunpack.i.h.bf16 %v11490_v15  ;;  %v11495_v15 = vld [vmem:[#allocation36_spill] sm:$0xff] }
 0x249   : > { %v6254_v33 = vpack.i.bf16 %v8987_v44, %v8975_v27  ;;  %v11250_v47 = vrot.slane %v8999_v30, 4  ;;  %v1938_v4 = vsel %vm11260_vm1, %v1927_v14, %v5592_v24  ;;  %v1939_v16 = vsel %vm11260_vm1, %v1928_v60, %v5593_v50  ;;  %6250 = vrot.lane.b32.xlu0 %v6249_v55, %s11491_s18 }
 0x24a   : > { %v2872_v12 = vrot.slane %v8844_v49, 3  ;;  %v2874_v63 = vrot.slane %v8853_v9, 3  ;;  %v1941_v8 = vsel %vm11258_vm2, %v1930_v35, %v5597_v2  ;;  %v5603_v19 = vunpack.i.h.bf16 %v11492_v23 }
 0x24b   : > { %v5602_v48 = vunpack.i.l.bf16 %v11492_v23  ;;  %v6259_v27 = vpack.i.bf16 %v2833_v25, %v8991_v34  ;;  %v11493_v44 = vrot.slane %v8133_v37, 3  ;;  %v2871_v54 = vsel %vm1348_vm14, %v2868_v57, %v2870_v43  ;;  %6255 = vrot.lane.b32.xlu1 %v6254_v33, %s11491_s18 }
 0x24c   : > { %v2876_v22 = vrot.slane %v8857_v42, 3  ;;  %v2878_v14 = vrot.slane %v8874_v11, 3  ;;  %v1942_v60 = vsel %vm11258_vm2, %v1931_v31, %v5598_v32  ;;  %v5608_v51 = vunpack.i.h.bf16 %v11494_v45 }
 0x24d   : > { %v2869_v24 = vsel %vm1348_vm14, %v11493_v44, %v2868_v57  ;;  %v5607_v35 = vunpack.i.l.bf16 %v11494_v45  ;;  %v6264_v37 = vpack.i.bf16 %v11250_v47, %v2832_v7  ;;  %v2873_v34 = vsel %vm1348_vm14, %v2870_v43, %v2872_v12  ;;  %6260 = vrot.lane.b32.xlu0 %v6259_v27, %s11491_s18  ;;  %v9090_v43 = vld [vmem:[%s7235_s20 + $0x58] sm:$0xff]  ;;  %v11508_v47 = vld [vmem:[#allocation47_spill] sm:$0xff] }
 0x24e   : > { %v2875_v6 = vsel %vm1348_vm14, %v2872_v12, %v2874_v63  ;;  %v2880_v13 = vrot.slane %v8878_v18, 3  ;;  %v2882_v36 = vrot.slane %v9027_v20, 3  ;;  %v1943_v31 = vsel %vm11258_vm2, %v1932_v58, %v5602_v48 }
 0x24f   : > { %v1944_v50 = vsel %vm11258_vm2, %v1933_v28, %v5603_v19  ;;  %v5612_v2 = vunpack.i.l.bf16 %v11495_v15  ;;  %v6269_v55 = vpack.i.bf16 %v2871_v54, %v2869_v24  ;;  %v5613_v25 = vunpack.i.h.bf16 %v11495_v15  ;;  %v11496_v28 = vld [vmem:[#allocation37_spill] sm:$0xff]  ;;  %6265 = vrot.lane.b32.xlu1 %v6264_v37, %s11491_s18  ;;  %v11497_v24 = vld [vmem:[#allocation38_spill] sm:$0xff] }
 0x250   : > { %v2877_v7 = vsel %vm1348_vm14, %v2874_v63, %v2876_v22  ;;  %v2879_v57 = vsel %vm1348_vm14, %v2876_v22, %v2878_v14  ;;  %v2884_v32 = vrot.slane %v9090_v43, 3  ;;  %v1945_v33 = vsel %vm11258_vm2, %v1934_v52, %v5607_v35 }
 0x251   : > { %v1946_v58 = vsel %vm11258_vm2, %v1935_v61, %v5608_v51  ;;  %v5617_v12 = vunpack.i.l.bf16 %v11496_v28  ;;  %v6274_v23 = vpack.i.bf16 %v2875_v6, %v2873_v34  ;;  %v5618_v19 = vunpack.i.h.bf16 %v11496_v28  ;;  %6270 = vrot.lane.b32.xlu0 %v6269_v55, %s11498_s23 }
 0x252   : > { %v2881_v48 = vsel %vm1348_vm14, %v2878_v14, %v2880_v13  ;;  %v2883_v63 = vsel %vm1348_vm14, %v2880_v13, %v2882_v36  ;;  %v2921_v27 = vrot.slane %v8840_v3, 4  ;;  %v1947_v44 = vsel %vm11258_vm2, %v1936_v38, %v5612_v2  ;;  %v11499_v38 = vld [vmem:[#allocation39_spill] sm:$0xff] }
 0x253   : > { %v5622_v54 = vunpack.i.l.bf16 %v11497_v24  ;;  %v6279_v52 = vpack.i.bf16 %v2879_v57, %v2877_v7  ;;  %v11249_v61 = vrot.slane %v8999_v30, 5  ;;  %v1948_v22 = vsel %vm11258_vm2, %v1937_v40, %v5613_v25  ;;  %6275 = vrot.lane.b32.xlu1 %v6274_v23, %s11498_s23  ;;  %v11501_v25 = vld [vmem:[#allocation40_spill] sm:$0xff] }
 0x254   : > { %v2885_v45 = vsel %vm1348_vm14, %v2882_v36, %v2884_v32  ;;  %v2923_v51 = vrot.slane %v8844_v49, 4  ;;  %v2925_v14 = vrot.slane %v8853_v9, 4  ;;  %v1949_v35 = vsel %vm11258_vm2, %v1938_v4, %v5617_v12 }
 0x255   : > { %v5623_v37 = vunpack.i.h.bf16 %v11497_v24  ;;  %v5627_v34 = vunpack.i.l.bf16 %v11499_v38  ;;  %v6284_v6 = vpack.i.bf16 %v2883_v63, %v2881_v48  ;;  %v1950_v13 = vsel %vm11258_vm2, %v1939_v16, %v5618_v19  ;;  %6280 = vrot.lane.b32.xlu0 %v6279_v52, %s11498_s23  ;;  %v11502_v48 = vld [vmem:[#allocation65_spill] sm:$0xff] }
 0x256   : > { %v11500_v15 = vrot.slane %v8255_v39, 4  ;;  %v2927_v36 = vrot.slane %v8857_v42, 4  ;;  %v2929_v2 = vrot.slane %v8874_v11, 4  ;;  %v1952_v4 = vsel %vm11257_vm4, %v1941_v8, %v5622_v54 }
 0x257   : > { %v5628_v55 = vunpack.i.h.bf16 %v11499_v38  ;;  %v5632_v7 = vunpack.i.l.bf16 %v11501_v25  ;;  %v6289_v16 = vpack.i.bf16 %v11249_v61, %v2885_v45  ;;  %v9128_v57 = vsel %vm1400_vm15, %v2921_v27, %v2923_v51  ;;  %6285 = vrot.lane.b32.xlu1 %v6284_v6, %s11498_s23  ;;  %v11504_v38 = vld [vmem:[#allocation42_spill] sm:$0xff] }
 0x258   : > { %v9117_v40 = vsel %vm1400_vm15, %v11500_v15, %v2921_v27  ;;  %v9131_v32 = vsel %vm1400_vm15, %v2923_v51, %v2925_v14  ;;  %v2931_v28 = vrot.slane %v8878_v18, 4  ;;  %v2933_v12 = vrot.slane %v9027_v20, 4  ;;  %v11503_v27 = vld [vmem:[#allocation41_spill] sm:$0xff] }
 0x259   : > { %v1953_v8 = vsel %vm11257_vm4, %v1942_v60, %v5623_v37  ;;  %v1954_v23 = vsel %vm11257_vm4, %v1943_v31, %v5627_v34  ;;  %v5633_v19 = vunpack.i.h.bf16 %v11501_v25  ;;  %v6294_v63 = vpack.i.bf16 %v9117_v40, %v11502_v48  ;;  %6290 = vrot.lane.b32.xlu0 %v6289_v16, %s11498_s23  ;;  %v9169_v25 = vld [vmem:[%s7619_s25 + $0x8] sm:$0xff] }
 0x25a   : > { %v5637_v24 = vunpack.i.l.bf16 %v11503_v27  ;;  %v9143_v54 = vsel %vm1400_vm15, %v2925_v14, %v2927_v36  ;;  %v9146_v52 = vsel %vm1400_vm15, %v2927_v36, %v2929_v2  ;;  %v2935_v60 = vrot.slane %v9090_v43, 4 }
 0x25b   : > { %v1955_v31 = vsel %vm11257_vm4, %v1944_v50, %v5628_v55  ;;  %v1956_v45 = vsel %vm11257_vm4, %v1945_v33, %v5632_v7  ;;  %v5638_v51 = vunpack.i.h.bf16 %v11503_v27  ;;  %v6299_v37 = vpack.i.bf16 %v9131_v32, %v9128_v57  ;;  %v11505_v33 = vld [vmem:[#allocation43_spill] sm:$0xff]  ;;  %6295 = vrot.lane.b32.xlu1 %v6294_v63, %s11390_s27  ;;  %v11507_v27 = vld [vmem:[#allocation46_spill] sm:$0xff] }
 0x25c   : > { %v5643_v14 = vunpack.i.h.bf16 %v11504_v38  ;;  %v5642_v34 = vunpack.i.l.bf16 %v11504_v38  ;;  %v9158_v6 = vsel %vm1400_vm15, %v2929_v2, %v2931_v28  ;;  %v9161_v15 = vsel %vm1400_vm15, %v2931_v28, %v2933_v12  ;;  %v11506_v28 = vld [vmem:[#allocation45_spill] sm:$0xff] }
 0x25d   : > { %v1957_v50 = vsel %vm11257_vm4, %v1946_v58, %v5633_v19  ;;  %v5647_v36 = vunpack.i.l.bf16 %v11505_v33  ;;  %v6304_v55 = vpack.i.bf16 %v9146_v52, %v9143_v54  ;;  %v9172_v7 = vrot.slane %v9169_v25, 5  ;;  %6300 = vrot.lane.b32.xlu0 %v6299_v37, %s11390_s27 }
 0x25e   : > { %v1958_v2 = vsel %vm11257_vm4, %v1947_v44, %v5637_v24  ;;  %v5648_v16 = vunpack.i.h.bf16 %v11505_v33  ;;  %v5652_v48 = vunpack.i.l.bf16 %v11506_v28  ;;  %v9180_v58 = vsel %vm1400_vm15, %v2933_v12, %v2935_v60 }
 0x25f   : > { %v1959_v19 = vsel %vm11257_vm4, %v1948_v22, %v5638_v51  ;;  %v5653_v63 = vunpack.i.h.bf16 %v11506_v28  ;;  %v5657_v38 = vunpack.i.l.bf16 %v11507_v27  ;;  %v6309_v44 = vpack.i.bf16 %v9161_v15, %v9158_v6  ;;  %v11509_v51 = vld [vmem:[#allocation48_spill] sm:$0xff]  ;;  %6305 = vrot.lane.b32.xlu1 %v6304_v55, %s11390_s27 }
 0x260   : > { %v1960_v24 = vsel %vm11257_vm4, %v1949_v35, %v5642_v34  ;;  %v1961_v33 = vsel %vm11257_vm4, %v1950_v13, %v5643_v14  ;;  %v5658_v61 = vunpack.i.h.bf16 %v11507_v27  ;;  %v5662_v12 = vunpack.i.l.bf16 %v11508_v47  ;;  %v11510_v34 = vld [vmem:[#allocation49_spill] sm:$0xff] }
 0x261   : > { %v1963_v1 = vsel %vm11256_vm5, %v1952_v4, %v5647_v36  ;;  %v5663_v22 = vunpack.i.h.bf16 %v11508_v47  ;;  %v5667_v28 = vunpack.i.l.bf16 %v11509_v51  ;;  %v6314_v37 = vpack.i.bf16 %v9172_v7, %v9180_v58  ;;  %6310 = vrot.lane.b32.xlu0 %v6309_v44, %s11390_s27 }
 0x262   : > { %v1964_v35 = vsel %vm11256_vm5, %v1953_v8, %v5648_v16  ;;  %v1965_v13 = vsel %vm11256_vm5, %v1954_v23, %v5652_v48  ;;  %v5668_v14 = vunpack.i.h.bf16 %v11509_v51  ;;  %v5672_v27 = vunpack.i.l.bf16 %v11510_v34  ;;  %v11511_v23 = vld [vmem:[#allocation50_spill] sm:$0xff]  ;;  %v9212_v48 = vld [vmem:[%s7235_s20 + $0x60] sm:$0xf] }
 0x263   : > { %v1966_v4 = vsel %vm11256_vm5, %v1955_v31, %v5653_v63  ;;  %v1967_v47 = vsel %vm11256_vm5, %v1956_v45, %v5657_v38  ;;  %v5673_v36 = vunpack.i.h.bf16 %v11510_v34  ;;  %v6319_v55 = vpack.i.bf16 %v9128_v57, %v9117_v40  ;;  %6315 = vrot.lane.b32.xlu1 %v6314_v37, %s11390_s27  ;;  %v11513_v37 = vld [vmem:[#allocation52_spill] sm:$0xff] }
 0x264   : > { %v1968_v59 = vsel %vm11256_vm5, %v1957_v50, %v5658_v61  ;;  %v1969_v8 = vsel %vm11256_vm5, %v1958_v2, %v5662_v12  ;;  %v5677_v16 = vunpack.i.l.bf16 %v11511_v23  ;;  %v2968_v51 = vrot.slane %v9212_v48, 4 }
 0x265   : > { %v1970_v31 = vsel %vm11256_vm5, %v1959_v19, %v5663_v22  ;;  %v1971_v45 = vsel %vm11256_vm5, %v1960_v24, %v5667_v28  ;;  %v5678_v63 = vunpack.i.h.bf16 %v11511_v23  ;;  %v6324_v40 = vpack.i.bf16 %v9143_v54, %v9131_v32  ;;  %v11512_v19 = vld [vmem:[#allocation51_spill] sm:$0xff]  ;;  %6320 = vrot.lane.b32.xlu0 %v6319_v55, %s11397_s22 }
 0x266   : > { %v1972_v61 = vsel %vm11256_vm5, %v1961_v33, %v5668_v14  ;;  %v1974_v57 = vsel %vm11253_vm7, %v1963_v1, %v5672_v27  ;;  %v3003_v50 = vrot.slane %v8840_v3, 5  ;;  %v3005_v2 = vrot.slane %v8844_v49, 5 }
 0x267   : > { %v1975_v38 = vsel %vm11253_vm7, %v1964_v35, %v5673_v36  ;;  %v5682_v44 = vunpack.i.l.bf16 %v11512_v19  ;;  %v6329_v24 = vpack.i.bf16 %v9158_v6, %v9146_v52  ;;  %v3801_v12 = vrot.slane %v9169_v25, 6  ;;  %6325 = vrot.lane.b32.xlu1 %v6324_v40, %s11397_s22  ;;  %v11515_v36 = vld [vmem:[#allocation53_spill] sm:$0xff] }
 0x268   : > { %v1976_v32 = vsel %vm11253_vm7, %v1965_v13, %v5677_v16  ;;  %v2969_v1 = vsel %vm1400_vm15, %v2935_v60, %v2968_v51  ;;  %v3007_v54 = vrot.slane %v8853_v9, 5  ;;  %v3009_v33 = vrot.slane %v8857_v42, 5 }
 0x269   : > { %v9238_v22 = vsel %vm11253_vm7, %v1966_v4, %v5678_v63  ;;  %v5683_v28 = vunpack.i.h.bf16 %v11512_v19  ;;  %v5687_v35 = vunpack.i.l.bf16 %v11513_v37  ;;  %v6334_v52 = vpack.i.bf16 %v9180_v58, %v9161_v15  ;;  %6330 = vrot.lane.b32.xlu0 %v6329_v24, %s11397_s22  ;;  %v11516_v19 = vld [vmem:[#allocation54_spill] sm:$0xff] }
 0x26a   : > { %v11514_v6 = vrot.slane %v8255_v39, 5  ;;  %v3006_v13 = vsel %vm1485_vm3, %v3003_v50, %v3005_v2  ;;  %v3011_v14 = vrot.slane %v8874_v11, 5  ;;  %v3013_v34 = vrot.slane %v8878_v18, 5 }
 0x26b   : > { %v1978_v27 = vsel %vm11253_vm7, %v1967_v47, %v5682_v44  ;;  %v5688_v4 = vunpack.i.h.bf16 %v11513_v37  ;;  %v5692_v55 = vunpack.i.l.bf16 %v11515_v36  ;;  %v6339_v15 = vpack.i.bf16 %v3801_v12, %v2969_v1  ;;  %6335 = vrot.lane.b32.xlu1 %v6334_v52, %s11397_s22 }
 0x26c   : > { %v3004_v60 = vsel %vm1485_vm3, %v11514_v6, %v3003_v50  ;;  %v3008_v58 = vsel %vm1485_vm3, %v3005_v2, %v3007_v54  ;;  %v3010_v23 = vsel %vm1485_vm3, %v3007_v54, %v3009_v33  ;;  %v3015_v16 = vrot.slane %v9027_v20, 5 }
 0x26d   : > { %v3017_v51 = vrot.slane %v9090_v43, 5  ;;  %v1979_v63 = vsel %vm11253_vm7, %v1968_v59, %v5683_v28  ;;  %v1980_v47 = vsel %vm11253_vm7, %v1969_v8, %v5687_v35  ;;  %v5693_v40 = vunpack.i.h.bf16 %v11515_v36  ;;  %6340 = vrot.lane.b32.xlu0 %v6339_v15, %s11397_s22 }
 0x26e   : > { %v6344_v50 = vpack.i.bf16 %v3006_v13, %v3004_v60  ;;  %v5697_v44 = vunpack.i.l.bf16 %v11516_v19  ;;  %v3012_v24 = vsel %vm1485_vm3, %v3009_v33, %v3011_v14  ;;  %v3014_v2 = vsel %vm1485_vm3, %v3011_v14, %v3013_v34  ;;  %v11517_v60 = vld [vmem:[#allocation55_spill] sm:$0xff] }
 0x26f   : > { %v3019_v1 = vrot.slane %v9212_v48, 5  ;;  %v1981_v54 = vsel %vm11253_vm7, %v1970_v31, %v5688_v4  ;;  %v1982_v37 = vsel %vm11253_vm7, %v1971_v45, %v5692_v55  ;;  %v5698_v59 = vunpack.i.h.bf16 %v11516_v19 }
 0x270   : > { %v6349_v8 = vpack.i.bf16 %v3010_v23, %v3008_v58  ;;  %v3016_v28 = vsel %vm1485_vm3, %v3013_v34, %v3015_v16  ;;  %v3018_v35 = vsel %vm1485_vm3, %v3015_v16, %v3017_v51  ;;  %v3054_v52 = vrot.slane %v8840_v3, 6  ;;  %6345 = vrot.lane.b32.xlu1 %v6344_v50, %s11406_s24 }
 0x271   : > { %v3056_v33 = vrot.slane %v8844_v49, 6  ;;  %v1983_v6 = vsel %vm11253_vm7, %v1972_v61, %v5693_v40  ;;  %v5702_v13 = vunpack.i.l.bf16 %v11517_v60  ;;  %v6354_v31 = vpack.i.bf16 %v3014_v2, %v3012_v24  ;;  %v11518_v61 = vld [vmem:[#allocation56_spill] sm:$0xff] }
 0x272   : > { %v3855_v45 = vrot.slane %v9169_v25, 7  ;;  %v1985_v14 = vsel %vm11259_vm10, %v1974_v57, %v5697_v44  ;;  %v3020_v4 = vsel %vm1485_vm3, %v3017_v51, %v3019_v1  ;;  %v3058_v34 = vrot.slane %v8853_v9, 6  ;;  %6350 = vrot.lane.b32.xlu0 %v6349_v8, %s11406_s24  ;;  %v11520_v51 = vld [vmem:[#allocation57_spill] sm:$0xff]  ;;  %v11521_v1 = vld [vmem:[#allocation58_spill] sm:$0xff] }
 0x273   : > { %v3060_v36 = vrot.slane %v8857_v42, 6  ;;  %v1986_v3 = vsel %vm11259_vm10, %v1975_v38, %v5698_v59  ;;  %v5703_v49 = vunpack.i.h.bf16 %v11517_v60  ;;  %v5707_v55 = vunpack.i.l.bf16 %v11518_v61 }
 0x274   : > { %v6359_v15 = vpack.i.bf16 %v3018_v35, %v3016_v28  ;;  %v11519_v58 = vrot.slane %v8255_v39, 6  ;;  %v3057_v57 = vsel %vm1537_vm8, %v3054_v52, %v3056_v33  ;;  %v3062_v16 = vrot.slane %v8874_v11, 6  ;;  %6355 = vrot.lane.b32.xlu1 %v6354_v31, %s11406_s24 }
 0x275   : > { %v3064_v9 = vrot.slane %v8878_v18, 6  ;;  %v1987_v42 = vsel %vm11259_vm10, %v1976_v32, %v5702_v13  ;;  %v5708_v38 = vunpack.i.h.bf16 %v11518_v61  ;;  %v5712_v40 = vunpack.i.l.bf16 %v11520_v51 }
 0x276   : > { %v3055_v23 = vsel %vm1537_vm8, %v11519_v58, %v3054_v52  ;;  %v6364_v50 = vpack.i.bf16 %v3855_v45, %v3020_v4  ;;  %v3059_v39 = vsel %vm1537_vm8, %v3056_v33, %v3058_v34  ;;  %v3061_v19 = vsel %vm1537_vm8, %v3058_v34, %v3060_v36  ;;  %6360 = vrot.lane.b32.xlu0 %v6359_v15, %s11406_s24 }
 0x277   : > { %v3066_v44 = vrot.slane %v9027_v20, 6  ;;  %v3068_v11 = vrot.slane %v9090_v43, 6  ;;  %v1988_v18 = vsel %vm11259_vm10, %v9238_v22, %v5703_v49  ;;  %v1989_v32 = vsel %vm11259_vm10, %v1978_v27, %v5707_v55  ;;  %v11522_v27 = vld [vmem:[#allocation59_spill] sm:$0xff]  ;;  %v11525_v55 = vld [vmem:[#allocation61_spill] sm:$0xff] }
 0x278   : > { %v5713_v24 = vunpack.i.h.bf16 %v11520_v51  ;;  %v6369_v2 = vpack.i.bf16 %v3057_v57, %v3055_v23  ;;  %v5717_v59 = vunpack.i.l.bf16 %v11521_v1  ;;  %vm11261_vm7 = vcmask 359424   ;;  %6365 = vrot.lane.b32.xlu1 %v6364_v50, %s11406_s24 }
 0x279   : > { %v3063_v8 = vsel %vm1537_vm8, %v3060_v36, %v3062_v16  ;;  %v3065_v20 = vsel %vm1537_vm8, %v3062_v16, %v3064_v9  ;;  %v3070_v43 = vrot.slane %v9212_v48, 6  ;;  %v1990_v28 = vsel %vm11259_vm10, %v1979_v63, %v5708_v38  ;;  %v11523_v48 = vld [vmem:[#allocation60_spill] sm:$0xff]  ;;  %v9326_v36 = vld [vmem:[%s7619_s25 + $0x10] sm:$0xff]  ;;  %v11528_v38 = vld [vmem:[#allocation62_spill] sm:$0xff] }
 0x27a   : > { %v5718_v22 = vunpack.i.h.bf16 %v11521_v1  ;;  %v5722_v35 = vunpack.i.l.bf16 %v11522_v27  ;;  %v6374_v52 = vpack.i.bf16 %v3061_v19, %v3059_v39  ;;  %v1991_v33 = vsel %vm11259_vm10, %v1980_v47, %v5712_v40  ;;  %6370 = vrot.lane.b32.xlu0 %v6369_v2, %s11524_s21  ;;  %v11529_v40 = vld [vmem:[#allocation63_spill] sm:$0xff]  ;;  %v11531_v19 = vld [vmem:[#allocation64_spill] sm:$0xff]  ;;  %v11534_v2 = vld [vmem:[#allocation66_spill] sm:$0xff] }
 0x27b   : > { %v5723_v60 = vunpack.i.h.bf16 %v11522_v27  ;;  %v3067_v13 = vsel %vm1537_vm8, %v3064_v9, %v3066_v44  ;;  %v3069_v31 = vsel %vm1537_vm8, %v3066_v44, %v3068_v11  ;;  %v1992_v4 = vsel %vm11259_vm10, %v1981_v54, %v5713_v24 }
 0x27c   : > { %v5727_v34 = vunpack.i.l.bf16 %v11523_v48  ;;  %v6379_v63 = vpack.i.bf16 %v3065_v20, %v3063_v8  ;;  %v9329_v49 = vrot.slane %v9326_v36, 7  ;;  %v1993_v47 = vsel %vm11259_vm10, %v1982_v37, %v5717_v59  ;;  %6375 = vrot.lane.b32.xlu1 %v6374_v52, %s11524_s21  ;;  %v11536_v8 = vld [vmem:[#allocation67_spill] sm:$0xff] }
 0x27d   : > { %v5728_v61 = vunpack.i.h.bf16 %v11523_v48  ;;  %v5732_v15 = vunpack.i.l.bf16 %v11525_v55  ;;  %v3071_v58 = vsel %vm1537_vm8, %v3068_v11, %v3070_v43  ;;  %v1994_v54 = vsel %vm11259_vm10, %v1983_v6, %v5718_v22  ;;  %v9357_v43 = vld [vmem:[%s7404_s16 + $0x8] sm:$0xff] }
 0x27e   : > { %vm11526_vm5 = vcmask 326656   ;;  %v5733_v57 = vunpack.i.h.bf16 %v11525_v55  ;;  %v6384_v16 = vpack.i.bf16 %v3069_v31, %v3067_v13  ;;  %v5738_v51 = vunpack.i.h.bf16 %v11528_v38  ;;  %6380 = vrot.lane.b32.xlu0 %v6379_v63, %s11524_s21  ;;  %v9370_v31 = vld [vmem:[%s7404_s16 + $0x20] sm:$0xff]  ;;  %v9378_v63 = vld [vmem:[%s7404_s16 + $0x28] sm:$0xff] }
 0x27f   : > { %v1996_v23 = vsel %vm11526_vm5, %v1985_v14, %v5722_v35  ;;  %vm11527_vm4 = vmmov %vm11526_vm5  ;;  %v5737_v37 = vunpack.i.l.bf16 %v11528_v38  ;;  %v5742_v50 = vunpack.i.l.bf16 %v11529_v40  ;;  %v5743_v6 = vunpack.i.h.bf16 %v11529_v40  ;;  %v11542_v40 = vld [vmem:[#allocation70_spill] sm:$0xff] }
 0x280   : > { %v1997_v9 = vsel %vm11527_vm4, %v1986_v3, %v5723_v60  ;;  %vm11530_vm2 = vmmov %vm11527_vm4  ;;  %v5747_v14 = vunpack.i.l.bf16 %v11531_v19  ;;  %v6389_v44 = vpack.i.bf16 %v9329_v49, %v3071_v58  ;;  %v5748_v24 = vunpack.i.h.bf16 %v11531_v19  ;;  %6385 = vrot.lane.b32.xlu1 %v6384_v16, %s11524_s21  ;;  %v11540_v60 = vld [vmem:[#allocation68_spill] sm:$0xff]  ;;  %v9386_v58 = vld [vmem:[%s7404_s16 + $0x30] sm:$0xff] }
 0x281   : > { %v1998_v39 = vsel %vm11530_vm2, %v1987_v42, %v5727_v34  ;;  %vm11532_vm5 = vmmov %vm11530_vm2  ;;  %v5752_v1 = vunpack.i.l.bf16 %v11534_v2  ;;  %vm11271_vm10 = vcmask 392192   ;;  %v5753_v59 = vunpack.i.h.bf16 %v11534_v2 }
 0x282   : > { %v1999_v11 = vsel %vm11532_vm5, %v1988_v18, %v5728_v61  ;;  %vm11533_vm4 = vmmov %vm11530_vm2  ;;  %v5757_v20 = vunpack.i.l.bf16 %v11536_v8  ;;  %v6394_v18 = vpack.i.bf16 %v8893_v10, %v9357_v43  ;;  %v2007_v52 = vsel %vm11261_vm7, %v1996_v23, %v5747_v14  ;;  %6390 = vrot.lane.b32.xlu0 %v6389_v44, %s11524_s21 }
 0x283   : > { %v2000_v3 = vsel %vm11533_vm4, %v1989_v32, %v5732_v15  ;;  %vm11535_vm1 = vmmov %vm11530_vm2  ;;  %v5762_v13 = vunpack.i.l.bf16 %v11540_v60  ;;  %v2009_v48 = vsel %vm11261_vm7, %v1998_v39, %v5752_v1  ;;  %v3149_v34 = vrot.slane %v9370_v31, 1  ;;  %v9401_v39 = vld [vmem:[%s7404_s16 + $0x40] sm:$0xff] }
 0x284   : > { %v2001_v42 = vsel %vm11535_vm1, %v1990_v28, %v5733_v57  ;;  %vm11537_vm2 = vmmov %vm11535_vm1  ;;  %v5758_v28 = vunpack.i.h.bf16 %v11536_v8  ;;  %v2005_v35 = vsel %vm11535_vm1, %v1994_v54, %v5743_v6  ;;  %v2010_v61 = vsel %vm11261_vm7, %v1999_v11, %v5753_v59  ;;  %6395 = vrot.lane.b32.xlu1 %v6394_v18, %s11420_s19  ;;  %v11541_v57 = vld [vmem:[#allocation69_spill] sm:$0xff]  ;;  %v9404_v6 = vld [vmem:[%s7404_s16 + $0x38] sm:$0xff] }
 0x285   : > { %v2002_v32 = vsel %vm11537_vm2, %v1991_v33, %v5737_v37  ;;  %vm11538_vm5 = vmmov %vm11535_vm1  ;;  %v6399_v33 = vpack.i.bf16 %v9370_v31, %v8897_v56  ;;  %v2011_v55 = vsel %vm11261_vm7, %v2000_v3, %v5757_v20  ;;  %v5763_v15 = vunpack.i.h.bf16 %v11540_v60 }
 0x286   : > { %v2003_v22 = vsel %vm11538_vm5, %v1992_v4, %v5738_v51  ;;  %vm11539_vm4 = vmmov %vm11535_vm1  ;;  %v2008_v4 = vsel %vm11261_vm7, %v1997_v9, %v5748_v24  ;;  %v6404_v54 = vpack.i.bf16 %v9386_v58, %v9378_v63  ;;  %v2012_v23 = vsel %vm11261_vm7, %v2001_v42, %v5758_v28  ;;  %v11544_v42 = vld [vmem:[#allocation71_spill] sm:$0xff] }
 0x287   : > { %v2004_v27 = vsel %vm11539_vm4, %v1993_v47, %v5742_v50  ;;  %v3151_v47 = vrot.slane %v9378_v63, 1  ;;  %v5767_v16 = vunpack.i.l.bf16 %v11541_v57  ;;  %v3609_v9 = vrot.slane %v9169_v25, 3  ;;  %6400 = vrot.lane.b32.xlu0 %v6399_v33, %s11420_s19 }
 0x288   : > { %v3611_v38 = vrot.slane %v9326_v36, 3  ;;  %v9395_v51 = vsel %vm11261_vm7, %v2002_v32, %v5762_v13  ;;  %v5768_v37 = vunpack.i.h.bf16 %v11541_v57  ;;  %v5772_v50 = vunpack.i.l.bf16 %v11542_v40  ;;  %6405 = vrot.lane.b32.xlu1 %v6404_v54, %s11420_s19 }
 0x289   : > { %v6409_v19 = vpack.i.bf16 %v9401_v39, %v9404_v6  ;;  %v11543_v14 = vrot.slane %v8897_v56, 1  ;;  %v9416_v11 = vsel %vm1214_vm6, %v3149_v34, %v3151_v47  ;;  %v3661_v3 = vrot.slane %v9169_v25, 4  ;;  %v9425_v56 = vld [vmem:[%s7404_s16 + $0x48] sm:$0xff] }
 0x28a   : > { %v11267_v24 = vrot.slane %v9326_v36, 4  ;;  %v2014_v2 = vsel %vm11261_vm7, %v2003_v22, %v5763_v15  ;;  %v5773_v1 = vunpack.i.h.bf16 %v11542_v40  ;;  %v5777_v59 = vunpack.i.l.bf16 %v11544_v42 }
 0x28b   : > { %v9411_v44 = vsel %vm1214_vm6, %v11543_v14, %v3149_v34  ;;  %v6414_v8 = vpack.i.bf16 %v9326_v36, %v9425_v56  ;;  %v2015_v20 = vsel %vm11261_vm7, %v2004_v27, %v5767_v16  ;;  %vm2028_vm2 = vcmask 424960   ;;  %6410 = vrot.lane.b32.xlu0 %v6409_v19, %s11420_s19  ;;  %v11546_v34 = vld [vmem:[#allocation72_spill] sm:$0xff] }
 0x28c   : > { %v11545_v18 = vrot.slane %v8999_v30, 3  ;;  %v3612_v22 = vsel %vm1348_vm14, %v3609_v9, %v3611_v38  ;;  %v3715_v28 = vrot.slane %v9326_v36, 5  ;;  %v2016_v60 = vsel %vm11261_vm7, %v2005_v35, %v5768_v37  ;;  %v9451_v35 = vld [vmem:[%s7619_s25 + $0x18] sm:$0xff] }
 0x28d   : > { %v2018_v13 = vsel %vm11271_vm10, %v2007_v52, %v5772_v50  ;;  %v5778_v33 = vunpack.i.h.bf16 %v11544_v42  ;;  %v6419_v27 = vpack.i.bf16 %v9416_v11, %v9411_v44  ;;  %v5782_v15 = vunpack.i.l.bf16 %v11546_v34  ;;  %6415 = vrot.lane.b32.xlu1 %v6414_v8, %s11420_s19 }
 0x28e   : > { %v3610_v32 = vsel %vm1348_vm14, %v11545_v18, %v3609_v9  ;;  %v11547_v54 = vrot.slane %v8999_v30, 4  ;;  %v3664_v16 = vsel %vm1400_vm15, %v3661_v3, %v11267_v24  ;;  %v11266_v52 = vrot.slane %v9451_v35, 5 }
 0x28f   : > { %v2019_v9 = vsel %vm11271_vm10, %v2008_v4, %v5773_v1  ;;  %v2020_v37 = vsel %vm11271_vm10, %v2009_v48, %v5777_v59  ;;  %v5783_v40 = vunpack.i.h.bf16 %v11546_v34  ;;  %v6424_v50 = vpack.i.bf16 %v3612_v22, %v3610_v32  ;;  %v11549_v4 = vld [vmem:[#allocation73_spill] sm:$0xff]  ;;  %v11550_v59 = vld [vmem:[#allocation74_spill] sm:$0xff]  ;;  %6420 = vrot.lane.b32.xlu0 %v6419_v27, %s11278_s26 }
 0x290   : > { %v3662_v57 = vsel %vm1400_vm15, %v11547_v54, %v3661_v3  ;;  %v11548_v19 = vrot.slane %v8999_v30, 5  ;;  %v3716_v3 = vsel %vm1485_vm3, %v9172_v7, %v3715_v28  ;;  %v3802_v42 = vrot.slane %v9326_v36, 6 }
 0x291   : > { %v11265_v18 = vrot.slane %v9451_v35, 6  ;;  %v5788_v1 = vunpack.i.h.bf16 %v11549_v4  ;;  %v5787_v48 = vunpack.i.l.bf16 %v11549_v4  ;;  %v5792_v34 = vunpack.i.l.bf16 %v11550_v59  ;;  %6425 = vrot.lane.b32.xlu1 %v6424_v50, %s11269_s28 }
 0x292   : > { %v3714_v14 = vsel %vm1485_vm3, %v11548_v19, %v9172_v7  ;;  %vm2039_vm5 = vcmask 457728   ;;  %v6429_v30 = vpack.i.bf16 %v3664_v16, %v3662_v57  ;;  %v9471_v8 = vsel %vm11271_vm10, %v2010_v61, %v5778_v33  ;;  %v11551_v57 = vld [vmem:[#allocation75_spill] sm:$0xff] }
 0x293   : > { %v9474_v7 = vsel %vm11271_vm10, %v2011_v55, %v5782_v15  ;;  %vm11325_vm4 = vcmask 490496   ;;  %v9479_v32 = vsel %vm1485_vm3, %v3715_v28, %v11266_v52  ;;  %v3858_v22 = vrot.slane %v9451_v35, 7  ;;  %v9496_v15 = vld [vmem:[%s7619_s25 + $0x20] sm:$0xff] }
 0x294   : > { %v9483_v54 = vsel %vm11271_vm10, %v2012_v23, %v5783_v40  ;;  %v5793_v27 = vunpack.i.h.bf16 %v11550_v59  ;;  %v5797_v16 = vunpack.i.l.bf16 %v11551_v57  ;;  %v6434_v61 = vpack.i.bf16 %v3716_v3, %v3714_v14  ;;  %6430 = vrot.lane.b32.xlu0 %v6429_v30, %s11491_s18  ;;  %v11555_v59 = vld [vmem:[#allocation80_spill] sm:$0xff] }
 0x295   : > { %v5798_v55 = vunpack.i.h.bf16 %v11551_v57  ;;  %v3803_v33 = vsel %vm1537_vm8, %v3801_v12, %v3802_v42  ;;  %v3805_v28 = vsel %vm1537_vm8, %v3802_v42, %v11265_v18  ;;  %v11264_v23 = vrot.slane %v9496_v15, 7 }
 0x296   : > { %v9501_v40 = vsel %vm11271_vm10, %v9395_v51, %v5787_v48  ;;  %v9504_v50 = vsel %vm11271_vm10, %v2014_v2, %v5788_v1  ;;  %v9507_v19 = vsel %vm11271_vm10, %v2015_v20, %v5792_v34  ;;  %v6439_v12 = vpack.i.bf16 %v9479_v32, %v3716_v3  ;;  %v11554_v1 = vld [vmem:[#allocation76_spill] sm:$0xff]  ;;  %6435 = vrot.lane.b32.xlu1 %v6434_v61, %s11498_s23  ;;  %v11557_v34 = vld [vmem:[#allocation85_spill] sm:$0xff] }
 0x297   : > { %vm11552_vm1 = vcmask 1040384   ;;  %v3153_v51 = vrot.slane %v9386_v58, 1  ;;  %v11262_v2 = vrot.slane %v9404_v6, 1  ;;  %v9520_v4 = vsel %vm11271_vm10, %v2016_v60, %v5793_v27 }
 0x298   : > { %v3857_v14 = vsel %vm11552_vm1, %v3855_v45, %v9329_v49  ;;  %vm11553_vm7 = vmmov %vm11552_vm1  ;;  %v2029_v20 = vsel %vm2028_vm2, %v2018_v13, %v5797_v16  ;;  %v5802_v48 = vunpack.i.l.bf16 %v11554_v1  ;;  %v6444_v3 = vpack.i.bf16 %v3805_v28, %v3803_v33  ;;  %6440 = vrot.lane.b32.xlu0 %v6439_v12, %s11390_s27  ;;  %v11558_v12 = vld [vmem:[#allocation81_spill] sm:$0xff] }
 0x299   : > { %v3859_v42 = vsel %vm11553_vm7, %v9329_v49, %v3858_v22  ;;  %v2030_v25 = vsel %vm2028_vm2, %v2019_v9, %v5798_v55  ;;  %v5822_v49 = vunpack.i.l.bf16 %v11555_v59  ;;  %vm11556_vm7 = vmmov %vm11552_vm1  ;;  %v5823_v60 = vunpack.i.h.bf16 %v11555_v59 }
 0x29a   : > { %v9531_v58 = vsel %vm11556_vm7, %v3858_v22, %v11264_v23  ;;  %v5848_v13 = vunpack.i.h.bf16 %v11557_v34  ;;  %v5847_v30 = vunpack.i.l.bf16 %v11557_v34  ;;  %v6449_v27 = vpack.i.bf16 %v3859_v42, %v3857_v14  ;;  %6445 = vrot.lane.b32.xlu1 %v6444_v3, %s11397_s22 }
 0x29b   : > { %v9540_v9 = vsel %vm1214_vm6, %v3151_v47, %v3153_v51  ;;  %v9545_v57 = vsel %vm1214_vm6, %v3153_v51, %v11262_v2  ;;  %v3613_v22 = vrot.slane %v9451_v35, 3  ;;  %v11263_v16 = vrot.slane %v9496_v15, 3 }
 0x29c   : > { %v2031_v61 = vsel %vm2028_vm2, %v2020_v37, %v5802_v48  ;;  %v6454_v55 = vpack.i.bf16 %v9531_v58, %v3859_v42  ;;  %v3978_v47 = vrot.slane %v9326_v36, 1  ;;  %v3979_v33 = vrot.slane %v9451_v35, 1  ;;  %6450 = vrot.lane.b32.xlu0 %v6449_v27, %s11406_s24  ;;  %v9564_v48 = vld [vmem:[%s7619_s25 + $0x28] sm:$0xff]  ;;  %v6171_v27 = vpop.permute.xlu0 %6170 }
 0x29d   : > { %v2040_v28 = vsel %vm2039_vm5, %v2029_v20, %v5822_v49  ;;  %v5828_v14 = vunpack.i.h.bf16 %v11558_v12  ;;  %v5827_v51 = vunpack.i.l.bf16 %v11558_v12  ;;  %v3981_v59 = vrot.slane %v9496_v15, 1  ;;  %v6176_v18 = vpop.permute.xlu1 %6175 }
 0x29e   : > { %v2041_v34 = vsel %vm2039_vm5, %v2030_v25, %v5823_v60  ;;  %v2051_v37 = vsel %vm11325_vm4, %v2040_v28, %v5847_v30  ;;  %v6459_v42 = vpack.i.bf16 %v9545_v57, %v9540_v9  ;;  %v3983_v3 = vrot.slane %v9564_v48, 1  ;;  %v9575_v60 = vld [vmem:[%s7619_s25 + $0x30] sm:$0xff]  ;;  %6455 = vrot.lane.b32.xlu1 %v6454_v55, %s11524_s21 }
 0x29f   : > { %v2052_v20 = vsel %vm11325_vm4, %v2041_v34, %v5848_v13  ;;  %v3614_v49 = vsel %vm1348_vm14, %v3611_v38, %v3613_v22  ;;  %v3616_v25 = vsel %vm1348_vm14, %v3613_v22, %v11263_v16  ;;  %v11268_v30 = vrot.slane %v9575_v60, 1  ;;  %v11559_v16 = vld [vmem:[#allocation86_spill] sm:$0xff] }
 0x2a0   : > { %vm11324_vm1 = vcmask 523264   ;;  %v6464_v28 = vpack.i.bf16 %v9496_v15, %v9451_v35  ;;  %v3980_v13 = vsel %vm1214_vm6, %v3978_v47, %v3979_v33  ;;  %v3665_v12 = vrot.slane %v9451_v35, 4  ;;  %6460 = vrot.lane.b32.xlu0 %v6459_v42, %s11278_s26  ;;  %v9595_v24 = vpop.permute.xlu0 %6180 }
 0x2a1   : > { %v6173_v38 = vunpack.i.h.bf16 %v6171_v27  ;;  %v6172_v34 = vunpack.i.l.bf16 %v6171_v27  ;;  %v3982_v2 = vsel %vm1214_vm6, %v3979_v33, %v3981_v59  ;;  %v5853_v23 = vunpack.i.h.bf16 %v11559_v16 }
 0x2a2   : > { %v6469_v52 = vpack.i.bf16 %v3616_v25, %v3614_v49  ;;  %vm11322_vm7 = vcmask 883712   ;;  %v3984_v55 = vsel %vm1214_vm6, %v3981_v59, %v3983_v3  ;;  %v3986_v27 = vsel %vm1214_vm6, %v3983_v3, %v11268_v30  ;;  %6465 = vrot.lane.b32.xlu1 %v6464_v28, %s11420_s19  ;;  %v11563_v28 = vld [vmem:[#allocation77_spill] sm:$0xff] }
 0x2a3   : > { %v2708_v45 = vsel %vm11324_vm1, %v2051_v37, %v6172_v34  ;;  %v2709_v47 = vsel %vm11324_vm1, %v2052_v20, %v6173_v38  ;;  %v3719_v33 = vrot.slane %v9496_v15, 5  ;;  %v5852_v22 = vunpack.i.l.bf16 %v11559_v16 }
 0x2a4   : > { %v2718_v42 = vpack.c.bf16 %v2709_v47, %v2708_v45  ;;  %v6474_v49 = vpack.i.bf16 %v3982_v2, %v3980_v13  ;;  %v11560_v59 = vrot.slane %v9326_v36, 4  ;;  %v6178_v25 = vunpack.i.h.bf16 %v6176_v18  ;;  %6470 = vrot.lane.b32.xlu0 %v6469_v52, %s11269_s28  ;;  %v9613_v36 = vpop.permute.xlu1 %6185  ;;  %s11566_s28 = smov 40  }
 0x2a5   : > { %v6177_v20 = vunpack.i.l.bf16 %v6176_v18  ;;  %v11561_v38 = vrot.slane %v9496_v15, 4  ;;  %v11274_v34 = vrot.slane %v9564_v48, 5  ;;  %v11562_v16 = vunpack.i.h.bf16 %v11554_v1 }
 0x2a6   : > { %v3666_v37 = vsel %vm1400_vm15, %v11560_v59, %v3665_v12  ;;  %v5807_v45 = vunpack.i.l.bf16 %v11563_v28  ;;  %v2042_v2 = vsel %vm2039_vm5, %v2031_v61, %v5827_v51  ;;  %5372 = vmatmul.mubr.msk.bf16.vlgmr.msra.gmra.mrb[0].mxu0 %vm11322_vm7, %v2718_v42  ;;  %v6479_v18 = vpack.i.bf16 %v3986_v27, %v3984_v55  ;;  %v9626_v55 = vpop.permute.xlu0 %6190  ;;  %6475 = vrot.lane.b32.xlu1 %v6474_v49, %s11566_s28 }
 0x2a7   : > { %v3668_v3 = vsel %vm1400_vm15, %v3665_v12, %v11561_v38  ;;  %v2032_v30 = vsel %vm2028_vm2, %v9471_v8, %v11562_v16  ;;  %v11564_v12 = vmov 0.0   ;;  %v11565_v1 = vrot.slane %v9451_v35, 5 }
 0x2a8   : > { %v2043_v13 = vsel %vm2039_vm5, %v2032_v30, %v5828_v14  ;;  %5375 = vmatprep.mubr.msk.bf16.mxu0 %vm11288_vm9, %v11564_v12  ;;  %v3806_v47 = vrot.slane %v9496_v15, 6  ;;  %v11273_v61 = vrot.slane %v9564_v48, 6  ;;  %v5808_v52 = vunpack.i.h.bf16 %v11563_v28  ;;  %6480 = vrot.lane.b32.xlu0 %v6479_v18, %s11566_s28  ;;  %v9642_v49 = vpop.permute.xlu1 %6195 }
 0x2a9   : > { %v3720_v8 = vsel %vm1485_vm3, %v11565_v1, %v3719_v33  ;;  %v2053_v51 = vsel %vm11325_vm4, %v2042_v2, %v5852_v22  ;;  %v2054_v42 = vsel %vm11325_vm4, %v2043_v13, %v5853_v23  ;;  %v6484_v14 = vpack.i.bf16 %v3668_v3, %v3666_v37  ;;  %v11567_v23 = vld [vmem:[#allocation82_spill] sm:$0xff] }
 0x2aa   : > { %v2710_v30 = vsel %vm11324_vm1, %v2053_v51, %v6177_v20  ;;  %v2711_v27 = vsel %vm11324_vm1, %v2054_v42, %v6178_v25  ;;  %v9634_v59 = vsel %vm1485_vm3, %v3719_v33, %v11274_v34  ;;  %v3862_v38 = vrot.slane %v9564_v48, 7  ;;  %v11568_v25 = vld [vmem:[#allocation87_spill] sm:$0xff]  ;;  %v9654_v13 = vpop.permute.xlu0 %6200 }
 0x2ab   : > { %v2033_v22 = vsel %vm2028_vm2, %v9474_v7, %v5807_v45  ;;  %v5833_v16 = vunpack.i.h.bf16 %v11567_v23  ;;  %v5832_v28 = vunpack.i.l.bf16 %v11567_v23  ;;  %v6489_v37 = vpack.i.bf16 %v3720_v8, %v9479_v32  ;;  %11570 = vst [vmem:[#allocation12_spill] sm:$0xff] %v9654_v13  ;;  %6485 = vrot.lane.b32.xlu1 %v6484_v14, %s11491_s18  ;;  %v11573_v14 = vld [vmem:[#allocation78_spill] sm:$0xff] }
 0x2ac   : > { %v5857_v20 = vunpack.i.l.bf16 %v11568_v25  ;;  %v11569_v33 = vrot.slane %v9451_v35, 6  ;;  %v3809_v7 = vsel %vm1537_vm8, %v3806_v47, %v11273_v61  ;;  %v11272_v45 = vrot.slane %v9575_v60, 7 }
 0x2ad   : > { %v5858_v2 = vunpack.i.h.bf16 %v11568_v25  ;;  %v2719_v18 = vpack.c.bf16 %v2711_v27, %v2710_v30  ;;  %v6494_v32 = vpack.i.bf16 %v9634_v59, %v3720_v8  ;;  %v3157_v1 = vrot.slane %v9401_v39, 1  ;;  %6490 = vrot.lane.b32.xlu0 %v6489_v37, %s11498_s23  ;;  %v9673_v39 = vpop.permute.xlu1 %6205 }
 0x2ae   : > { %v3807_v3 = vsel %vm1537_vm8, %v11569_v33, %v3806_v47  ;;  %v6183_v35 = vunpack.i.h.bf16 %v9595_v24  ;;  %v6182_v51 = vunpack.i.l.bf16 %v9595_v24  ;;  %v11571_v42 = vrot.slane %v9496_v15, 7  ;;  %11574 = vst [vmem:[#allocation15_spill] sm:$0xff] %v9673_v39 }
 0x2af   : > { %vm11572_vm10 = vcmask 1040384   ;;  %v9665_v23 = vrot.slane %v9425_v56, 1  ;;  %v2034_v25 = vsel %vm2028_vm2, %v9483_v54, %v5808_v52  ;;  %v5812_v30 = vunpack.i.l.bf16 %v11573_v14  ;;  %5376 = vmatmul.mubr.msk.bf16.gmra.mrb[4].mxu0 %vm11322_vm7, %v2719_v18  ;;  %6495 = vrot.lane.b32.xlu1 %v6494_v32, %s11390_s27 }
 0x2b0   : > { %v3863_v47 = vsel %vm11572_vm10, %v11571_v42, %v3862_v38  ;;  %v2044_v8 = vsel %vm2039_vm5, %v2033_v22, %v5832_v28  ;;  %v6499_v24 = vpack.i.bf16 %v3809_v7, %v3807_v3  ;;  %v5813_v27 = vunpack.i.h.bf16 %v11573_v14  ;;  %5379 = vmatprep.mubr.msk.bf16.mxu0 %vm11288_vm9, %v11564_v12  ;;  %v9686_v22 = vpop.permute.xlu0 %6210  ;;  %v9714_v14 = vld [vmem:[%s7619_s25 + $0x38] sm:$0xff] }
 0x2b1   : > { %v2045_v33 = vsel %vm2039_vm5, %v2034_v25, %v5833_v16  ;;  %v2055_v56 = vsel %vm11325_vm4, %v2044_v8, %v5857_v20  ;;  %v9683_v54 = vsel %vm11572_vm10, %v3862_v38, %v11272_v45  ;;  %11575 = vst [vmem:[#allocation16_spill] sm:$0xff] %v9686_v22  ;;  %v6504_v28 = vpack.i.bf16 %v3863_v47, %v9531_v58  ;;  %v9708_v42 = vpop.permute.xlu1 %6215 }
 0x2b2   : > { %v2056_v52 = vsel %vm11325_vm4, %v2045_v33, %v5858_v2  ;;  %v11576_v16 = vrot.slane %v9404_v6, 1  ;;  %v3617_v20 = vrot.slane %v9564_v48, 3  ;;  %v2712_v38 = vsel %vm11324_vm1, %v2055_v56, %v6182_v51  ;;  %v11577_v6 = vld [vmem:[#allocation83_spill] sm:$0xff]  ;;  %6500 = vrot.lane.b32.xlu0 %v6499_v24, %s11397_s22  ;;  %11578 = vst [vmem:[#allocation17_spill] sm:$0xff] %v9708_v42  ;;  %v9718_v33 = vld [vmem:[%s7619_s25 + $0x40] sm:$0xff] }
 0x2b3   : > { %v2713_v3 = vsel %vm11324_vm1, %v2056_v52, %v6183_v35  ;;  %v9700_v7 = vsel %vm1214_vm6, %v3157_v1, %v9665_v23  ;;  %v11275_v2 = vrot.slane %v9575_v60, 3  ;;  %v2035_v58 = vsel %vm2028_vm2, %v9501_v40, %v5812_v30  ;;  %v11579_v35 = vld [vmem:[#allocation89_spill] sm:$0xff]  ;;  %6505 = vrot.lane.b32.xlu1 %v6504_v28, %s11406_s24 }
 0x2b4   : > { %v9693_v37 = vsel %vm1214_vm6, %v11576_v16, %v3157_v1  ;;  %v5838_v18 = vunpack.i.h.bf16 %v11577_v6  ;;  %v5837_v32 = vunpack.i.l.bf16 %v11577_v6  ;;  %v6509_v51 = vpack.i.bf16 %v9683_v54, %v3863_v47  ;;  %v9721_v30 = vpop.permute.xlu0 %6220 }
 0x2b5   : > { %v5863_v25 = vunpack.i.h.bf16 %v11579_v35  ;;  %v5862_v1 = vunpack.i.l.bf16 %v11579_v35  ;;  %v3987_v8 = vrot.slane %v9714_v14, 1  ;;  %v11277_v40 = vrot.slane %v9718_v33, 1 }
 0x2b6   : > { %v2720_v24 = vpack.c.bf16 %v2713_v3, %v2712_v38  ;;  %v6514_v47 = vpack.i.bf16 %v9700_v7, %v9693_v37  ;;  %v11580_v56 = vrot.slane %v9496_v15, 3  ;;  %v3669_v16 = vrot.slane %v9564_v48, 4  ;;  %v11581_v3 = vld [vmem:[#allocation79_spill] sm:$0xff]  ;;  %6510 = vrot.lane.b32.xlu0 %v6509_v51, %s11524_s21 }
 0x2b7   : > { %v6188_v6 = vunpack.i.h.bf16 %v9613_v36  ;;  %v6187_v35 = vunpack.i.l.bf16 %v9613_v36  ;;  %v3620_v45 = vsel %vm1348_vm14, %v3617_v20, %v11275_v2  ;;  %v2036_v38 = vsel %vm2028_vm2, %v9504_v50, %v5813_v27 }
 0x2b8   : > { %v3618_v52 = vsel %vm1348_vm14, %v11580_v56, %v3617_v20  ;;  %v5817_v61 = vunpack.i.l.bf16 %v11581_v3  ;;  %v2046_v34 = vsel %vm2039_vm5, %v2035_v58, %v5837_v32  ;;  %5380 = vmatmul.mubr.msk.bf16.gmra.mrb[8].mxu0 %vm11322_vm7, %v2720_v24  ;;  %v9742_v56 = vpop.permute.xlu1 %6225  ;;  %v6519_v36 = vpack.i.bf16 %v9575_v60, %v9564_v48  ;;  %v9758_v2 = vpop.permute.xlu0 %6230  ;;  %6515 = vrot.lane.b32.xlu1 %v6514_v47, %s11278_s26  ;;  %s11592_s26 = smov 8  }
 0x2b9   : > { %11582 = vst [vmem:[#allocation13_spill] sm:$0xff] %v9742_v56  ;;  %v2047_v20 = vsel %vm2039_vm5, %v2036_v38, %v5838_v18  ;;  %5383 = vmatprep.mubr.msk.bf16.mxu0 %vm11288_vm9, %v11564_v12  ;;  %v11583_v50 = vrot.slane %v9575_v60, 1  ;;  %v3990_v58 = vsel %vm1214_vm6, %v3987_v8, %v11277_v40  ;;  %v3723_v32 = vrot.slane %v9575_v60, 5  ;;  %11584 = vst [vmem:[#allocation19_spill] sm:$0xff] %v9758_v2 }
 0x2ba   : > { %v2057_v51 = vsel %vm11325_vm4, %v2046_v34, %v5862_v1  ;;  %v2058_v24 = vsel %vm11325_vm4, %v2047_v20, %v5863_v25  ;;  %v6524_v18 = vpack.i.bf16 %v3620_v45, %v3618_v52  ;;  %v11585_v38 = vrot.slane %v9496_v15, 4  ;;  %v11587_v1 = vld [vmem:[#allocation84_spill] sm:$0xff]  ;;  %6520 = vrot.lane.b32.xlu0 %v6519_v36, %s11420_s19  ;;  %v11589_v52 = vld [vmem:[#allocation90_spill] sm:$0xff] }
 0x2bb   : > { %v3988_v27 = vsel %vm1214_vm6, %v11583_v50, %v3987_v8  ;;  %v2714_v50 = vsel %vm11324_vm1, %v2057_v51, %v6187_v35  ;;  %v2715_v22 = vsel %vm11324_vm1, %v2058_v24, %v6188_v6  ;;  %v11586_v8 = vrot.slane %v9575_v60, 4 }
 0x2bc   : > { %v3670_v28 = vsel %vm1400_vm15, %v11585_v38, %v3669_v16  ;;  %v11283_v34 = vrot.slane %v9714_v14, 5  ;;  %v5818_v25 = vunpack.i.h.bf16 %v11581_v3  ;;  %v5843_v20 = vunpack.i.h.bf16 %v11587_v1  ;;  %v9774_v15 = vpop.permute.xlu1 %6235  ;;  %v9783_v38 = vpop.permute.xlu0 %6240  ;;  %6525 = vrot.lane.b32.xlu1 %v6524_v18, %s11592_s26 }
 0x2bd   : > { %v3672_v40 = vsel %vm1400_vm15, %v3669_v16, %v11586_v8  ;;  %v5842_v45 = vunpack.i.l.bf16 %v11587_v1  ;;  %11588 = vst [vmem:[#allocation20_spill] sm:$0xff] %v9774_v15  ;;  %v6529_v47 = vpack.i.bf16 %v3990_v58, %v3988_v27  ;;  %v5868_v35 = vunpack.i.h.bf16 %v11589_v52  ;;  %11591 = vst [vmem:[#allocation14_spill] sm:$0xff] %v9783_v38 }
 0x2be   : > { %v11590_v6 = vrot.slane %v9564_v48, 5  ;;  %v3810_v16 = vrot.slane %v9575_v60, 6  ;;  %v5867_v3 = vunpack.i.l.bf16 %v11589_v52  ;;  %v2721_v36 = vpack.c.bf16 %v2715_v22, %v2714_v50 }
 0x2bf   : > { %v6534_v8 = vpack.i.bf16 %v3672_v40, %v3670_v28  ;;  %v3866_v27 = vrot.slane %v9714_v14, 7  ;;  %v2037_v58 = vsel %vm2028_vm2, %v9507_v19, %v5817_v61  ;;  %v6193_v1 = vunpack.i.h.bf16 %v9626_v55  ;;  %6530 = vrot.lane.b32.xlu0 %v6529_v47, %s11566_s28 }
 0x2c0   : > { %v3724_v51 = vsel %vm1485_vm3, %v11590_v6, %v3723_v32  ;;  %v6192_v6 = vunpack.i.l.bf16 %v9626_v55  ;;  %v9794_v24 = vsel %vm1485_vm3, %v3723_v32, %v11283_v34  ;;  %v2038_v52 = vsel %vm2028_vm2, %v9520_v4, %v5818_v25  ;;  %5384 = vmatmul.mubr.msk.bf16.gmra.mrb[12].mxu0 %vm11322_vm7, %v2721_v36  ;;  %v9801_v19 = vpop.permute.xlu1 %6245  ;;  %v9816_v25 = vpop.permute.xlu0 %6250  ;;  %v9826_v36 = vld [vmem:[%s7404_s16 + $0x50] sm:$0xff] }
 0x2c1   : > { %v2048_v22 = vsel %vm2039_vm5, %v2037_v58, %v5842_v45  ;;  %v6539_v61 = vpack.i.bf16 %v3724_v51, %v9634_v59  ;;  %v2049_v55 = vsel %vm2039_vm5, %v2038_v52, %v5843_v20  ;;  %5387 = vmatprep.mubr.msk.bf16.mxu0 %vm11288_vm9, %v11564_v12  ;;  %v11593_v40 = vrot.slane %v9564_v48, 6  ;;  %11595 = vst [vmem:[#allocation21_spill] sm:$0xff] %v9816_v25  ;;  %v9830_v58 = vld [vmem:[%s7404_s16 + $0x58] sm:$0xff]  ;;  %vm11612_vm9 = vmmov %vm11572_vm10 }
 0x2c2   : > { %v11594_v28 = vrot.slane %v9714_v14, 6  ;;  %v11282_v18 = vrot.slane %v9718_v33, 7  ;;  %v2059_v50 = vsel %vm11325_vm4, %v2048_v22, %v5867_v3  ;;  %v2060_v59 = vsel %vm11325_vm4, %v2049_v55, %v5868_v35  ;;  %6535 = vrot.lane.b32.xlu1 %v6534_v8, %s11491_s18 }
 0x2c3   : > { %v3811_v4 = vsel %vm1537_vm8, %v11593_v40, %v3810_v16  ;;  %v6544_v20 = vpack.i.bf16 %v9794_v24, %v3724_v51  ;;  %v11596_v48 = vrot.slane %v9575_v60, 7  ;;  %v2716_v47 = vsel %vm11324_vm1, %v2059_v50, %v6192_v6  ;;  %6540 = vrot.lane.b32.xlu0 %v6539_v61, %s11498_s23  ;;  %v9862_v50 = vld [vmem:[%s7619_s25 + $0x50] sm:$0xff] }
 0x2c4   : > { %v3813_v32 = vsel %vm1537_vm8, %v3810_v16, %v11594_v28  ;;  %v2717_v16 = vsel %vm11324_vm1, %v2060_v59, %v6193_v1  ;;  %v3559_v3 = vrot.slane %v9826_v36, 1  ;;  %v11281_v35 = vrot.slane %v9830_v58, 1  ;;  %v9834_v51 = vpop.permute.xlu1 %6255  ;;  %v9841_v1 = vpop.permute.xlu0 %6260 }
 0x2c5   : > { %v3867_v45 = vsel %vm11572_vm10, %v11596_v48, %v3866_v27  ;;  %11597 = vst [vmem:[#allocation8_spill] sm:$0xff] %v9834_v51  ;;  %v6549_v8 = vpack.i.bf16 %v3813_v32, %v3811_v4  ;;  %v9839_v6 = vsel %vm11572_vm10, %v3866_v27, %v11282_v18  ;;  %11598 = vst [vmem:[#allocation22_spill] sm:$0xff] %v9841_v1  ;;  %v3621_v40 = vrot.slane %v9714_v14, 3 }
 0x2c6   : > { %6545 = vrot.lane.b32.xlu1 %v6544_v20, %s11390_s27  ;;  %v2722_v52 = vpack.c.bf16 %v2717_v16, %v2716_v47  ;;  %v6554_v22 = vpack.i.bf16 %v3867_v45, %v9683_v54  ;;  %v3560_v61 = vsel %vm1214_vm6, %v9665_v23, %v3559_v3  ;;  %v3562_v55 = vsel %vm1214_vm6, %v3559_v3, %v11281_v35  ;;  %v9858_v54 = vld [vmem:[%s7619_s25 + $0x48] sm:$0xff] }
 0x2c7   : > { %v11280_v4 = vrot.slane %v9718_v33, 3  ;;  %6550 = vrot.lane.b32.xlu0 %v6549_v8, %s11397_s22  ;;  %v6559_v28 = vpack.i.bf16 %v9839_v6, %v3867_v45  ;;  %v3991_v32 = vrot.slane %v9858_v54, 1  ;;  %v11284_v59 = vrot.slane %v9862_v50, 1 }
 0x2c8   : > { %5388 = vmatmul.mubr.msk.bf16.gmra.mrb[16].mxu0 %vm11322_vm7, %v2722_v52  ;;  %v9854_v27 = vpop.permute.xlu1 %6265  ;;  %v9865_v20 = vpop.permute.xlu0 %6270  ;;  %v6564_v48 = vpack.i.bf16 %v3562_v55, %v3560_v61  ;;  %v11600_v47 = vrot.slane %v9575_v60, 3  ;;  %v3673_v3 = vrot.slane %v9714_v14, 4  ;;  %v11286_v8 = vrot.slane %v9718_v33, 4 }
 0x2c9   : > { %11599 = vst [vmem:[#allocation6_spill] sm:$0xff] %v9854_v27  ;;  %v3624_v45 = vsel %vm1348_vm14, %v3621_v40, %v11280_v4  ;;  %v11602_v61 = vrot.slane %v9718_v33, 1  ;;  %v11605_v35 = vrot.slane %v9575_v60, 4  ;;  %v11607_v1 = vrot.slane %v9714_v14, 5 }
 0x2ca   : > { %6555 = vrot.lane.b32.xlu1 %v6554_v22, %s11406_s24  ;;  %v3622_v16 = vsel %vm1348_vm14, %v11600_v47, %v3621_v40  ;;  %v6569_v22 = vpack.i.bf16 %v9718_v33, %v9714_v14  ;;  %v3994_v47 = vsel %vm1214_vm6, %v3991_v32, %v11284_v59  ;;  %v3727_v40 = vrot.slane %v9718_v33, 5 }
 0x2cb   : > { %6560 = vrot.lane.b32.xlu0 %v6559_v28, %s11524_s21  ;;  %v3992_v55 = vsel %vm1214_vm6, %v11602_v61, %v3991_v32  ;;  %v6574_v28 = vpack.i.bf16 %v3624_v45, %v3622_v16  ;;  %v3674_v18 = vsel %vm1400_vm15, %v11605_v35, %v3673_v3  ;;  %v3676_v34 = vsel %vm1400_vm15, %v3673_v3, %v11286_v8 }
 0x2cc   : > { %v9877_v52 = vpop.permute.xlu1 %6275  ;;  %v9888_v4 = vpop.permute.xlu0 %6280  ;;  %v9898_v61 = vrot.slane %v9858_v54, 5  ;;  %v6579_v59 = vpack.i.bf16 %v3994_v47, %v3992_v55  ;;  %v3814_v60 = vrot.slane %v9718_v33, 6  ;;  %v11287_v35 = vrot.slane %v9858_v54, 6 }
 0x2cd   : > { %11601 = vst [vmem:[#allocation5_spill] sm:$0xff] %v9877_v52  ;;  %11603 = vst [vmem:[#allocation23_spill] sm:$0xff] %v9888_v4  ;;  %v6584_v45 = vpack.i.bf16 %v3676_v34, %v3674_v18  ;;  %v11608_v47 = vrot.slane %v9714_v14, 6  ;;  %v3872_v18 = vrot.slane %v9862_v50, 7  ;;  %v9935_v14 = vld [vmem:[%s7404_s16 + $0x60] sm:$0xf]  ;;  %v6619_v2 = vpack.i.bf16 %v9862_v50, %v9858_v54 }
 0x2ce   : > { %6565 = vrot.lane.b32.xlu1 %v6564_v48, %s11604_s0  ;;  %v3728_v48 = vsel %vm1485_vm3, %v11607_v1, %v3727_v40  ;;  %v9913_v3 = vsel %vm1485_vm3, %v3727_v40, %v9898_v61  ;;  %v3817_v34 = vsel %vm1537_vm8, %v3814_v60, %v11287_v35  ;;  %v3625_v4 = vrot.slane %v9858_v54, 3 }
 0x2cf   : > { %6570 = vrot.lane.b32.xlu0 %v6569_v22, %s11420_s19  ;;  %v3870_v22 = vrot.slane %v9858_v54, 7  ;;  %v6589_v1 = vpack.i.bf16 %v3728_v48, %v9794_v24  ;;  %v3815_v8 = vsel %vm1537_vm8, %v11608_v47, %v3814_v60  ;;  %v3563_v47 = vrot.slane %v9935_v14, 1 }
 0x2d0   : > { %v9901_v32 = vpop.permute.xlu1 %6285  ;;  %v9908_v16 = vpop.permute.xlu0 %6290  ;;  %v6599_v35 = vpack.i.bf16 %v3817_v34, %v3815_v8  ;;  %v3677_v51 = vrot.slane %v9858_v54, 4  ;;  %v3818_v25 = vrot.slane %v9862_v50, 6 }
 0x2d1   : > { %11606 = vst [vmem:[#allocation7_spill] sm:$0xff] %v9901_v32  ;;  %v9942_v32 = vsel %vm11612_vm9, %v3870_v22, %v3872_v18 }
 0x2d2   : > { %6575 = vrot.lane.b32.xlu1 %v6574_v28, %s11592_s26  ;;  %v11610_v28 = vrot.slane %v9718_v33, 7 }
 0x2d3   : > { %6580 = vrot.lane.b32.xlu0 %v6579_v59, %s11566_s28  ;;  %v6594_v59 = vpack.i.bf16 %v9913_v3, %v3728_v48 }
 0x2d4   : > { %v9917_v55 = vpop.permute.xlu1 %6295  ;;  %v9927_v40 = vpop.permute.xlu0 %6300  ;;  %v3871_v24 = vsel %vm11572_vm10, %v11610_v28, %v3870_v22  ;;  %v11614_v28 = vrot.slane %v9830_v58, 1  ;;  %v9957_v22 = vld [vmem:[%s7619_s25 + $0x58] sm:$0xff]  ;;  %vm11625_vm10 = vmmov %vm11612_vm9 }
 0x2d5   : > { %11609 = vst [vmem:[#allocation9_spill] sm:$0xff] %v9927_v40  ;;  %v6604_v48 = vpack.i.bf16 %v3871_v24, %v9839_v6  ;;  %v6609_v8 = vpack.i.bf16 %v9942_v32, %v3871_v24  ;;  %v3995_v34 = vrot.slane %v9957_v22, 1  ;;  %v11617_v6 = vrot.slane %v9862_v50, 1 }
 0x2d6   : > { %6585 = vrot.lane.b32.xlu1 %v6584_v45, %s11491_s18  ;;  %v3564_v15 = vsel %vm1214_vm6, %v11614_v28, %v3563_v47  ;;  %v3765_v40 = vrot.slane %v9862_v50, 5  ;;  %v11622_v50 = vrot.slane %v9858_v54, 6 }
 0x2d7   : > { %6590 = vrot.lane.b32.xlu0 %v6589_v1, %s11498_s23  ;;  %v6614_v28 = vpack.i.bf16 %v3563_v47, %v3564_v15  ;;  %v3996_v39 = vsel %vm1214_vm6, %v11617_v6, %v3995_v34 }
 0x2d8   : > { %v9939_v60 = vpop.permute.xlu1 %6305  ;;  %v9944_v45 = vpop.permute.xlu0 %6310 }
 0x2d9   : > { %11611 = vst [vmem:[#allocation24_spill] sm:$0xff] %v9939_v60  ;;  %11613 = vst [vmem:[#allocation10_spill] sm:$0xff] %v9944_v45  ;;  %v9961_v45 = vld [vmem:[%s7619_s25 + $0x60] sm:$0xf]  ;;  %v11615_v60 = vrot.slane %v9718_v33, 3  ;;  %s11644_s25 = smov 60  }
 0x2da   : > { %6595 = vrot.lane.b32.xlu1 %v6594_v59, %s11390_s27 }
 0x2db   : > { %6600 = vrot.lane.b32.xlu0 %v6599_v35, %s11397_s22  ;;  %v3626_v35 = vsel %vm1348_vm14, %v11615_v60, %v3625_v4 }
 0x2dc   : > { %v9953_v1 = vpop.permute.xlu1 %6315  ;;  %v9964_v59 = vpop.permute.xlu0 %6320  ;;  %v6624_v60 = vpack.i.bf16 %v3625_v4, %v3626_v35  ;;  %v3819_v35 = vsel %vm1537_vm8, %v11622_v50, %v3818_v25 }
 0x2de   : > { %6605 = vrot.lane.b32.xlu1 %v6604_v48, %s11406_s24  ;;  %v11618_v48 = vrot.slane %v9961_v45, 1 }
 0x2df   : > { %6610 = vrot.lane.b32.xlu0 %v6609_v8, %s11524_s21  ;;  %v11620_v8 = vrot.slane %v9718_v33, 4  ;;  %v3766_v33 = vsel %vm1485_vm3, %v9898_v61, %v3765_v40 }
 0x2e0   : > { %v9972_v24 = vpop.permute.xlu1 %6325  ;;  %v3998_v15 = vsel %vm1214_vm6, %v3995_v34, %v11618_v48  ;;  %v9982_v47 = vpop.permute.xlu0 %6330  ;;  %v3820_v34 = vrot.slane %v9957_v22, 6 }
 0x2e1   : > { %11616 = vst [vmem:[#allocation44_spill] sm:$0xff] %v9972_v24  ;;  %11619 = vst [vmem:[#allocation25_spill] sm:$0xff] %v9982_v47  ;;  %v3678_v24 = vsel %vm1400_vm15, %v11620_v8, %v3677_v51  ;;  %v6629_v6 = vpack.i.bf16 %v3998_v15, %v3996_v39  ;;  %v6639_v39 = vpack.i.bf16 %v9898_v61, %v9913_v3 }
 0x2e2   : > { %6615 = vrot.lane.b32.xlu1 %v6614_v28, %s11604_s0  ;;  %v6634_v4 = vpack.i.bf16 %v3677_v51, %v3678_v24  ;;  %v3874_v28 = vrot.slane %v9957_v22, 7  ;;  %v3821_v15 = vsel %vm1537_vm8, %v3818_v25, %v3820_v34  ;;  %v3910_v51 = vrot.slane %v9961_v45, 7  ;;  %v6901_v34 = vld [vmem:[%s7404_s16] sm:$0xff]  ;;  %s11636_s0 = smov 44  }
 0x2e3   : > { %6620 = vrot.lane.b32.xlu0 %v6619_v2, %s11420_s19  ;;  %v6649_v54 = vpack.i.bf16 %v3821_v15, %v3819_v35  ;;  %v3191_v50 = vrot.slane %v6901_v34, 2  ;;  %v11629_v35 = vld [vmem:[#allocation88_spill] sm:$0xff] }
 0x2e4   : > { %v9990_v52 = vpop.permute.xlu1 %6335  ;;  %v9994_v48 = vpop.permute.xlu0 %6340  ;;  %v3875_v8 = vsel %vm11612_vm9, %v3872_v18, %v3874_v28  ;;  %v3911_v3 = vsel %vm11625_vm10, %v3874_v28, %v3910_v51  ;;  %v11628_v28 = vrot.slane %v8893_v10, 1  ;;  %v11630_v15 = vrot.slane %v11629_v35, 1 }
 0x2e5   : > { %11621 = vst [vmem:[#allocation26_spill] sm:$0xff] %v9990_v52  ;;  %v6654_v25 = vpack.i.bf16 %v3875_v8, %v9942_v32  ;;  %v10037_v32 = vld [vmem:[%s7404_s16 + $0x18] sm:$0xff]  ;;  %v3274_v10 = vrot.slane %v9357_v43, 3  ;;  %vm11648_vm10 = vcmask 162816  }
 0x2e6   : > { %6625 = vrot.lane.b32.xlu1 %v6624_v60, %s11592_s26  ;;  %v6644_v60 = vpack.i.bf16 %v3765_v40, %v3766_v33  ;;  %v3192_v40 = vrot.slane %v9357_v43, 2  ;;  %v3146_v51 = vsel %vm1214_vm6, %v11630_v15, %v11628_v28  ;;  %v11632_v15 = vrot.slane %v9961_v45, 1  ;;  %s11637_s26 = smov 48  }
 0x2e7   : > { %6630 = vrot.lane.b32.xlu0 %v6629_v6, %s11566_s28  ;;  %v11634_v47 = vrot.slane %v10037_v32, 3  ;;  %vm11645_vm6 = vcmask 130048  }
 0x2e8   : > { %v10001_v2 = vpop.permute.xlu1 %6345  ;;  %v10010_v24 = vpop.permute.xlu0 %6350  ;;  %vm11646_vm8 = vmmov %vm11645_vm6 }
 0x2e9   : > { %11623 = vst [vmem:[#allocation27_spill] sm:$0xff] %v10010_v24  ;;  %vm11647_vm9 = vmmov %vm11645_vm6 }
 0x2ea   : > { %6635 = vrot.lane.b32.xlu1 %v6634_v4, %s11491_s18  ;;  %v10025_v4 = vld [vmem:[%s7404_s16 + $0x10] sm:$0xff] }
 0x2eb   : > { %6640 = vrot.lane.b32.xlu0 %v6639_v39, %s11498_s23  ;;  %v3194_v18 = vrot.slane %v10025_v4, 2  ;;  %v6659_v39 = vpack.i.bf16 %v3911_v3, %v3875_v8  ;;  %v3275_v3 = vrot.slane %v10025_v4, 3  ;;  %s11668_s23 = smov 64  }
 0x2ec   : > { %v10015_v61 = vpop.permute.xlu1 %6355  ;;  %v10018_v6 = vpop.permute.xlu0 %6360 }
 0x2ed   : > { %11624 = vst [vmem:[#allocation28_spill] sm:$0xff] %v10015_v61  ;;  %11626 = vst [vmem:[#allocation29_spill] sm:$0xff] %v10018_v6  ;;  %v3193_v6 = vsel %vm1264_vm11, %v3191_v50, %v3192_v40  ;;  %v3195_v8 = vsel %vm1264_vm11, %v3192_v40, %v3194_v18  ;;  %v3326_v50 = vrot.slane %v10025_v4, 4  ;;  %v3328_v40 = vrot.slane %v10037_v32, 4 }
 0x2ee   : > { %6645 = vrot.lane.b32.xlu1 %v6644_v60, %s11390_s27  ;;  %v3196_v60 = vrot.slane %v10037_v32, 2  ;;  %v6674_v28 = vpack.i.bf16 %v3195_v8, %v3193_v6 }
 0x2ef   : > { %6650 = vrot.lane.b32.xlu0 %v6649_v54, %s11397_s22  ;;  %v6664_v54 = vpack.i.bf16 %v9961_v45, %v9957_v22  ;;  %v3325_v22 = vrot.slane %v9357_v43, 4  ;;  %v3278_v45 = vsel %vm1348_vm14, %v3275_v3, %v11634_v47 }
 0x2f0   : > { %v10029_v33 = vpop.permute.xlu1 %6365  ;;  %v10040_v34 = vpop.permute.xlu0 %6370  ;;  %v10056_v52 = vsel %vm1264_vm11, %v3194_v18, %v3196_v60  ;;  %v3330_v18 = vrot.slane %v9370_v31, 4 }
 0x2f1   : > { %11627 = vst [vmem:[#allocation30_spill] sm:$0xff] %v10029_v33 }
 0x2f2   : > { %6655 = vrot.lane.b32.xlu1 %v6654_v25, %s11406_s24  ;;  %v6669_v25 = vpack.i.bf16 %v3146_v51, %v11632_v15  ;;  %v6679_v51 = vpack.i.bf16 %v10056_v52, %v3195_v8  ;;  %v3327_v15 = vsel %vm1400_vm15, %v3325_v22, %v3326_v50  ;;  %v3198_v22 = vrot.slane %v9370_v31, 2 }
 0x2f3   : > { %6660 = vrot.lane.b32.xlu0 %v6659_v39, %s11524_s21  ;;  %v3276_v39 = vsel %vm1348_vm14, %v3274_v10, %v3275_v3  ;;  %v3331_v10 = vsel %vm1400_vm15, %v3328_v40, %v3330_v18  ;;  %s11640_s21 = smov 52  }
 0x2f4   : > { %v10051_v35 = vpop.permute.xlu1 %6375  ;;  %v10061_v61 = vpop.permute.xlu0 %6380  ;;  %v6684_v6 = vpack.i.bf16 %v3278_v45, %v3276_v39  ;;  %v10096_v45 = vsel %vm1264_vm11, %v3196_v60, %v3198_v22 }
 0x2f5   : > { %11631 = vst [vmem:[#allocation31_spill] sm:$0xff] %v10051_v35  ;;  %11633 = vst [vmem:[#allocation32_spill] sm:$0xff] %v10061_v61  ;;  %v3329_v61 = vsel %vm1400_vm15, %v3326_v50, %v3328_v40  ;;  %v11307_v50 = vrot.slane %v9378_v63, 2  ;;  %v6704_v40 = vpack.i.bf16 %v9411_v44, %v8928_v46  ;;  %v6852_v44 = vld [vmem:[%s11116_s9 + $0x8] sm:$0xff]  }
 0x2f6   : > { %6665 = vrot.lane.b32.xlu1 %v6664_v54, %s11420_s19  ;;  %v6689_v3 = vpack.i.bf16 %v3329_v61, %v3327_v15  ;;  %v6694_v8 = vpack.i.bf16 %v3331_v10, %v3329_v61  ;;  %s11641_s19 = smov 56  }
 0x2f7   : > { %6670 = vrot.lane.b32.xlu0 %v6669_v25, %s11566_s28  ;;  %v10101_v61 = vsel %vm1264_vm11, %v3198_v22, %v11307_v50 }
 0x2f8   : > { %v10070_v43 = vpop.permute.xlu1 %6385  ;;  %v10075_v54 = vpop.permute.xlu0 %6390  ;;  %v6714_v46 = vpack.i.bf16 %v10101_v61, %v10096_v45 }
 0x2f9   : > { %11635 = vst [vmem:[#allocation33_spill] sm:$0xff] %v10070_v43 }
 0x2fa   : > { %6675 = vrot.lane.b32.xlu1 %v6674_v28, %s11636_s0 }
 0x2fb   : > { %6680 = vrot.lane.b32.xlu0 %v6679_v51, %s11637_s26  ;;  %v11310_v51 = vrot.slane %v9378_v63, 4 }
 0x2fc   : > { %v10080_v47 = vpop.permute.xlu1 %6395  ;;  %v10082_v25 = vpop.permute.xlu0 %6400 }
 0x2fd   : > { %11638 = vst [vmem:[#allocation34_spill] sm:$0xff] %v10080_v47  ;;  %11639 = vst [vmem:[#allocation18_spill] sm:$0xff] %v10082_v25  ;;  %v10118_v60 = vsel %vm1400_vm15, %v3330_v18, %v11310_v51  ;;  %v6218_v51 = vunpack.i.h.bf16 %v9708_v42  ;;  %v6318_v47 = vunpack.i.h.bf16 %v9953_v1 }
 0x2fe   : > { %6685 = vrot.lane.b32.xlu1 %v6684_v6, %s11640_s21  ;;  %v6851_v6 = vld [vmem:[%s11116_s9] sm:$0xff]  }
 0x2ff   : > { %6690 = vrot.lane.b32.xlu0 %v6689_v3, %s11641_s19  ;;  %5392 = vmatpush3.bf16.msra.mxu1 %v6851_v6  ;;  %v4032_v56 = vsel %vm1896_vm12, %v10025_v4, %v6218_v51 }
 0x300   : > { %v10088_v28 = vpop.permute.xlu1 %6405  ;;  %v10090_v39 = vpop.permute.xlu0 %6410  ;;  %5393 = vmatprep.subr.bf16.mxu1 %v11564_v12 }
 0x301   : > { %11642 = vst [vmem:[#allocation35_spill] sm:$0xff] %v10088_v28  ;;  %11643 = vst [vmem:[#allocation36_spill] sm:$0xff] %v10090_v39  ;;  %v6853_v39 = vld [vmem:[%s11116_s9 + $0x10] sm:$0xff]  }
 0x302   : > { %6695 = vrot.lane.b32.xlu1 %v6694_v8, %s11644_s25 }
 0x303   : > { %5394 = vmatpush3.bf16.msra.mxu1 %v6852_v44  ;;  %v6268_v44 = vunpack.i.h.bf16 %v9854_v27 }
 0x304   : > { %v10104_v15 = vpop.permute.xlu1 %6415  ;;  %v6421_v3 = vpop.permute.xlu0 %6420  ;;  %5395 = vmatprep.subr.bf16.mxu1 %v11564_v12 }
 0x305   : > { %v6422_v6 = vunpack.i.l.bf16 %v6421_v3  ;;  %v6423_v43 = vunpack.i.h.bf16 %v6421_v3 }
 0x306   : > { %6705 = vrot.lane.b32.xlu1 %v6704_v40, %s11566_s28  ;;  %v6724_v40 = vpack.i.bf16 %v10118_v60, %v3331_v10  ;;  %v6854_v10 = vld [vmem:[%s11116_s9 + $0x18] sm:$0xff]  }
 0x307   : > { %5396 = vmatpush3.bf16.msra.mxu1 %v6853_v39  ;;  %v4033_v3 = vsel %vm1896_vm12, %v10037_v32, %v6422_v6 }
 0x308   : > { %v6426_v8 = vpop.permute.xlu1 %6425  ;;  %v6431_v22 = vpop.permute.xlu0 %6430  ;;  %5397 = vmatprep.subr.bf16.mxu1 %v11564_v12 }
 0x309   : > { %v6427_v18 = vunpack.i.l.bf16 %v6426_v8  ;;  %v6428_v28 = vunpack.i.h.bf16 %v6426_v8  ;;  %v6432_v35 = vunpack.i.l.bf16 %v6431_v22  ;;  %v4034_v8 = vsel %vm1896_vm12, %v9370_v31, %v6423_v43 }
 0x30a   : > { %6715 = vrot.lane.b32.xlu1 %v6714_v46, %s11637_s26  ;;  %v6243_v46 = vunpack.i.h.bf16 %v9783_v38  ;;  %v6293_v38 = vunpack.i.h.bf16 %v9908_v16  ;;  %v6343_v43 = vunpack.i.h.bf16 %v9994_v48 }
 0x30b   : > { %v4044_v39 = vsel %vm1907_vm13, %v4033_v3, %v6427_v18  ;;  %v4045_v13 = vsel %vm1907_vm13, %v4034_v8, %v6428_v28  ;;  %5398 = vmatpush3.bf16.msra.mxu1 %v6854_v10 }
 0x30c   : > { %v6436_v50 = vpop.permute.xlu1 %6435  ;;  %v6441_v25 = vpop.permute.xlu0 %6440  ;;  %v4043_v6 = vsel %vm1907_vm13, %v4032_v56, %v6243_v46  ;;  %5399 = vmatprep.subr.bf16.mxu1 %v11564_v12 }
 0x30d   : > { %v6437_v24 = vunpack.i.l.bf16 %v6436_v50  ;;  %v6438_v27 = vunpack.i.h.bf16 %v6436_v50  ;;  %v4054_v31 = vsel %vm1918_vm0, %v4043_v6, %v6268_v44  ;;  %v6442_v4 = vunpack.i.l.bf16 %v6441_v25  ;;  %v6855_v50 = vld [vmem:[%s11116_s9 + $0x20] sm:$0xff]  }
 0x30e   : > { %6725 = vrot.lane.b32.xlu1 %v6724_v40, %s11641_s19  ;;  %v6433_v40 = vunpack.i.h.bf16 %v6431_v22  ;;  %v4055_v22 = vsel %vm1918_vm0, %v4044_v39, %v6432_v35  ;;  %v6443_v18 = vunpack.i.h.bf16 %v6441_v25  ;;  %v4065_v46 = vsel %vm11646_vm8, %v4054_v31, %v6293_v38  ;;  %v6856_v35 = vld [vmem:[%s11116_s9 + $0x28] sm:$0xff]   ;;  %vm11650_vm8 = vmmov %vm11648_vm10 }
 0x30f   : > { %v4066_v56 = vsel %vm11645_vm6, %v4055_v22, %v6437_v24  ;;  %5400 = vmatpush3.bf16.msra.mxu1 %v6855_v50  ;;  %v4076_v39 = vsel %vm11648_vm10, %v4065_v46, %v6318_v47  ;;  %vm11649_vm6 = vcmask 195584   ;;  %v6393_v38 = vunpack.i.h.bf16 %v10075_v54 }
 0x310   : > { %v6446_v42 = vpop.permute.xlu1 %6445  ;;  %v6451_v17 = vpop.permute.xlu0 %6450  ;;  %v4056_v28 = vsel %vm1918_vm0, %v4045_v13, %v6433_v40  ;;  %v6368_v13 = vunpack.i.h.bf16 %v10029_v33  ;;  %5401 = vmatprep.subr.bf16.mxu1 %v11564_v12  ;;  %v4087_v24 = vsel %vm11649_vm6, %v4076_v39, %v6343_v43  ;;  %vm11652_vm7 = vmmov %vm11649_vm6  ;;  %v6418_v47 = vunpack.i.h.bf16 %v10104_v15 }
 0x311   : > { %v6447_v10 = vunpack.i.l.bf16 %v6446_v42  ;;  %v4067_v44 = vsel %vm11647_vm9, %v4056_v28, %v6438_v27  ;;  %v6448_v3 = vunpack.i.h.bf16 %v6446_v42  ;;  %v4077_v27 = vsel %vm11650_vm8, %v4066_v56, %v6442_v4  ;;  %vm11651_vm9 = vmmov %vm11650_vm8 }
 0x312   : > { %v6452_v42 = vunpack.i.l.bf16 %v6451_v17  ;;  %v4078_v40 = vsel %vm11651_vm9, %v4067_v44, %v6443_v18  ;;  %v6453_v31 = vunpack.i.h.bf16 %v6451_v17  ;;  %vm11653_vm10 = vmmov %vm11649_vm6  ;;  %vm11654_vm6 = vcmask 228352  }
 0x313   : > { %v4088_v6 = vsel %vm11652_vm7, %v4077_v27, %v6447_v10  ;;  %v4089_v50 = vsel %vm11653_vm10, %v4078_v40, %v6448_v3  ;;  %5402 = vmatpush3.bf16.msra.mxu1 %v6856_v35  ;;  %v4098_v43 = vsel %vm11654_vm6, %v4087_v24, %v6368_v13  ;;  %vm11655_vm8 = vcmask 261120   ;;  %vm11656_vm9 = vmmov %vm11654_vm6 }
 0x314   : > { %v6456_v51 = vpop.permute.xlu1 %6455  ;;  %v10157_v8 = vpop.permute.xlu0 %6460  ;;  %5403 = vmatprep.subr.bf16.mxu1 %v11564_v12  ;;  %v4109_v4 = vsel %vm11655_vm8, %v4098_v43, %v6393_v38  ;;  %v4099_v56 = vsel %vm11656_vm9, %v4088_v6, %v6452_v42  ;;  %vm11657_vm7 = vmmov %vm11654_vm6  ;;  %vm11659_vm10 = vcmask 293888   ;;  %v6857_v38 = vld [vmem:[%s11116_s9 + $0x30] sm:$0x3f]  }
 0x315   : > { %v6457_v22 = vunpack.i.l.bf16 %v6456_v51  ;;  %v6458_v28 = vunpack.i.h.bf16 %v6456_v51  ;;  %v4100_v17 = vsel %vm11657_vm7, %v4089_v50, %v6453_v31  ;;  %vm11658_vm1 = vmmov %vm11655_vm8  ;;  %v4120_v51 = vsel %vm11659_vm10, %v4109_v4, %v6418_v47 }
 0x316   : > { %vm11660_vm4 = vmmov %vm11658_vm1  ;;  %v6462_v13 = vunpack.i.l.bf16 %v10157_v8  ;;  %vm11667_vm7 = vcmask 130048  }
 0x317   : > { %v4110_v10 = vsel %vm11658_vm1, %v4099_v56, %v6457_v22  ;;  %v4111_v35 = vsel %vm11660_vm4, %v4100_v17, %v6458_v28  ;;  %vm11661_vm6 = vmmov %vm11659_vm10  ;;  %vm11663_vm1 = vcmask 326656   ;;  %v4451_v28 = vsel %vm1264_vm11, %v6857_v38, 0  ;;  %v6904_v56 = vld [vmem:[%s7404_s16 + $0x20] sm:$0xff] }
 0x318   : > { %v6466_v25 = vpop.permute.xlu1 %6465  ;;  %v6471_v33 = vpop.permute.xlu0 %6470  ;;  %vm11662_vm8 = vmmov %vm11661_vm6  ;;  %5404 = vmatpush3.bf16.msra.mxu1 %v4451_v28  ;;  %v6463_v17 = vunpack.i.h.bf16 %v10157_v8  ;;  %vm11669_vm10 = vcmask 162816  }
 0x319   : > { %v6467_v46 = vunpack.i.l.bf16 %v6466_v25  ;;  %v6468_v39 = vunpack.i.h.bf16 %v6466_v25  ;;  %vm11664_vm9 = vmmov %vm11663_vm1  ;;  %v6472_v31 = vunpack.i.l.bf16 %v6471_v33 }
 0x31a   : > { %vm11665_vm4 = vmmov %vm11663_vm1 }
 0x31b   : > { %v4121_v24 = vsel %vm11661_vm6, %v4110_v10, %v6467_v46  ;;  %v4122_v42 = vsel %vm11662_vm8, %v4111_v35, %v6468_v39  ;;  %v10199_v10 = vld [vmem:[%s7404_s16 + $0x28] sm:$0xff]  ;;  %v6473_v35 = vunpack.i.h.bf16 %v6471_v33  ;;  %vm11671_vm6 = vmmov %vm11667_vm7  ;;  %vm11672_vm8 = vcmask 195584  }
 0x31c   : > { %v6476_v18 = vpop.permute.xlu1 %6475  ;;  %v10182_v27 = vpop.permute.xlu0 %6480 }
 0x31d   : > { %v6478_v44 = vunpack.i.h.bf16 %v6476_v18  ;;  %v6477_v3 = vunpack.i.l.bf16 %v6476_v18  ;;  %v6482_v6 = vunpack.i.l.bf16 %v10182_v27  ;;  %v3279_v18 = vrot.slane %v6904_v56, 3 }
 0x31f   : > { %v4131_v25 = vsel %vm11663_vm1, %v4120_v51, %v6477_v3  ;;  %v4132_v40 = vsel %vm11664_vm9, %v4121_v24, %v6478_v44  ;;  %v10193_v46 = vsel %vm11665_vm4, %v4122_v42, %v6482_v6  ;;  %v4035_v44 = vsel %vm1896_vm12, %v10199_v10, %v6462_v13  ;;  %vm11673_vm1 = vmmov %vm11669_vm10 }
 0x320   : > { %v4153_v22 = vrot.slane %v4131_v25, 5  ;;  %v4154_v47 = vrot.slane %v4132_v40, 5  ;;  %v6486_v50 = vpop.permute.xlu1 %6485  ;;  %v11326_v39 = vrot.slane %v10193_v46, 5  ;;  %v6491_v4 = vpop.permute.xlu0 %6490  ;;  %v11327_v51 = vrot.slane %v10199_v10, 3  ;;  %vm11675_vm4 = vmmov %vm11672_vm8 }
 0x321   : > { %v6487_v43 = vunpack.i.l.bf16 %v6486_v50  ;;  %v4046_v24 = vsel %vm1907_vm13, %v4035_v44, %v6472_v31  ;;  %v6492_v38 = vunpack.i.l.bf16 %v6491_v4  ;;  %v6488_v8 = vunpack.i.h.bf16 %v6486_v50 }
 0x322   : > { %v4155_v3 = vsel %vm1485_vm3, %v4153_v22, %v4154_v47  ;;  %v4157_v25 = vsel %vm1485_vm3, %v4154_v47, %v11326_v39  ;;  %v6709_v13 = vpack.i.bf16 %v10096_v45, %v10056_v52  ;;  %v10213_v22 = vld [vmem:[%s7404_s16 + $0x30] sm:$0xff]  ;;  %v11666_v31 = vrot.slane %v10037_v32, 3 }
 0x323   : > { %v4057_v40 = vsel %vm1918_vm0, %v4046_v24, %v6487_v43  ;;  %v6699_v56 = vpack.i.bf16 %v4157_v25, %v4155_v3  ;;  %v4036_v33 = vsel %vm1896_vm12, %v10213_v22, %v6463_v17  ;;  %v3282_v47 = vsel %vm1348_vm14, %v3279_v18, %v11327_v51 }
 0x324   : > { %v6496_v42 = vpop.permute.xlu1 %6495  ;;  %v6501_v28 = vpop.permute.xlu0 %6500  ;;  %v3280_v44 = vsel %vm1348_vm14, %v11666_v31, %v3279_v18  ;;  %v3334_v50 = vrot.slane %v10213_v22, 4  ;;  %v4047_v43 = vsel %vm1907_vm13, %v4036_v33, %v6473_v35  ;;  %v6493_v3 = vunpack.i.h.bf16 %v6491_v4 }
 0x325   : > { %v6497_v6 = vunpack.i.l.bf16 %v6496_v42  ;;  %v4068_v52 = vsel %vm11667_vm7, %v4057_v40, %v6492_v38  ;;  %v6502_v45 = vunpack.i.l.bf16 %v6501_v28  ;;  %6700 = vrot.lane.b32.xlu0 %v6699_v56, %s11668_s23  ;;  %v4058_v17 = vsel %vm1918_vm0, %v4047_v43, %v6488_v8 }
 0x326   : > { %v6498_v32 = vunpack.i.h.bf16 %v6496_v42  ;;  %v6719_v18 = vpack.i.bf16 %v3282_v47, %v3280_v44  ;;  %v11670_v51 = vrot.slane %v9378_v63, 4  ;;  %v4069_v4 = vsel %vm11671_vm6, %v4058_v17, %v6493_v3  ;;  %v10243_v3 = vld [vmem:[%s7404_s16 + $0x38] sm:$0xff] }
 0x327   : > { %v4079_v25 = vsel %vm11669_vm10, %v4068_v52, %v6497_v6  ;;  %v6503_v38 = vunpack.i.h.bf16 %v6501_v28  ;;  %vm11674_vm9 = vcmask 228352   ;;  %v3202_v43 = vrot.slane %v10213_v22, 2 }
 0x328   : > { %v6506_v24 = vpop.permute.xlu1 %6505  ;;  %v6511_v39 = vpop.permute.xlu0 %6510  ;;  %v10232_v35 = vsel %vm1400_vm15, %v11670_v51, %v3334_v50  ;;  %v4090_v40 = vsel %vm11672_vm8, %v4079_v25, %v6502_v45  ;;  %v4080_v8 = vsel %vm11673_vm1, %v4069_v4, %v6498_v32  ;;  %v11328_v28 = vrot.slane %v10243_v3, 2  ;;  %vm11677_vm10 = vmmov %vm11674_vm9 }
 0x329   : > { %v6507_v31 = vunpack.i.l.bf16 %v6506_v24  ;;  %v6512_v56 = vunpack.i.l.bf16 %v6511_v39  ;;  %6710 = vrot.lane.b32.xlu0 %v6709_v13, %s11636_s0  ;;  %v6508_v6 = vunpack.i.h.bf16 %v6506_v24  ;;  %v6729_v51 = vpack.i.bf16 %v10232_v35, %v10118_v60 }
 0x32a   : > { %v6483_v52 = vunpack.i.h.bf16 %v10182_v27  ;;  %v4091_v13 = vsel %vm11675_vm4, %v4080_v8, %v6503_v38  ;;  %v6513_v45 = vunpack.i.h.bf16 %v6511_v39  ;;  %vm11676_vm7 = vcmask 261120  }
 0x32b   : > { %v4101_v33 = vsel %vm11674_vm9, %v4090_v40, %v6507_v31  ;;  %v4102_v32 = vsel %vm11677_vm10, %v4091_v13, %v6508_v6  ;;  %vm11678_vm6 = vcmask 293888   ;;  %vm11679_vm8 = vcmask 326656   ;;  %vm11681_vm1 = vmmov %vm11676_vm7 }
 0x32c   : > { %v6516_v42 = vpop.permute.xlu1 %6515  ;;  %v6521_v44 = vpop.permute.xlu0 %6520  ;;  %v4112_v24 = vsel %vm11676_vm7, %v4101_v33, %v6512_v56  ;;  %v11680_v27 = vrot.slane %v9378_v63, 2  ;;  %v10261_v39 = vsel %vm1264_vm11, %v3202_v43, %v11328_v28  ;;  %v4113_v56 = vsel %vm11681_vm1, %v4102_v32, %v6513_v45  ;;  %vm11682_vm9 = vmmov %vm11678_vm6 }
 0x32d   : > { %v6522_v47 = vunpack.i.l.bf16 %v6521_v44  ;;  %6720 = vrot.lane.b32.xlu0 %v6719_v18, %s11640_s21  ;;  %v6523_v25 = vunpack.i.h.bf16 %v6521_v44  ;;  %v6517_v40 = vunpack.i.l.bf16 %v6516_v42  ;;  %v3336_v18 = vrot.slane %v10243_v3, 4  ;;  %vm11683_vm4 = vmmov %vm11679_vm8 }
 0x32e   : > { %v3203_v38 = vsel %vm1264_vm11, %v11680_v27, %v3202_v43  ;;  %v6739_v63 = vpack.i.bf16 %v9540_v9, %v9416_v11  ;;  %v3283_v45 = vrot.slane %v10213_v22, 3  ;;  %v11329_v32 = vrot.slane %v10243_v3, 3 }
 0x32f   : > { %v4123_v60 = vsel %vm11678_vm6, %v4112_v24, %v6522_v47  ;;  %v4124_v44 = vsel %vm11682_vm9, %v4113_v56, %v6523_v25  ;;  %v6749_v24 = vpack.i.bf16 %v10261_v39, %v3203_v38  ;;  %v10280_v9 = vsel %vm1400_vm15, %v3334_v50, %v3336_v18 }
 0x330   : > { %v6526_v17 = vpop.permute.xlu1 %6525  ;;  %v4134_v31 = vsel %vm11679_vm8, %v4123_v60, %v6483_v52  ;;  %v6518_v60 = vunpack.i.h.bf16 %v6516_v42  ;;  %vm11686_vm7 = vcmask 130048   ;;  %vm11687_vm10 = vcmask 162816  }
 0x331   : > { %v10253_v4 = vpop.permute.xlu0 %6530  ;;  %v6527_v8 = vunpack.i.l.bf16 %v6526_v17  ;;  %6730 = vrot.lane.b32.xlu0 %v6729_v51, %s11644_s25  ;;  %v4158_v47 = vrot.slane %v4134_v31, 5  ;;  %v4037_v51 = vsel %vm1896_vm12, %v10243_v3, %v6517_v40  ;;  %v6528_v25 = vunpack.i.h.bf16 %v6526_v17  ;;  %vm11688_vm6 = vmmov %vm11686_vm7 }
 0x332   : > { %v6532_v6 = vunpack.i.l.bf16 %v10253_v4  ;;  %vm11689_vm8 = vcmask 195584   ;;  %vm11690_vm1 = vmmov %vm11687_vm10  ;;  %vm11691_vm9 = vcmask 228352  }
 0x333   : > { %v4048_v31 = vsel %vm1907_vm13, %v4037_v51, %v6527_v8  ;;  %v6744_v8 = vpack.i.bf16 %v3203_v38, %v10101_v61  ;;  %v10296_v51 = vld [vmem:[%s7404_s16 + $0x40] sm:$0xff] }
 0x334   : > { %v6536_v33 = vpop.permute.xlu1 %6535  ;;  %v10271_v43 = vsel %vm11683_vm4, %v4124_v44, %v6532_v6  ;;  %v11684_v44 = vrot.slane %v10193_v46, 5  ;;  %v3286_v46 = vsel %vm1348_vm14, %v3283_v45, %v11329_v32  ;;  %vm11692_vm4 = vmmov %vm11689_vm8 }
 0x335   : > { %v6537_v52 = vunpack.i.l.bf16 %v6536_v33  ;;  %v6541_v13 = vpop.permute.xlu0 %6540  ;;  %v4160_v11 = vrot.slane %v10271_v43, 5  ;;  %v6538_v27 = vunpack.i.h.bf16 %v6536_v33  ;;  %6740 = vrot.lane.b32.xlu0 %v6739_v63, %s11566_s28  ;;  %v11685_v33 = vrot.slane %v10199_v10, 3 }
 0x336   : > { %v6542_v56 = vunpack.i.l.bf16 %v6541_v13  ;;  %v4159_v40 = vsel %vm1485_vm3, %v11684_v44, %v4158_v47  ;;  %v6543_v38 = vunpack.i.h.bf16 %v6541_v13  ;;  %v3342_v43 = vrot.slane %v9826_v36, 4 }
 0x337   : > { %v4059_v6 = vsel %vm1918_vm0, %v4048_v31, %v6537_v52  ;;  %v4161_v50 = vsel %vm1485_vm3, %v4158_v47, %v4160_v11  ;;  %v3284_v63 = vsel %vm1348_vm14, %v11685_v33, %v3283_v45  ;;  %v4038_v52 = vsel %vm1896_vm12, %v10296_v51, %v6518_v60 }
 0x338   : > { %v6546_v22 = vpop.permute.xlu1 %6545  ;;  %v6734_v17 = vpack.i.bf16 %v4161_v50, %v4159_v40  ;;  %v6759_v47 = vpack.i.bf16 %v10280_v9, %v10232_v35  ;;  %v3338_v31 = vrot.slane %v10296_v51, 4  ;;  %v4049_v61 = vsel %vm1907_vm13, %v4038_v52, %v6528_v25 }
 0x339   : > { %v6547_v42 = vunpack.i.l.bf16 %v6546_v22  ;;  %v6551_v28 = vpop.permute.xlu0 %6550  ;;  %v4070_v10 = vsel %vm11686_vm7, %v4059_v6, %v6542_v56  ;;  %6750 = vrot.lane.b32.xlu0 %v6749_v24, %s11637_s26  ;;  %v4060_v60 = vsel %vm1918_vm0, %v4049_v61, %v6538_v27  ;;  %v6548_v50 = vunpack.i.h.bf16 %v6546_v22 }
 0x33a   : > { %v6552_v44 = vunpack.i.l.bf16 %v6551_v28  ;;  %6735 = vrot.lane.b32.xlu1 %v6734_v17, %s11668_s23  ;;  %v6754_v32 = vpack.i.bf16 %v3286_v46, %v3284_v63  ;;  %v10315_v13 = vsel %vm1400_vm15, %v3336_v18, %v3338_v31  ;;  %v4071_v25 = vsel %vm11688_vm6, %v4060_v60, %v6543_v38  ;;  %v10327_v46 = vld [vmem:[%s7404_s16 + $0x48] sm:$0xff] }
 0x33b   : > { %v4081_v45 = vsel %vm11687_vm10, %v4070_v10, %v6547_v42  ;;  %v6553_v56 = vunpack.i.h.bf16 %v6551_v28  ;;  %v4082_v22 = vsel %vm11690_vm1, %v4071_v25, %v6548_v50  ;;  %v6764_v18 = vpack.i.bf16 %v10315_v13, %v10280_v9  ;;  %vm11694_vm10 = vmmov %vm11691_vm9 }
 0x33c   : > { %v6556_v40 = vpop.permute.xlu1 %6555  ;;  %v4092_v6 = vsel %vm11689_vm8, %v4081_v45, %v6552_v44  ;;  %v3206_v28 = vrot.slane %v10296_v51, 2  ;;  %v10330_v61 = vrot.slane %v10327_v46, 2  ;;  %vm11693_vm7 = vcmask 261120  }
 0x33d   : > { %v6557_v33 = vunpack.i.l.bf16 %v6556_v40  ;;  %v6561_v35 = vpop.permute.xlu0 %6560  ;;  %6760 = vrot.lane.b32.xlu0 %v6759_v47, %s11641_s19  ;;  %v6558_v42 = vunpack.i.h.bf16 %v6556_v40  ;;  %v4093_v47 = vsel %vm11692_vm4, %v4082_v22, %v6553_v56  ;;  %vm11695_vm6 = vcmask 293888   ;;  %vm11698_vm1 = vmmov %vm11693_vm7 }
 0x33e   : > { %v6562_v24 = vunpack.i.l.bf16 %v6561_v35  ;;  %6745 = vrot.lane.b32.xlu1 %v6744_v8, %s11636_s0  ;;  %v6533_v8 = vunpack.i.h.bf16 %v10253_v4  ;;  %v6563_v38 = vunpack.i.h.bf16 %v6561_v35  ;;  %vm11696_vm8 = vcmask 326656  }
 0x33f   : > { %v4103_v17 = vsel %vm11691_vm9, %v4092_v6, %v6557_v33  ;;  %v4104_v40 = vsel %vm11694_vm10, %v4093_v47, %v6558_v42  ;;  %v6774_v4 = vpack.i.bf16 %v9693_v37, %v9545_v57  ;;  %v11697_v35 = vrot.slane %v10243_v3, 2  ;;  %vm11699_vm9 = vmmov %vm11695_vm6 }
 0x340   : > { %v6566_v27 = vpop.permute.xlu1 %6565  ;;  %v4114_v10 = vsel %vm11693_vm7, %v4103_v17, %v6562_v24  ;;  %v4115_v56 = vsel %vm11698_vm1, %v4104_v40, %v6563_v38  ;;  %v3340_v42 = vrot.slane %v10327_v46, 4  ;;  %vm11700_vm4 = vmmov %vm11696_vm8  ;;  %v3287_v47 = vrot.slane %v10296_v51, 3 }
 0x341   : > { %v6571_v63 = vpop.permute.xlu0 %6570  ;;  %v6567_v33 = vunpack.i.l.bf16 %v6566_v27  ;;  %v3207_v25 = vsel %vm1264_vm11, %v11697_v35, %v3206_v28  ;;  %v3289_v40 = vrot.slane %v10327_v46, 3  ;;  %vm11701_vm7 = vcmask 130048  }
 0x342   : > { %v6572_v52 = vunpack.i.l.bf16 %v6571_v63  ;;  %6755 = vrot.lane.b32.xlu1 %v6754_v32, %s11640_s21  ;;  %v6573_v9 = vunpack.i.h.bf16 %v6571_v63  ;;  %v10348_v32 = vsel %vm1264_vm11, %v3206_v28, %v10330_v61  ;;  %v6568_v63 = vunpack.i.h.bf16 %v6566_v27 }
 0x343   : > { %v4039_v38 = vsel %vm1896_vm12, %v10327_v46, %v6567_v33  ;;  %v10369_v35 = vsel %vm1400_vm15, %v3338_v31, %v3340_v42  ;;  %v6779_v51 = vpack.i.bf16 %v3207_v25, %v10261_v39  ;;  %vm11702_vm10 = vcmask 162816  }
 0x344   : > { %v6576_v44 = vpop.permute.xlu1 %6575  ;;  %v4125_v60 = vsel %vm11695_vm6, %v4114_v10, %v6572_v52  ;;  %v4126_v57 = vsel %vm11699_vm9, %v4115_v56, %v6573_v9  ;;  %vm11704_vm6 = vmmov %vm11701_vm7  ;;  %vm11706_vm1 = vcmask 195584   ;;  %vm11707_vm9 = vcmask 228352  }
 0x345   : > { %v4136_v50 = vsel %vm11696_vm8, %v4125_v60, %v6533_v8  ;;  %v10339_v45 = vpop.permute.xlu0 %6580  ;;  %v6577_v6 = vunpack.i.l.bf16 %v6576_v44  ;;  %v6784_v8 = vpack.i.bf16 %v10348_v32, %v3207_v25  ;;  %vm11705_vm8 = vmmov %vm11702_vm10 }
 0x346   : > { %v6582_v24 = vunpack.i.l.bf16 %v10339_v45  ;;  %6765 = vrot.lane.b32.xlu1 %v6764_v18, %s11644_s25  ;;  %v4162_v37 = vrot.slane %v4136_v50, 5  ;;  %v6578_v18 = vunpack.i.h.bf16 %v6576_v44 }
 0x347   : > { %v4050_v9 = vsel %vm1907_vm13, %v4039_v38, %v6577_v6 }
 0x348   : > { %v6586_v22 = vpop.permute.xlu1 %6585  ;;  %v10356_v52 = vsel %vm11700_vm4, %v4126_v57, %v6582_v24  ;;  %v4163_v44 = vsel %vm1485_vm3, %v4160_v11, %v4162_v37  ;;  %vm11708_vm4 = vmmov %vm11706_vm1 }
 0x349   : > { %v6587_v17 = vunpack.i.l.bf16 %v6586_v22  ;;  %v6591_v28 = vpop.permute.xlu0 %6590  ;;  %v4164_v10 = vrot.slane %v10356_v52, 5  ;;  %v6588_v60 = vunpack.i.h.bf16 %v6586_v22 }
 0x34a   : > { %v6592_v27 = vunpack.i.l.bf16 %v6591_v28  ;;  %6775 = vrot.lane.b32.xlu1 %v6774_v4, %s11566_s28  ;;  %v4040_v4 = vsel %vm1896_vm12, %v9826_v36, %v6568_v63  ;;  %v6593_v57 = vunpack.i.h.bf16 %v6591_v28  ;;  %v11703_v28 = vrot.slane %v10243_v3, 3 }
 0x34b   : > { %v4061_v56 = vsel %vm1918_vm0, %v4050_v9, %v6587_v17  ;;  %v4165_v6 = vsel %vm1485_vm3, %v4162_v37, %v4164_v10  ;;  %v4051_v31 = vsel %vm1907_vm13, %v4040_v4, %v6578_v18  ;;  %v6794_v17 = vpack.i.bf16 %v10369_v35, %v10315_v13 }
 0x34c   : > { %v6596_v50 = vpop.permute.xlu1 %6595  ;;  %v6769_v22 = vpack.i.bf16 %v4165_v6, %v4163_v44  ;;  %v4062_v11 = vsel %vm1918_vm0, %v4051_v31, %v6588_v60  ;;  %v4072_v38 = vsel %vm11701_vm7, %v4061_v56, %v6592_v27  ;;  %v3288_v13 = vsel %vm1348_vm14, %v11703_v28, %v3287_v47 }
 0x34d   : > { %v6597_v33 = vunpack.i.l.bf16 %v6596_v50  ;;  %v6601_v24 = vpop.permute.xlu0 %6600  ;;  %v6598_v37 = vunpack.i.h.bf16 %v6596_v50  ;;  %v3290_v18 = vsel %vm1348_vm14, %v3287_v47, %v3289_v40  ;;  %v4073_v27 = vsel %vm11704_vm6, %v4062_v11, %v6593_v57 }
 0x34e   : > { %v6602_v9 = vunpack.i.l.bf16 %v6601_v24  ;;  %6770 = vrot.lane.b32.xlu0 %v6769_v22, %s11668_s23  ;;  %6785 = vrot.lane.b32.xlu1 %v6784_v8, %s11637_s26  ;;  %v6603_v50 = vunpack.i.h.bf16 %v6601_v24  ;;  %v10400_v56 = vsel %vm1400_vm15, %v3340_v42, %v3342_v43  ;;  %v6789_v6 = vpack.i.bf16 %v3290_v18, %v3288_v13 }
 0x34f   : > { %v4083_v39 = vsel %vm11702_vm10, %v4072_v38, %v6597_v33  ;;  %v4084_v8 = vsel %vm11705_vm8, %v4073_v27, %v6598_v37  ;;  %v6799_v22 = vpack.i.bf16 %v10400_v56, %v10369_v35  ;;  %v6583_v42 = vunpack.i.h.bf16 %v10339_v45  ;;  %vm11710_vm10 = vmmov %vm11707_vm9 }
 0x350   : > { %v6606_v63 = vpop.permute.xlu1 %6605  ;;  %v4094_v33 = vsel %vm11706_vm1, %v4083_v39, %v6602_v9  ;;  %v4095_v31 = vsel %vm11708_vm4, %v4084_v8, %v6603_v50  ;;  %v3241_v11 = vrot.slane %v9826_v36, 2  ;;  %vm11709_vm7 = vcmask 261120  }
 0x351   : > { %v6607_v25 = vunpack.i.l.bf16 %v6606_v63  ;;  %v6611_v60 = vpop.permute.xlu0 %6610  ;;  %v6608_v47 = vunpack.i.h.bf16 %v6606_v63  ;;  %vm11711_vm6 = vcmask 293888   ;;  %vm11712_vm8 = vcmask 326656   ;;  %vm11713_vm1 = vmmov %vm11709_vm7 }
 0x352   : > { %v6612_v3 = vunpack.i.l.bf16 %v6611_v60  ;;  %6780 = vrot.lane.b32.xlu0 %v6779_v51, %s11636_s0  ;;  %6795 = vrot.lane.b32.xlu1 %v6794_v17, %s11641_s19  ;;  %v6613_v38 = vunpack.i.h.bf16 %v6611_v60  ;;  %v6809_v18 = vpack.i.bf16 %v9665_v23, %v9700_v7  ;;  %v3242_v60 = vsel %vm1264_vm11, %v10330_v61, %v3241_v11  ;;  %vm11715_vm11 = vmmov %vm11712_vm8 }
 0x353   : > { %v4105_v4 = vsel %vm11707_vm9, %v4094_v33, %v6607_v25  ;;  %v4106_v63 = vsel %vm11710_vm10, %v4095_v31, %v6608_v47  ;;  %v3344_v27 = vrot.slane %v9830_v58, 4  ;;  %vm11714_vm9 = vmmov %vm11711_vm6  ;;  %vm11716_vm4 = vcmask 130048  }
 0x354   : > { %v6616_v44 = vpop.permute.xlu1 %6615  ;;  %v4116_v51 = vsel %vm11709_vm7, %v4105_v4, %v6612_v3  ;;  %v4117_v50 = vsel %vm11713_vm1, %v4106_v63, %v6613_v38  ;;  %v6910_v63 = vld [vmem:[%s7404_s16 + $0x50] sm:$0xff]  ;;  %vm11717_vm7 = vmmov %vm11716_vm4  ;;  %vm11718_vm10 = vcmask 162816  }
 0x355   : > { %v6621_v24 = vpop.permute.xlu0 %6620  ;;  %v6618_v37 = vunpack.i.h.bf16 %v6616_v44  ;;  %v6617_v9 = vunpack.i.l.bf16 %v6616_v44 }
 0x356   : > { %v6622_v57 = vunpack.i.l.bf16 %v6621_v24  ;;  %6790 = vrot.lane.b32.xlu0 %v6789_v6, %s11640_s21  ;;  %v6623_v39 = vunpack.i.h.bf16 %v6621_v24 }
 0x357   : > { %v4042_v8 = vsel %vm1896_vm12, %v9935_v14, %v6618_v37  ;;  %v4041_v33 = vsel %vm1896_vm12, %v9830_v58, %v6617_v9 }
 0x358   : > { %v6626_v17 = vpop.permute.xlu1 %6625  ;;  %v4127_v35 = vsel %vm11711_vm6, %v4116_v51, %v6622_v57  ;;  %v4128_v23 = vsel %vm11714_vm9, %v4117_v50, %v6623_v39  ;;  %v6819_v57 = vpack.i.bf16 %v3241_v11, %v3242_v60  ;;  %v3291_v39 = vrot.slane %v6910_v63, 3  ;;  %vm11719_vm6 = vmmov %vm11718_vm10 }
 0x359   : > { %v4138_v45 = vsel %vm11712_vm8, %v4127_v35, %v6583_v42  ;;  %v6628_v25 = vunpack.i.h.bf16 %v6626_v17  ;;  %v6627_v28 = vunpack.i.l.bf16 %v6626_v17  ;;  %v10417_v13 = vpop.permute.xlu0 %6630  ;;  %v6911_v35 = vld [vmem:[%s7404_s16 + $0x58] sm:$0xff]  ;;  %v3345_v11 = vsel %vm1400_vm15, %v3342_v43, %v3344_v27  ;;  %s5429_s16 = smul.u32 13, %s11899_s29 }
 0x35a   : > { %v6632_v3 = vunpack.i.l.bf16 %v10417_v13  ;;  %6800 = vrot.lane.b32.xlu0 %v6799_v22, %s11644_s25  ;;  %v4166_v7 = vrot.slane %v4138_v45, 5  ;;  %v3293_v45 = vrot.slane %v6911_v35, 3  ;;  %vm11720_vm8 = vcmask 195584  }
 0x35b   : > { %v4052_v4 = vsel %vm1907_vm13, %v4041_v33, %v6627_v28  ;;  %v4053_v24 = vsel %vm1907_vm13, %v4042_v8, %v6628_v25  ;;  %vm11721_vm1 = vmmov %vm11720_vm8  ;;  %vm11722_vm9 = vcmask 228352   ;;  %v6633_v63 = vunpack.i.h.bf16 %v10417_v13 }
 0x35c   : > { %v6636_v44 = vpop.permute.xlu1 %6635  ;;  %v10435_v42 = vsel %vm11715_vm11, %v4128_v23, %v6632_v3  ;;  %v4167_v60 = vsel %vm1485_vm3, %v4164_v10, %v4166_v7  ;;  %v6814_v10 = vpack.i.bf16 %v10330_v61, %v10348_v32  ;;  %vm11723_vm11 = vmmov %vm11722_vm9 }
 0x35d   : > { %v6638_v6 = vunpack.i.h.bf16 %v6636_v44  ;;  %v6637_v47 = vunpack.i.l.bf16 %v6636_v44  ;;  %v6641_v31 = vpop.permute.xlu0 %6640  ;;  %v4168_v38 = vrot.slane %v10435_v42, 5  ;;  %v4528_v42 = vld [vmem:[%s11111_s4 + $0x10] sm:$0xff] }
 0x35e   : > { %v6643_v37 = vunpack.i.h.bf16 %v6641_v31  ;;  %v6642_v9 = vunpack.i.l.bf16 %v6641_v31  ;;  %6810 = vrot.lane.b32.xlu0 %v6809_v18, %s11566_s28  ;;  %v3377_v31 = vrot.slane %v9935_v14, 4  ;;  %s5430_s28 = smul.u32 104, %s11897_s30 }
 0x35f   : > { %v4063_v22 = vsel %vm1918_vm0, %v4052_v4, %v6637_v47  ;;  %v4064_v51 = vsel %vm1918_vm0, %v4053_v24, %v6638_v6  ;;  %v4169_v18 = vsel %vm1485_vm3, %v4166_v7, %v4168_v38  ;;  %v3292_v7 = vsel %vm1348_vm14, %v3289_v40, %v3291_v39 }
 0x360   : > { %v6646_v17 = vpop.permute.xlu1 %6645  ;;  %v4075_v50 = vsel %vm11716_vm4, %v4064_v51, %v6643_v37  ;;  %v4074_v8 = vsel %vm11717_vm7, %v4063_v22, %v6642_v9  ;;  %v6804_v3 = vpack.i.bf16 %v4169_v18, %v4167_v60  ;;  %v6829_v6 = vpack.i.bf16 %v3345_v11, %v10400_v56 }
 0x361   : > { %v6648_v25 = vunpack.i.h.bf16 %v6646_v17  ;;  %v6647_v28 = vunpack.i.l.bf16 %v6646_v17  ;;  %v6651_v33 = vpop.permute.xlu0 %6650  ;;  %v3294_v24 = vsel %vm1348_vm14, %v3291_v39, %v3293_v45  ;;  %v3378_v17 = vsel %vm1400_vm15, %v3344_v27, %v3377_v31 }
 0x362   : > { %v6653_v44 = vunpack.i.h.bf16 %v6651_v33  ;;  %v6652_v23 = vunpack.i.l.bf16 %v6651_v33  ;;  %6805 = vrot.lane.b32.xlu1 %v6804_v3, %s11668_s23  ;;  %6820 = vrot.lane.b32.xlu0 %v6819_v57, %s11637_s26  ;;  %v6824_v56 = vpack.i.bf16 %v3294_v24, %v3292_v7  ;;  %vm11724_vm14 = vcmask 261120   ;;  %v4532_v7 = vld [vmem:[%s11111_s4 + $0x30] sm:$0xff]  ;;  %v4533_v24 = vld [vmem:[%s11111_s4 + $0x38] sm:$0xff] }
 0x363   : > { %v4085_v36 = vsel %vm11718_vm10, %v4074_v8, %v6647_v28  ;;  %v4086_v43 = vsel %vm11719_vm6, %v4075_v50, %v6648_v25  ;;  %vm11725_vm4 = vmmov %vm11724_vm14  ;;  %vm11726_vm7 = vcmask 293888   ;;  %vm11728_vm6 = vcmask 326656  }
 0x364   : > { %v6656_v52 = vpop.permute.xlu1 %6655  ;;  %v4096_v22 = vsel %vm11720_vm8, %v4085_v36, %v6652_v23  ;;  %v4097_v51 = vsel %vm11721_vm1, %v4086_v43, %v6653_v44  ;;  %vm11727_vm10 = vmmov %vm11726_vm7  ;;  %v6834_v58 = vpack.i.bf16 %v3378_v17, %v3345_v11  ;;  %v4526_v11 = vld [vmem:[%s11111_s4] sm:$0xff]  ;;  %vm4732_vm8 = vcmask 60416   ;;  %v4529_v44 = vld [vmem:[%s11111_s4 + $0x18] sm:$0xff] }
 0x365   : > { %v6658_v47 = vunpack.i.h.bf16 %v6656_v52  ;;  %v6657_v4 = vunpack.i.l.bf16 %v6656_v52  ;;  %v6661_v37 = vpop.permute.xlu0 %6660  ;;  %vm11729_vm15 = vmmov %vm11728_vm6  ;;  %vm4745_vm1 = vcmask 58368   ;;  %v11730_v36 = vmov 0   ;;  %v4530_v43 = vld [vmem:[%s11111_s4 + $0x20] sm:$0xff] }
 0x366   : > { %v6663_v46 = vunpack.i.h.bf16 %v6661_v37  ;;  %v6662_v57 = vunpack.i.l.bf16 %v6661_v37  ;;  %6815 = vrot.lane.b32.xlu1 %v6814_v10, %s11636_s0  ;;  %6830 = vrot.lane.b32.xlu0 %v6829_v6, %s11641_s19  ;;  %v4531_v6 = vld [vmem:[%s11111_s4 + $0x28] sm:$0xff]  ;;  %v5988_v17 = vunpack.i.h.bf16 %v8482_v0  ;;  %v6322_v0 = vunpack.i.l.bf16 %v9964_v59 }
 0x367   : > { %v4107_v61 = vsel %vm11722_vm9, %v4096_v22, %v6657_v4  ;;  %v4108_v32 = vsel %vm11723_vm11, %v4097_v51, %v6658_v47  ;;  %v4534_v4 = vld [vmem:[%s11111_s4 + $0x40] sm:$0xff]  ;;  %v4535_v37 = vld [vmem:[%s11111_s4 + $0x48] sm:$0x3f]  ;;  %vm11734_vm11 = vcmask 162816  }
 0x368   : > { %v6666_v40 = vpop.permute.xlu1 %6665  ;;  %v4118_v39 = vsel %vm11724_vm14, %v4107_v61, %v6662_v57  ;;  %v4119_v35 = vsel %vm11725_vm4, %v4108_v32, %v6663_v46  ;;  %v11731_v61 = vld [vmem:[#allocation91_spill] sm:$0xff]  ;;  %v6197_v46 = vunpack.i.l.bf16 %v9642_v49  ;;  %vm11735_vm14 = vmmov %vm11734_vm11  ;;  %vm11737_vm4 = vcmask 195584  }
 0x369   : > { %v6668_v14 = vunpack.i.h.bf16 %v6666_v40  ;;  %v6667_v9 = vunpack.i.l.bf16 %v6666_v40  ;;  %v10480_v45 = vpop.permute.xlu0 %6670  ;;  %v5898_v32 = vunpack.i.h.bf16 %v11731_v61  ;;  %v5928_v40 = vunpack.i.h.bf16 %v8458_v41 }
 0x36a   : > { %v6672_v60 = vunpack.i.l.bf16 %v10480_v45  ;;  %6825 = vrot.lane.b32.xlu1 %v6824_v56, %s11640_s21  ;;  %s621_s21 = sadd.s32 %s5430_s28, %s5429_s16  ;;  %v6222_v56 = vunpack.i.l.bf16 %v9721_v30  ;;  %s5431_s28 = smul.u32 10, %s11899_s29 }
 0x36b   : > { %v4129_v25 = vsel %vm11726_vm7, %v4118_v39, %v6667_v9  ;;  %v4130_v28 = vsel %vm11727_vm10, %v4119_v35, %v6668_v14  ;;  %s5254_s19 = sshll.u32 %s621_s21, 2  ;;  %v5958_v14 = vunpack.i.h.bf16 %v8470_v62  ;;  %v6247_v9 = vunpack.i.l.bf16 %v9801_v19  ;;  %v6912_v35 = vld [vmem:[%s7235_s20] sm:$0xff]  ;;  %vm11739_vm7 = vmmov %vm11737_vm4  ;;  %s5432_s16 = smul.u32 80, %s11897_s30 }
 0x36c   : > { %v4140_v18 = vsel %vm11728_vm6, %v4129_v25, %v6633_v63  ;;  %v4141_v27 = vsel %vm11729_vm15, %v4130_v28, %v6672_v60  ;;  %s10506_s27 = scalar_lea.vmem %s11118_s11, %s5254_s19  ;;  %v6272_v63 = vunpack.i.l.bf16 %v9865_v20  ;;  %v6676_v39 = vpop.permute.xlu1 %6675  ;;  %v3409_v25 = vsel %vm1896_vm12, %v6912_v35, %v5898_v32  ;;  %v6913_v60 = vld [vmem:[%s7235_s20 + $0x8] sm:$0xff]  ;;  %s5256_s19 = sshll.u32 %s11897_s30, 3 }
 0x36d   : > { %v4170_v13 = vrot.slane %v4140_v18, 5  ;;  %v4172_v50 = vrot.slane %v4141_v27, 5  ;;  %4733 = vst.msk [vmem:[%s10506_s27] sm:$0xf] %vm4732_vm8, %v11730_v36  ;;  %4734 = vst.msk [vmem:[%s10506_s27 + $0x4] sm:$0xf] %vm4732_vm8, %v11730_v36  ;;  %v6018_v28 = vunpack.i.h.bf16 %v8502_v5  ;;  %v3410_v41 = vsel %vm1896_vm12, %v6913_v60, %v6197_v46  ;;  %s10999_s24 = sadd.s32 %s5256_s19, %s11899_s29  ;;  %s630_s0 = sadd.s32 %s5432_s16, %s5431_s28 }
 0x36e   : > { %6835 = vrot.lane.b32.xlu1 %v6834_v58, %s11644_s25  ;;  %4746 = vst.msk [vmem:[%s10506_s27 + $0x30] sm:$0x3] %vm4745_vm1, %v11730_v36  ;;  %v6297_v18 = vunpack.i.l.bf16 %v9917_v55  ;;  %v3419_v62 = vsel %vm1907_vm13, %v3409_v25, %v5928_v40  ;;  %v6048_v58 = vunpack.i.h.bf16 %v8600_v53  ;;  %vm11740_vm10 = vcmask 228352   ;;  %s5257_s22 = sshll.u32 %s10999_s24, 1 }
 0x36f   : > { %v4171_v8 = vsel %vm1485_vm3, %v4168_v38, %v4170_v13  ;;  %v4173_v33 = vsel %vm1485_vm3, %v4170_v13, %v4172_v50  ;;  %v4527_v38 = vld [vmem:[%s11111_s4 + $0x8] sm:$0xff]  ;;  %4735 = vst.msk [vmem:[%s10506_s27 + $0x8] sm:$0xf] %vm4732_vm8, %v11730_v36  ;;  %4736 = vst.msk [vmem:[%s10506_s27 + $0xc] sm:$0xf] %vm4732_vm8, %v11730_v36  ;;  %v3420_v13 = vsel %vm1907_vm13, %v3410_v41, %v6222_v56  ;;  %vm11732_vm3 = vcmask 130048   ;;  %s648_s18 = scalar_lea.vmem %s11121_s14, %s5257_s22 }
 0x370   : > { %v6839_v3 = vpack.i.bf16 %v4173_v33, %v4171_v8  ;;  %4737 = vst.msk [vmem:[%s10506_s27 + $0x10] sm:$0xf] %vm4732_vm8, %v11730_v36  ;;  %4738 = vst.msk [vmem:[%s10506_s27 + $0x14] sm:$0xf] %vm4732_vm8, %v11730_v36  ;;  %v3429_v50 = vsel %vm1918_vm0, %v3419_v62, %v5958_v14  ;;  %v6078_v8 = vunpack.i.h.bf16 %v8660_v29  ;;  %v3430_v5 = vsel %vm1918_vm0, %v3420_v13, %v6247_v9  ;;  %v6686_v61 = vpop.permute.xlu1 %6685 }
 0x371   : > { %4739 = vst.msk [vmem:[%s10506_s27 + $0x18] sm:$0xf] %vm4732_vm8, %v11730_v36  ;;  %4740 = vst.msk [vmem:[%s10506_s27 + $0x1c] sm:$0xf] %vm4732_vm8, %v11730_v36  ;;  %v6347_v33 = vunpack.i.l.bf16 %v10001_v2  ;;  %vm11742_vm15 = vcmask 261120   ;;  %v6688_v60 = vunpack.i.h.bf16 %v6686_v61  ;;  %v6687_v41 = vunpack.i.l.bf16 %v6686_v61 }
 0x372   : > { %4538 = vperm.xlu1 %5493, %v4526_v11   ;;  %6840 = vrot.lane.b32.xlu0 %v6839_v3, %s11668_s23  ;;  %4741 = vst.msk [vmem:[%s10506_s27 + $0x20] sm:$0xf] %vm4732_vm8, %v11730_v36  ;;  %4742 = vst.msk [vmem:[%s10506_s27 + $0x24] sm:$0xf] %vm4732_vm8, %v11730_v36  ;;  %v3439_v3 = vsel %vm11732_vm3, %v3429_v50, %v5988_v17  ;;  %s640_s23 = scalar_lea.vmem %s11120_s13, %s5257_s22 }
 0x373   : > { %4743 = vst.msk [vmem:[%s10506_s27 + $0x28] sm:$0xf] %vm4732_vm8, %v11730_v36  ;;  %4744 = vst.msk [vmem:[%s10506_s27 + $0x2c] sm:$0xf] %vm4732_vm8, %v11730_v36 }
 0x374   : > { %vm11733_vm9 = vmmov %vm11732_vm3  ;;  %vm11744_vm3 = vcmask 293888  }
 0x375   : > { %v3440_v53 = vsel %vm11733_vm9, %v3430_v5, %v6272_v63  ;;  %vm11741_vm6 = vmmov %vm11740_vm10 }
 0x376   : > { %4548 = vperm.xlu1 %5493, %v4528_v42   ;;  %4543 = vperm.xlu0 %5492, %v4527_v38   ;;  %v6108_v42 = vunpack.i.h.bf16 %v8729_v26  ;;  %v6372_v38 = vunpack.i.l.bf16 %v10040_v34  ;;  %v3450_v29 = vsel %vm11735_vm14, %v3440_v53, %v6297_v18  ;;  %vm11743_vm1 = vmmov %vm11742_vm15 }
 0x377   : > { %vm11745_vm9 = vmmov %vm11744_vm3 }
 0x379   : > { %v10558_v23 = vpop.f32.mrb[0].mxu0 }
 0x37a   : > { %4558 = vperm.xlu1 %5493, %v4530_v43   ;;  %4553 = vperm.xlu0 %5492, %v4529_v44   ;;  %v5373_v52 = vpop.f32.mrb[1].mxu0  ;;  %v3449_v43 = vsel %vm11734_vm11, %v3439_v3, %v6018_v28  ;;  %v6138_v44 = vunpack.i.h.bf16 %v8785_v21  ;;  %v6678_v21 = vunpack.i.h.bf16 %v6676_v39  ;;  %vm11746_vm11 = vcmask 326656  }
 0x37b   : > { %v10560_v10 = vpop.f32.mrb[2].mxu0  ;;  %v11736_v52 = vld [vmem:[#allocation34_spill] sm:$0xff]  ;;  %vm11747_vm14 = vmmov %vm11746_vm11 }
 0x37c   : > { %v5374_v47 = vpop.f32.mrb[3].mxu0 }
 0x37e   : > { %4568 = vperm.xlu1 %5493, %v4532_v7   ;;  %4563 = vperm.xlu0 %5492, %v4531_v6   ;;  %v6397_v7 = vunpack.i.l.bf16 %v11736_v52  ;;  %v6681_v6 = vpop.permute.xlu0 %6680 }
 0x37f   : > { %v6682_v35 = vunpack.i.l.bf16 %v6681_v6 }
 0x382   : > { %v10574_v31 = vpop.f32.mrb[4].mxu0  ;;  %4578 = vperm.xlu1 %5493, %v4534_v4   ;;  %4573 = vperm.xlu0 %5492, %v4533_v24   ;;  %v3459_v4 = vsel %vm11737_vm4, %v3449_v43, %v6048_v58  ;;  %v11738_v24 = vld [vmem:[#allocation11_spill] sm:$0xff]  ;;  %vm11748_vm4 = vcmask 359424   ;;  %v6691_v18 = vpop.permute.xlu0 %6690 }
 0x383   : > { %v5377_v22 = vpop.f32.mrb[5].mxu0  ;;  %v6168_v26 = vunpack.i.h.bf16 %v11738_v24  ;;  %v3469_v32 = vsel %vm11740_vm10, %v3459_v4, %v6078_v8  ;;  %v6696_v58 = vpop.permute.xlu1 %6695  ;;  %vm11750_vm10 = vcmask 392192   ;;  %v6914_v43 = vld [vmem:[%s7235_s20 + $0x10] sm:$0xff] }
 0x384   : > { %v10576_v51 = vpop.f32.mrb[6].mxu0  ;;  %v3460_v22 = vsel %vm11739_vm7, %v3450_v29, %v6322_v0  ;;  %v3479_v40 = vsel %vm11742_vm15, %v3469_v32, %v6108_v42  ;;  %vm11749_vm7 = vmmov %vm11748_vm4  ;;  %v6198_v0 = vunpack.i.h.bf16 %v9642_v49  ;;  %v6698_v53 = vunpack.i.h.bf16 %v6696_v58  ;;  %v11752_v29 = vld [vmem:[#allocation12_spill] sm:$0xff] }
 0x385   : > { %v5378_v57 = vpop.f32.mrb[7].mxu0  ;;  %v3470_v46 = vsel %vm11741_vm6, %v3460_v22, %v6347_v33  ;;  %v3489_v14 = vsel %vm11744_vm3, %v3479_v40, %v6138_v44  ;;  %vm11751_vm6 = vmmov %vm11750_vm10  ;;  %v6693_v33 = vunpack.i.h.bf16 %v6691_v18  ;;  %v6223_v49 = vunpack.i.h.bf16 %v9721_v30 }
 0x386   : > { %4583 = vperm.xlu0 %5492, %v4535_v37   ;;  %v6673_v37 = vunpack.i.h.bf16 %v10480_v45  ;;  %v6677_v57 = vunpack.i.l.bf16 %v6676_v39  ;;  %v3480_v56 = vsel %vm11743_vm1, %v3470_v46, %v6372_v38  ;;  %v3499_v17 = vsel %vm11746_vm11, %v3489_v14, %v6168_v26  ;;  %v11754_v46 = vld [vmem:[#allocation21_spill] sm:$0xff] }
 0x387   : > { %v3490_v9 = vsel %vm11745_vm9, %v3480_v56, %v6397_v7  ;;  %v6683_v45 = vunpack.i.h.bf16 %v6681_v6  ;;  %v6697_v38 = vunpack.i.l.bf16 %v6696_v58  ;;  %v3411_v44 = vsel %vm1896_vm12, %v6914_v43, %v6198_v0  ;;  %v11753_v6 = vld [vmem:[#allocation13_spill] sm:$0xff] }
 0x388   : > { %v3500_v63 = vsel %vm11747_vm14, %v3490_v9, %v6673_v37  ;;  %v3509_v28 = vsel %vm11748_vm4, %v3499_v17, %v6677_v57  ;;  %v6202_v7 = vunpack.i.l.bf16 %v11752_v29  ;;  %v6248_v32 = vunpack.i.h.bf16 %v9801_v19  ;;  %v11757_v14 = vld [vmem:[#allocation5_spill] sm:$0xff]  ;;  %v6706_v17 = vpop.permute.xlu1 %6705 }
 0x389   : > { %v3510_v39 = vsel %vm11749_vm7, %v3500_v63, %v6678_v21  ;;  %v3519_v8 = vsel %vm11750_vm10, %v3509_v28, %v6682_v35  ;;  %v6252_v21 = vunpack.i.l.bf16 %v11754_v46  ;;  %vm11755_vm15 = vcmask 490496   ;;  %v6915_v28 = vld [vmem:[%s7235_s20 + $0x18] sm:$0xff] }
 0x38a   : > { %v3520_v5 = vsel %vm11751_vm6, %v3510_v39, %v6683_v45  ;;  %v3529_v3 = vsel %vm2028_vm2, %v3519_v8, %v6687_v41  ;;  %vm11756_vm1 = vmmov %vm11755_vm15  ;;  %v6273_v56 = vunpack.i.h.bf16 %v9865_v20  ;;  %v6277_v9 = vunpack.i.l.bf16 %v11757_v14  ;;  %v11761_v8 = vld [vmem:[#allocation44_spill] sm:$0xff] }
 0x38b   : > { %v10599_v27 = vpop.f32.mrb[8].mxu0  ;;  %v3530_v42 = vsel %vm2028_vm2, %v3520_v5, %v6688_v60  ;;  %vm11758_vm3 = vcmask 523264   ;;  %v3412_v19 = vsel %vm1896_vm12, %v6915_v28, %v6202_v7  ;;  %v6298_v39 = vunpack.i.h.bf16 %v9917_v55  ;;  %v11760_v60 = vld [vmem:[#allocation9_spill] sm:$0xff]  ;;  %v11762_v55 = vld [vmem:[#allocation27_spill] sm:$0xff] }
 0x38c   : > { %v5381_v11 = vpop.f32.mrb[9].mxu0  ;;  %v3540_v26 = vsel %vm2039_vm5, %v3530_v42, %v6693_v33  ;;  %vm11759_vm9 = vmmov %vm11758_vm3  ;;  %v6302_v41 = vunpack.i.l.bf16 %v11760_v60  ;;  %v3421_v20 = vsel %vm1907_vm13, %v3411_v44, %v6223_v49  ;;  %v6327_v5 = vunpack.i.l.bf16 %v11761_v8  ;;  %v11766_v44 = vld [vmem:[#allocation31_spill] sm:$0xff] }
 0x38d   : > { %v10609_v36 = vpop.f32.mrb[10].mxu0  ;;  %v6692_v11 = vunpack.i.l.bf16 %v6691_v18  ;;  %v3550_v30 = vsel %vm11756_vm1, %v3540_v26, %v6698_v53  ;;  %v3431_v33 = vsel %vm1918_vm0, %v3421_v20, %v6248_v32  ;;  %v6352_v42 = vunpack.i.l.bf16 %v11762_v55 }
 0x38e   : > { %v5382_v47 = vpop.f32.mrb[11].mxu0  ;;  %vm11763_vm11 = vcmask 883712   ;;  %vm11764_vm14 = vcmask 130048   ;;  %v6373_v43 = vunpack.i.h.bf16 %v10040_v34  ;;  %vm11767_vm7 = vmmov 0  }
 0x38f   : > { %v6227_v47 = vunpack.i.l.bf16 %v11753_v6  ;;  %v3539_v24 = vsel %vm2039_vm5, %v3529_v3, %v6692_v11  ;;  %v6348_v3 = vunpack.i.h.bf16 %v10001_v2  ;;  %v3441_v53 = vsel %vm11764_vm14, %v3431_v33, %v6273_v56  ;;  %vm11765_vm4 = vmmov %vm11764_vm14 }
 0x390   : > { %v3549_v57 = vsel %vm11755_vm15, %v3539_v24, %v6697_v38  ;;  %vm11768_vm10 = vcmask 162816   ;;  %v6398_v2 = vunpack.i.h.bf16 %v11736_v52  ;;  %v6716_v24 = vpop.permute.xlu1 %6715  ;;  %vm11771_vm15 = vcmask 195584  }
 0x391   : > { %v3422_v0 = vsel %vm1907_vm13, %v3412_v19, %v6227_v47  ;;  %v3451_v7 = vsel %vm11768_vm10, %v3441_v53, %v6298_v39  ;;  %vm11769_vm6 = vmmov %vm11768_vm10  ;;  %v11770_v47 = vld [vmem:[#allocation18_spill] sm:$0xff]  ;;  %v6707_v34 = vunpack.i.l.bf16 %v6706_v17  ;;  %v6717_v19 = vunpack.i.l.bf16 %v6716_v24 }
 0x392   : > { %v3432_v11 = vsel %vm1918_vm0, %v3422_v0, %v6252_v21  ;;  %vm11772_vm1 = vmmov %vm11771_vm15  ;;  %v6203_v0 = vunpack.i.h.bf16 %v11752_v29  ;;  %v6228_v29 = vunpack.i.h.bf16 %v11753_v6  ;;  %v11790_v6 = vld [vmem:[#allocation23_spill] sm:$0xff] }
 0x393   : > { %v10627_v25 = vpop.f32.mrb[12].mxu0  ;;  %v3442_v38 = vsel %vm11765_vm4, %v3432_v11, %v6277_v9  ;;  %vm11777_vm4 = vcmask 293888  }
 0x394   : > { %v5385_v62 = vpop.f32.mrb[13].mxu0  ;;  %v3452_v49 = vsel %vm11769_vm6, %v3442_v38, %v6302_v41  ;;  %vm11778_vm10 = vmmov %vm11777_vm4  ;;  %vm11779_vm6 = vcmask 326656  }
 0x395   : > { %v10631_v13 = vpop.f32.mrb[14].mxu0 }
 0x396   : > { %v5386_v50 = vpop.f32.mrb[15].mxu0 }
 0x397   : > { %v6701_v4 = vpop.permute.xlu0 %6700  ;;  %v6323_v50 = vunpack.i.h.bf16 %v9964_v59  ;;  %v6377_v59 = vunpack.i.l.bf16 %v11766_v44 }
 0x398   : > { %v6703_v22 = vunpack.i.h.bf16 %v6701_v4  ;;  %v6702_v37 = vunpack.i.l.bf16 %v6701_v4  ;;  %v6402_v4 = vunpack.i.l.bf16 %v11770_v47 }
 0x399   : > { %v3461_v26 = vsel %vm11771_vm15, %v3451_v7, %v6323_v50  ;;  %vm11780_vm15 = vmmov %vm11779_vm6  ;;  %v11785_v7 = vld [vmem:[#allocation15_spill] sm:$0xff] }
 0x39a   : > { %v4204_v63 = vsel %vm11758_vm3, %v3549_v57, %v6702_v37  ;;  %v4205_v45 = vsel %vm11759_vm9, %v3550_v30, %v6703_v22  ;;  %v3462_v22 = vsel %vm11772_vm1, %v3452_v49, %v6327_v5  ;;  %v6708_v37 = vunpack.i.h.bf16 %v6706_v17 }
 0x39b   : > { %v10645_v61 = vpop.f32.mrb[16].mxu0  ;;  %v4214_v18 = vpack.c.bf16 %v4205_v45, %v4204_v63  ;;  %v6711_v62 = vpop.permute.xlu0 %6710  ;;  %vm11773_vm3 = vcmask 228352   ;;  %v6718_v17 = vunpack.i.h.bf16 %v6716_v24  ;;  %vm11781_vm1 = vcmask 359424  }
 0x39c   : > { %v5389_v40 = vpop.f32.mrb[17].mxu0  ;;  %v3471_v21 = vsel %vm11773_vm3, %v3461_v26, %v6348_v3  ;;  %vm11774_vm9 = vmmov %vm11773_vm3  ;;  %v6713_v30 = vunpack.i.h.bf16 %v6711_v62  ;;  %v6207_v49 = vunpack.i.l.bf16 %v11785_v7 }
 0x39d   : > { %v10655_v35 = vpop.f32.mrb[18].mxu0  ;;  %5406 = vmatmul.mubr.msk.bf16.vlgmr.msra.gmra.mrb[0].mxu1 %vm11763_vm11, %v4214_v18  ;;  %v3472_v57 = vsel %vm11774_vm9, %v3462_v22, %v6352_v42  ;;  %v6712_v40 = vunpack.i.l.bf16 %v6711_v62  ;;  %vm11775_vm11 = vcmask 261120   ;;  %vm11782_vm3 = vmmov %vm11781_vm1  ;;  %vm11783_vm9 = vcmask 392192  }
 0x39e   : > { %v5390_v58 = vpop.f32.mrb[19].mxu0  ;;  %5409 = vmatprep.mubr.msk.bf16.mxu1 %vm11767_vm7, %v11564_v12  ;;  %v3481_v56 = vsel %vm11775_vm11, %v3471_v21, %v6373_v43  ;;  %vm11776_vm14 = vmmov %vm11775_vm11  ;;  %v6916_v43 = vld [vmem:[%s7235_s20 + $0x20] sm:$0xff]  ;;  %v11787_v21 = vld [vmem:[#allocation8_spill] sm:$0xff] }
 0x39f   : > { %v6721_v32 = vpop.permute.xlu0 %6720  ;;  %v3482_v52 = vsel %vm11776_vm14, %v3472_v57, %v6377_v59  ;;  %v3491_v9 = vsel %vm11777_vm4, %v3481_v56, %v6398_v2  ;;  %v6726_v58 = vpop.permute.xlu1 %6725  ;;  %vm11784_vm11 = vmmov %vm11783_vm9  ;;  %v3413_v59 = vsel %vm1896_vm12, %v6916_v43, %v6203_v0  ;;  %v11786_v2 = vld [vmem:[#allocation19_spill] sm:$0xff]  ;;  %v6257_v57 = vunpack.i.l.bf16 %v11787_v21 }
 0x3a0   : > { %v3492_v63 = vsel %vm11778_vm10, %v3482_v52, %v6402_v4  ;;  %v3501_v45 = vsel %vm11779_vm6, %v3491_v9, %v6707_v34  ;;  %v6723_v18 = vunpack.i.h.bf16 %v6721_v32  ;;  %v6722_v62 = vunpack.i.l.bf16 %v6721_v32 }
 0x3a1   : > { %v3502_v28 = vsel %vm11780_vm15, %v3492_v63, %v6708_v37  ;;  %v3511_v39 = vsel %vm11781_vm1, %v3501_v45, %v6712_v40  ;;  %v6728_v33 = vunpack.i.h.bf16 %v6726_v58  ;;  %v6727_v11 = vunpack.i.l.bf16 %v6726_v58  ;;  %v6917_v45 = vld [vmem:[%s7235_s20 + $0x28] sm:$0xff] }
 0x3a2   : > { %v3512_v41 = vsel %vm11782_vm3, %v3502_v28, %v6713_v30  ;;  %v3521_v50 = vsel %vm11783_vm9, %v3511_v39, %v6717_v19  ;;  %v6232_v4 = vunpack.i.l.bf16 %v11786_v2  ;;  %v6253_v32 = vunpack.i.h.bf16 %v11754_v46  ;;  %v11793_v46 = vld [vmem:[#allocation24_spill] sm:$0xff] }
 0x3a3   : > { %v6731_v20 = vpop.permute.xlu0 %6730  ;;  %v3522_v5 = vsel %vm11784_vm11, %v3512_v41, %v6718_v17  ;;  %v3531_v3 = vsel %vm2028_vm2, %v3521_v50, %v6722_v62  ;;  %vm11788_vm14 = vcmask 490496   ;;  %v6278_v56 = vunpack.i.h.bf16 %v11757_v14 }
 0x3a4   : > { %v3532_v42 = vsel %vm2028_vm2, %v3522_v5, %v6723_v18  ;;  %v6733_v53 = vunpack.i.h.bf16 %v6731_v20  ;;  %v6732_v38 = vunpack.i.l.bf16 %v6731_v20  ;;  %v3541_v26 = vsel %vm2039_vm5, %v3531_v3, %v6727_v11  ;;  %vm11789_vm4 = vmmov %vm11788_vm14  ;;  %v11794_v20 = vld [vmem:[#allocation25_spill] sm:$0xff] }
 0x3a5   : > { %v3542_v22 = vsel %vm2039_vm5, %v3532_v42, %v6728_v33  ;;  %v6282_v52 = vunpack.i.l.bf16 %v11790_v6  ;;  %vm11791_vm10 = vcmask 523264   ;;  %v3414_v28 = vsel %vm1896_vm12, %v6917_v45, %v6207_v49  ;;  %v11802_v49 = vld [vmem:[#allocation35_spill] sm:$0xff] }
 0x3a6   : > { %v3551_v30 = vsel %vm11788_vm14, %v3541_v26, %v6732_v38  ;;  %v3552_v40 = vsel %vm11789_vm4, %v3542_v22, %v6733_v53  ;;  %vm11792_vm6 = vmmov %vm11791_vm10  ;;  %v6303_v17 = vunpack.i.h.bf16 %v11760_v60  ;;  %v6307_v19 = vunpack.i.l.bf16 %v11793_v46  ;;  %v11795_v60 = vld [vmem:[#allocation28_spill] sm:$0xff] }
 0x3a7   : > { %v6741_v39 = vpop.permute.xlu0 %6740  ;;  %v3423_v62 = vsel %vm1907_vm13, %v3413_v59, %v6228_v29  ;;  %v3424_v14 = vsel %vm1907_vm13, %v3414_v28, %v6232_v4  ;;  %v6328_v58 = vunpack.i.h.bf16 %v11761_v8  ;;  %v6332_v0 = vunpack.i.l.bf16 %v11794_v20  ;;  %v11799_v38 = vld [vmem:[#allocation32_spill] sm:$0xff] }
 0x3a8   : > { %v3433_v50 = vsel %vm1918_vm0, %v3423_v62, %v6253_v32  ;;  %v3434_v5 = vsel %vm1918_vm0, %v3424_v14, %v6257_v57  ;;  %v6353_v33 = vunpack.i.h.bf16 %v11762_v55  ;;  %v6357_v11 = vunpack.i.l.bf16 %v11795_v60  ;;  %v11815_v14 = vld [vmem:[#allocation16_spill] sm:$0xff] }
 0x3a9   : > { %vm11796_vm15 = vcmask 883712   ;;  %vm11797_vm1 = vcmask 130048   ;;  %v6378_v53 = vunpack.i.h.bf16 %v11766_v44  ;;  %v6382_v8 = vunpack.i.l.bf16 %v11799_v38 }
 0x3aa   : > { %v3443_v3 = vsel %vm11797_vm1, %v3433_v50, %v6278_v56  ;;  %vm11798_vm3 = vmmov %vm11797_vm1  ;;  %vm11800_vm9 = vcmask 162816   ;;  %v6403_v55 = vunpack.i.h.bf16 %v11770_v47  ;;  %v6407_v29 = vunpack.i.l.bf16 %v11802_v49 }
 0x3ab   : > { %v3444_v42 = vsel %vm11798_vm3, %v3434_v5, %v6282_v52  ;;  %v3453_v43 = vsel %vm11800_vm9, %v3443_v3, %v6303_v17  ;;  %vm11801_vm11 = vmmov %vm11800_vm9  ;;  %v6751_v4 = vpop.permute.xlu0 %6750  ;;  %vm11803_vm14 = vcmask 195584   ;;  %v6743_v22 = vunpack.i.h.bf16 %v6741_v39 }
 0x3ac   : > { %v6736_v24 = vpop.permute.xlu1 %6735  ;;  %v3454_v59 = vsel %vm11801_vm11, %v3444_v42, %v6307_v19  ;;  %vm11804_vm4 = vmmov %vm11803_vm14  ;;  %v6742_v44 = vunpack.i.l.bf16 %v6741_v39  ;;  %vm11809_vm3 = vcmask 293888   ;;  %vm11811_vm11 = vcmask 326656  }
 0x3ad   : > { %v6738_v37 = vunpack.i.h.bf16 %v6736_v24  ;;  %v6737_v34 = vunpack.i.l.bf16 %v6736_v24  ;;  %v3463_v24 = vsel %vm11803_vm14, %v3453_v43, %v6328_v58  ;;  %v3464_v26 = vsel %vm11804_vm4, %v3454_v59, %v6332_v0  ;;  %vm11810_vm9 = vmmov %vm11809_vm3  ;;  %v6918_v59 = vld [vmem:[%s7235_s20 + $0x30] sm:$0xff] }
 0x3ae   : > { %vm11812_vm14 = vmmov %vm11811_vm11  ;;  %v6753_v45 = vunpack.i.h.bf16 %v6751_v4  ;;  %v6752_v28 = vunpack.i.l.bf16 %v6751_v4  ;;  %vm11813_vm4 = vcmask 359424   ;;  %v6208_v62 = vunpack.i.h.bf16 %v11785_v7  ;;  %v6920_v4 = vld [vmem:[%s7235_s20 + $0x38] sm:$0xff] }
 0x3af   : > { %v4206_v9 = vsel %vm11791_vm10, %v3551_v30, %v6737_v34  ;;  %v4207_v63 = vsel %vm11792_vm6, %v3552_v40, %v6738_v37  ;;  %vm11805_vm10 = vcmask 228352   ;;  %v6213_v58 = vunpack.i.h.bf16 %v11815_v14 }
 0x3b0   : > { %v4215_v41 = vpack.c.bf16 %v4207_v63, %v4206_v9  ;;  %v6746_v18 = vpop.permute.xlu1 %6745  ;;  %v3473_v34 = vsel %vm11805_vm10, %v3463_v24, %v6353_v33  ;;  %vm11806_vm6 = vmmov %vm11805_vm10  ;;  %v6212_v50 = vunpack.i.l.bf16 %v11815_v14  ;;  %v3415_v7 = vsel %vm1896_vm12, %v6918_v59, %v6208_v62 }
 0x3b1   : > { %v3474_v32 = vsel %vm11806_vm6, %v3464_v26, %v6357_v11  ;;  %v6748_v57 = vunpack.i.h.bf16 %v6746_v18  ;;  %v6747_v30 = vunpack.i.l.bf16 %v6746_v18  ;;  %vm11814_vm10 = vmmov %vm11813_vm4  ;;  %v6761_v18 = vpop.permute.xlu0 %6760  ;;  %vm11816_vm6 = vcmask 392192   ;;  %v11818_v26 = vld [vmem:[#allocation17_spill] sm:$0xff] }
 0x3b2   : > { %5410 = vmatmul.mubr.msk.bf16.gmra.mrb[4].mxu1 %vm11796_vm15, %v4215_v41  ;;  %vm11807_vm15 = vcmask 261120   ;;  %v6763_v11 = vunpack.i.h.bf16 %v6761_v18  ;;  %v6762_v3 = vunpack.i.l.bf16 %v6761_v18  ;;  %v3416_v24 = vsel %vm1896_vm12, %v6920_v4, %v6212_v50  ;;  %v11832_v4 = vld [vmem:[#allocation33_spill] sm:$0xff] }
 0x3b3   : > { %5413 = vmatprep.mubr.msk.bf16.mxu1 %vm11767_vm7, %v11564_v12  ;;  %v3483_v40 = vsel %vm11807_vm15, %v3473_v34, %v6378_v53  ;;  %vm11808_vm1 = vmmov %vm11807_vm15  ;;  %v6308_v62 = vunpack.i.h.bf16 %v11793_v46  ;;  %v11828_v46 = vld [vmem:[#allocation29_spill] sm:$0xff] }
 0x3b4   : > { %v6756_v37 = vpop.permute.xlu1 %6755  ;;  %v3484_v47 = vsel %vm11808_vm1, %v3474_v32, %v6382_v8  ;;  %v3493_v56 = vsel %vm11809_vm3, %v3483_v40, %v6403_v55  ;;  %vm11817_vm15 = vmmov %vm11816_vm6  ;;  %v6919_v55 = vld [vmem:[%s7235_s20 + $0x40] sm:$0xff]  ;;  %vm11821_vm1 = vcmask 490496  }
 0x3b5   : > { %v3494_v52 = vsel %vm11810_vm9, %v3484_v47, %v6407_v29  ;;  %v3503_v9 = vsel %vm11811_vm11, %v3493_v56, %v6742_v44  ;;  %v6758_v39 = vunpack.i.h.bf16 %v6756_v37  ;;  %v6757_v41 = vunpack.i.l.bf16 %v6756_v37  ;;  %v11819_v37 = vld [vmem:[#allocation20_spill] sm:$0xff]  ;;  %vm11822_vm3 = vmmov %vm11821_vm1 }
 0x3b6   : > { %v3504_v63 = vsel %vm11812_vm14, %v3494_v52, %v6743_v22  ;;  %v3513_v17 = vsel %vm11813_vm4, %v3503_v9, %v6747_v30  ;;  %v10758_v29 = vsel %vm1896_vm12, %v6919_v55, %v6213_v58  ;;  %v6217_v22 = vunpack.i.l.bf16 %v11818_v26  ;;  %v11820_v52 = vld [vmem:[#allocation22_spill] sm:$0xff] }
 0x3b7   : > { %v3514_v19 = vsel %vm11814_vm10, %v3504_v63, %v6748_v57  ;;  %v3523_v5 = vsel %vm11816_vm6, %v3513_v17, %v6752_v28  ;;  %v6233_v44 = vunpack.i.h.bf16 %v11786_v2  ;;  %v6237_v34 = vunpack.i.l.bf16 %v11819_v37  ;;  %v11823_v2 = vld [vmem:[#allocation7_spill] sm:$0xff] }
 0x3b8   : > { %v6766_v0 = vpop.permute.xlu1 %6765  ;;  %v3524_v33 = vsel %vm11817_vm15, %v3514_v19, %v6753_v45  ;;  %v3533_v42 = vsel %vm2028_vm2, %v3523_v5, %v6757_v41  ;;  %v6258_v56 = vunpack.i.h.bf16 %v11787_v21  ;;  %v6262_v9 = vunpack.i.l.bf16 %v11820_v52  ;;  %v6921_v41 = vld [vmem:[%s7235_s20 + $0x48] sm:$0xff] }
 0x3b9   : > { %v3534_v53 = vsel %vm2028_vm2, %v3524_v33, %v6758_v39  ;;  %v6768_v8 = vunpack.i.h.bf16 %v6766_v0  ;;  %v6767_v43 = vunpack.i.l.bf16 %v6766_v0  ;;  %v3543_v57 = vsel %vm2039_vm5, %v3533_v42, %v6762_v3  ;;  %v11826_v21 = vld [vmem:[#allocation10_spill] sm:$0xff] }
 0x3ba   : > { %v3544_v30 = vsel %vm2039_vm5, %v3534_v53, %v6763_v11  ;;  %v6283_v28 = vunpack.i.h.bf16 %v11790_v6  ;;  %v6287_v17 = vunpack.i.l.bf16 %v11823_v2  ;;  %vm11824_vm9 = vcmask 523264   ;;  %v11827_v11 = vld [vmem:[#allocation26_spill] sm:$0xff] }
 0x3bb   : > { %v3553_v63 = vsel %vm11821_vm1, %v3543_v57, %v6767_v43  ;;  %v3554_v45 = vsel %vm11822_vm3, %v3544_v30, %v6768_v8  ;;  %vm11825_vm11 = vmmov %vm11824_vm9  ;;  %v3418_v18 = vsel %vm1896_vm12, %v6921_v41, %v6217_v22  ;;  %v6312_v14 = vunpack.i.l.bf16 %v11826_v21  ;;  %v11835_v22 = vld [vmem:[#allocation36_spill] sm:$0xff]  ;;  %v11843_v41 = vld [vmem:[#allocation6_spill] sm:$0xff] }
 0x3bc   : > { %v6776_v58 = vpop.permute.xlu1 %6775  ;;  %v3425_v5 = vsel %vm1907_vm13, %v3415_v7, %v6233_v44  ;;  %v3426_v6 = vsel %vm1907_vm13, %v3416_v24, %v6237_v34  ;;  %v6333_v33 = vunpack.i.h.bf16 %v11794_v20  ;;  %v6337_v3 = vunpack.i.l.bf16 %v11827_v11 }
 0x3bd   : > { %v3435_v42 = vsel %vm1918_vm0, %v3425_v5, %v6258_v56  ;;  %v3436_v53 = vsel %vm1918_vm0, %v3426_v6, %v6262_v9  ;;  %v6358_v8 = vunpack.i.h.bf16 %v11795_v60  ;;  %v6362_v43 = vunpack.i.l.bf16 %v11828_v46 }
 0x3be   : > { %vm11829_vm12 = vcmask 883712   ;;  %vm11830_vm14 = vcmask 130048   ;;  %v6383_v55 = vunpack.i.h.bf16 %v11799_v38  ;;  %v6387_v20 = vunpack.i.l.bf16 %v11832_v4 }
 0x3bf   : > { %v3445_v59 = vsel %vm11830_vm14, %v3435_v42, %v6283_v28  ;;  %vm11831_vm4 = vmmov %vm11830_vm14  ;;  %vm11833_vm10 = vcmask 162816   ;;  %v6408_v60 = vunpack.i.h.bf16 %v11802_v49  ;;  %v6412_v44 = vunpack.i.l.bf16 %v11835_v22  ;;  %v11840_v28 = vld [vmem:[#allocation14_spill] sm:$0xff] }
 0x3c0   : > { %v6771_v32 = vpop.permute.xlu0 %6770  ;;  %v3446_v7 = vsel %vm11831_vm4, %v3436_v53, %v6287_v17  ;;  %v3455_v24 = vsel %vm11833_vm10, %v3445_v59, %v6308_v62  ;;  %vm11834_vm6 = vmmov %vm11833_vm10  ;;  %v6786_v34 = vpop.permute.xlu1 %6785  ;;  %vm11836_vm15 = vcmask 195584   ;;  %v6778_v38 = vunpack.i.h.bf16 %v6776_v58 }
 0x3c1   : > { %v6773_v40 = vunpack.i.h.bf16 %v6771_v32  ;;  %v6772_v47 = vunpack.i.l.bf16 %v6771_v32  ;;  %v3456_v26 = vsel %vm11834_vm6, %v3446_v7, %v6312_v14  ;;  %v3465_v57 = vsel %vm11836_vm15, %v3455_v24, %v6333_v33  ;;  %vm11837_vm1 = vmmov %vm11836_vm15 }
 0x3c2   : > { %v3466_v30 = vsel %vm11837_vm1, %v3456_v26, %v6337_v3  ;;  %vm11838_vm3 = vcmask 228352   ;;  %v6242_v49 = vunpack.i.l.bf16 %v11840_v28  ;;  %v6267_v62 = vunpack.i.l.bf16 %v11843_v41 }
 0x3c3   : > { %v4208_v19 = vsel %vm11824_vm9, %v3553_v63, %v6772_v47  ;;  %v4209_v39 = vsel %vm11825_vm11, %v3554_v45, %v6773_v40  ;;  %v6777_v40 = vunpack.i.l.bf16 %v6776_v58  ;;  %v3475_v47 = vsel %vm11838_vm3, %v3465_v57, %v6358_v8  ;;  %vm11839_vm9 = vmmov %vm11838_vm3 }
 0x3c4   : > { %v4216_v0 = vpack.c.bf16 %v4209_v39, %v4208_v19  ;;  %v6781_v50 = vpop.permute.xlu0 %6780  ;;  %v3476_v56 = vsel %vm11839_vm9, %v3466_v30, %v6362_v43  ;;  %v6238_v45 = vunpack.i.h.bf16 %v11819_v37  ;;  %vm11841_vm11 = vcmask 261120   ;;  %v6796_v53 = vpop.permute.xlu1 %6795 }
 0x3c5   : > { %v6783_v9 = vunpack.i.h.bf16 %v6781_v50  ;;  %v6782_v63 = vunpack.i.l.bf16 %v6781_v50  ;;  %v3485_v17 = vsel %vm11841_vm11, %v3475_v47, %v6383_v55  ;;  %v6263_v39 = vunpack.i.h.bf16 %v11820_v52 }
 0x3c6   : > { %5414 = vmatmul.mubr.msk.bf16.gmra.mrb[8].mxu1 %vm11829_vm12, %v4216_v0  ;;  %vm11842_vm12 = vmmov %vm11841_vm11  ;;  %vm11844_vm14 = vcmask 293888   ;;  %vm11846_vm10 = vcmask 326656   ;;  %v6788_v5 = vunpack.i.h.bf16 %v6786_v34  ;;  %v6787_v37 = vunpack.i.l.bf16 %v6786_v34 }
 0x3c7   : > { %5417 = vmatprep.mubr.msk.bf16.mxu1 %vm11767_vm7, %v11564_v12  ;;  %v3486_v19 = vsel %vm11842_vm12, %v3476_v56, %v6387_v20  ;;  %v3495_v14 = vsel %vm11844_vm14, %v3485_v17, %v6408_v60  ;;  %vm11845_vm4 = vmmov %vm11844_vm14  ;;  %vm11848_vm15 = vcmask 359424   ;;  %v3427_v8 = vsel %vm1907_vm13, %v10758_v29, %v6238_v45  ;;  %v11855_v17 = vld [vmem:[#allocation30_spill] sm:$0xff] }
 0x3c8   : > { %v6791_v32 = vpop.permute.xlu0 %6790  ;;  %v3496_v58 = vsel %vm11845_vm4, %v3486_v19, %v6412_v44  ;;  %v3505_v0 = vsel %vm11846_vm10, %v3495_v14, %v6777_v40  ;;  %vm11847_vm6 = vmmov %vm11846_vm10  ;;  %v3428_v43 = vsel %vm1907_vm13, %v3418_v18, %v6242_v49  ;;  %v6288_v59 = vunpack.i.h.bf16 %v11823_v2 }
 0x3c9   : > { %v3506_v50 = vsel %vm11847_vm6, %v3496_v58, %v6778_v38  ;;  %v3515_v6 = vsel %vm11848_vm15, %v3505_v0, %v6782_v63  ;;  %vm11849_vm1 = vmmov %vm11848_vm15  ;;  %v6793_v3 = vunpack.i.h.bf16 %v6791_v32  ;;  %v6792_v42 = vunpack.i.l.bf16 %v6791_v32 }
 0x3ca   : > { %v3516_v33 = vsel %vm11849_vm1, %v3506_v50, %v6783_v9  ;;  %v6292_v7 = vunpack.i.l.bf16 %v9908_v16  ;;  %v3437_v55 = vsel %vm1918_vm0, %v3427_v8, %v6263_v39  ;;  %v3438_v20 = vsel %vm1918_vm0, %v3428_v43, %v6267_v62 }
 0x3cb   : > { %v6313_v24 = vunpack.i.h.bf16 %v11826_v21  ;;  %vm11850_vm3 = vcmask 392192   ;;  %v6798_v44 = vunpack.i.h.bf16 %v6796_v53  ;;  %v6797_v34 = vunpack.i.l.bf16 %v6796_v53 }
 0x3cc   : > { %v6801_v52 = vpop.permute.xlu0 %6800  ;;  %v3525_v26 = vsel %vm11850_vm3, %v3515_v6, %v6787_v37  ;;  %vm11851_vm9 = vmmov %vm11850_vm3  ;;  %vm11852_vm11 = vcmask 130048   ;;  %vm11854_vm14 = vcmask 162816   ;;  %v6317_v21 = vunpack.i.l.bf16 %v9953_v1 }
 0x3cd   : > { %v3526_v60 = vsel %vm11851_vm9, %v3516_v33, %v6788_v5  ;;  %v3535_v29 = vsel %vm2028_vm2, %v3525_v26, %v6792_v42  ;;  %v6803_v32 = vunpack.i.h.bf16 %v6801_v52  ;;  %v6802_v2 = vunpack.i.l.bf16 %v6801_v52  ;;  %vm11853_vm12 = vmmov %vm11852_vm11 }
 0x3ce   : > { %v3536_v18 = vsel %vm2028_vm2, %v3526_v60, %v6793_v3  ;;  %v3447_v16 = vsel %vm11852_vm11, %v3437_v55, %v6288_v59  ;;  %v3448_v57 = vsel %vm11853_vm12, %v3438_v20, %v6292_v7  ;;  %v6338_v38 = vunpack.i.h.bf16 %v11827_v11  ;;  %vm11860_vm15 = vmmov %vm11854_vm14 }
 0x3cf   : > { %v3457_v30 = vsel %vm11854_vm14, %v3447_v16, %v6313_v24  ;;  %v6342_v40 = vunpack.i.l.bf16 %v9994_v48  ;;  %v3545_v9 = vsel %vm2039_vm5, %v3535_v29, %v6797_v34  ;;  %v3546_v63 = vsel %vm2039_vm5, %v3536_v18, %v6798_v44 }
 0x3d0   : > { %v6811_v47 = vpop.permute.xlu0 %6810  ;;  %v6363_v49 = vunpack.i.h.bf16 %v11828_v46  ;;  %v6367_v19 = vunpack.i.l.bf16 %v11855_v17  ;;  %vm11856_vm0 = vcmask 490496   ;;  %v6388_v11 = vunpack.i.h.bf16 %v11832_v4 }
 0x3d1   : > { %v3555_v39 = vsel %vm11856_vm0, %v3545_v9, %v6802_v2  ;;  %vm11857_vm4 = vmmov %vm11856_vm0  ;;  %v6392_v48 = vunpack.i.l.bf16 %v10075_v54  ;;  %vm11858_vm10 = vcmask 523264   ;;  %v3458_v14 = vsel %vm11860_vm15, %v3448_v57, %v6317_v21 }
 0x3d2   : > { %v3556_v1 = vsel %vm11857_vm4, %v3546_v63, %v6803_v32  ;;  %vm11859_vm6 = vmmov %vm11858_vm10  ;;  %v6413_v58 = vunpack.i.h.bf16 %v11835_v22  ;;  %v6417_v46 = vunpack.i.l.bf16 %v10104_v15  ;;  %vm11861_vm1 = vcmask 195584  }
 0x3d3   : > { %v3467_v37 = vsel %vm11861_vm1, %v3457_v30, %v6338_v38  ;;  %vm11862_vm3 = vmmov %vm11861_vm1  ;;  %v6813_v4 = vunpack.i.h.bf16 %v6811_v47  ;;  %v6812_v33 = vunpack.i.l.bf16 %v6811_v47  ;;  %vm11863_vm9 = vcmask 228352  }
 0x3d4   : > { %v6806_v56 = vpop.permute.xlu1 %6805  ;;  %v6821_v5 = vpop.permute.xlu0 %6820  ;;  %v3468_v6 = vsel %vm11862_vm3, %v3458_v14, %v6342_v40  ;;  %v3477_v54 = vsel %vm11863_vm9, %v3467_v37, %v6363_v49  ;;  %vm11864_vm11 = vmmov %vm11863_vm9  ;;  %vm11865_vm12 = vcmask 883712   ;;  %vm11866_vm14 = vcmask 261120  }
 0x3d5   : > { %v6808_v45 = vunpack.i.h.bf16 %v6806_v56  ;;  %v6807_v28 = vunpack.i.l.bf16 %v6806_v56  ;;  %v3478_v3 = vsel %vm11864_vm11, %v3468_v6, %v6367_v19  ;;  %v3487_v22 = vsel %vm11866_vm14, %v3477_v54, %v6388_v11  ;;  %vm11867_vm0 = vmmov %vm11866_vm14  ;;  %v5265_v19 = vld [vmem:[%s11115_s8] ss:$0 sm:$0xff] }
 0x3d6   : > { %v3488_v15 = vsel %vm11867_vm0, %v3478_v3, %v6392_v48  ;;  %vm11868_vm4 = vcmask 293888   ;;  %v6823_v55 = vunpack.i.h.bf16 %v6821_v5  ;;  %v6822_v20 = vunpack.i.l.bf16 %v6821_v5 }
 0x3d7   : > { %v4210_v41 = vsel %vm11858_vm10, %v3555_v39, %v6807_v28  ;;  %v4211_v62 = vsel %vm11859_vm6, %v3556_v1, %v6808_v45  ;;  %v3497_v52 = vsel %vm11868_vm4, %v3487_v22, %v6413_v58  ;;  %vm11869_vm10 = vmmov %vm11868_vm4  ;;  %vm11870_vm6 = vcmask 326656  }
 0x3d8   : > { %v4217_v0 = vpack.c.bf16 %v4211_v62, %v4210_v41  ;;  %v6816_v50 = vpop.permute.xlu1 %6815  ;;  %v3498_v8 = vsel %vm11869_vm10, %v3488_v15, %v6417_v46  ;;  %v3507_v59 = vsel %vm11870_vm6, %v3497_v52, %v6812_v33  ;;  %vm11871_vm15 = vmmov %vm11870_vm6  ;;  %vm11872_vm1 = vcmask 359424   ;;  %v6831_v34 = vpop.permute.xlu0 %6830 }
 0x3d9   : > { %v6818_v42 = vunpack.i.h.bf16 %v6816_v50  ;;  %v6817_v53 = vunpack.i.l.bf16 %v6816_v50  ;;  %v3508_v7 = vsel %vm11871_vm15, %v3498_v8, %v6813_v4  ;;  %vm11873_vm3 = vmmov %vm11872_vm1  ;;  %v6833_v32 = vunpack.i.h.bf16 %v6831_v34 }
 0x3da   : > { %5418 = vmatmul.mubr.msk.bf16.gmra.mrb[12].mxu1 %vm11865_vm12, %v4217_v0  ;;  %v6832_v2 = vunpack.i.l.bf16 %v6831_v34  ;;  %vm11876_vm11 = vcmask 490496   ;;  %vm11878_vm14 = vcmask 523264   ;;  %vm11880_vm4 = vcmask 883712  }
 0x3db   : > { %5421 = vmatprep.mubr.msk.bf16.mxu1 %vm11767_vm7, %v11564_v12  ;;  %v3517_v24 = vsel %vm11872_vm1, %v3507_v59, %v6817_v53  ;;  %v3518_v26 = vsel %vm11873_vm3, %v3508_v7, %v6818_v42  ;;  %vm11874_vm7 = vcmask 392192   ;;  %vm11877_vm12 = vmmov %vm11876_vm11  ;;  %v4335_v39 = vadd.f32 %v5265_v19, %v10558_v23 }
 0x3dc   : > { %v6826_v43 = vpop.permute.xlu1 %6825  ;;  %v3527_v12 = vsel %vm11874_vm7, %v3517_v24, %v6822_v20  ;;  %vm11875_vm9 = vmmov %vm11874_vm7  ;;  %v4338_v48 = vadd.f32 %v5265_v19, %v10560_v10  ;;  %v4343_v41 = vadd.f32 %v5265_v19, %v10574_v31  ;;  %vm4777_vm10 = vsmask.f32 1280 }
 0x3dd   : > { %v6828_v60 = vunpack.i.h.bf16 %v6826_v43  ;;  %v6827_v44 = vunpack.i.l.bf16 %v6826_v43  ;;  %v3528_v18 = vsel %vm11875_vm9, %v3518_v26, %v6823_v55  ;;  %vm11879_vm0 = vmmov %vm11878_vm14  ;;  %vm4778_vm6 = vsmask.f32 5392 }
 0x3de   : > { %v4346_v14 = vadd.f32 %v5265_v19, %v10576_v51  ;;  %v4351_v58 = vadd.f32 %v5265_v19, %v10599_v27  ;;  %v10883_v46 = vadd.f32 %v5265_v19, %v10609_v36  ;;  %v4359_v23 = vadd.f32 %v5265_v19, %v10627_v25  ;;  %vm10927_vm1 = vmor %vm4777_vm10, %vm4778_vm6 }
 0x3df   : > { %v3537_v16 = vsel %vm2028_vm2, %v3527_v12, %v6827_v44  ;;  %v3538_v57 = vsel %vm2028_vm2, %v3528_v18, %v6828_v60  ;;  %vm4890_vm2 = vcmask 60417   ;;  %v10892_v6 = vadd.f32 %v5265_v19, %v10631_v13  ;;  %v4893_v13 = vld [vmem:[%s10506_s27 + $0x4] sm:$0xe] }
 0x3e0   : > { %v6836_v29 = vpop.permute.xlu1 %6835  ;;  %v3547_v40 = vsel %vm2039_vm5, %v3537_v16, %v6832_v2  ;;  %v3548_v47 = vsel %vm2039_vm5, %v3538_v57, %v6833_v32  ;;  %vm4891_vm5 = vsmask.f32 7942  ;;  %v10895_v51 = vadd.f32 %v5265_v19, %v10645_v61 }
 0x3e1   : > { %v6838_v30 = vunpack.i.h.bf16 %v6836_v29  ;;  %v6837_v21 = vunpack.i.l.bf16 %v6836_v29  ;;  %v10898_v27 = vadd.f32 %v5265_v19, %v10655_v35  ;;  %vm10904_vm15 = vmand %vm4890_vm2, %vm4891_vm5  ;;  %vm4623_vm3 = vcmask 62464  }
 0x3e2   : > { %vm4632_vm7 = vcmask 57344   ;;  %vm4906_vm9 = vsmask.f32 256 }
 0x3e3   : > { %v3557_v63 = vsel %vm11876_vm11, %v3547_v40, %v6837_v21  ;;  %v3558_v45 = vsel %vm11877_vm12, %v3548_v47, %v6838_v30  ;;  %vm4907_vm11 = vmand %vm4632_vm7, %vm4906_vm9  ;;  %vm4960_vm12 = vcmask 59392  }
 0x3e4   : > { %v6841_v38 = vpop.permute.xlu0 %6840 }
 0x3e5   : > { %v6843_v56 = vunpack.i.h.bf16 %v6841_v38  ;;  %v6842_v9 = vunpack.i.l.bf16 %v6841_v38  ;;  %v11019_v38 = vld [vmem:[%s11117_s10] ss:$0 sm:$0xff] }
 0x3e7   : > { %v4212_v28 = vsel %vm11878_vm14, %v3557_v63, %v6842_v9  ;;  %v4213_v49 = vsel %vm11879_vm0, %v3558_v45, %v6843_v56 }
 0x3e8   : > { %v4218_v17 = vpack.c.bf16 %v4213_v49, %v4212_v28 }
 0x3ea   : > { %5422 = vmatmul.mubr.msk.bf16.gmra.mrb[16].mxu1 %vm11880_vm4, %v4218_v17 }
 0x3f1   : > { %v10875_v1 = vpop.permute.xlu1 %4538 }
 0x3f2   : > { %v4586_v11 = vmul.f32 %v10875_v1, %v4335_v39 }
 0x3f4   : > { %v5313_v62 = vpack.c.bf16 %v4586_v11, %v4586_v11  ;;  %v4634_v50 = vmul.f32 %v4586_v11, %v4586_v11  ;;  %v4606_v25 = vsel %vm1907_vm13, %v4586_v11, 0.0 }
 0x3f5   : > { %v10886_v0 = vpop.permute.xlu1 %4548  ;;  %v10888_v10 = vpop.permute.xlu0 %4543 }
 0x3f6   : > { %v4781_v5 = vshrl.u32 %v5313_v62, 16  ;;  %v4784_v31 = vshll.u32 %v5313_v62, 16  ;;  %v4588_v37 = vmul.f32 %v10886_v0, %v4343_v41  ;;  %v4587_v36 = vmul.f32 %v10888_v10, %v4338_v48 }
 0x3f7   : > { %v4644_v15 = vsel %vm1907_vm13, %v4634_v50, 0.0 }
 0x3f8   : > { %v4783_v4 = vrot.slane %v4781_v5, 6  ;;  %v4786_v33 = vrot.slane %v4784_v31, 7  ;;  %v4636_v54 = vmul.f32 %v4588_v37, %v4588_v37  ;;  %v5315_v42 = vpack.c.bf16 %v4588_v37, %v4588_v37 }
 0x3f9   : > { %v4607_v61 = vsel %vm1907_vm13, %v4587_v36, 0.0  ;;  %v4635_v53 = vmul.f32 %v4587_v36, %v4587_v36  ;;  %v5314_v35 = vpack.c.bf16 %v4587_v36, %v4587_v36  ;;  %v10910_v22 = vpop.permute.xlu1 %4558  ;;  %v10914_v59 = vpop.permute.xlu0 %4553  ;;  %v4609_v60 = vsel %vm1907_vm13, %v4588_v37, 0.0 }
 0x3fa   : > { %v4787_v52 = vor.u32 %v4786_v33, %v4783_v4  ;;  %v4608_v8 = vadd.f32 %v4607_v61, %v4606_v25  ;;  %v4590_v43 = vmul.f32 %v10910_v22, %v4351_v58  ;;  %v4800_v7 = vshrl.u32 %v5315_v42, 16 }
 0x3fb   : > { %v4803_v55 = vshll.u32 %v5315_v42, 16  ;;  %v4645_v20 = vsel %vm1907_vm13, %v4635_v53, 0.0  ;;  %v4790_v24 = vshrl.u32 %v5314_v35, 16  ;;  %v4793_v34 = vshll.u32 %v5314_v35, 16 }
 0x3fc   : > { %v4894_v26 = vsel %vm10904_vm15, %v4787_v52, %v4893_v13  ;;  %v4646_v44 = vadd.f32 %v4645_v20, %v4644_v15  ;;  %v4647_v29 = vsel %vm1907_vm13, %v4636_v54, 0.0  ;;  %v4802_v12 = vrot.slane %v4800_v7, 6 }
 0x3fd   : > { %4895 = vst [vmem:[%s10506_s27 + $0x4] sm:$0xe] %v4894_v26  ;;  %v4805_v18 = vrot.slane %v4803_v55, 7  ;;  %v4792_v32 = vrot.slane %v4790_v24, 6  ;;  %v4788_v2 = vrot.slane %v4787_v52, 4  ;;  %v4795_v16 = vrot.slane %v4793_v34, 7  ;;  %v10923_v21 = vpop.permute.xlu1 %4568  ;;  %v10932_v17 = vpop.permute.xlu0 %4563 }
 0x3fe   : > { %v5317_v57 = vpack.c.bf16 %v4590_v43, %v4590_v43  ;;  %v4589_v30 = vmul.f32 %v10914_v59, %v4346_v14  ;;  %v4613_v40 = vsel %vm1907_vm13, %v4590_v43, 0.0  ;;  %v4638_v47 = vmul.f32 %v4590_v43, %v4590_v43 }
 0x3ff   : > { %v4610_v56 = vadd.f32 %v4609_v60, %v4608_v8  ;;  %v4648_v9 = vadd.f32 %v4647_v29, %v4646_v44  ;;  %v4806_v63 = vor.u32 %v4805_v18, %v4802_v12  ;;  %v4796_v45 = vor.u32 %v4795_v16, %v4792_v32 }
 0x400   : > { %v4820_v28 = vshrl.u32 %v5317_v57, 16  ;;  %v4823_v49 = vshll.u32 %v5317_v57, 16  ;;  %v4611_v19 = vsel %vm1907_vm13, %v4589_v30, 0.0  ;;  %v4637_v39 = vmul.f32 %v4589_v30, %v4589_v30 }
 0x401   : > { %v5316_v11 = vpack.c.bf16 %v4589_v30, %v4589_v30  ;;  %v4592_v48 = vmul.f32 %v10923_v21, %v4359_v23  ;;  %v4797_v41 = vsel %vm10927_vm1, %v4788_v2, %v4796_v45  ;;  %v4798_v62 = vrot.slane %v4796_v45, 4  ;;  %v10946_v42 = vpop.permute.xlu1 %4578  ;;  %v10951_v52 = vpop.permute.xlu0 %4573 }
 0x402   : > { %v4822_v14 = vrot.slane %v4820_v28, 6  ;;  %v4825_v58 = vrot.slane %v4823_v49, 7  ;;  %4896 = vst.msk [vmem:[%s10506_s27 + $0x8] sm:$0xf] %vm4732_vm8, %v4797_v41  ;;  %v4612_v50 = vadd.f32 %v4611_v19, %v4610_v56  ;;  %v4649_v5 = vsel %vm1907_vm13, %v4637_v39, 0.0 }
 0x403   : > { %v4810_v31 = vshrl.u32 %v5316_v11, 16  ;;  %v4813_v37 = vshll.u32 %v5316_v11, 16  ;;  %v4808_v36 = vrot.slane %v4806_v63, 4  ;;  %v4807_v25 = vsel %vm10927_vm1, %v4798_v62, %v4806_v63 }
 0x404   : > { %v4651_v4 = vsel %vm1907_vm13, %v4638_v47, 0.0  ;;  %v4650_v23 = vadd.f32 %v4649_v5, %v4648_v9  ;;  %4897 = vst.msk [vmem:[%s10506_s27 + $0xc] sm:$0xf] %vm4732_vm8, %v4807_v25  ;;  %v4826_v33 = vor.u32 %v4825_v58, %v4822_v14  ;;  %v5319_v13 = vpack.c.bf16 %v4592_v48, %v4592_v48 }
 0x405   : > { %v4812_v54 = vrot.slane %v4810_v31, 6  ;;  %v4815_v3 = vrot.slane %v4813_v37, 7  ;;  %v4617_v61 = vsel %vm1907_vm13, %v4592_v48, 0.0  ;;  %v4591_v53 = vmul.f32 %v10932_v17, %v10883_v46  ;;  %v10966_v63 = vpop.permute.xlu0 %4583 }
 0x406   : > { %v4614_v35 = vadd.f32 %v4613_v40, %v4612_v50  ;;  %v4652_v15 = vadd.f32 %v4651_v4, %v4650_v23  ;;  %v4640_v43 = vmul.f32 %v4592_v48, %v4592_v48  ;;  %v4840_v7 = vshrl.u32 %v5319_v13, 16 }
 0x407   : > { %v4816_v8 = vor.u32 %v4815_v3, %v4812_v54  ;;  %v4843_v55 = vshll.u32 %v5319_v13, 16  ;;  %v4615_v20 = vsel %vm1907_vm13, %v4591_v53, 0.0  ;;  %v4639_v24 = vmul.f32 %v4591_v53, %v4591_v53 }
 0x408   : > { %v5318_v26 = vpack.c.bf16 %v4591_v53, %v4591_v53  ;;  %v4594_v60 = vmul.f32 %v10946_v42, %v10895_v51  ;;  %v4842_v34 = vrot.slane %v4840_v7, 6  ;;  %v4616_v12 = vadd.f32 %v4615_v20, %v4614_v35 }
 0x409   : > { %v4817_v46 = vsel %vm10927_vm1, %v4808_v36, %v4816_v8  ;;  %v4818_v44 = vrot.slane %v4816_v8, 4  ;;  %v4845_v29 = vrot.slane %v4843_v55, 7  ;;  %v4653_v18 = vsel %vm1907_vm13, %v4639_v24, 0.0 }
 0x40a   : > { %4898 = vst.msk [vmem:[%s10506_s27 + $0x10] sm:$0xf] %vm4732_vm8, %v4817_v46  ;;  %v4830_v32 = vshrl.u32 %v5318_v26, 16  ;;  %v4833_v2 = vshll.u32 %v5318_v26, 16  ;;  %v4828_v16 = vrot.slane %v4826_v33, 4  ;;  %v4655_v30 = vsel %vm1907_vm13, %v4640_v43, 0.0 }
 0x40b   : > { %v4827_v57 = vsel %vm10927_vm1, %v4818_v44, %v4826_v33  ;;  %v4654_v51 = vadd.f32 %v4653_v18, %v4652_v15  ;;  %v4642_v56 = vmul.f32 %v4594_v60, %v4594_v60  ;;  %v5321_v9 = vpack.c.bf16 %v4594_v60, %v4594_v60 }
 0x40c   : > { %4899 = vst.msk [vmem:[%s10506_s27 + $0x14] sm:$0xf] %vm4732_vm8, %v4827_v57  ;;  %v4832_v40 = vrot.slane %v4830_v32, 6  ;;  %v4835_v47 = vrot.slane %v4833_v2, 7  ;;  %v4846_v45 = vor.u32 %v4845_v29, %v4842_v34  ;;  %v4593_v28 = vmul.f32 %v10951_v52, %v10892_v6 }
 0x40d   : > { %v4618_v49 = vadd.f32 %v4617_v61, %v4616_v12  ;;  %v4656_v19 = vadd.f32 %v4655_v30, %v4654_v51  ;;  %v4621_v11 = vsel %vm1907_vm13, %v4594_v60, 0.0  ;;  %v4860_v48 = vshrl.u32 %v5321_v9, 16 }
 0x40e   : > { %v4836_v39 = vor.u32 %v4835_v47, %v4832_v40  ;;  %v4863_v41 = vshll.u32 %v5321_v9, 16  ;;  %v4619_v62 = vsel %vm1907_vm13, %v4593_v28, 0.0  ;;  %v4641_v14 = vmul.f32 %v4593_v28, %v4593_v28 }
 0x40f   : > { %v5320_v58 = vpack.c.bf16 %v4593_v28, %v4593_v28  ;;  %v4595_v50 = vmul.f32 %v10966_v63, %v10898_v27  ;;  %v4659_v6 = vsel %vm1907_vm13, %v4642_v56, 0.0  ;;  %v4862_v37 = vrot.slane %v4860_v48, 6 }
 0x410   : > { %v4837_v5 = vsel %vm10927_vm1, %v4828_v16, %v4836_v39  ;;  %v4838_v31 = vrot.slane %v4836_v39, 4  ;;  %v4620_v36 = vadd.f32 %v4619_v62, %v4618_v49  ;;  %v4657_v25 = vsel %vm1907_vm13, %v4641_v14, 0.0  ;;  %v4908_v16 = vld [vmem:[%s10506_s27 + $0x2c] sm:$0x1] }
 0x411   : > { %4900 = vst.msk [vmem:[%s10506_s27 + $0x18] sm:$0xf] %vm4732_vm8, %v4837_v5  ;;  %v4850_v4 = vshrl.u32 %v5320_v58, 16  ;;  %v4853_v23 = vshll.u32 %v5320_v58, 16  ;;  %v4865_v54 = vrot.slane %v4863_v41, 7  ;;  %v4658_v3 = vadd.f32 %v4657_v25, %v4656_v19 }
 0x412   : > { %v4847_v33 = vsel %vm10927_vm1, %v4838_v31, %v4846_v45  ;;  %v4624_v27 = vsel %vm4623_vm3, %v4595_v50, 0.0  ;;  %v4622_v53 = vadd.f32 %v4621_v11, %v4620_v36  ;;  %v4643_v35 = vmul.f32 %v4595_v50, %v4595_v50 }
 0x413   : > { %4901 = vst.msk [vmem:[%s10506_s27 + $0x1c] sm:$0xf] %vm4732_vm8, %v4847_v33  ;;  %v4852_v13 = vrot.slane %v4850_v4, 6  ;;  %v4855_v61 = vrot.slane %v4853_v23, 7  ;;  %v4660_v15 = vadd.f32 %v4659_v6, %v4658_v3  ;;  %v5322_v8 = vpack.c.bf16 %v4595_v50, %v4595_v50 }
 0x414   : > { %v4848_v43 = vrot.slane %v4846_v45, 4  ;;  %v4625_v55 = vadd.f32 %v4624_v27, %v4622_v53  ;;  %v4661_v20 = vsel %vm4623_vm3, %v4643_v35, 0.0  ;;  %v4866_v24 = vor.u32 %v4865_v54, %v4862_v37 }
 0x415   : > { %v4856_v7 = vor.u32 %v4855_v61, %v4852_v13  ;;  %v4662_v26 = vadd.f32 %v4661_v20, %v4660_v15  ;;  %v4870_v60 = vshrl.u32 %v5322_v8, 16  ;;  %v4873_v46 = vshll.u32 %v5322_v8, 16 }
 0x416   : > { %v4626_v29 = vrot.slane %v4625_v55, 4  ;;  %v4868_v30 = vrot.slane %v4866_v24, 4 }
 0x417   : > { %v4857_v44 = vsel %vm10927_vm1, %v4848_v43, %v4856_v7  ;;  %v4858_v34 = vrot.slane %v4856_v7, 4  ;;  %v4663_v12 = vrot.slane %v4662_v26, 4  ;;  %v4872_v18 = vrot.slane %v4870_v60, 6 }
 0x418   : > { %4902 = vst.msk [vmem:[%s10506_s27 + $0x20] sm:$0xf] %vm4732_vm8, %v4857_v44  ;;  %v4875_v32 = vrot.slane %v4873_v46, 7  ;;  %v4627_v57 = vadd.f32 %v4626_v29, %v4625_v55 }
 0x419   : > { %v4867_v2 = vsel %vm10927_vm1, %v4858_v34, %v4866_v24  ;;  %v4664_v51 = vadd.f32 %v4663_v12, %v4662_v26  ;;  %v4878_v47 = vrot.slane %v4872_v18, 4 }
 0x41a   : > { %4903 = vst.msk [vmem:[%s10506_s27 + $0x24] sm:$0xf] %vm4732_vm8, %v4867_v2  ;;  %v4876_v40 = vor.u32 %v4875_v32, %v4872_v18  ;;  %v4628_v56 = vrot.slane %v4627_v57, 2 }
 0x41b   : > { %v4665_v9 = vrot.slane %v4664_v51, 2  ;;  %v4909_v28 = vsel %vm4907_vm11, %v4878_v47, %v4908_v16 }
 0x41c   : > { %v4877_v45 = vsel %vm10927_vm1, %v4868_v30, %v4876_v40  ;;  %v4629_v49 = vadd.f32 %v4628_v56, %v4627_v57  ;;  %4910 = vst [vmem:[%s10506_s27 + $0x2c] sm:$0x1] %v4909_v28 }
 0x41d   : > { %4904 = vst.msk [vmem:[%s10506_s27 + $0x28] sm:$0xf] %vm4732_vm8, %v4877_v45  ;;  %v4666_v19 = vadd.f32 %v4665_v9, %v4664_v51  ;;  %s5255_s27 = sshll.u32 %s630_s0, 2 }
 0x41e   : > { %v4630_v39 = vrot.slane %v4629_v49, 1  ;;  %s11025_s25 = scalar_lea.vmem %s11119_s12, %s5255_s27 }
 0x41f   : > { %v4667_v11 = vrot.slane %v4666_v19, 1 }
 0x420   : > { %v4631_v48 = vadd.f32 %v4630_v39, %v4629_v49 }
 0x421   : > { %v4668_v41 = vadd.f32 %v4667_v11, %v4666_v19 }
 0x422   : > { %4633 = vst.msk [vmem:[%s640_s23] sm:$0x1] %vm4632_vm7, %v4631_v48 }
 0x423   : > { %4669 = vst.msk [vmem:[%s640_s23 + $0x1] sm:$0x1] %vm4632_vm7, %v4668_v41 }
 0x470   : > { %v4487_v62 = vpop.f32.mrb[0].mxu1 }
 0x471   : > { %v4488_v14 = vadd.f32 %v11019_v38, %v4487_v62  ;;  %v5407_v58 = vpop.f32.mrb[1].mxu1 }
 0x472   : > { %v4490_v50 = vpop.f32.mrb[2].mxu1 }
 0x473   : > { %v4596_v5 = vmul.f32 %v10875_v1, %v4488_v14  ;;  %v5323_v31 = vpack.c.bf16 %v4488_v14, %v4488_v14  ;;  %v4491_v6 = vadd.f32 %v11019_v38, %v4490_v50  ;;  %v5408_v37 = vpop.f32.mrb[3].mxu1 }
 0x475   : > { %v4696_v36 = vmul.f32 %v4596_v5, %v4596_v5  ;;  %4951 = vst.msk [vmem:[%s11025_s25] sm:$0xf] %vm4732_vm8, %v5323_v31  ;;  %v4597_v25 = vmul.f32 %v10888_v10, %v4491_v6  ;;  %v5324_v4 = vpack.c.bf16 %v4491_v6, %v4491_v6  ;;  %v4670_v23 = vsel %vm1907_vm13, %v4596_v5, 0.0 }
 0x477   : > { %v4671_v33 = vsel %vm1907_vm13, %v4597_v25, 0.0  ;;  %v4697_v54 = vmul.f32 %v4597_v25, %v4597_v25  ;;  %4952 = vst.msk [vmem:[%s11025_s25 + $0x4] sm:$0xf] %vm4732_vm8, %v5324_v4  ;;  %v4706_v1 = vsel %vm1907_vm13, %v4696_v36, 0.0 }
 0x478   : > { %v4672_v3 = vadd.f32 %v4671_v33, %v4670_v23 }
 0x479   : > { %v4707_v27 = vsel %vm1907_vm13, %v4697_v54, 0.0 }
 0x47a   : > { %v4708_v13 = vadd.f32 %v4707_v27, %v4706_v1 }
 0x485   : > { %v4495_v61 = vpop.f32.mrb[4].mxu1 }
 0x486   : > { %v4496_v53 = vadd.f32 %v11019_v38, %v4495_v61  ;;  %v5411_v10 = vpop.f32.mrb[5].mxu1 }
 0x487   : > { %v4498_v35 = vpop.f32.mrb[6].mxu1 }
 0x488   : > { %v4598_v15 = vmul.f32 %v10886_v0, %v4496_v53  ;;  %v5325_v8 = vpack.c.bf16 %v4496_v53, %v4496_v53  ;;  %v4499_v43 = vadd.f32 %v11019_v38, %v4498_v35  ;;  %v5412_v7 = vpop.f32.mrb[7].mxu1 }
 0x48a   : > { %v4673_v55 = vsel %vm1907_vm13, %v4598_v15, 0.0  ;;  %v4698_v20 = vmul.f32 %v4598_v15, %v4598_v15  ;;  %4953 = vst.msk [vmem:[%s11025_s25 + $0x8] sm:$0xf] %vm4732_vm8, %v5325_v8  ;;  %v4599_v24 = vmul.f32 %v10914_v59, %v4499_v43  ;;  %v5326_v26 = vpack.c.bf16 %v4499_v43, %v4499_v43 }
 0x48b   : > { %v4674_v60 = vadd.f32 %v4673_v55, %v4672_v3 }
 0x48c   : > { %v4709_v46 = vsel %vm1907_vm13, %v4698_v20, 0.0  ;;  %v4675_v44 = vsel %vm1907_vm13, %v4599_v24, 0.0  ;;  %v4699_v34 = vmul.f32 %v4599_v24, %v4599_v24  ;;  %4954 = vst.msk [vmem:[%s11025_s25 + $0xc] sm:$0xf] %vm4732_vm8, %v5326_v26 }
 0x48d   : > { %v4710_v0 = vadd.f32 %v4709_v46, %v4708_v13  ;;  %v4676_v29 = vadd.f32 %v4675_v44, %v4674_v60 }
 0x48e   : > { %v4711_v12 = vsel %vm1907_vm13, %v4699_v34, 0.0 }
 0x48f   : > { %v4712_v18 = vadd.f32 %v4711_v12, %v4710_v0 }
 0x499   : > { %v4503_v32 = vpop.f32.mrb[8].mxu1 }
 0x49a   : > { %v4504_v2 = vadd.f32 %v11019_v38, %v4503_v32  ;;  %v5415_v59 = vpop.f32.mrb[9].mxu1 }
 0x49b   : > { %v4506_v16 = vpop.f32.mrb[10].mxu1 }
 0x49c   : > { %v4600_v57 = vmul.f32 %v10910_v22, %v4504_v2  ;;  %v5327_v30 = vpack.c.bf16 %v4504_v2, %v4504_v2  ;;  %v4507_v51 = vadd.f32 %v11019_v38, %v4506_v16  ;;  %v5416_v40 = vpop.f32.mrb[11].mxu1 }
 0x49e   : > { %v4677_v47 = vsel %vm1907_vm13, %v4600_v57, 0.0  ;;  %v4700_v56 = vmul.f32 %v4600_v57, %v4600_v57  ;;  %4955 = vst.msk [vmem:[%s11025_s25 + $0x10] sm:$0xf] %vm4732_vm8, %v5327_v30  ;;  %v4601_v9 = vmul.f32 %v10932_v17, %v4507_v51  ;;  %v5328_v45 = vpack.c.bf16 %v4507_v51, %v4507_v51 }
 0x49f   : > { %v4678_v28 = vadd.f32 %v4677_v47, %v4676_v29 }
 0x4a0   : > { %v4713_v49 = vsel %vm1907_vm13, %v4700_v56, 0.0  ;;  %v4679_v19 = vsel %vm1907_vm13, %v4601_v9, 0.0  ;;  %v4701_v39 = vmul.f32 %v4601_v9, %v4601_v9  ;;  %4956 = vst.msk [vmem:[%s11025_s25 + $0x14] sm:$0xf] %vm4732_vm8, %v5328_v45 }
 0x4a1   : > { %v4714_v22 = vadd.f32 %v4713_v49, %v4712_v18  ;;  %v4680_v11 = vadd.f32 %v4679_v19, %v4678_v28 }
 0x4a2   : > { %v4715_v48 = vsel %vm1907_vm13, %v4701_v39, 0.0 }
 0x4a3   : > { %v4716_v41 = vadd.f32 %v4715_v48, %v4714_v22 }
 0x4ad   : > { %v4511_v62 = vpop.f32.mrb[12].mxu1 }
 0x4ae   : > { %v4512_v14 = vadd.f32 %v11019_v38, %v4511_v62  ;;  %v5419_v17 = vpop.f32.mrb[13].mxu1 }
 0x4af   : > { %v4514_v58 = vpop.f32.mrb[14].mxu1 }
 0x4b0   : > { %v4602_v50 = vmul.f32 %v10923_v21, %v4512_v14  ;;  %v5329_v5 = vpack.c.bf16 %v4512_v14, %v4512_v14  ;;  %v4515_v31 = vadd.f32 %v11019_v38, %v4514_v58  ;;  %v5420_v6 = vpop.f32.mrb[15].mxu1 }
 0x4b2   : > { %v4681_v37 = vsel %vm1907_vm13, %v4602_v50, 0.0  ;;  %v4702_v36 = vmul.f32 %v4602_v50, %v4602_v50  ;;  %4957 = vst.msk [vmem:[%s11025_s25 + $0x18] sm:$0xf] %vm4732_vm8, %v5329_v5  ;;  %v4603_v25 = vmul.f32 %v10951_v52, %v4515_v31  ;;  %v5330_v4 = vpack.c.bf16 %v4515_v31, %v4515_v31 }
 0x4b3   : > { %v4682_v23 = vadd.f32 %v4681_v37, %v4680_v11 }
 0x4b4   : > { %v4717_v33 = vsel %vm1907_vm13, %v4702_v36, 0.0  ;;  %v4683_v54 = vsel %vm1907_vm13, %v4603_v25, 0.0  ;;  %v4703_v3 = vmul.f32 %v4603_v25, %v4603_v25  ;;  %4958 = vst.msk [vmem:[%s11025_s25 + $0x1c] sm:$0xf] %vm4732_vm8, %v5330_v4 }
 0x4b5   : > { %v4718_v21 = vadd.f32 %v4717_v33, %v4716_v41  ;;  %v4684_v1 = vadd.f32 %v4683_v54, %v4682_v23 }
 0x4b6   : > { %v4719_v27 = vsel %vm1907_vm13, %v4703_v3, 0.0 }
 0x4b7   : > { %v4720_v13 = vadd.f32 %v4719_v27, %v4718_v21 }
 0x4bd   : > { %v4519_v61 = vpop.f32.mrb[16].mxu1 }
 0x4be   : > { %v4520_v53 = vadd.f32 %v11019_v38, %v4519_v61  ;;  %v5423_v10 = vpop.f32.mrb[17].mxu1 }
 0x4bf   : > { %v4522_v52 = vpop.f32.mrb[18].mxu1 }
 0x4c0   : > { %v4604_v35 = vmul.f32 %v10946_v42, %v4520_v53  ;;  %v5331_v15 = vpack.c.bf16 %v4520_v53, %v4520_v53  ;;  %v4523_v8 = vadd.f32 %v11019_v38, %v4522_v52  ;;  %v5424_v43 = vpop.f32.mrb[19].mxu1 }
 0x4c2   : > { %v4685_v7 = vsel %vm1907_vm13, %v4604_v35, 0.0  ;;  %v4704_v55 = vmul.f32 %v4604_v35, %v4604_v35  ;;  %4959 = vst.msk [vmem:[%s11025_s25 + $0x20] sm:$0xf] %vm4732_vm8, %v5331_v15  ;;  %v4605_v20 = vmul.f32 %v10966_v63, %v4523_v8  ;;  %v5332_v24 = vpack.c.bf16 %v4523_v8, %v4523_v8 }
 0x4c3   : > { %v4686_v26 = vadd.f32 %v4685_v7, %v4684_v1 }
 0x4c4   : > { %v4721_v60 = vsel %vm1907_vm13, %v4704_v55, 0.0  ;;  %v4687_v46 = vsel %vm4623_vm3, %v4605_v20, 0.0  ;;  %v4705_v42 = vmul.f32 %v4605_v20, %v4605_v20  ;;  %4961 = vst.msk [vmem:[%s11025_s25 + $0x24] sm:$0x7] %vm4960_vm12, %v5332_v24 }
 0x4c5   : > { %v4722_v44 = vadd.f32 %v4721_v60, %v4720_v13  ;;  %v4688_v38 = vadd.f32 %v4687_v46, %v4686_v26 }
 0x4c6   : > { %v4723_v34 = vsel %vm4623_vm3, %v4705_v42, 0.0 }
 0x4c7   : > { %v4689_v0 = vrot.slane %v4688_v38, 4  ;;  %v4724_v29 = vadd.f32 %v4723_v34, %v4722_v44 }
 0x4c9   : > { %v4690_v12 = vadd.f32 %v4689_v0, %v4688_v38  ;;  %v4725_v18 = vrot.slane %v4724_v29, 4 }
 0x4cb   : > { %v4691_v32 = vrot.slane %v4690_v12, 2  ;;  %v4726_v2 = vadd.f32 %v4725_v18, %v4724_v29 }
 0x4cd   : > { %v4692_v63 = vadd.f32 %v4691_v32, %v4690_v12  ;;  %v4727_v59 = vrot.slane %v4726_v2, 2 }
 0x4cf   : > { %v4693_v16 = vrot.slane %v4692_v63, 1  ;;  %v4728_v57 = vadd.f32 %v4727_v59, %v4726_v2 }
 0x4d1   : > { %v4694_v30 = vadd.f32 %v4693_v16, %v4692_v63  ;;  %v4729_v51 = vrot.slane %v4728_v57, 1 }
 0x4d3   : > { %4695 = vst.msk [vmem:[%s648_s18] sm:$0x1] %vm4632_vm7, %v4694_v30  ;;  %v4730_v40 = vadd.f32 %v4729_v51, %v4728_v57 }
 0x4d5   : > { %4731 = vst.msk [vmem:[%s648_s18 + $0x1] sm:$0x1] %vm4632_vm7, %v4730_v40 }
 0x4d6 PF: > { %s25_s17 = sadd.s32 1, %s6960_s17   ;;  %s11885_s30 = sld [smem:[#allocation2_spill]] }
 0x4d7   : > { %p22_p2 = scmp.ge.s32.totalorder %s25_s17, 18   ;;  %s11886_s23 = sld [smem:[#allocation3_spill]] }
 0x4d8   : > { %s11887_s16 = sld [smem:[#allocation4_spill]]  ;;  %s11888_s29 = smov %s6952_s15 }
 0x4d9   :  { %24 = sbr.rel (!%p22_p2) target bundleno = 3 (0x3), region = 136 }
 0x4dd   : > { %s11889_s15 = smov %s11886_s23 }

</bundles_post_ra>
